<compile_context>
chip_gen: v7x
topology: tpu7x:2x2x1
jax: 0.10.0
libtpu: 0.0.40
codegen_flags: <defaults>
</compile_context>

<pallas_src>
import functools
import math

import jax
import jax.numpy as jnp
from jax.experimental import pallas as pl
from jax.experimental.pallas import tpu as pltpu


# --------------------------- small shared helpers ---------------------------

@functools.lru_cache(maxsize=None)
def _vmem_limit_bytes():
    """Per-generation VMEM budget: ~3/4 of physical (96 MiB v5e/v6e, 48 MiB v7x)."""
    try:
        cap = int(pltpu.get_tpu_info().vmem_capacity_bytes)
    except Exception:
        cap = 64 * 1024 * 1024
    return max(32 * 1024 * 1024, (cap * 3) // 4)


def _cparams(*sem):
    return pltpu.CompilerParams(dimension_semantics=tuple(sem),
                                vmem_limit_bytes=_vmem_limit_bytes())


@functools.lru_cache(maxsize=None)
def _single_buffer_ok():
    """Probe (eagerly) whether pipeline_mode=pl.Buffered(1) is accepted."""
    try:
        def _probe_kernel(w_ref, o_ref):
            o_ref[...] = w_ref[...] * 2.0

        f = pl.pallas_call(
            _probe_kernel,
            out_shape=jax.ShapeDtypeStruct((16, 128), jnp.float32),
            grid=(2,),
            in_specs=[pl.BlockSpec((8, 128), lambda i: (0, 0),
                                   pipeline_mode=pl.Buffered(1))],
            out_specs=pl.BlockSpec((8, 128), lambda i: (i, 0)),
        )
        jax.block_until_ready(f(jnp.ones((8, 128), jnp.float32)))
        return True
    except Exception:
        return False


def _weight_spec(shape):
    """BlockSpec for a grid-invariant weight: constant index, single-buffered
    (no double-buffering needed since the block never changes)."""
    idx = lambda b, _n=len(shape): (0,) * _n
    if _single_buffer_ok():
        return pl.BlockSpec(shape, idx, pipeline_mode=pl.Buffered(1))
    return pl.BlockSpec(shape, idx)


def _dot(a, b):
    """MXU matmul: bf16 inputs (weights already stored bf16), f32 accumulation."""
    return jnp.dot(a.astype(jnp.bfloat16), b.astype(jnp.bfloat16),
                   preferred_element_type=jnp.float32)


def _layer_norm(x, gamma, beta, eps):
    """f32 row-wise LayerNorm (VPU math kept in f32; v5e has no bf16 VPU)."""
    mu = jnp.mean(x, axis=-1, keepdims=True)
    var = jnp.mean((x - mu) * (x - mu), axis=-1, keepdims=True)
    return (x - mu) * jax.lax.rsqrt(var + eps) * gamma + beta


def _attention_core(q, k, v, nhead, causal):
    """Batched-head attention on the VMEM tile.

    q: (Bb, T, d), k/v: (Bb, S, d) in f32.  Heads are split once, QK^T and PV
    run as single batched dot_generals over (Bb*nhead), softmax is one
    vectorized pass, heads merged once -- no per-head lane slices/concat.
    """
    Bb, T, d = q.shape
    S = k.shape[1]
    dh = d // nhead
    scale = 1.0 / math.sqrt(dh)

    def split(x, L):
        return (x.reshape(Bb, L, nhead, dh).transpose(0, 2, 1, 3)
                 .reshape(Bb * nhead, L, dh).astype(jnp.bfloat16))

    qh, kh, vh = split(q, T), split(k, S), split(v, S)

    s = jnp.einsum("bqd,bkd->bqk", qh, kh,
                   preferred_element_type=jnp.float32) * scale      # (Bb*H,T,S)
    if causal:
        row = jax.lax.broadcasted_iota(jnp.int32, (T, S), 0)
        col = jax.lax.broadcasted_iota(jnp.int32, (T, S), 1)
        s = jnp.where((col <= row)[None, :, :], s, -1e30)

    m = jnp.max(s, axis=-1, keepdims=True)
    p = jnp.exp(s - m)
    inv = pl.reciprocal(jnp.sum(p, axis=-1, keepdims=True), approx=True)
    ctx = jnp.einsum("bqk,bkd->bqd", (p * inv).astype(jnp.bfloat16), vh,
                     preferred_element_type=jnp.float32)            # (Bb*H,T,dh)
    return (ctx.reshape(Bb, nhead, T, dh).transpose(0, 2, 1, 3)
               .reshape(Bb, T, d))


# ------------------------------ fused kernels -------------------------------

def _decoder_layer_kernel(
        x_ref, mem_ref,
        sqkv_w_ref, sqkv_b_ref, so_w_ref, so_b_ref, n1_g_ref, n1_b_ref,
        cq_w_ref, cq_b_ref, ckv_w_ref, ckv_b_ref, co_w_ref, co_b_ref,
        n2_g_ref, n2_b_ref,
        f1_w_ref, f1_b_ref, f2_w_ref, f2_b_ref, n3_g_ref, n3_b_ref,
        o_ref, *, nhead, eps):
    """One full post-norm nn.TransformerDecoderLayer on a (Bb, T, d) block."""
    Bb, T, d = x_ref.shape
    S = mem_ref.shape[1]

    x = x_ref[...].astype(jnp.float32).reshape(Bb * T, d)
    mem = mem_ref[...].astype(jnp.float32).reshape(Bb * S, d)

    # ---- causal self-attention + residual + LayerNorm (norm1) ----
    qkv = _dot(x, sqkv_w_ref[...]) + sqkv_b_ref[...]                 # (Bb*T, 3d)
    q, k, v = qkv[:, :d], qkv[:, d:2 * d], qkv[:, 2 * d:]
    ctx = _attention_core(q.reshape(Bb, T, d), k.reshape(Bb, T, d),
                          v.reshape(Bb, T, d), nhead, causal=True)
    attn = _dot(ctx.reshape(Bb * T, d), so_w_ref[...]) + so_b_ref[...]
    x = _layer_norm(x + attn, n1_g_ref[...], n1_b_ref[...], eps)

    # ---- cross-attention over encoder memory + residual + LayerNorm (norm2) ----
    q = _dot(x, cq_w_ref[...]) + cq_b_ref[...]                       # (Bb*T, d)
    kv = _dot(mem, ckv_w_ref[...]) + ckv_b_ref[...]                  # (Bb*S, 2d)
    k, v = kv[:, :d], kv[:, d:]
    ctx = _attention_core(q.reshape(Bb, T, d), k.reshape(Bb, S, d),
                          v.reshape(Bb, S, d), nhead, causal=False)
    attn = _dot(ctx.reshape(Bb * T, d), co_w_ref[...]) + co_b_ref[...]
    x = _layer_norm(x + attn, n2_g_ref[...], n2_b_ref[...], eps)

    # ---- feed-forward (linear -> relu -> linear) + residual + LayerNorm (norm3) ----
    h = jnp.maximum(_dot(x, f1_w_ref[...]) + f1_b_ref[...], 0.0)
    y = _dot(h, f2_w_ref[...]) + f2_b_ref[...]
    x = _layer_norm(x + y, n3_g_ref[...], n3_b_ref[...], eps)

    o_ref[...] = x.reshape(Bb, T, d).astype(o_ref.dtype)


def _tiled_linear_kernel(x_ref, w_ref, b_ref, o_ref, acc_ref):
    @pl.when(pl.program_id(2) == 0)
    def _init():
        acc_ref[...] = jnp.zeros_like(acc_ref)

    acc_ref[...] += _dot(x_ref[...], w_ref[...])

    @pl.when(pl.program_id(2) == pl.num_programs(2) - 1)
    def _store():
        o_ref[...] = (acc_ref[...] + b_ref[...].astype(jnp.float32)).astype(o_ref.dtype)


# ------------------------------ pallas wrappers ------------------------------

def decoder_layer(x, mem, lp, nhead, eps=1e-5, batch_block=None):
    """One fused pallas_call per decoder layer. The whole batch is packed into
    a single grid step at small sizes (activation blocks are tiny); for large
    B shard the batch via `batch_block` (keep the grid extent even on v7x)."""
    B, T, d = x.shape
    S = mem.shape[1]
    dff = lp["ff1_w"].shape[1]
    bb = B if batch_block is None else batch_block
    assert B % bb == 0

    in_specs = [
        pl.BlockSpec((bb, T, d), lambda b: (b, 0, 0)),
        pl.BlockSpec((bb, S, d), lambda b: (b, 0, 0)),
        _weight_spec((d, 3 * d)), _weight_spec((1, 3 * d)),
        _weight_spec((d, d)), _weight_spec((1, d)),
        _weight_spec((1, d)), _weight_spec((1, d)),
        _weight_spec((d, d)), _weight_spec((1, d)),
        _weight_spec((d, 2 * d)), _weight_spec((1, 2 * d)),
        _weight_spec((d, d)), _weight_spec((1, d)),
        _weight_spec((1, d)), _weight_spec((1, d)),
        _weight_spec((d, dff)), _weight_spec((1, dff)),
        _weight_spec((dff, d)), _weight_spec((1, d)),
        _weight_spec((1, d)), _weight_spec((1, d)),
    ]
    return pl.pallas_call(
        functools.partial(_decoder_layer_kernel, nhead=nhead, eps=eps),
        out_shape=jax.ShapeDtypeStruct((B, T, d), x.dtype),
        grid=(B // bb,),
        in_specs=in_specs,
        out_specs=pl.BlockSpec((bb, T, d), lambda b: (b, 0, 0)),
        compiler_params=_cparams("parallel"),
    )(x, mem,
      lp["self_qkv_w"], lp["self_qkv_b"], lp["self_o_w"], lp["self_o_b"],
      lp["n1_g"], lp["n1_b"],
      lp["cross_q_w"], lp["cross_q_b"], lp["cross_kv_w"], lp["cross_kv_b"],
      lp["cross_o_w"], lp["cross_o_b"], lp["n2_g"], lp["n2_b"],
      lp["ff1_w"], lp["ff1_b"], lp["ff2_w"], lp["ff2_b"],
      lp["n3_g"], lp["n3_b"])


def _round_up(x, m):
    return (x + m - 1) // m * m


def _pad_axis(a, mult, axis):
    pad = _round_up(a.shape[axis], mult) - a.shape[axis]
    if pad == 0:
        return a
    widths = [(0, 0)] * a.ndim
    widths[axis] = (0, pad)
    return jnp.pad(a, widths)


def tiled_linear(x, w, b, tm=1024, tn=512, tk=512):
    """x:(M,K) @ w:(K,N) + b -> (M,N). Tiled MXU GEMM, f32 VMEM accumulator.
    tm is sized to cover all of M where possible so the bf16 (K,N) weight is
    streamed from HBM exactly once; N/K are lane-dense multiples of 128."""
    M, K = x.shape
    N = w.shape[1]
    tm = min(tm, _round_up(M, 8))
    tn = min(tn, _round_up(N, 128))
    tk = min(tk, _round_up(K, 128))
    xp = _pad_axis(_pad_axis(x, tm, 0), tk, 1)
    wp = _pad_axis(_pad_axis(w, tk, 0), tn, 1)
    bp = _pad_axis(b, tn, 1)                       # b is (1, N)
    Mp, Kp = xp.shape
    Np = wp.shape[1]
    out = pl.pallas_call(
        _tiled_linear_kernel,
        out_shape=jax.ShapeDtypeStruct((Mp, Np), x.dtype),
        grid=(Mp // tm, Np // tn, Kp // tk),
        in_specs=[
            pl.BlockSpec((tm, tk), lambda i, j, k: (i, k)),
            pl.BlockSpec((tk, tn), lambda i, j, k: (k, j)),
            pl.BlockSpec((1, tn), lambda i, j, k: (0, j)),
        ],
        out_specs=pl.BlockSpec((tm, tn), lambda i, j, k: (i, j)),
        scratch_shapes=[pltpu.VMEM((tm, tn), jnp.float32)],
        compiler_params=_cparams("parallel", "parallel", "arbitrary"),
    )(xp, wp, bp)
    return out[:M, :N]


# ----------------------------- model (glue) ---------------------------------

def init_params(key, vocab_size, src_vocab, d_model, nhead, num_layers, dim_ff):
    keys = iter(jax.random.split(key, 8 + num_layers * 16))
    wb = lambda shape: (0.02 * jax.random.normal(next(keys), shape)).astype(jnp.bfloat16)
    wf = lambda shape: (0.02 * jax.random.normal(next(keys), shape)).astype(jnp.float32)
    z = lambda shape: jnp.zeros(shape, jnp.float32)
    o = lambda shape: jnp.ones(shape, jnp.float32)

    params = {
        "enc_embedding": wf((src_vocab, d_model)),      # BERT stub
        "embedding": wf((vocab_size, d_model)),         # nn.Embedding(vocab, d)
        "fc_out_w": wb((d_model, vocab_size)),          # nn.Linear(d, vocab), (in,out)
        "fc_out_b": z((1, vocab_size)),
        "layers": [],
    }
    for _ in range(num_layers):
        lp = {
            # packed in_proj for self-attention (Wq|Wk|Wv), stored (in,out) bf16
            "self_qkv_w": wb((d_model, 3 * d_model)), "self_qkv_b": z((1, 3 * d_model)),
            "self_o_w": wb((d_model, d_model)), "self_o_b": z((1, d_model)),
            # cross-attention: Q from tgt, packed (Wk|Wv) from memory
            "cross_q_w": wb((d_model, d_model)), "cross_q_b": z((1, d_model)),
            "cross_kv_w": wb((d_model, 2 * d_model)), "cross_kv_b": z((1, 2 * d_model)),
            "cross_o_w": wb((d_model, d_model)), "cross_o_b": z((1, d_model)),
            # feed-forward
            "ff1_w": wb((d_model, dim_ff)), "ff1_b": z((1, dim_ff)),
            "ff2_w": wb((dim_ff, d_model)), "ff2_b": z((1, d_model)),
        }
        for n in ("n1", "n2", "n3"):
            lp[n + "_g"] = o((1, d_model))
            lp[n + "_b"] = z((1, d_model))
        params["layers"].append(lp)
    return params


def html_generator_forward(params, input_ids, attention_mask, target_ids, nhead):
    del attention_mask  # only consumed inside the (stubbed) BERT encoder
    B, T = target_ids.shape
    d = params["embedding"].shape[1]

    # encoder_output = bert(...).last_hidden_state  (stubbed, see TODO above)
    encoder_output = jnp.take(params["enc_embedding"], input_ids, axis=0)  # (B,S,d)

    # tgt_embeddings = embedding(target_ids)
    x = jnp.take(params["embedding"], target_ids, axis=0)                  # (B,T,d)

    for lp in params["layers"]:
        x = decoder_layer(x, encoder_output, lp, nhead)

    logits = tiled_linear(x.reshape(B * T, d), params["fc_out_w"], params["fc_out_b"])
    return logits.reshape(B, T, -1)                 # (B, T, vocab)


# --------------------------------- main --------------------------------------

if __name__ == "__main__":
    # Small shapes consistent with the module structure (lane-dense d_model).
    VOCAB, SRC_VOCAB = 64, 100
    D_MODEL, NHEAD, NUM_LAYERS, DIM_FF = 128, 4, 2, 256
    B, SRC_LEN, TGT_LEN = 2, 16, 16

    # Run the Buffered(1)/VMEM probes eagerly (before any jit tracing).
    _single_buffer_ok()
    _vmem_limit_bytes()

    key = jax.random.PRNGKey(0)
    k_param, k_in, k_tgt = jax.random.split(key, 3)

    params = init_params(k_param, VOCAB, SRC_VOCAB, D_MODEL, NHEAD, NUM_LAYERS, DIM_FF)
    input_ids = jax.random.randint(k_in, (B, SRC_LEN), 0, SRC_VOCAB, dtype=jnp.int32)
    attention_mask = jnp.ones((B, SRC_LEN), jnp.int32)
    target_ids = jax.random.randint(k_tgt, (B, TGT_LEN), 0, VOCAB, dtype=jnp.int32)

    fwd = jax.jit(functools.partial(html_generator_forward, nhead=NHEAD))
    logits = fwd(params, input_ids, attention_mask, target_ids)
    jax.block_until_ready(logits)

    assert logits.shape == (B, TGT_LEN, VOCAB), logits.shape
    assert bool(jnp.all(jnp.isfinite(logits)))
    print("KERNEL_OK")
</pallas_src>

<mosaic_0001>
module attributes {stable_mosaic.version = 11 : i64} {
  func.func @_probe_kernel(%arg0: i32, %arg1: memref<8x128xf32, #tpu.memory_space<vmem>>, %arg2: memref<8x128xf32, #tpu.memory_space<vmem>>) attributes {dimension_semantics = [#tpu.dimension_semantics<arbitrary>], iteration_bounds = array<i64: 2>, scalar_prefetch = 0 : i64, scratch_operands = 0 : i64, tpu.core_type = #tpu.core_type<tc>, window_params = [{pipeline_mode = #tpu.pipeline_mode<synchronous>, transform_indices = @transform_0, window_bounds = array<i64: 8, 128>}, {transform_indices = @transform_1, window_bounds = array<i64: 8, 128>}]} {
    %c0 = arith.constant 0 : index
    %c0_0 = arith.constant 0 : index
    %0 = vector.load %arg1[%c0, %c0_0] : memref<8x128xf32, #tpu.memory_space<vmem>>, vector<8x128xf32>
    %cst = arith.constant 2.000000e+00 : f32
    %1 = vector.broadcast %cst : f32 to vector<8x128xf32>
    %2 = arith.mulf %0, %1 : vector<8x128xf32>
    %c0_1 = arith.constant 0 : index
    %c0_2 = arith.constant 0 : index
    %3 = vector.load %arg2[%c0_1, %c0_2] : memref<8x128xf32, #tpu.memory_space<vmem>>, vector<8x128xf32>
    tpu.vector_store %arg2[%c0_1, %c0_2], %2 {strides = array<i32>} : memref<8x128xf32, #tpu.memory_space<vmem>>, vector<8x128xf32>,
    return
  }
  func.func @transform_0(%arg0: i32) -> (i32, i32) {
    %c0_i32 = arith.constant 0 : i32
    %c0_i32_0 = arith.constant 0 : i32
    %c0_i32_1 = arith.constant 0 : i32
    return %c0_i32, %c0_i32_0 : i32, i32
  }
  func.func @transform_1(%arg0: i32) -> (i32, i32) {
    %c0_i32 = arith.constant 0 : i32
    %c0_i32_0 = arith.constant 0 : i32
    return %arg0, %c0_i32 : i32, i32
  }
}

module attributes {stable_mosaic.version = 11 : i64} {
  func.func @_tiled_linear_kernel(%arg0: i32, %arg1: i32, %arg2: i32, %arg3: memref<32x128xf32, #tpu.memory_space<vmem>>, %arg4: memref<128x128xbf16, #tpu.memory_space<vmem>>, %arg5: memref<1x128xf32, #tpu.memory_space<vmem>>, %arg6: memref<32x128xf32, #tpu.memory_space<vmem>>, %arg7: memref<32x128xf32, #tpu.memory_space<vmem>>) attributes {dimension_semantics = [#tpu.dimension_semantics<parallel>, #tpu.dimension_semantics<parallel>, #tpu.dimension_semantics<arbitrary>], iteration_bounds = array<i64: 1, 1, 1>, scalar_prefetch = 0 : i64, scratch_operands = 1 : i64, tpu.core_type = #tpu.core_type<tc>, window_params = [{transform_indices = @transform_0, window_bounds = array<i64: 32, 128>}, {transform_indices = @transform_1, window_bounds = array<i64: 128, 128>}, {transform_indices = @transform_2, window_bounds = array<i64: 1, 128>}, {transform_indices = @transform_3, window_bounds = array<i64: 32, 128>}]} {
    %c0_i32 = arith.constant 0 : i32
    %0 = arith.cmpi eq, %arg2, %c0_i32 : i32
    %1 = arith.extui %0 : i1 to i32
    %c0_i32_0 = arith.constant 0 : i32
    %2 = arith.cmpi ne, %1, %c0_i32_0 : i32
    scf.if %2 {
      %cst_10 = arith.constant 0.000000e+00 : f32
      %13 = vector.broadcast %cst_10 : f32 to vector<32x128xf32>
      %c0_11 = arith.constant 0 : index
      %c0_12 = arith.constant 0 : index
      %14 = vector.load %arg7[%c0_11, %c0_12] : memref<32x128xf32, #tpu.memory_space<vmem>>, vector<32x128xf32>
      tpu.vector_store %arg7[%c0_11, %c0_12], %13 {strides = array<i32>} : memref<32x128xf32, #tpu.memory_space<vmem>>, vector<32x128xf32>,
    } else {
    }
    %c0 = arith.constant 0 : index
    %c0_1 = arith.constant 0 : index
    %3 = vector.load %arg7[%c0, %c0_1] : memref<32x128xf32, #tpu.memory_space<vmem>>, vector<32x128xf32>
    %c0_2 = arith.constant 0 : index
    %c0_3 = arith.constant 0 : index
    %4 = vector.load %arg3[%c0_2, %c0_3] : memref<32x128xf32, #tpu.memory_space<vmem>>, vector<32x128xf32>
    %c0_4 = arith.constant 0 : index
    %c0_5 = arith.constant 0 : index
    %5 = vector.load %arg4[%c0_4, %c0_5] : memref<128x128xbf16, #tpu.memory_space<vmem>>, vector<128x128xbf16>
    %6 = arith.truncf %4 : vector<32x128xf32> to vector<32x128xbf16>
    %cst = arith.constant dense<0.000000e+00> : vector<32x128xf32>
    %7 = tpu.matmul %6, %5, %cst {dimension_numbers = #tpu.dot_dimension_numbers<[1], [0], [0], [1], [0, 0, 1, 1], [], []>} : vector<32x128xbf16>, vector<128x128xbf16>, vector<32x128xf32> -> vector<32x128xf32>
    %8 = arith.addf %3, %7 : vector<32x128xf32>
    %c0_6 = arith.constant 0 : index
    %c0_7 = arith.constant 0 : index
    %9 = vector.load %arg7[%c0_6, %c0_7] : memref<32x128xf32, #tpu.memory_space<vmem>>, vector<32x128xf32>
    tpu.vector_store %arg7[%c0_6, %c0_7], %8 {strides = array<i32>} : memref<32x128xf32, #tpu.memory_space<vmem>>, vector<32x128xf32>,
    %c0_i32_8 = arith.constant 0 : i32
    %10 = arith.cmpi eq, %arg2, %c0_i32_8 : i32
    %11 = arith.extui %10 : i1 to i32
    %c0_i32_9 = arith.constant 0 : i32
    %12 = arith.cmpi ne, %11, %c0_i32_9 : i32
    scf.if %12 {
      %c0_10 = arith.constant 0 : index
      %c0_11 = arith.constant 0 : index
      %13 = vector.load %arg7[%c0_10, %c0_11] : memref<32x128xf32, #tpu.memory_space<vmem>>, vector<32x128xf32>
      %c0_12 = arith.constant 0 : index
      %c0_13 = arith.constant 0 : index
      %14 = vector.load %arg5[%c0_12, %c0_13] : memref<1x128xf32, #tpu.memory_space<vmem>>, vector<1x128xf32>
      %15 = vector.broadcast %14 : vector<1x128xf32> to vector<32x128xf32>
      %16 = arith.addf %13, %15 : vector<32x128xf32>
      %c0_14 = arith.constant 0 : index
      %c0_15 = arith.constant 0 : index
      %17 = vector.load %arg6[%c0_14, %c0_15] : memref<32x128xf32, #tpu.memory_space<vmem>>, vector<32x128xf32>
      tpu.vector_store %arg6[%c0_14, %c0_15], %16 {strides = array<i32>} : memref<32x128xf32, #tpu.memory_space<vmem>>, vector<32x128xf32>,
    } else {
    }
    return
  }
  func.func @transform_0(%arg0: i32, %arg1: i32, %arg2: i32) -> (i32, i32) {
    %c0_i32 = arith.constant 0 : i32
    return %arg0, %arg2 : i32, i32
  }
  func.func @transform_1(%arg0: i32, %arg1: i32, %arg2: i32) -> (i32, i32) {
    %c0_i32 = arith.constant 0 : i32
    return %arg2, %arg1 : i32, i32
  }
  func.func @transform_2(%arg0: i32, %arg1: i32, %arg2: i32) -> (i32, i32) {
    %c0_i32 = arith.constant 0 : i32
    %c0_i32_0 = arith.constant 0 : i32
    return %c0_i32, %arg1 : i32, i32
  }
  func.func @transform_3(%arg0: i32, %arg1: i32, %arg2: i32) -> (i32, i32) {
    %c0_i32 = arith.constant 0 : i32
    return %arg0, %arg1 : i32, i32
  }
}

module attributes {stable_mosaic.version = 11 : i64} {
  func.func @_decoder_layer_kernel(%arg0: i32, %arg1: memref<2x16x128xf32, #tpu.memory_space<vmem>>, %arg2: memref<2x16x128xf32, #tpu.memory_space<vmem>>, %arg3: memref<128x384xbf16, #tpu.memory_space<vmem>>, %arg4: memref<1x384xf32, #tpu.memory_space<vmem>>, %arg5: memref<128x128xbf16, #tpu.memory_space<vmem>>, %arg6: memref<1x128xf32, #tpu.memory_space<vmem>>, %arg7: memref<1x128xf32, #tpu.memory_space<vmem>>, %arg8: memref<1x128xf32, #tpu.memory_space<vmem>>, %arg9: memref<128x128xbf16, #tpu.memory_space<vmem>>, %arg10: memref<1x128xf32, #tpu.memory_space<vmem>>, %arg11: memref<128x256xbf16, #tpu.memory_space<vmem>>, %arg12: memref<1x256xf32, #tpu.memory_space<vmem>>, %arg13: memref<128x128xbf16, #tpu.memory_space<vmem>>, %arg14: memref<1x128xf32, #tpu.memory_space<vmem>>, %arg15: memref<1x128xf32, #tpu.memory_space<vmem>>, %arg16: memref<1x128xf32, #tpu.memory_space<vmem>>, %arg17: memref<128x256xbf16, #tpu.memory_space<vmem>>, %arg18: memref<1x256xf32, #tpu.memory_space<vmem>>, %arg19: memref<256x128xbf16, #tpu.memory_space<vmem>>, %arg20: memref<1x128xf32, #tpu.memory_space<vmem>>, %arg21: memref<1x128xf32, #tpu.memory_space<vmem>>, %arg22: memref<1x128xf32, #tpu.memory_space<vmem>>, %arg23: memref<2x16x128xf32, #tpu.memory_space<vmem>>) attributes {dimension_semantics = [#tpu.dimension_semantics<parallel>], iteration_bounds = array<i64: 1>, scalar_prefetch = 0 : i64, scratch_operands = 0 : i64, tpu.core_type = #tpu.core_type<tc>, window_params = [{transform_indices = @transform_0, window_bounds = array<i64: 2, 16, 128>}, {transform_indices = @transform_1, window_bounds = array<i64: 2, 16, 128>}, {pipeline_mode = #tpu.pipeline_mode<synchronous>, transform_indices = @transform_2, window_bounds = array<i64: 128, 384>}, {pipeline_mode = #tpu.pipeline_mode<synchronous>, transform_indices = @transform_3, window_bounds = array<i64: 1, 384>}, {pipeline_mode = #tpu.pipeline_mode<synchronous>, transform_indices = @transform_4, window_bounds = array<i64: 128, 128>}, {pipeline_mode = #tpu.pipeline_mode<synchronous>, transform_indices = @transform_5, window_bounds = array<i64: 1, 128>}, {pipeline_mode = #tpu.pipeline_mode<synchronous>, transform_indices = @transform_6, window_bounds = array<i64: 1, 128>}, {pipeline_mode = #tpu.pipeline_mode<synchronous>, transform_indices = @transform_7, window_bounds = array<i64: 1, 128>}, {pipeline_mode = #tpu.pipeline_mode<synchronous>, transform_indices = @transform_8, window_bounds = array<i64: 128, 128>}, {pipeline_mode = #tpu.pipeline_mode<synchronous>, transform_indices = @transform_9, window_bounds = array<i64: 1, 128>}, {pipeline_mode = #tpu.pipeline_mode<synchronous>, transform_indices = @transform_10, window_bounds = array<i64: 128, 256>}, {pipeline_mode = #tpu.pipeline_mode<synchronous>, transform_indices = @transform_11, window_bounds = array<i64: 1, 256>}, {pipeline_mode = #tpu.pipeline_mode<synchronous>, transform_indices = @transform_12, window_bounds = array<i64: 128, 128>}, {pipeline_mode = #tpu.pipeline_mode<synchronous>, transform_indices = @transform_13, window_bounds = array<i64: 1, 128>}, {pipeline_mode = #tpu.pipeline_mode<synchronous>, transform_indices = @transform_14, window_bounds = array<i64: 1, 128>}, {pipeline_mode = #tpu.pipeline_mode<synchronous>, transform_indices = @transform_15, window_bounds = array<i64: 1, 128>}, {pipeline_mode = #tpu.pipeline_mode<synchronous>, transform_indices = @transform_16, window_bounds = array<i64: 128, 256>}, {pipeline_mode = #tpu.pipeline_mode<synchronous>, transform_indices = @transform_17, window_bounds = array<i64: 1, 256>}, {pipeline_mode = #tpu.pipeline_mode<synchronous>, transform_indices = @transform_18, window_bounds = array<i64: 256, 128>}, {pipeline_mode = #tpu.pipeline_mode<synchronous>, transform_indices = @transform_19, window_bounds = array<i64: 1, 128>}, {pipeline_mode = #tpu.pipeline_mode<synchronous>, transform_indices = @transform_20, window_bounds = array<i64: 1, 128>}, {pipeline_mode = #tpu.pipeline_mode<synchronous>, transform_indices = @transform_21, window_bounds = array<i64: 1, 128>}, {transform_indices = @transform_22, window_bounds = array<i64: 2, 16, 128>}]} {
    %c0 = arith.constant 0 : index
    %c0_0 = arith.constant 0 : index
    %c0_1 = arith.constant 0 : index
    %0 = vector.load %arg1[%c0, %c0_0, %c0_1] : memref<2x16x128xf32, #tpu.memory_space<vmem>>, vector<2x16x128xf32>
    %1 = vector.shape_cast %0 : vector<2x16x128xf32> to vector<32x128xf32>
    %c0_2 = arith.constant 0 : index
    %c0_3 = arith.constant 0 : index
    %c0_4 = arith.constant 0 : index
    %2 = vector.load %arg2[%c0_2, %c0_3, %c0_4] : memref<2x16x128xf32, #tpu.memory_space<vmem>>, vector<2x16x128xf32>
    %3 = vector.shape_cast %2 : vector<2x16x128xf32> to vector<32x128xf32>
    %c0_5 = arith.constant 0 : index
    %c0_6 = arith.constant 0 : index
    %4 = vector.load %arg3[%c0_5, %c0_6] : memref<128x384xbf16, #tpu.memory_space<vmem>>, vector<128x384xbf16>
    %5 = arith.truncf %1 : vector<32x128xf32> to vector<32x128xbf16>
    %cst = arith.constant dense<0.000000e+00> : vector<32x384xf32>
    %6 = tpu.matmul %5, %4, %cst {dimension_numbers = #tpu.dot_dimension_numbers<[1], [0], [0], [1], [0, 0, 1, 1], [], []>} : vector<32x128xbf16>, vector<128x384xbf16>, vector<32x384xf32> -> vector<32x384xf32>
    %c0_7 = arith.constant 0 : index
    %c0_8 = arith.constant 0 : index
    %7 = vector.load %arg4[%c0_7, %c0_8] : memref<1x384xf32, #tpu.memory_space<vmem>>, vector<1x384xf32>
    %8 = vector.broadcast %7 : vector<1x384xf32> to vector<32x384xf32>
    %9 = arith.addf %6, %8 : vector<32x384xf32>
    %10 = vector.extract_strided_slice %9 {offsets = [0, 0], sizes = [32, 128], strides = [1, 1]} : vector<32x384xf32> to vector<32x128xf32>
    %11 = vector.extract_strided_slice %9 {offsets = [0, 128], sizes = [32, 128], strides = [1, 1]} : vector<32x384xf32> to vector<32x128xf32>
    %12 = vector.extract_strided_slice %9 {offsets = [0, 256], sizes = [32, 128], strides = [1, 1]} : vector<32x384xf32> to vector<32x128xf32>
    %13 = vector.shape_cast %10 : vector<32x128xf32> to vector<2x16x128xf32>
    %14 = vector.shape_cast %11 : vector<32x128xf32> to vector<2x16x128xf32>
    %15 = vector.shape_cast %12 : vector<32x128xf32> to vector<2x16x128xf32>
    %16 = vector.shape_cast %13 : vector<2x16x128xf32> to vector<2x16x4x32xf32>
    %17 = tpu.transpose %16, [0, 2, 1, 3] : vector<2x16x4x32xf32> -> vector<2x4x16x32xf32>
    %18 = vector.shape_cast %17 : vector<2x4x16x32xf32> to vector<8x16x32xf32>
    %19 = arith.truncf %18 : vector<8x16x32xf32> to vector<8x16x32xbf16>
    %20 = vector.shape_cast %14 : vector<2x16x128xf32> to vector<2x16x4x32xf32>
    %21 = tpu.transpose %20, [0, 2, 1, 3] : vector<2x16x4x32xf32> -> vector<2x4x16x32xf32>
    %22 = vector.shape_cast %21 : vector<2x4x16x32xf32> to vector<8x16x32xf32>
    %23 = arith.truncf %22 : vector<8x16x32xf32> to vector<8x16x32xbf16>
    %24 = vector.shape_cast %15 : vector<2x16x128xf32> to vector<2x16x4x32xf32>
    %25 = tpu.transpose %24, [0, 2, 1, 3] : vector<2x16x4x32xf32> -> vector<2x4x16x32xf32>
    %26 = vector.shape_cast %25 : vector<2x4x16x32xf32> to vector<8x16x32xf32>
    %27 = arith.truncf %26 : vector<8x16x32xf32> to vector<8x16x32xbf16>
    "tpu.trace_start"() <{level = 10 : i32, message = "bqd,bkd->bqk"}> : () -> ()
    %cst_9 = arith.constant dense<0.000000e+00> : vector<8x16x16xf32>
    %28 = tpu.matmul %19, %23, %cst_9 {dimension_numbers = #tpu.dot_dimension_numbers<[2], [2], [1], [1], [0, 0, 0, 1, 1, 1], [0], [0]>} : vector<8x16x32xbf16>, vector<8x16x32xbf16>, vector<8x16x16xf32> -> vector<8x16x16xf32>
    "tpu.trace_stop"() : () -> ()
    %cst_10 = arith.constant 0.176776692 : f32
    %29 = vector.broadcast %cst_10 : f32 to vector<8x16x16xf32>
    %30 = arith.mulf %28, %29 : vector<8x16x16xf32>
    %31 = tpu.iota {dimensions = array<i32: 0>} : vector<16x16xi32>
    %32 = tpu.iota {dimensions = array<i32: 1>} : vector<16x16xi32>
    %33 = arith.cmpi sle, %32, %31 : vector<16x16xi32>
    %34 = vector.shape_cast %33 : vector<16x16xi1> to vector<1x16x16xi1>
    %cst_11 = arith.constant -1.000000e+30 : f32
    %35 = vector.shape_cast %34 : vector<1x16x16xi1> to vector<1x16x16xi1>
    %36 = vector.broadcast %35 : vector<1x16x16xi1> to vector<8x16x16xi1>
    %37 = vector.broadcast %cst_11 : f32 to vector<8x16x16xf32>
    %38 = arith.select %36, %30, %37 : vector<8x16x16xi1>, vector<8x16x16xf32>
    %cst_12 = arith.constant dense<0xFF800000> : vector<8x16xf32>
    %39 = vector.multi_reduction <maximumf>, %38, %cst_12 [2] : vector<8x16x16xf32> to vector<8x16xf32>
    %40 = vector.shape_cast %39 : vector<8x16xf32> to vector<8x16x1xf32>
    %41 = vector.broadcast %40 : vector<8x16x1xf32> to vector<8x16x16xf32>
    %42 = arith.subf %38, %41 : vector<8x16x16xf32>
    %43 = math.exp %42 : vector<8x16x16xf32>
    %cst_13 = arith.constant dense<0.000000e+00> : vector<8x16xf32>
    %44 = vector.multi_reduction <add>, %43, %cst_13 [2] : vector<8x16x16xf32> to vector<8x16xf32>
    %45 = vector.shape_cast %44 : vector<8x16xf32> to vector<8x16x1xf32>
    %46 = tpu.reciprocal %45 {approx = true} : vector<8x16x1xf32> -> vector<8x16x1xf32>
    %47 = vector.broadcast %46 : vector<8x16x1xf32> to vector<8x16x16xf32>
    %48 = arith.mulf %43, %47 : vector<8x16x16xf32>
    %49 = arith.truncf %48 : vector<8x16x16xf32> to vector<8x16x16xbf16>
    "tpu.trace_start"() <{level = 10 : i32, message = "bqk,bkd->bqd"}> : () -> ()
    %cst_14 = arith.constant dense<0.000000e+00> : vector<8x16x32xf32>
    %50 = tpu.matmul %49, %27, %cst_14 {dimension_numbers = #tpu.dot_dimension_numbers<[2], [1], [1], [2], [0, 0, 0, 1, 1, 2], [0], [0]>} : vector<8x16x16xbf16>, vector<8x16x32xbf16>, vector<8x16x32xf32> -> vector<8x16x32xf32>
    "tpu.trace_stop"() : () -> ()
    %51 = vector.shape_cast %50 : vector<8x16x32xf32> to vector<2x4x16x32xf32>
    %52 = tpu.transpose %51, [0, 2, 1, 3] : vector<2x4x16x32xf32> -> vector<2x16x4x32xf32>
    %53 = vector.shape_cast %52 : vector<2x16x4x32xf32> to vector<2x16x128xf32>
    %54 = vector.shape_cast %53 : vector<2x16x128xf32> to vector<32x128xf32>
    %c0_15 = arith.constant 0 : index
    %c0_16 = arith.constant 0 : index
    %55 = vector.load %arg5[%c0_15, %c0_16] : memref<128x128xbf16, #tpu.memory_space<vmem>>, vector<128x128xbf16>
    %56 = arith.truncf %54 : vector<32x128xf32> to vector<32x128xbf16>
    %cst_17 = arith.constant dense<0.000000e+00> : vector<32x128xf32>
    %57 = tpu.matmul %56, %55, %cst_17 {dimension_numbers = #tpu.dot_dimension_numbers<[1], [0], [0], [1], [0, 0, 1, 1], [], []>} : vector<32x128xbf16>, vector<128x128xbf16>, vector<32x128xf32> -> vector<32x128xf32>
    %c0_18 = arith.constant 0 : index
    %c0_19 = arith.constant 0 : index
    %58 = vector.load %arg6[%c0_18, %c0_19] : memref<1x128xf32, #tpu.memory_space<vmem>>, vector<1x128xf32>
    %59 = vector.broadcast %58 : vector<1x128xf32> to vector<32x128xf32>
    %60 = arith.addf %57, %59 : vector<32x128xf32>
    %61 = arith.addf %1, %60 : vector<32x128xf32>
    %c0_20 = arith.constant 0 : index
    %c0_21 = arith.constant 0 : index
    %62 = vector.load %arg7[%c0_20, %c0_21] : memref<1x128xf32, #tpu.memory_space<vmem>>, vector<1x128xf32>
    %c0_22 = arith.constant 0 : index
    %c0_23 = arith.constant 0 : index
    %63 = vector.load %arg8[%c0_22, %c0_23] : memref<1x128xf32, #tpu.memory_space<vmem>>, vector<1x128xf32>
    %cst_24 = arith.constant dense<0.000000e+00> : vector<32xf32>
    %64 = vector.multi_reduction <add>, %61, %cst_24 [1] : vector<32x128xf32> to vector<32xf32>
    %65 = vector.shape_cast %64 : vector<32xf32> to vector<32x1xf32>
    %cst_25 = arith.constant 1.280000e+02 : f32
    %66 = vector.broadcast %cst_25 : f32 to vector<32x1xf32>
    %67 = arith.divf %65, %66 : vector<32x1xf32>
    %68 = vector.broadcast %67 : vector<32x1xf32> to vector<32x128xf32>
    %69 = arith.subf %61, %68 : vector<32x128xf32>
    %70 = vector.broadcast %67 : vector<32x1xf32> to vector<32x128xf32>
    %71 = arith.subf %61, %70 : vector<32x128xf32>
    %72 = arith.mulf %69, %71 : vector<32x128xf32>
    %cst_26 = arith.constant dense<0.000000e+00> : vector<32xf32>
    %73 = vector.multi_reduction <add>, %72, %cst_26 [1] : vector<32x128xf32> to vector<32xf32>
    %74 = vector.shape_cast %73 : vector<32xf32> to vector<32x1xf32>
    %cst_27 = arith.constant 1.280000e+02 : f32
    %75 = vector.broadcast %cst_27 : f32 to vector<32x1xf32>
    %76 = arith.divf %74, %75 : vector<32x1xf32>
    %77 = vector.broadcast %67 : vector<32x1xf32> to vector<32x128xf32>
    %78 = arith.subf %61, %77 : vector<32x128xf32>
    %cst_28 = arith.constant 9.99999974E-6 : f32
    %79 = vector.broadcast %cst_28 : f32 to vector<32x1xf32>
    %80 = arith.addf %76, %79 : vector<32x1xf32>
    %81 = math.rsqrt %80 : vector<32x1xf32>
    %82 = vector.broadcast %81 : vector<32x1xf32> to vector<32x128xf32>
    %83 = arith.mulf %78, %82 : vector<32x128xf32>
    %84 = vector.broadcast %62 : vector<1x128xf32> to vector<32x128xf32>
    %85 = arith.mulf %83, %84 : vector<32x128xf32>
    %86 = vector.broadcast %63 : vector<1x128xf32> to vector<32x128xf32>
    %87 = arith.addf %85, %86 : vector<32x128xf32>
    %c0_29 = arith.constant 0 : index
    %c0_30 = arith.constant 0 : index
    %88 = vector.load %arg9[%c0_29, %c0_30] : memref<128x128xbf16, #tpu.memory_space<vmem>>, vector<128x128xbf16>
    %89 = arith.truncf %87 : vector<32x128xf32> to vector<32x128xbf16>
    %cst_31 = arith.constant dense<0.000000e+00> : vector<32x128xf32>
    %90 = tpu.matmul %89, %88, %cst_31 {dimension_numbers = #tpu.dot_dimension_numbers<[1], [0], [0], [1], [0, 0, 1, 1], [], []>} : vector<32x128xbf16>, vector<128x128xbf16>, vector<32x128xf32> -> vector<32x128xf32>
    %c0_32 = arith.constant 0 : index
    %c0_33 = arith.constant 0 : index
    %91 = vector.load %arg10[%c0_32, %c0_33] : memref<1x128xf32, #tpu.memory_space<vmem>>, vector<1x128xf32>
    %92 = vector.broadcast %91 : vector<1x128xf32> to vector<32x128xf32>
    %93 = arith.addf %90, %92 : vector<32x128xf32>
    %c0_34 = arith.constant 0 : index
    %c0_35 = arith.constant 0 : index
    %94 = vector.load %arg11[%c0_34, %c0_35] : memref<128x256xbf16, #tpu.memory_space<vmem>>, vector<128x256xbf16>
    %95 = arith.truncf %3 : vector<32x128xf32> to vector<32x128xbf16>
    %cst_36 = arith.constant dense<0.000000e+00> : vector<32x256xf32>
    %96 = tpu.matmul %95, %94, %cst_36 {dimension_numbers = #tpu.dot_dimension_numbers<[1], [0], [0], [1], [0, 0, 1, 1], [], []>} : vector<32x128xbf16>, vector<128x256xbf16>, vector<32x256xf32> -> vector<32x256xf32>
    %c0_37 = arith.constant 0 : index
    %c0_38 = arith.constant 0 : index
    %97 = vector.load %arg12[%c0_37, %c0_38] : memref<1x256xf32, #tpu.memory_space<vmem>>, vector<1x256xf32>
    %98 = vector.broadcast %97 : vector<1x256xf32> to vector<32x256xf32>
    %99 = arith.addf %96, %98 : vector<32x256xf32>
    %100 = vector.extract_strided_slice %99 {offsets = [0, 0], sizes = [32, 128], strides = [1, 1]} : vector<32x256xf32> to vector<32x128xf32>
    %101 = vector.extract_strided_slice %99 {offsets = [0, 128], sizes = [32, 128], strides = [1, 1]} : vector<32x256xf32> to vector<32x128xf32>
    %102 = vector.shape_cast %93 : vector<32x128xf32> to vector<2x16x128xf32>
    %103 = vector.shape_cast %100 : vector<32x128xf32> to vector<2x16x128xf32>
    %104 = vector.shape_cast %101 : vector<32x128xf32> to vector<2x16x128xf32>
    %105 = vector.shape_cast %102 : vector<2x16x128xf32> to vector<2x16x4x32xf32>
    %106 = tpu.transpose %105, [0, 2, 1, 3] : vector<2x16x4x32xf32> -> vector<2x4x16x32xf32>
    %107 = vector.shape_cast %106 : vector<2x4x16x32xf32> to vector<8x16x32xf32>
    %108 = arith.truncf %107 : vector<8x16x32xf32> to vector<8x16x32xbf16>
    %109 = vector.shape_cast %103 : vector<2x16x128xf32> to vector<2x16x4x32xf32>
    %110 = tpu.transpose %109, [0, 2, 1, 3] : vector<2x16x4x32xf32> -> vector<2x4x16x32xf32>
    %111 = vector.shape_cast %110 : vector<2x4x16x32xf32> to vector<8x16x32xf32>
    %112 = arith.truncf %111 : vector<8x16x32xf32> to vector<8x16x32xbf16>
    %113 = vector.shape_cast %104 : vector<2x16x128xf32> to vector<2x16x4x32xf32>
    %114 = tpu.transpose %113, [0, 2, 1, 3] : vector<2x16x4x32xf32> -> vector<2x4x16x32xf32>
    %115 = vector.shape_cast %114 : vector<2x4x16x32xf32> to vector<8x16x32xf32>
    %116 = arith.truncf %115 : vector<8x16x32xf32> to vector<8x16x32xbf16>
    "tpu.trace_start"() <{level = 10 : i32, message = "bqd,bkd->bqk"}> : () -> ()
    %cst_39 = arith.constant dense<0.000000e+00> : vector<8x16x16xf32>
    %117 = tpu.matmul %108, %112, %cst_39 {dimension_numbers = #tpu.dot_dimension_numbers<[2], [2], [1], [1], [0, 0, 0, 1, 1, 1], [0], [0]>} : vector<8x16x32xbf16>, vector<8x16x32xbf16>, vector<8x16x16xf32> -> vector<8x16x16xf32>
    "tpu.trace_stop"() : () -> ()
    %cst_40 = arith.constant 0.176776692 : f32
    %118 = vector.broadcast %cst_40 : f32 to vector<8x16x16xf32>
    %119 = arith.mulf %117, %118 : vector<8x16x16xf32>
    %cst_41 = arith.constant dense<0xFF800000> : vector<8x16xf32>
    %120 = vector.multi_reduction <maximumf>, %119, %cst_41 [2] : vector<8x16x16xf32> to vector<8x16xf32>
    %121 = vector.shape_cast %120 : vector<8x16xf32> to vector<8x16x1xf32>
    %122 = vector.broadcast %121 : vector<8x16x1xf32> to vector<8x16x16xf32>
    %123 = arith.subf %119, %122 : vector<8x16x16xf32>
    %124 = math.exp %123 : vector<8x16x16xf32>
    %cst_42 = arith.constant dense<0.000000e+00> : vector<8x16xf32>
    %125 = vector.multi_reduction <add>, %124, %cst_42 [2] : vector<8x16x16xf32> to vector<8x16xf32>
    %126 = vector.shape_cast %125 : vector<8x16xf32> to vector<8x16x1xf32>
    %127 = tpu.reciprocal %126 {approx = true} : vector<8x16x1xf32> -> vector<8x16x1xf32>
    %128 = vector.broadcast %127 : vector<8x16x1xf32> to vector<8x16x16xf32>
    %129 = arith.mulf %124, %128 : vector<8x16x16xf32>
    %130 = arith.truncf %129 : vector<8x16x16xf32> to vector<8x16x16xbf16>
    "tpu.trace_start"() <{level = 10 : i32, message = "bqk,bkd->bqd"}> : () -> ()
    %cst_43 = arith.constant dense<0.000000e+00> : vector<8x16x32xf32>
    %131 = tpu.matmul %130, %116, %cst_43 {dimension_numbers = #tpu.dot_dimension_numbers<[2], [1], [1], [2], [0, 0, 0, 1, 1, 2], [0], [0]>} : vector<8x16x16xbf16>, vector<8x16x32xbf16>, vector<8x16x32xf32> -> vector<8x16x32xf32>
    "tpu.trace_stop"() : () -> ()
    %132 = vector.shape_cast %131 : vector<8x16x32xf32> to vector<2x4x16x32xf32>
    %133 = tpu.transpose %132, [0, 2, 1, 3] : vector<2x4x16x32xf32> -> vector<2x16x4x32xf32>
    %134 = vector.shape_cast %133 : vector<2x16x4x32xf32> to vector<2x16x128xf32>
    %135 = vector.shape_cast %134 : vector<2x16x128xf32> to vector<32x128xf32>
    %c0_44 = arith.constant 0 : index
    %c0_45 = arith.constant 0 : index
    %136 = vector.load %arg13[%c0_44, %c0_45] : memref<128x128xbf16, #tpu.memory_space<vmem>>, vector<128x128xbf16>
    %137 = arith.truncf %135 : vector<32x128xf32> to vector<32x128xbf16>
    %cst_46 = arith.constant dense<0.000000e+00> : vector<32x128xf32>
    %138 = tpu.matmul %137, %136, %cst_46 {dimension_numbers = #tpu.dot_dimension_numbers<[1], [0], [0], [1], [0, 0, 1, 1], [], []>} : vector<32x128xbf16>, vector<128x128xbf16>, vector<32x128xf32> -> vector<32x128xf32>
    %c0_47 = arith.constant 0 : index
    %c0_48 = arith.constant 0 : index
    %139 = vector.load %arg14[%c0_47, %c0_48] : memref<1x128xf32, #tpu.memory_space<vmem>>, vector<1x128xf32>
    %140 = vector.broadcast %139 : vector<1x128xf32> to vector<32x128xf32>
    %141 = arith.addf %138, %140 : vector<32x128xf32>
    %142 = arith.addf %87, %141 : vector<32x128xf32>
    %c0_49 = arith.constant 0 : index
    %c0_50 = arith.constant 0 : index
    %143 = vector.load %arg15[%c0_49, %c0_50] : memref<1x128xf32, #tpu.memory_space<vmem>>, vector<1x128xf32>
    %c0_51 = arith.constant 0 : index
    %c0_52 = arith.constant 0 : index
    %144 = vector.load %arg16[%c0_51, %c0_52] : memref<1x128xf32, #tpu.memory_space<vmem>>, vector<1x128xf32>
    %cst_53 = arith.constant dense<0.000000e+00> : vector<32xf32>
    %145 = vector.multi_reduction <add>, %142, %cst_53 [1] : vector<32x128xf32> to vector<32xf32>
    %146 = vector.shape_cast %145 : vector<32xf32> to vector<32x1xf32>
    %cst_54 = arith.constant 1.280000e+02 : f32
    %147 = vector.broadcast %cst_54 : f32 to vector<32x1xf32>
    %148 = arith.divf %146, %147 : vector<32x1xf32>
    %149 = vector.broadcast %148 : vector<32x1xf32> to vector<32x128xf32>
    %150 = arith.subf %142, %149 : vector<32x128xf32>
    %151 = vector.broadcast %148 : vector<32x1xf32> to vector<32x128xf32>
    %152 = arith.subf %142, %151 : vector<32x128xf32>
    %153 = arith.mulf %150, %152 : vector<32x128xf32>
    %cst_55 = arith.constant dense<0.000000e+00> : vector<32xf32>
    %154 = vector.multi_reduction <add>, %153, %cst_55 [1] : vector<32x128xf32> to vector<32xf32>
    %155 = vector.shape_cast %154 : vector<32xf32> to vector<32x1xf32>
    %cst_56 = arith.constant 1.280000e+02 : f32
    %156 = vector.broadcast %cst_56 : f32 to vector<32x1xf32>
    %157 = arith.divf %155, %156 : vector<32x1xf32>
    %158 = vector.broadcast %148 : vector<32x1xf32> to vector<32x128xf32>
    %159 = arith.subf %142, %158 : vector<32x128xf32>
    %cst_57 = arith.constant 9.99999974E-6 : f32
    %160 = vector.broadcast %cst_57 : f32 to vector<32x1xf32>
    %161 = arith.addf %157, %160 : vector<32x1xf32>
    %162 = math.rsqrt %161 : vector<32x1xf32>
    %163 = vector.broadcast %162 : vector<32x1xf32> to vector<32x128xf32>
    %164 = arith.mulf %159, %163 : vector<32x128xf32>
    %165 = vector.broadcast %143 : vector<1x128xf32> to vector<32x128xf32>
    %166 = arith.mulf %164, %165 : vector<32x128xf32>
    %167 = vector.broadcast %144 : vector<1x128xf32> to vector<32x128xf32>
    %168 = arith.addf %166, %167 : vector<32x128xf32>
    %c0_58 = arith.constant 0 : index
    %c0_59 = arith.constant 0 : index
    %169 = vector.load %arg17[%c0_58, %c0_59] : memref<128x256xbf16, #tpu.memory_space<vmem>>, vector<128x256xbf16>
    %170 = arith.truncf %168 : vector<32x128xf32> to vector<32x128xbf16>
    %cst_60 = arith.constant dense<0.000000e+00> : vector<32x256xf32>
    %171 = tpu.matmul %170, %169, %cst_60 {dimension_numbers = #tpu.dot_dimension_numbers<[1], [0], [0], [1], [0, 0, 1, 1], [], []>} : vector<32x128xbf16>, vector<128x256xbf16>, vector<32x256xf32> -> vector<32x256xf32>
    %c0_61 = arith.constant 0 : index
    %c0_62 = arith.constant 0 : index
    %172 = vector.load %arg18[%c0_61, %c0_62] : memref<1x256xf32, #tpu.memory_space<vmem>>, vector<1x256xf32>
    %173 = vector.broadcast %172 : vector<1x256xf32> to vector<32x256xf32>
    %174 = arith.addf %171, %173 : vector<32x256xf32>
    %cst_63 = arith.constant 0.000000e+00 : f32
    %175 = vector.broadcast %cst_63 : f32 to vector<32x256xf32>
    %176 = arith.maximumf %174, %175 : vector<32x256xf32>
    %c0_64 = arith.constant 0 : index
    %c0_65 = arith.constant 0 : index
    %177 = vector.load %arg19[%c0_64, %c0_65] : memref<256x128xbf16, #tpu.memory_space<vmem>>, vector<256x128xbf16>
    %178 = arith.truncf %176 : vector<32x256xf32> to vector<32x256xbf16>
    %cst_66 = arith.constant dense<0.000000e+00> : vector<32x128xf32>
    %179 = tpu.matmul %178, %177, %cst_66 {dimension_numbers = #tpu.dot_dimension_numbers<[1], [0], [0], [1], [0, 0, 1, 1], [], []>} : vector<32x256xbf16>, vector<256x128xbf16>, vector<32x128xf32> -> vector<32x128xf32>
    %c0_67 = arith.constant 0 : index
    %c0_68 = arith.constant 0 : index
    %180 = vector.load %arg20[%c0_67, %c0_68] : memref<1x128xf32, #tpu.memory_space<vmem>>, vector<1x128xf32>
    %181 = vector.broadcast %180 : vector<1x128xf32> to vector<32x128xf32>
    %182 = arith.addf %179, %181 : vector<32x128xf32>
    %183 = arith.addf %168, %182 : vector<32x128xf32>
    %c0_69 = arith.constant 0 : index
    %c0_70 = arith.constant 0 : index
    %184 = vector.load %arg21[%c0_69, %c0_70] : memref<1x128xf32, #tpu.memory_space<vmem>>, vector<1x128xf32>
    %c0_71 = arith.constant 0 : index
    %c0_72 = arith.constant 0 : index
    %185 = vector.load %arg22[%c0_71, %c0_72] : memref<1x128xf32, #tpu.memory_space<vmem>>, vector<1x128xf32>
    %cst_73 = arith.constant dense<0.000000e+00> : vector<32xf32>
    %186 = vector.multi_reduction <add>, %183, %cst_73 [1] : vector<32x128xf32> to vector<32xf32>
    %187 = vector.shape_cast %186 : vector<32xf32> to vector<32x1xf32>
    %cst_74 = arith.constant 1.280000e+02 : f32
    %188 = vector.broadcast %cst_74 : f32 to vector<32x1xf32>
    %189 = arith.divf %187, %188 : vector<32x1xf32>
    %190 = vector.broadcast %189 : vector<32x1xf32> to vector<32x128xf32>
    %191 = arith.subf %183, %190 : vector<32x128xf32>
    %192 = vector.broadcast %189 : vector<32x1xf32> to vector<32x128xf32>
    %193 = arith.subf %183, %192 : vector<32x128xf32>
    %194 = arith.mulf %191, %193 : vector<32x128xf32>
    %cst_75 = arith.constant dense<0.000000e+00> : vector<32xf32>
    %195 = vector.multi_reduction <add>, %194, %cst_75 [1] : vector<32x128xf32> to vector<32xf32>
    %196 = vector.shape_cast %195 : vector<32xf32> to vector<32x1xf32>
    %cst_76 = arith.constant 1.280000e+02 : f32
    %197 = vector.broadcast %cst_76 : f32 to vector<32x1xf32>
    %198 = arith.divf %196, %197 : vector<32x1xf32>
    %199 = vector.broadcast %189 : vector<32x1xf32> to vector<32x128xf32>
    %200 = arith.subf %183, %199 : vector<32x128xf32>
    %cst_77 = arith.constant 9.99999974E-6 : f32
    %201 = vector.broadcast %cst_77 : f32 to vector<32x1xf32>
    %202 = arith.addf %198, %201 : vector<32x1xf32>
    %203 = math.rsqrt %202 : vector<32x1xf32>
    %204 = vector.broadcast %203 : vector<32x1xf32> to vector<32x128xf32>
    %205 = arith.mulf %200, %204 : vector<32x128xf32>
    %206 = vector.broadcast %184 : vector<1x128xf32> to vector<32x128xf32>
    %207 = arith.mulf %205, %206 : vector<32x128xf32>
    %208 = vector.broadcast %185 : vector<1x128xf32> to vector<32x128xf32>
    %209 = arith.addf %207, %208 : vector<32x128xf32>
    %210 = vector.shape_cast %209 : vector<32x128xf32> to vector<2x16x128xf32>
    %c0_78 = arith.constant 0 : index
    %c0_79 = arith.constant 0 : index
    %c0_80 = arith.constant 0 : index
    %211 = vector.load %arg23[%c0_78, %c0_79, %c0_80] : memref<2x16x128xf32, #tpu.memory_space<vmem>>, vector<2x16x128xf32>
    tpu.vector_store %arg23[%c0_78, %c0_79, %c0_80], %210 {strides = array<i32>} : memref<2x16x128xf32, #tpu.memory_space<vmem>>, vector<2x16x128xf32>,
    return
  }
  func.func @transform_0(%arg0: i32) -> (i32, i32, i32) {
    %c0_i32 = arith.constant 0 : i32
    %c0_i32_0 = arith.constant 0 : i32
    %c0_i32_1 = arith.constant 0 : i32
    return %arg0, %c0_i32, %c0_i32_0 : i32, i32, i32
  }
  func.func @transform_1(%arg0: i32) -> (i32, i32, i32) {
    %c0_i32 = arith.constant 0 : i32
    %c0_i32_0 = arith.constant 0 : i32
    %c0_i32_1 = arith.constant 0 : i32
    return %arg0, %c0_i32, %c0_i32_0 : i32, i32, i32
  }
  func.func @transform_2(%arg0: i32) -> (i32, i32) {
    %c0_i32 = arith.constant 0 : i32
    %c0_i32_0 = arith.constant 0 : i32
    %c0_i32_1 = arith.constant 0 : i32
    return %c0_i32, %c0_i32_0 : i32, i32
  }
  func.func @transform_3(%arg0: i32) -> (i32, i32) {
    %c0_i32 = arith.constant 0 : i32
    %c0_i32_0 = arith.constant 0 : i32
    %c0_i32_1 = arith.constant 0 : i32
    return %c0_i32, %c0_i32_0 : i32, i32
  }
  func.func @transform_4(%arg0: i32) -> (i32, i32) {
    %c0_i32 = arith.constant 0 : i32
    %c0_i32_0 = arith.constant 0 : i32
    %c0_i32_1 = arith.constant 0 : i32
    return %c0_i32, %c0_i32_0 : i32, i32
  }
  func.func @transform_5(%arg0: i32) -> (i32, i32) {
    %c0_i32 = arith.constant 0 : i32
    %c0_i32_0 = arith.constant 0 : i32
    %c0_i32_1 = arith.constant 0 : i32
    return %c0_i32, %c0_i32_0 : i32, i32
  }
  func.func @transform_6(%arg0: i32) -> (i32, i32) {
    %c0_i32 = arith.constant 0 : i32
    %c0_i32_0 = arith.constant 0 : i32
    %c0_i32_1 = arith.constant 0 : i32
    return %c0_i32, %c0_i32_0 : i32, i32
  }
  func.func @transform_7(%arg0: i32) -> (i32, i32) {
    %c0_i32 = arith.constant 0 : i32
    %c0_i32_0 = arith.constant 0 : i32
    %c0_i32_1 = arith.constant 0 : i32
    return %c0_i32, %c0_i32_0 : i32, i32
  }
  func.func @transform_8(%arg0: i32) -> (i32, i32) {
    %c0_i32 = arith.constant 0 : i32
    %c0_i32_0 = arith.constant 0 : i32
    %c0_i32_1 = arith.constant 0 : i32
    return %c0_i32, %c0_i32_0 : i32, i32
  }
  func.func @transform_9(%arg0: i32) -> (i32, i32) {
    %c0_i32 = arith.constant 0 : i32
    %c0_i32_0 = arith.constant 0 : i32
    %c0_i32_1 = arith.constant 0 : i32
    return %c0_i32, %c0_i32_0 : i32, i32
  }
  func.func @transform_10(%arg0: i32) -> (i32, i32) {
    %c0_i32 = arith.constant 0 : i32
    %c0_i32_0 = arith.constant 0 : i32
    %c0_i32_1 = arith.constant 0 : i32
    return %c0_i32, %c0_i32_0 : i32, i32
  }
  func.func @transform_11(%arg0: i32) -> (i32, i32) {
    %c0_i32 = arith.constant 0 : i32
    %c0_i32_0 = arith.constant 0 : i32
    %c0_i32_1 = arith.constant 0 : i32
    return %c0_i32, %c0_i32_0 : i32, i32
  }
  func.func @transform_12(%arg0: i32) -> (i32, i32) {
    %c0_i32 = arith.constant 0 : i32
    %c0_i32_0 = arith.constant 0 : i32
    %c0_i32_1 = arith.constant 0 : i32
    return %c0_i32, %c0_i32_0 : i32, i32
  }
  func.func @transform_13(%arg0: i32) -> (i32, i32) {
    %c0_i32 = arith.constant 0 : i32
    %c0_i32_0 = arith.constant 0 : i32
    %c0_i32_1 = arith.constant 0 : i32
    return %c0_i32, %c0_i32_0 : i32, i32
  }
  func.func @transform_14(%arg0: i32) -> (i32, i32) {
    %c0_i32 = arith.constant 0 : i32
    %c0_i32_0 = arith.constant 0 : i32
    %c0_i32_1 = arith.constant 0 : i32
    return %c0_i32, %c0_i32_0 : i32, i32
  }
  func.func @transform_15(%arg0: i32) -> (i32, i32) {
    %c0_i32 = arith.constant 0 : i32
    %c0_i32_0 = arith.constant 0 : i32
    %c0_i32_1 = arith.constant 0 : i32
    return %c0_i32, %c0_i32_0 : i32, i32
  }
  func.func @transform_16(%arg0: i32) -> (i32, i32) {
    %c0_i32 = arith.constant 0 : i32
    %c0_i32_0 = arith.constant 0 : i32
    %c0_i32_1 = arith.constant 0 : i32
    return %c0_i32, %c0_i32_0 : i32, i32
  }
  func.func @transform_17(%arg0: i32) -> (i32, i32) {
    %c0_i32 = arith.constant 0 : i32
    %c0_i32_0 = arith.constant 0 : i32
    %c0_i32_1 = arith.constant 0 : i32
    return %c0_i32, %c0_i32_0 : i32, i32
  }
  func.func @transform_18(%arg0: i32) -> (i32, i32) {
    %c0_i32 = arith.constant 0 : i32
    %c0_i32_0 = arith.constant 0 : i32
    %c0_i32_1 = arith.constant 0 : i32
    return %c0_i32, %c0_i32_0 : i32, i32
  }
  func.func @transform_19(%arg0: i32) -> (i32, i32) {
    %c0_i32 = arith.constant 0 : i32
    %c0_i32_0 = arith.constant 0 : i32
    %c0_i32_1 = arith.constant 0 : i32
    return %c0_i32, %c0_i32_0 : i32, i32
  }
  func.func @transform_20(%arg0: i32) -> (i32, i32) {
    %c0_i32 = arith.constant 0 : i32
    %c0_i32_0 = arith.constant 0 : i32
    %c0_i32_1 = arith.constant 0 : i32
    return %c0_i32, %c0_i32_0 : i32, i32
  }
  func.func @transform_21(%arg0: i32) -> (i32, i32) {
    %c0_i32 = arith.constant 0 : i32
    %c0_i32_0 = arith.constant 0 : i32
    %c0_i32_1 = arith.constant 0 : i32
    return %c0_i32, %c0_i32_0 : i32, i32
  }
  func.func @transform_22(%arg0: i32) -> (i32, i32, i32) {
    %c0_i32 = arith.constant 0 : i32
    %c0_i32_0 = arith.constant 0 : i32
    %c0_i32_1 = arith.constant 0 : i32
    return %arg0, %c0_i32, %c0_i32_0 : i32, i32, i32
  }
}

module attributes {stable_mosaic.version = 11 : i64} {
  func.func @_decoder_layer_kernel(%arg0: i32, %arg1: memref<2x16x128xf32, #tpu.memory_space<vmem>>, %arg2: memref<2x16x128xf32, #tpu.memory_space<vmem>>, %arg3: memref<128x384xbf16, #tpu.memory_space<vmem>>, %arg4: memref<1x384xf32, #tpu.memory_space<vmem>>, %arg5: memref<128x128xbf16, #tpu.memory_space<vmem>>, %arg6: memref<1x128xf32, #tpu.memory_space<vmem>>, %arg7: memref<1x128xf32, #tpu.memory_space<vmem>>, %arg8: memref<1x128xf32, #tpu.memory_space<vmem>>, %arg9: memref<128x128xbf16, #tpu.memory_space<vmem>>, %arg10: memref<1x128xf32, #tpu.memory_space<vmem>>, %arg11: memref<128x256xbf16, #tpu.memory_space<vmem>>, %arg12: memref<1x256xf32, #tpu.memory_space<vmem>>, %arg13: memref<128x128xbf16, #tpu.memory_space<vmem>>, %arg14: memref<1x128xf32, #tpu.memory_space<vmem>>, %arg15: memref<1x128xf32, #tpu.memory_space<vmem>>, %arg16: memref<1x128xf32, #tpu.memory_space<vmem>>, %arg17: memref<128x256xbf16, #tpu.memory_space<vmem>>, %arg18: memref<1x256xf32, #tpu.memory_space<vmem>>, %arg19: memref<256x128xbf16, #tpu.memory_space<vmem>>, %arg20: memref<1x128xf32, #tpu.memory_space<vmem>>, %arg21: memref<1x128xf32, #tpu.memory_space<vmem>>, %arg22: memref<1x128xf32, #tpu.memory_space<vmem>>, %arg23: memref<2x16x128xf32, #tpu.memory_space<vmem>>) attributes {dimension_semantics = [#tpu.dimension_semantics<parallel>], iteration_bounds = array<i64: 1>, scalar_prefetch = 0 : i64, scratch_operands = 0 : i64, tpu.core_type = #tpu.core_type<tc>, window_params = [{transform_indices = @transform_0, window_bounds = array<i64: 2, 16, 128>}, {transform_indices = @transform_1, window_bounds = array<i64: 2, 16, 128>}, {pipeline_mode = #tpu.pipeline_mode<synchronous>, transform_indices = @transform_2, window_bounds = array<i64: 128, 384>}, {pipeline_mode = #tpu.pipeline_mode<synchronous>, transform_indices = @transform_3, window_bounds = array<i64: 1, 384>}, {pipeline_mode = #tpu.pipeline_mode<synchronous>, transform_indices = @transform_4, window_bounds = array<i64: 128, 128>}, {pipeline_mode = #tpu.pipeline_mode<synchronous>, transform_indices = @transform_5, window_bounds = array<i64: 1, 128>}, {pipeline_mode = #tpu.pipeline_mode<synchronous>, transform_indices = @transform_6, window_bounds = array<i64: 1, 128>}, {pipeline_mode = #tpu.pipeline_mode<synchronous>, transform_indices = @transform_7, window_bounds = array<i64: 1, 128>}, {pipeline_mode = #tpu.pipeline_mode<synchronous>, transform_indices = @transform_8, window_bounds = array<i64: 128, 128>}, {pipeline_mode = #tpu.pipeline_mode<synchronous>, transform_indices = @transform_9, window_bounds = array<i64: 1, 128>}, {pipeline_mode = #tpu.pipeline_mode<synchronous>, transform_indices = @transform_10, window_bounds = array<i64: 128, 256>}, {pipeline_mode = #tpu.pipeline_mode<synchronous>, transform_indices = @transform_11, window_bounds = array<i64: 1, 256>}, {pipeline_mode = #tpu.pipeline_mode<synchronous>, transform_indices = @transform_12, window_bounds = array<i64: 128, 128>}, {pipeline_mode = #tpu.pipeline_mode<synchronous>, transform_indices = @transform_13, window_bounds = array<i64: 1, 128>}, {pipeline_mode = #tpu.pipeline_mode<synchronous>, transform_indices = @transform_14, window_bounds = array<i64: 1, 128>}, {pipeline_mode = #tpu.pipeline_mode<synchronous>, transform_indices = @transform_15, window_bounds = array<i64: 1, 128>}, {pipeline_mode = #tpu.pipeline_mode<synchronous>, transform_indices = @transform_16, window_bounds = array<i64: 128, 256>}, {pipeline_mode = #tpu.pipeline_mode<synchronous>, transform_indices = @transform_17, window_bounds = array<i64: 1, 256>}, {pipeline_mode = #tpu.pipeline_mode<synchronous>, transform_indices = @transform_18, window_bounds = array<i64: 256, 128>}, {pipeline_mode = #tpu.pipeline_mode<synchronous>, transform_indices = @transform_19, window_bounds = array<i64: 1, 128>}, {pipeline_mode = #tpu.pipeline_mode<synchronous>, transform_indices = @transform_20, window_bounds = array<i64: 1, 128>}, {pipeline_mode = #tpu.pipeline_mode<synchronous>, transform_indices = @transform_21, window_bounds = array<i64: 1, 128>}, {transform_indices = @transform_22, window_bounds = array<i64: 2, 16, 128>}]} {
    %c0 = arith.constant 0 : index
    %c0_0 = arith.constant 0 : index
    %c0_1 = arith.constant 0 : index
    %0 = vector.load %arg1[%c0, %c0_0, %c0_1] : memref<2x16x128xf32, #tpu.memory_space<vmem>>, vector<2x16x128xf32>
    %1 = vector.shape_cast %0 : vector<2x16x128xf32> to vector<32x128xf32>
    %c0_2 = arith.constant 0 : index
    %c0_3 = arith.constant 0 : index
    %c0_4 = arith.constant 0 : index
    %2 = vector.load %arg2[%c0_2, %c0_3, %c0_4] : memref<2x16x128xf32, #tpu.memory_space<vmem>>, vector<2x16x128xf32>
    %3 = vector.shape_cast %2 : vector<2x16x128xf32> to vector<32x128xf32>
    %c0_5 = arith.constant 0 : index
    %c0_6 = arith.constant 0 : index
    %4 = vector.load %arg3[%c0_5, %c0_6] : memref<128x384xbf16, #tpu.memory_space<vmem>>, vector<128x384xbf16>
    %5 = arith.truncf %1 : vector<32x128xf32> to vector<32x128xbf16>
    %cst = arith.constant dense<0.000000e+00> : vector<32x384xf32>
    %6 = tpu.matmul %5, %4, %cst {dimension_numbers = #tpu.dot_dimension_numbers<[1], [0], [0], [1], [0, 0, 1, 1], [], []>} : vector<32x128xbf16>, vector<128x384xbf16>, vector<32x384xf32> -> vector<32x384xf32>
    %c0_7 = arith.constant 0 : index
    %c0_8 = arith.constant 0 : index
    %7 = vector.load %arg4[%c0_7, %c0_8] : memref<1x384xf32, #tpu.memory_space<vmem>>, vector<1x384xf32>
    %8 = vector.broadcast %7 : vector<1x384xf32> to vector<32x384xf32>
    %9 = arith.addf %6, %8 : vector<32x384xf32>
    %10 = vector.extract_strided_slice %9 {offsets = [0, 0], sizes = [32, 128], strides = [1, 1]} : vector<32x384xf32> to vector<32x128xf32>
    %11 = vector.extract_strided_slice %9 {offsets = [0, 128], sizes = [32, 128], strides = [1, 1]} : vector<32x384xf32> to vector<32x128xf32>
    %12 = vector.extract_strided_slice %9 {offsets = [0, 256], sizes = [32, 128], strides = [1, 1]} : vector<32x384xf32> to vector<32x128xf32>
    %13 = vector.shape_cast %10 : vector<32x128xf32> to vector<2x16x128xf32>
    %14 = vector.shape_cast %11 : vector<32x128xf32> to vector<2x16x128xf32>
    %15 = vector.shape_cast %12 : vector<32x128xf32> to vector<2x16x128xf32>
    %16 = vector.shape_cast %13 : vector<2x16x128xf32> to vector<2x16x4x32xf32>
    %17 = tpu.transpose %16, [0, 2, 1, 3] : vector<2x16x4x32xf32> -> vector<2x4x16x32xf32>
    %18 = vector.shape_cast %17 : vector<2x4x16x32xf32> to vector<8x16x32xf32>
    %19 = arith.truncf %18 : vector<8x16x32xf32> to vector<8x16x32xbf16>
    %20 = vector.shape_cast %14 : vector<2x16x128xf32> to vector<2x16x4x32xf32>
    %21 = tpu.transpose %20, [0, 2, 1, 3] : vector<2x16x4x32xf32> -> vector<2x4x16x32xf32>
    %22 = vector.shape_cast %21 : vector<2x4x16x32xf32> to vector<8x16x32xf32>
    %23 = arith.truncf %22 : vector<8x16x32xf32> to vector<8x16x32xbf16>
    %24 = vector.shape_cast %15 : vector<2x16x128xf32> to vector<2x16x4x32xf32>
    %25 = tpu.transpose %24, [0, 2, 1, 3] : vector<2x16x4x32xf32> -> vector<2x4x16x32xf32>
    %26 = vector.shape_cast %25 : vector<2x4x16x32xf32> to vector<8x16x32xf32>
    %27 = arith.truncf %26 : vector<8x16x32xf32> to vector<8x16x32xbf16>
    "tpu.trace_start"() <{level = 10 : i32, message = "bqd,bkd->bqk"}> : () -> ()
    %cst_9 = arith.constant dense<0.000000e+00> : vector<8x16x16xf32>
    %28 = tpu.matmul %19, %23, %cst_9 {dimension_numbers = #tpu.dot_dimension_numbers<[2], [2], [1], [1], [0, 0, 0, 1, 1, 1], [0], [0]>} : vector<8x16x32xbf16>, vector<8x16x32xbf16>, vector<8x16x16xf32> -> vector<8x16x16xf32>
    "tpu.trace_stop"() : () -> ()
    %cst_10 = arith.constant 0.176776692 : f32
    %29 = vector.broadcast %cst_10 : f32 to vector<8x16x16xf32>
    %30 = arith.mulf %28, %29 : vector<8x16x16xf32>
    %31 = tpu.iota {dimensions = array<i32: 0>} : vector<16x16xi32>
    %32 = tpu.iota {dimensions = array<i32: 1>} : vector<16x16xi32>
    %33 = arith.cmpi sle, %32, %31 : vector<16x16xi32>
    %34 = vector.shape_cast %33 : vector<16x16xi1> to vector<1x16x16xi1>
    %cst_11 = arith.constant -1.000000e+30 : f32
    %35 = vector.shape_cast %34 : vector<1x16x16xi1> to vector<1x16x16xi1>
    %36 = vector.broadcast %35 : vector<1x16x16xi1> to vector<8x16x16xi1>
    %37 = vector.broadcast %cst_11 : f32 to vector<8x16x16xf32>
    %38 = arith.select %36, %30, %37 : vector<8x16x16xi1>, vector<8x16x16xf32>
    %cst_12 = arith.constant dense<0xFF800000> : vector<8x16xf32>
    %39 = vector.multi_reduction <maximumf>, %38, %cst_12 [2] : vector<8x16x16xf32> to vector<8x16xf32>
    %40 = vector.shape_cast %39 : vector<8x16xf32> to vector<8x16x1xf32>
    %41 = vector.broadcast %40 : vector<8x16x1xf32> to vector<8x16x16xf32>
    %42 = arith.subf %38, %41 : vector<8x16x16xf32>
    %43 = math.exp %42 : vector<8x16x16xf32>
    %cst_13 = arith.constant dense<0.000000e+00> : vector<8x16xf32>
    %44 = vector.multi_reduction <add>, %43, %cst_13 [2] : vector<8x16x16xf32> to vector<8x16xf32>
    %45 = vector.shape_cast %44 : vector<8x16xf32> to vector<8x16x1xf32>
    %46 = tpu.reciprocal %45 {approx = true} : vector<8x16x1xf32> -> vector<8x16x1xf32>
    %47 = vector.broadcast %46 : vector<8x16x1xf32> to vector<8x16x16xf32>
    %48 = arith.mulf %43, %47 : vector<8x16x16xf32>
    %49 = arith.truncf %48 : vector<8x16x16xf32> to vector<8x16x16xbf16>
    "tpu.trace_start"() <{level = 10 : i32, message = "bqk,bkd->bqd"}> : () -> ()
    %cst_14 = arith.constant dense<0.000000e+00> : vector<8x16x32xf32>
    %50 = tpu.matmul %49, %27, %cst_14 {dimension_numbers = #tpu.dot_dimension_numbers<[2], [1], [1], [2], [0, 0, 0, 1, 1, 2], [0], [0]>} : vector<8x16x16xbf16>, vector<8x16x32xbf16>, vector<8x16x32xf32> -> vector<8x16x32xf32>
    "tpu.trace_stop"() : () -> ()
    %51 = vector.shape_cast %50 : vector<8x16x32xf32> to vector<2x4x16x32xf32>
    %52 = tpu.transpose %51, [0, 2, 1, 3] : vector<2x4x16x32xf32> -> vector<2x16x4x32xf32>
    %53 = vector.shape_cast %52 : vector<2x16x4x32xf32> to vector<2x16x128xf32>
    %54 = vector.shape_cast %53 : vector<2x16x128xf32> to vector<32x128xf32>
    %c0_15 = arith.constant 0 : index
    %c0_16 = arith.constant 0 : index
    %55 = vector.load %arg5[%c0_15, %c0_16] : memref<128x128xbf16, #tpu.memory_space<vmem>>, vector<128x128xbf16>
    %56 = arith.truncf %54 : vector<32x128xf32> to vector<32x128xbf16>
    %cst_17 = arith.constant dense<0.000000e+00> : vector<32x128xf32>
    %57 = tpu.matmul %56, %55, %cst_17 {dimension_numbers = #tpu.dot_dimension_numbers<[1], [0], [0], [1], [0, 0, 1, 1], [], []>} : vector<32x128xbf16>, vector<128x128xbf16>, vector<32x128xf32> -> vector<32x128xf32>
    %c0_18 = arith.constant 0 : index
    %c0_19 = arith.constant 0 : index
    %58 = vector.load %arg6[%c0_18, %c0_19] : memref<1x128xf32, #tpu.memory_space<vmem>>, vector<1x128xf32>
    %59 = vector.broadcast %58 : vector<1x128xf32> to vector<32x128xf32>
    %60 = arith.addf %57, %59 : vector<32x128xf32>
    %61 = arith.addf %1, %60 : vector<32x128xf32>
    %c0_20 = arith.constant 0 : index
    %c0_21 = arith.constant 0 : index
    %62 = vector.load %arg7[%c0_20, %c0_21] : memref<1x128xf32, #tpu.memory_space<vmem>>, vector<1x128xf32>
    %c0_22 = arith.constant 0 : index
    %c0_23 = arith.constant 0 : index
    %63 = vector.load %arg8[%c0_22, %c0_23] : memref<1x128xf32, #tpu.memory_space<vmem>>, vector<1x128xf32>
    %cst_24 = arith.constant dense<0.000000e+00> : vector<32xf32>
    %64 = vector.multi_reduction <add>, %61, %cst_24 [1] : vector<32x128xf32> to vector<32xf32>
    %65 = vector.shape_cast %64 : vector<32xf32> to vector<32x1xf32>
    %cst_25 = arith.constant 1.280000e+02 : f32
    %66 = vector.broadcast %cst_25 : f32 to vector<32x1xf32>
    %67 = arith.divf %65, %66 : vector<32x1xf32>
    %68 = vector.broadcast %67 : vector<32x1xf32> to vector<32x128xf32>
    %69 = arith.subf %61, %68 : vector<32x128xf32>
    %70 = vector.broadcast %67 : vector<32x1xf32> to vector<32x128xf32>
    %71 = arith.subf %61, %70 : vector<32x128xf32>
    %72 = arith.mulf %69, %71 : vector<32x128xf32>
    %cst_26 = arith.constant dense<0.000000e+00> : vector<32xf32>
    %73 = vector.multi_reduction <add>, %72, %cst_26 [1] : vector<32x128xf32> to vector<32xf32>
    %74 = vector.shape_cast %73 : vector<32xf32> to vector<32x1xf32>
    %cst_27 = arith.constant 1.280000e+02 : f32
    %75 = vector.broadcast %cst_27 : f32 to vector<32x1xf32>
    %76 = arith.divf %74, %75 : vector<32x1xf32>
    %77 = vector.broadcast %67 : vector<32x1xf32> to vector<32x128xf32>
    %78 = arith.subf %61, %77 : vector<32x128xf32>
    %cst_28 = arith.constant 9.99999974E-6 : f32
    %79 = vector.broadcast %cst_28 : f32 to vector<32x1xf32>
    %80 = arith.addf %76, %79 : vector<32x1xf32>
    %81 = math.rsqrt %80 : vector<32x1xf32>
    %82 = vector.broadcast %81 : vector<32x1xf32> to vector<32x128xf32>
    %83 = arith.mulf %78, %82 : vector<32x128xf32>
    %84 = vector.broadcast %62 : vector<1x128xf32> to vector<32x128xf32>
    %85 = arith.mulf %83, %84 : vector<32x128xf32>
    %86 = vector.broadcast %63 : vector<1x128xf32> to vector<32x128xf32>
    %87 = arith.addf %85, %86 : vector<32x128xf32>
    %c0_29 = arith.constant 0 : index
    %c0_30 = arith.constant 0 : index
    %88 = vector.load %arg9[%c0_29, %c0_30] : memref<128x128xbf16, #tpu.memory_space<vmem>>, vector<128x128xbf16>
    %89 = arith.truncf %87 : vector<32x128xf32> to vector<32x128xbf16>
    %cst_31 = arith.constant dense<0.000000e+00> : vector<32x128xf32>
    %90 = tpu.matmul %89, %88, %cst_31 {dimension_numbers = #tpu.dot_dimension_numbers<[1], [0], [0], [1], [0, 0, 1, 1], [], []>} : vector<32x128xbf16>, vector<128x128xbf16>, vector<32x128xf32> -> vector<32x128xf32>
    %c0_32 = arith.constant 0 : index
    %c0_33 = arith.constant 0 : index
    %91 = vector.load %arg10[%c0_32, %c0_33] : memref<1x128xf32, #tpu.memory_space<vmem>>, vector<1x128xf32>
    %92 = vector.broadcast %91 : vector<1x128xf32> to vector<32x128xf32>
    %93 = arith.addf %90, %92 : vector<32x128xf32>
    %c0_34 = arith.constant 0 : index
    %c0_35 = arith.constant 0 : index
    %94 = vector.load %arg11[%c0_34, %c0_35] : memref<128x256xbf16, #tpu.memory_space<vmem>>, vector<128x256xbf16>
    %95 = arith.truncf %3 : vector<32x128xf32> to vector<32x128xbf16>
    %cst_36 = arith.constant dense<0.000000e+00> : vector<32x256xf32>
    %96 = tpu.matmul %95, %94, %cst_36 {dimension_numbers = #tpu.dot_dimension_numbers<[1], [0], [0], [1], [0, 0, 1, 1], [], []>} : vector<32x128xbf16>, vector<128x256xbf16>, vector<32x256xf32> -> vector<32x256xf32>
    %c0_37 = arith.constant 0 : index
    %c0_38 = arith.constant 0 : index
    %97 = vector.load %arg12[%c0_37, %c0_38] : memref<1x256xf32, #tpu.memory_space<vmem>>, vector<1x256xf32>
    %98 = vector.broadcast %97 : vector<1x256xf32> to vector<32x256xf32>
    %99 = arith.addf %96, %98 : vector<32x256xf32>
    %100 = vector.extract_strided_slice %99 {offsets = [0, 0], sizes = [32, 128], strides = [1, 1]} : vector<32x256xf32> to vector<32x128xf32>
    %101 = vector.extract_strided_slice %99 {offsets = [0, 128], sizes = [32, 128], strides = [1, 1]} : vector<32x256xf32> to vector<32x128xf32>
    %102 = vector.shape_cast %93 : vector<32x128xf32> to vector<2x16x128xf32>
    %103 = vector.shape_cast %100 : vector<32x128xf32> to vector<2x16x128xf32>
    %104 = vector.shape_cast %101 : vector<32x128xf32> to vector<2x16x128xf32>
    %105 = vector.shape_cast %102 : vector<2x16x128xf32> to vector<2x16x4x32xf32>
    %106 = tpu.transpose %105, [0, 2, 1, 3] : vector<2x16x4x32xf32> -> vector<2x4x16x32xf32>
    %107 = vector.shape_cast %106 : vector<2x4x16x32xf32> to vector<8x16x32xf32>
    %108 = arith.truncf %107 : vector<8x16x32xf32> to vector<8x16x32xbf16>
    %109 = vector.shape_cast %103 : vector<2x16x128xf32> to vector<2x16x4x32xf32>
    %110 = tpu.transpose %109, [0, 2, 1, 3] : vector<2x16x4x32xf32> -> vector<2x4x16x32xf32>
    %111 = vector.shape_cast %110 : vector<2x4x16x32xf32> to vector<8x16x32xf32>
    %112 = arith.truncf %111 : vector<8x16x32xf32> to vector<8x16x32xbf16>
    %113 = vector.shape_cast %104 : vector<2x16x128xf32> to vector<2x16x4x32xf32>
    %114 = tpu.transpose %113, [0, 2, 1, 3] : vector<2x16x4x32xf32> -> vector<2x4x16x32xf32>
    %115 = vector.shape_cast %114 : vector<2x4x16x32xf32> to vector<8x16x32xf32>
    %116 = arith.truncf %115 : vector<8x16x32xf32> to vector<8x16x32xbf16>
    "tpu.trace_start"() <{level = 10 : i32, message = "bqd,bkd->bqk"}> : () -> ()
    %cst_39 = arith.constant dense<0.000000e+00> : vector<8x16x16xf32>
    %117 = tpu.matmul %108, %112, %cst_39 {dimension_numbers = #tpu.dot_dimension_numbers<[2], [2], [1], [1], [0, 0, 0, 1, 1, 1], [0], [0]>} : vector<8x16x32xbf16>, vector<8x16x32xbf16>, vector<8x16x16xf32> -> vector<8x16x16xf32>
    "tpu.trace_stop"() : () -> ()
    %cst_40 = arith.constant 0.176776692 : f32
    %118 = vector.broadcast %cst_40 : f32 to vector<8x16x16xf32>
    %119 = arith.mulf %117, %118 : vector<8x16x16xf32>
    %cst_41 = arith.constant dense<0xFF800000> : vector<8x16xf32>
    %120 = vector.multi_reduction <maximumf>, %119, %cst_41 [2] : vector<8x16x16xf32> to vector<8x16xf32>
    %121 = vector.shape_cast %120 : vector<8x16xf32> to vector<8x16x1xf32>
    %122 = vector.broadcast %121 : vector<8x16x1xf32> to vector<8x16x16xf32>
    %123 = arith.subf %119, %122 : vector<8x16x16xf32>
    %124 = math.exp %123 : vector<8x16x16xf32>
    %cst_42 = arith.constant dense<0.000000e+00> : vector<8x16xf32>
    %125 = vector.multi_reduction <add>, %124, %cst_42 [2] : vector<8x16x16xf32> to vector<8x16xf32>
    %126 = vector.shape_cast %125 : vector<8x16xf32> to vector<8x16x1xf32>
    %127 = tpu.reciprocal %126 {approx = true} : vector<8x16x1xf32> -> vector<8x16x1xf32>
    %128 = vector.broadcast %127 : vector<8x16x1xf32> to vector<8x16x16xf32>
    %129 = arith.mulf %124, %128 : vector<8x16x16xf32>
    %130 = arith.truncf %129 : vector<8x16x16xf32> to vector<8x16x16xbf16>
    "tpu.trace_start"() <{level = 10 : i32, message = "bqk,bkd->bqd"}> : () -> ()
    %cst_43 = arith.constant dense<0.000000e+00> : vector<8x16x32xf32>
    %131 = tpu.matmul %130, %116, %cst_43 {dimension_numbers = #tpu.dot_dimension_numbers<[2], [1], [1], [2], [0, 0, 0, 1, 1, 2], [0], [0]>} : vector<8x16x16xbf16>, vector<8x16x32xbf16>, vector<8x16x32xf32> -> vector<8x16x32xf32>
    "tpu.trace_stop"() : () -> ()
    %132 = vector.shape_cast %131 : vector<8x16x32xf32> to vector<2x4x16x32xf32>
    %133 = tpu.transpose %132, [0, 2, 1, 3] : vector<2x4x16x32xf32> -> vector<2x16x4x32xf32>
    %134 = vector.shape_cast %133 : vector<2x16x4x32xf32> to vector<2x16x128xf32>
    %135 = vector.shape_cast %134 : vector<2x16x128xf32> to vector<32x128xf32>
    %c0_44 = arith.constant 0 : index
    %c0_45 = arith.constant 0 : index
    %136 = vector.load %arg13[%c0_44, %c0_45] : memref<128x128xbf16, #tpu.memory_space<vmem>>, vector<128x128xbf16>
    %137 = arith.truncf %135 : vector<32x128xf32> to vector<32x128xbf16>
    %cst_46 = arith.constant dense<0.000000e+00> : vector<32x128xf32>
    %138 = tpu.matmul %137, %136, %cst_46 {dimension_numbers = #tpu.dot_dimension_numbers<[1], [0], [0], [1], [0, 0, 1, 1], [], []>} : vector<32x128xbf16>, vector<128x128xbf16>, vector<32x128xf32> -> vector<32x128xf32>
    %c0_47 = arith.constant 0 : index
    %c0_48 = arith.constant 0 : index
    %139 = vector.load %arg14[%c0_47, %c0_48] : memref<1x128xf32, #tpu.memory_space<vmem>>, vector<1x128xf32>
    %140 = vector.broadcast %139 : vector<1x128xf32> to vector<32x128xf32>
    %141 = arith.addf %138, %140 : vector<32x128xf32>
    %142 = arith.addf %87, %141 : vector<32x128xf32>
    %c0_49 = arith.constant 0 : index
    %c0_50 = arith.constant 0 : index
    %143 = vector.load %arg15[%c0_49, %c0_50] : memref<1x128xf32, #tpu.memory_space<vmem>>, vector<1x128xf32>
    %c0_51 = arith.constant 0 : index
    %c0_52 = arith.constant 0 : index
    %144 = vector.load %arg16[%c0_51, %c0_52] : memref<1x128xf32, #tpu.memory_space<vmem>>, vector<1x128xf32>
    %cst_53 = arith.constant dense<0.000000e+00> : vector<32xf32>
    %145 = vector.multi_reduction <add>, %142, %cst_53 [1] : vector<32x128xf32> to vector<32xf32>
    %146 = vector.shape_cast %145 : vector<32xf32> to vector<32x1xf32>
    %cst_54 = arith.constant 1.280000e+02 : f32
    %147 = vector.broadcast %cst_54 : f32 to vector<32x1xf32>
    %148 = arith.divf %146, %147 : vector<32x1xf32>
    %149 = vector.broadcast %148 : vector<32x1xf32> to vector<32x128xf32>
    %150 = arith.subf %142, %149 : vector<32x128xf32>
    %151 = vector.broadcast %148 : vector<32x1xf32> to vector<32x128xf32>
    %152 = arith.subf %142, %151 : vector<32x128xf32>
    %153 = arith.mulf %150, %152 : vector<32x128xf32>
    %cst_55 = arith.constant dense<0.000000e+00> : vector<32xf32>
    %154 = vector.multi_reduction <add>, %153, %cst_55 [1] : vector<32x128xf32> to vector<32xf32>
    %155 = vector.shape_cast %154 : vector<32xf32> to vector<32x1xf32>
    %cst_56 = arith.constant 1.280000e+02 : f32
    %156 = vector.broadcast %cst_56 : f32 to vector<32x1xf32>
    %157 = arith.divf %155, %156 : vector<32x1xf32>
    %158 = vector.broadcast %148 : vector<32x1xf32> to vector<32x128xf32>
    %159 = arith.subf %142, %158 : vector<32x128xf32>
    %cst_57 = arith.constant 9.99999974E-6 : f32
    %160 = vector.broadcast %cst_57 : f32 to vector<32x1xf32>
    %161 = arith.addf %157, %160 : vector<32x1xf32>
    %162 = math.rsqrt %161 : vector<32x1xf32>
    %163 = vector.broadcast %162 : vector<32x1xf32> to vector<32x128xf32>
    %164 = arith.mulf %159, %163 : vector<32x128xf32>
    %165 = vector.broadcast %143 : vector<1x128xf32> to vector<32x128xf32>
    %166 = arith.mulf %164, %165 : vector<32x128xf32>
    %167 = vector.broadcast %144 : vector<1x128xf32> to vector<32x128xf32>
    %168 = arith.addf %166, %167 : vector<32x128xf32>
    %c0_58 = arith.constant 0 : index
    %c0_59 = arith.constant 0 : index
    %169 = vector.load %arg17[%c0_58, %c0_59] : memref<128x256xbf16, #tpu.memory_space<vmem>>, vector<128x256xbf16>
    %170 = arith.truncf %168 : vector<32x128xf32> to vector<32x128xbf16>
    %cst_60 = arith.constant dense<0.000000e+00> : vector<32x256xf32>
    %171 = tpu.matmul %170, %169, %cst_60 {dimension_numbers = #tpu.dot_dimension_numbers<[1], [0], [0], [1], [0, 0, 1, 1], [], []>} : vector<32x128xbf16>, vector<128x256xbf16>, vector<32x256xf32> -> vector<32x256xf32>
    %c0_61 = arith.constant 0 : index
    %c0_62 = arith.constant 0 : index
    %172 = vector.load %arg18[%c0_61, %c0_62] : memref<1x256xf32, #tpu.memory_space<vmem>>, vector<1x256xf32>
    %173 = vector.broadcast %172 : vector<1x256xf32> to vector<32x256xf32>
    %174 = arith.addf %171, %173 : vector<32x256xf32>
    %cst_63 = arith.constant 0.000000e+00 : f32
    %175 = vector.broadcast %cst_63 : f32 to vector<32x256xf32>
    %176 = arith.maximumf %174, %175 : vector<32x256xf32>
    %c0_64 = arith.constant 0 : index
    %c0_65 = arith.constant 0 : index
    %177 = vector.load %arg19[%c0_64, %c0_65] : memref<256x128xbf16, #tpu.memory_space<vmem>>, vector<256x128xbf16>
    %178 = arith.truncf %176 : vector<32x256xf32> to vector<32x256xbf16>
    %cst_66 = arith.constant dense<0.000000e+00> : vector<32x128xf32>
    %179 = tpu.matmul %178, %177, %cst_66 {dimension_numbers = #tpu.dot_dimension_numbers<[1], [0], [0], [1], [0, 0, 1, 1], [], []>} : vector<32x256xbf16>, vector<256x128xbf16>, vector<32x128xf32> -> vector<32x128xf32>
    %c0_67 = arith.constant 0 : index
    %c0_68 = arith.constant 0 : index
    %180 = vector.load %arg20[%c0_67, %c0_68] : memref<1x128xf32, #tpu.memory_space<vmem>>, vector<1x128xf32>
    %181 = vector.broadcast %180 : vector<1x128xf32> to vector<32x128xf32>
    %182 = arith.addf %179, %181 : vector<32x128xf32>
    %183 = arith.addf %168, %182 : vector<32x128xf32>
    %c0_69 = arith.constant 0 : index
    %c0_70 = arith.constant 0 : index
    %184 = vector.load %arg21[%c0_69, %c0_70] : memref<1x128xf32, #tpu.memory_space<vmem>>, vector<1x128xf32>
    %c0_71 = arith.constant 0 : index
    %c0_72 = arith.constant 0 : index
    %185 = vector.load %arg22[%c0_71, %c0_72] : memref<1x128xf32, #tpu.memory_space<vmem>>, vector<1x128xf32>
    %cst_73 = arith.constant dense<0.000000e+00> : vector<32xf32>
    %186 = vector.multi_reduction <add>, %183, %cst_73 [1] : vector<32x128xf32> to vector<32xf32>
    %187 = vector.shape_cast %186 : vector<32xf32> to vector<32x1xf32>
    %cst_74 = arith.constant 1.280000e+02 : f32
    %188 = vector.broadcast %cst_74 : f32 to vector<32x1xf32>
    %189 = arith.divf %187, %188 : vector<32x1xf32>
    %190 = vector.broadcast %189 : vector<32x1xf32> to vector<32x128xf32>
    %191 = arith.subf %183, %190 : vector<32x128xf32>
    %192 = vector.broadcast %189 : vector<32x1xf32> to vector<32x128xf32>
    %193 = arith.subf %183, %192 : vector<32x128xf32>
    %194 = arith.mulf %191, %193 : vector<32x128xf32>
    %cst_75 = arith.constant dense<0.000000e+00> : vector<32xf32>
    %195 = vector.multi_reduction <add>, %194, %cst_75 [1] : vector<32x128xf32> to vector<32xf32>
    %196 = vector.shape_cast %195 : vector<32xf32> to vector<32x1xf32>
    %cst_76 = arith.constant 1.280000e+02 : f32
    %197 = vector.broadcast %cst_76 : f32 to vector<32x1xf32>
    %198 = arith.divf %196, %197 : vector<32x1xf32>
    %199 = vector.broadcast %189 : vector<32x1xf32> to vector<32x128xf32>
    %200 = arith.subf %183, %199 : vector<32x128xf32>
    %cst_77 = arith.constant 9.99999974E-6 : f32
    %201 = vector.broadcast %cst_77 : f32 to vector<32x1xf32>
    %202 = arith.addf %198, %201 : vector<32x1xf32>
    %203 = math.rsqrt %202 : vector<32x1xf32>
    %204 = vector.broadcast %203 : vector<32x1xf32> to vector<32x128xf32>
    %205 = arith.mulf %200, %204 : vector<32x128xf32>
    %206 = vector.broadcast %184 : vector<1x128xf32> to vector<32x128xf32>
    %207 = arith.mulf %205, %206 : vector<32x128xf32>
    %208 = vector.broadcast %185 : vector<1x128xf32> to vector<32x128xf32>
    %209 = arith.addf %207, %208 : vector<32x128xf32>
    %210 = vector.shape_cast %209 : vector<32x128xf32> to vector<2x16x128xf32>
    %c0_78 = arith.constant 0 : index
    %c0_79 = arith.constant 0 : index
    %c0_80 = arith.constant 0 : index
    %211 = vector.load %arg23[%c0_78, %c0_79, %c0_80] : memref<2x16x128xf32, #tpu.memory_space<vmem>>, vector<2x16x128xf32>
    tpu.vector_store %arg23[%c0_78, %c0_79, %c0_80], %210 {strides = array<i32>} : memref<2x16x128xf32, #tpu.memory_space<vmem>>, vector<2x16x128xf32>,
    return
  }
  func.func @transform_0(%arg0: i32) -> (i32, i32, i32) {
    %c0_i32 = arith.constant 0 : i32
    %c0_i32_0 = arith.constant 0 : i32
    %c0_i32_1 = arith.constant 0 : i32
    return %arg0, %c0_i32, %c0_i32_0 : i32, i32, i32
  }
  func.func @transform_1(%arg0: i32) -> (i32, i32, i32) {
    %c0_i32 = arith.constant 0 : i32
    %c0_i32_0 = arith.constant 0 : i32
    %c0_i32_1 = arith.constant 0 : i32
    return %arg0, %c0_i32, %c0_i32_0 : i32, i32, i32
  }
  func.func @transform_2(%arg0: i32) -> (i32, i32) {
    %c0_i32 = arith.constant 0 : i32
    %c0_i32_0 = arith.constant 0 : i32
    %c0_i32_1 = arith.constant 0 : i32
    return %c0_i32, %c0_i32_0 : i32, i32
  }
  func.func @transform_3(%arg0: i32) -> (i32, i32) {
    %c0_i32 = arith.constant 0 : i32
    %c0_i32_0 = arith.constant 0 : i32
    %c0_i32_1 = arith.constant 0 : i32
    return %c0_i32, %c0_i32_0 : i32, i32
  }
  func.func @transform_4(%arg0: i32) -> (i32, i32) {
    %c0_i32 = arith.constant 0 : i32
    %c0_i32_0 = arith.constant 0 : i32
    %c0_i32_1 = arith.constant 0 : i32
    return %c0_i32, %c0_i32_0 : i32, i32
  }
  func.func @transform_5(%arg0: i32) -> (i32, i32) {
    %c0_i32 = arith.constant 0 : i32
    %c0_i32_0 = arith.constant 0 : i32
    %c0_i32_1 = arith.constant 0 : i32
    return %c0_i32, %c0_i32_0 : i32, i32
  }
  func.func @transform_6(%arg0: i32) -> (i32, i32) {
    %c0_i32 = arith.constant 0 : i32
    %c0_i32_0 = arith.constant 0 : i32
    %c0_i32_1 = arith.constant 0 : i32
    return %c0_i32, %c0_i32_0 : i32, i32
  }
  func.func @transform_7(%arg0: i32) -> (i32, i32) {
    %c0_i32 = arith.constant 0 : i32
    %c0_i32_0 = arith.constant 0 : i32
    %c0_i32_1 = arith.constant 0 : i32
    return %c0_i32, %c0_i32_0 : i32, i32
  }
  func.func @transform_8(%arg0: i32) -> (i32, i32) {
    %c0_i32 = arith.constant 0 : i32
    %c0_i32_0 = arith.constant 0 : i32
    %c0_i32_1 = arith.constant 0 : i32
    return %c0_i32, %c0_i32_0 : i32, i32
  }
  func.func @transform_9(%arg0: i32) -> (i32, i32) {
    %c0_i32 = arith.constant 0 : i32
    %c0_i32_0 = arith.constant 0 : i32
    %c0_i32_1 = arith.constant 0 : i32
    return %c0_i32, %c0_i32_0 : i32, i32
  }
  func.func @transform_10(%arg0: i32) -> (i32, i32) {
    %c0_i32 = arith.constant 0 : i32
    %c0_i32_0 = arith.constant 0 : i32
    %c0_i32_1 = arith.constant 0 : i32
    return %c0_i32, %c0_i32_0 : i32, i32
  }
  func.func @transform_11(%arg0: i32) -> (i32, i32) {
    %c0_i32 = arith.constant 0 : i32
    %c0_i32_0 = arith.constant 0 : i32
    %c0_i32_1 = arith.constant 0 : i32
    return %c0_i32, %c0_i32_0 : i32, i32
  }
  func.func @transform_12(%arg0: i32) -> (i32, i32) {
    %c0_i32 = arith.constant 0 : i32
    %c0_i32_0 = arith.constant 0 : i32
    %c0_i32_1 = arith.constant 0 : i32
    return %c0_i32, %c0_i32_0 : i32, i32
  }
  func.func @transform_13(%arg0: i32) -> (i32, i32) {
    %c0_i32 = arith.constant 0 : i32
    %c0_i32_0 = arith.constant 0 : i32
    %c0_i32_1 = arith.constant 0 : i32
    return %c0_i32, %c0_i32_0 : i32, i32
  }
  func.func @transform_14(%arg0: i32) -> (i32, i32) {
    %c0_i32 = arith.constant 0 : i32
    %c0_i32_0 = arith.constant 0 : i32
    %c0_i32_1 = arith.constant 0 : i32
    return %c0_i32, %c0_i32_0 : i32, i32
  }
  func.func @transform_15(%arg0: i32) -> (i32, i32) {
    %c0_i32 = arith.constant 0 : i32
    %c0_i32_0 = arith.constant 0 : i32
    %c0_i32_1 = arith.constant 0 : i32
    return %c0_i32, %c0_i32_0 : i32, i32
  }
  func.func @transform_16(%arg0: i32) -> (i32, i32) {
    %c0_i32 = arith.constant 0 : i32
    %c0_i32_0 = arith.constant 0 : i32
    %c0_i32_1 = arith.constant 0 : i32
    return %c0_i32, %c0_i32_0 : i32, i32
  }
  func.func @transform_17(%arg0: i32) -> (i32, i32) {
    %c0_i32 = arith.constant 0 : i32
    %c0_i32_0 = arith.constant 0 : i32
    %c0_i32_1 = arith.constant 0 : i32
    return %c0_i32, %c0_i32_0 : i32, i32
  }
  func.func @transform_18(%arg0: i32) -> (i32, i32) {
    %c0_i32 = arith.constant 0 : i32
    %c0_i32_0 = arith.constant 0 : i32
    %c0_i32_1 = arith.constant 0 : i32
    return %c0_i32, %c0_i32_0 : i32, i32
  }
  func.func @transform_19(%arg0: i32) -> (i32, i32) {
    %c0_i32 = arith.constant 0 : i32
    %c0_i32_0 = arith.constant 0 : i32
    %c0_i32_1 = arith.constant 0 : i32
    return %c0_i32, %c0_i32_0 : i32, i32
  }
  func.func @transform_20(%arg0: i32) -> (i32, i32) {
    %c0_i32 = arith.constant 0 : i32
    %c0_i32_0 = arith.constant 0 : i32
    %c0_i32_1 = arith.constant 0 : i32
    return %c0_i32, %c0_i32_0 : i32, i32
  }
  func.func @transform_21(%arg0: i32) -> (i32, i32) {
    %c0_i32 = arith.constant 0 : i32
    %c0_i32_0 = arith.constant 0 : i32
    %c0_i32_1 = arith.constant 0 : i32
    return %c0_i32, %c0_i32_0 : i32, i32
  }
  func.func @transform_22(%arg0: i32) -> (i32, i32, i32) {
    %c0_i32 = arith.constant 0 : i32
    %c0_i32_0 = arith.constant 0 : i32
    %c0_i32_1 = arith.constant 0 : i32
    return %arg0, %c0_i32, %c0_i32_0 : i32, i32, i32
  }
}

</mosaic_0001>

<bundles_post_ra>
// kernel: tpu_custom_call.1
= control target key start
LH: loop header
LB: loop body
LE: loop exit
PB: predicated region body
PF: predicated region fallthrough
CT: control target
= control target key end

     0   :  { %6 = vsyncpa [#allocation3], 0  ;;  %s482_s0 = inlined_call_operand.hbm [shape: f32[8,128], index: 0, kind: input, shape index: {}]   ;;  %s483_s1 = inlined_call_operand.hbm [shape: f32[16,128], index: 1, kind: output, shape index: {}]  }
   0x1   :  { %7 = vsyncpa [#allocation4], 0 }
   0x2   :  { %9 = vsyncpa [#allocation4 + $0x1], 0  ;;  %s352_s6 = smov 0   ;;  %s354_s7 = smov 0  }
   0x3   :  { %s356_s8 = smov 0   ;;  %s358_s9 = smov 0  }
   0x4 LB: > { %s373_s10 = sadd.s32 4294967295, %s338_s9   ;;  %s184_s11 = sadd.s32 4294967294, %s338_s9   ;;  %s338_s9 = sphi %s358_s9, %s499_s9   ;;  %s334_s8 = sphi %s356_s8, %s498_s8   ;;  %s330_s7 = sphi %s354_s7, %s497_s7   ;;  %s326_s6 = sphi %s352_s6, %s496_s6  }
   0x5   : > { %s377_s12 = sadd.s32 1, %s338_s9   ;;  %s43_s13 = sadd.s32 1, %s334_s8 }
   0x6   : > { %s40_s14 = ssub.s32 %s338_s9, %s377_s12  ;;  %p53_p0 = scmp.ne.s32.totalorder %s334_s8, %s330_s7 }
   0x7   : > { %p41_p1 = scmp.eq.s32.totalorder %s40_s14, 0  ;;  %p54_p2 = scmp.eq.s32.totalorder %s373_s10, 1 }
   0x8   : > { %p59_p3 = scmp.ne.s32.totalorder %s330_s7, %s326_s6  ;;  %p60_p4 = scmp.eq.s32.totalorder %s184_s11, 1 }
   0x9   : > { %s388_s15 = scalar_select %p41_p1, %s334_s8, %s43_s13  }
   0xa   : > { %p390_p5 = por %p54_p2, %p53_p0  ;;  %p394_p6 = por %p60_p4, %p59_p3 }
   0xb   : > { %p185_p7 = scmp.ge.s32.totalorder %s338_s9, 1  ;;  %p67_p8 = scmp.lt.s32.totalorder %s338_s9, 3 }
   0xc   : > { %s487_s16 = scalar_select %p390_p5, 1, 0 }
   0xd   : > { %s488_s17 = scalar_select %p394_p6, 1, 0 }
   0xe   : > { %p484_p9 = scmp.eq.s32.totalorder %s373_s10, 0  ;;  %p401_p10 = pnand %p185_p7, %p67_p8 }
   0xf   : > { %s340_s19 = smov [#allocation2]   ;;  %s244_s24 = scalar_lea.hbm %s482_s0, 128 }
  0x10   : > { %s489_s18 = scalar_select %p401_p10, 1, 0 }
  0x11   : > { %s80_s20 = sshll.u32 %s340_s19, 4  ;;  %p200_p11 = pneg %p401_p10  ;;  %s81_s20 = int_to_ptr.vmem [resolvable:$true] %s80_s20 }
  0x12   : > { %p245_p13 = scmp.ne.s32.totalorder %s482_s0, %s244_s24  ;;  %p251_p3 = scmp.lt.u32.totalorder %s244_s24, %s482_s0 }
  0x13   : > { %p409_p12 = pnand %p484_p9, %p200_p11 }
  0x15   : > { %p246_p0 = pneg %p409_p12 }
  0x17   : > { %p247_p1 = pnand %p246_p0, %p245_p13 }
  0x19   : > { %p248_p2 = pneg %p247_p1 }
  0x1b   : > { %p253_p4 = pnand %p251_p3, %p248_p2 }
  0x1d   : > { %256 = shalt.err (!%p253_p4)
}
  0x1e   : > { %s257_s29 = scalar_lea.vmem %s81_s20, 128  ;;  %p265_p9 = scmp.lt.s32.totalorder %s81_s20, %s81_s20 }
  0x1f   : > { %p258_p7 = scmp.ne.s32.totalorder %s81_s20, %s257_s29  ;;  %p266_p6 = scmp.lt.s32.totalorder %s257_s29, %s257_s29 }
  0x21   : > { %p260_p8 = pnand %p258_p7, %p246_p0  ;;  %p267_p5 = por %p266_p6, %p265_p9 }
  0x23   : > { %p261_p11 = pneg %p260_p8 }
  0x25   : > { %p268_p10 = pnand %p267_p5, %p261_p11 }
  0x27   : > { %271 = shalt.err (!%p268_p10)
}
  0x28   : > { %203 = dma.hbm_to_vmem [thread:$0]  (!%p409_p12), %s482_s0, 128, %s81_s20, [#allocation3]  }
  0x29   : > { %p491_p13 = scmp.ne.s32.totalorder %s489_s18, 0 }
  0x2a   : > { %p492_p1 = scmp.eq.s32.totalorder (!%p491_p13), %s373_s10, 0 }
  0x2b   : > { %93 = sbr.rel (%p491_p13) target bundleno = 77 (0x4d), region = 24 }
  0x32   : > { %317 = dma.done.wait (%p492_p1), [#allocation3], 128   ;;  %p493_p0 = pmov %p492_p1 }
  0x33   : > { %s105_s3 = sand.u32 1, %s330_s7   ;;  %s191_s13 = sshll.u32 %s373_s10, 7  ;;  %v108_v0 = vld [vmem:[#allocation2] sm:$0xff] }
  0x34   : > { %319 = vsyncadd (%p493_p0), [#allocation3], 4294967168  ;;  %s189_s4 = sshll.u32 %s105_s3, 3  ;;  %v109_v1 = vmul.f32 2.0, %v108_v0  ;;  %s442_s19 = scalar_lea.hbm %s483_s1, %s191_s13 }
  0x35   : > { %s107_s5 = scalar_lea.vmem [#allocation5], %s189_s4  ;;  %s112_s20 = scalar_lea.sflag [#allocation4], %s105_s3 }
  0x36   : > { %s125_s11 = sshll.u32 %s107_s5, 4  ;;  %110 = vst [vmem:[%s107_s5] sm:$0xff] %v109_v1  ;;  %p494_p6 = scmp.ne.s32.totalorder %s487_s16, 0  ;;  %s437_s11 = int_to_ptr.vmem [resolvable:$true] %s125_s11 }
  0x37   : > { %s272_s21 = scalar_lea.vmem %s437_s11, 128  ;;  %s341_s10 = smov [#allocation5]  }
  0x38   : > { %p273_p5 = scmp.ne.s32.totalorder %s437_s11, %s272_s21  ;;  %s276_s22 = sshll.u32 %s341_s10, 4  ;;  %s277_s22 = int_to_ptr.vmem [resolvable:$false] %s276_s22 }
  0x39   : > { %s278_s23 = scalar_lea.vmem %s277_s22, 256  ;;  %p279_p12 = scmp.lt.s32.totalorder %s437_s11, %s277_s22 }
  0x3a   : > { %p274_p9 = pnand %p273_p5, %p494_p6  ;;  %p280_p2 = scmp.lt.s32.totalorder %s278_s23, %s272_s21 }
  0x3c   : > { %p275_p10 = pneg %p274_p9  ;;  %p281_p3 = por %p280_p2, %p279_p12 }
  0x3e   : > { %p282_p4 = pnand %p281_p3, %p275_p10 }
  0x40   : > { %285 = shalt.err (!%p282_p4)
}
  0x41   : > { %s286_s24 = scalar_lea.hbm %s442_s19, 128  ;;  %s290_s27 = scalar_lea.hbm %s483_s1, 256 }
  0x42   : > { %p287_p7 = scmp.ne.s32.totalorder %s442_s19, %s286_s24  ;;  %p291_p13 = scmp.lt.u32.totalorder %s442_s19, %s483_s1 }
  0x43   : > { %p292_p1 = scmp.lt.u32.totalorder %s290_s27, %s286_s24  ;;  %p294_p5 = scmp.lt.u32.totalorder %s286_s24, %s442_s19 }
  0x44   : > { %p288_p8 = pnand %p287_p7, %p494_p6 }
  0x45   : > { %p293_p0 = por %p292_p1, %p291_p13 }
  0x46   : > { %p289_p11 = pneg %p288_p8 }
  0x47   : > { %p295_p9 = por %p294_p5, %p293_p0 }
  0x49   : > { %p296_p10 = pnand %p295_p9, %p289_p11 }
  0x4b   : > { %299 = shalt.err (!%p296_p10)
}
  0x4c   : > { %198 = dma.vmem_to_hbm [thread:$0]  (%p494_p6), %s437_s11, 128, %s442_s19, %s112_s20  }
  0x4d PF: > { %p210_p12 = scmp.ge.s32.totalorder %s338_s9, 2  ;;  %s137_s30 = sand.u32 1, %s326_s6  }
  0x4e   : > { %p495_p2 = scmp.ne.s32.totalorder %s488_s17, 0  ;;  %s138_s2 = scalar_lea.sflag [#allocation4], %s137_s30 }
  0x50   : > { %p205_p3 = pnand %p210_p12, %p495_p2 }
  0x52   : > { %321 = dma.done.wait (!%p205_p3), %s138_s2, 128  }
  0x53   : > { %323 = vsyncadd (!%p205_p3), %s138_s2, 4294967168  ;;  %p12_p4 = scmp.ge.s32.totalorder %s377_s12, 4   ;;  %s496_s6 = smov %s330_s7 }
  0x54   : > { %s497_s7 = smov %s334_s8  ;;  %s498_s8 = smov %s388_s15 }
  0x55   : > { %s499_s9 = smov %s377_s12  ;;  %14 = sbr.rel (!%p12_p4) target bundleno = 4 (0x4), region = 61 }
  0x5c   :  { %143 = vsyncpa [#allocation3], 1 }
  0x5d   :  { %145 = vsyncpa [#allocation3 + $0x1], 1 }
  0x5e   :  { %146 = vsyncpa [#allocation4], 1 }
  0x5f   :  { %148 = vsyncpa [#allocation4 + $0x1], 1 }

// kernel: html_generator_forward.5
= control target key start
LH: loop header
LB: loop body
LE: loop exit
PB: predicated region body
PF: predicated region fallthrough
CT: control target
= control target key end

     0   :  { %s341_s0 = inlined_call_operand.vmem [shape: f32[32,128], index: 0, kind: input, shape index: {}]   ;;  %s342_s1 = inlined_call_operand.vmem [shape: bf16[128,128], index: 1, kind: input, shape index: {}]   ;;  %s343_s2 = inlined_call_operand.vmem [shape: f32[1,128], index: 2, kind: input, shape index: {}]   ;;  %s344_s3 = inlined_call_operand.hbm [shape: f32[32,128], index: 3, kind: output, shape index: {}]  }
   0x1   :  { %v235_v0 = vld [vmem:[%s342_s1] sm:$0xff]   ;;  %v236_v1 = vld [vmem:[%s342_s1 + $0x8] sm:$0xff]   ;;  %v237_v2 = vld [vmem:[%s342_s1 + $0x10] sm:$0xff]  }
   0x2   :  { %212 = vmatprep.subr.bf16.mxu0 %v235_v0  ;;  %v238_v3 = vld [vmem:[%s342_s1 + $0x18] sm:$0xff]   ;;  %v28_v4 = vld [vmem:[%s341_s0] sm:$0xff]  ;;  %v29_v5 = vld [vmem:[%s341_s0 + $0x8] sm:$0xff] }
   0x3   :  { %213 = vmatpush3.bf16.msra.mxu0 %v235_v0  ;;  %v48_v6 = vpack.c.bf16 %v29_v5, %v28_v4 }
   0x4   :  { %214 = vmatprep.subr.bf16.mxu0 %v236_v1 }
   0x7   :  { %215 = vmatpush3.bf16.msra.mxu0 %v236_v1 }
   0x8   :  { %216 = vmatprep.subr.bf16.mxu0 %v237_v2 }
   0x9   :  { %8 = vsyncpa [#allocation4], 0  ;;  %228 = vmatprep.mubr.bf16.mxu0 %v48_v6  ;;  %v239_v7 = vld [vmem:[%s342_s1 + $0x20] sm:$0xff]   ;;  %v240_v8 = vld [vmem:[%s342_s1 + $0x28] sm:$0xff]   ;;  %s267_s11 = smov [#allocation3]  }
   0xa   :  { %v241_v9 = vld [vmem:[%s342_s1 + $0x30] sm:$0xff]   ;;  %v242_v10 = vld [vmem:[%s342_s1 + $0x38] sm:$0xff]   ;;  %v201_v14 = vld [vmem:[%s343_s2] ss:$0 sm:$0xff]  ;;  %s182_s1 = sshll.u32 %s267_s11, 4  ;;  %s183_s1 = int_to_ptr.vmem [resolvable:$true] %s182_s1 }
   0xb   :  { %217 = vmatpush3.bf16.msra.mxu0 %v237_v2  ;;  %v30_v11 = vld [vmem:[%s341_s0 + $0x10] sm:$0xff]  ;;  %v31_v12 = vld [vmem:[%s341_s0 + $0x18] sm:$0xff]  ;;  %s243_s0 = scalar_lea.vmem %s183_s1, 512  ;;  %p248_p1 = scmp.lt.s32.totalorder %s183_s1, %s183_s1 }
   0xc   :  { %218 = vmatprep.subr.bf16.mxu0 %v238_v3  ;;  %v49_v13 = vpack.c.bf16 %v31_v12, %v30_v11  ;;  %p244_p0 = scmp.ne.s32.totalorder %s183_s1, %s243_s0  ;;  %p249_p2 = scmp.lt.s32.totalorder %s243_s0, %s243_s0 }
   0xe   :  { %p250_p3 = por %p249_p2, %p248_p1 }
   0xf   :  { %219 = vmatpush3.bf16.msra.mxu0 %v238_v3 }
  0x10   :  { %220 = vmatprep.subr.bf16.mxu0 %v239_v7  ;;  %p251_p4 = pnand %p250_p3, %p244_p0 }
  0x13   :  { %221 = vmatpush3.bf16.msra.mxu0 %v239_v7 }
  0x14   :  { %222 = vmatprep.subr.bf16.mxu0 %v240_v8 }
  0x17   :  { %223 = vmatpush3.bf16.msra.mxu0 %v240_v8 }
  0x18   :  { %224 = vmatprep.subr.bf16.mxu0 %v241_v9 }
  0x1b   :  { %225 = vmatpush3.bf16.msra.mxu0 %v241_v9 }
  0x1c   :  { %226 = vmatprep.subr.bf16.mxu0 %v242_v10 }
  0x1f   :  { %227 = vmatpush3.bf16.msra.mxu0 %v242_v10 }
  0x22   :  { %229 = vmatmul.mubr.bf16.vlgmr.msra.gmra.mrb[0].mxu0 %v49_v13 }
  0xf5   :  { %v230_v15 = vpop.f32.mrb[0].mxu0 }
  0xf6   :  { %v171_v16 = vadd.f32 %v230_v15, %v201_v14  ;;  %v132_v17 = vpop.f32.mrb[1].mxu0 }
  0xf7   :  { %v169_v18 = vadd.f32 %v201_v14, %v132_v17  ;;  %v231_v19 = vpop.f32.mrb[2].mxu0 }
  0xf8   :  { %175 = vst [vmem:[#allocation3 + $0x10] sm:$0xff] %v171_v16  ;;  %v172_v20 = vadd.f32 %v231_v19, %v201_v14  ;;  %v135_v21 = vpop.f32.mrb[3].mxu0 }
  0xf9   :  { %173 = vst [vmem:[#allocation3] sm:$0xff] %v169_v18  ;;  %v170_v22 = vadd.f32 %v201_v14, %v135_v21 }
  0xfa   :  { %176 = vst [vmem:[#allocation3 + $0x18] sm:$0xff] %v172_v20 }
  0xfb   :  { %174 = vst [vmem:[#allocation3 + $0x8] sm:$0xff] %v170_v22 }
  0xfc   :  { %254 = shalt.err (!%p251_p4)
}
  0xfd   :  { %s255_s13 = scalar_lea.hbm %s344_s3, 512 }
  0xfe   :  { %p256_p5 = scmp.ne.s32.totalorder %s344_s3, %s255_s13  ;;  %p259_p6 = scmp.lt.u32.totalorder %s255_s13, %s344_s3 }
 0x100   :  { %p261_p7 = pnand %p259_p6, %p256_p5 }
 0x102   :  { %264 = shalt.err (!%p261_p7)
}
 0x103   :  { %s268_s18 = smov 128   ;;  %s269_s19 = smov 8  }
 0x104   :  { %188 = dma.vmem_to_hbm [thread:$0]  %s183_s1, 512, %s344_s3, [#allocation4], %s268_s18, %s268_s18, %s269_s19  }
 0x105   :  { %265 = dma.done.wait [#allocation4], 512  }
 0x106   :  { %266 = vsyncadd [#allocation4], 4294966784 }
 0x107   :  { %192 = vsyncpa [#allocation4], 1 }

// kernel: html_generator_forward.4
= control target key start
LH: loop header
LB: loop body
LE: loop exit
PB: predicated region body
PF: predicated region fallthrough
CT: control target
= control target key end

     0   :  { %s11567_s0 = inlined_call_operand.vmem [shape: f32[2,16,128], index: 0, kind: input, shape index: {}]   ;;  %s11568_s1 = inlined_call_operand.vmem [shape: f32[2,16,128], index: 1, kind: input, shape index: {}]   ;;  %s11569_s2 = inlined_call_operand.vmem [shape: bf16[128,384], index: 2, kind: input, shape index: {}]   ;;  %s11570_s3 = inlined_call_operand.vmem [shape: f32[1,384], index: 3, kind: input, shape index: {}]   ;;  %s11571_s4 = inlined_call_operand.vmem [shape: bf16[128,128], index: 4, kind: input, shape index: {}]   ;;  %s11572_s5 = inlined_call_operand.vmem [shape: f32[1,128], index: 5, kind: input, shape index: {}]   ;;  %s11573_s6 = inlined_call_operand.vmem [shape: f32[1,128], index: 6, kind: input, shape index: {}]   ;;  %s11574_s7 = inlined_call_operand.vmem [shape: f32[1,128], index: 7, kind: input, shape index: {}]   ;;  %s11575_s8 = inlined_call_operand.vmem [shape: bf16[128,128], index: 8, kind: input, shape index: {}]   ;;  %s11576_s9 = inlined_call_operand.vmem [shape: f32[1,128], index: 9, kind: input, shape index: {}]   ;;  %s11577_s10 = inlined_call_operand.vmem [shape: bf16[128,256], index: 10, kind: input, shape index: {}]   ;;  %s11578_s11 = inlined_call_operand.vmem [shape: f32[1,256], index: 11, kind: input, shape index: {}]   ;;  %s11579_s12 = inlined_call_operand.vmem [shape: bf16[128,128], index: 12, kind: input, shape index: {}]   ;;  %s11580_s13 = inlined_call_operand.vmem [shape: f32[1,128], index: 13, kind: input, shape index: {}]   ;;  %s11581_s14 = inlined_call_operand.vmem [shape: f32[1,128], index: 14, kind: input, shape index: {}]   ;;  %s11582_s15 = inlined_call_operand.vmem [shape: f32[1,128], index: 15, kind: input, shape index: {}]   ;;  %s11583_s16 = inlined_call_operand.vmem [shape: bf16[128,256], index: 16, kind: input, shape index: {}]   ;;  %s11584_s17 = inlined_call_operand.vmem [shape: f32[1,256], index: 17, kind: input, shape index: {}]   ;;  %s11585_s18 = inlined_call_operand.vmem [shape: bf16[256,128], index: 18, kind: input, shape index: {}]   ;;  %s11586_s19 = inlined_call_operand.vmem [shape: f32[1,128], index: 19, kind: input, shape index: {}]   ;;  %s11587_s20 = inlined_call_operand.vmem [shape: f32[1,128], index: 20, kind: input, shape index: {}]   ;;  %s11588_s21 = inlined_call_operand.hbm [shape: f32[1,128], index: 21, kind: input, shape index: {}]   ;;  %s11589_s22 = inlined_call_operand.vmem [shape: f32[2,16,128], index: 22, kind: output, shape index: {}]  }
   0x1   :  { %11602 = sst [smem:[#allocation8_spill]] %s11567_s0 }
   0x2   :  { %11603 = sst [smem:[#allocation9_spill]] %s11568_s1 }
   0x3   :  { %11604 = sst [smem:[#allocation10_spill]] %s11569_s2 }
   0x4   :  { %11605 = sst [smem:[#allocation11_spill]] %s11570_s3 }
   0x5   :  { %11606 = sst [smem:[#allocation12_spill]] %s11571_s4 }
   0x6   :  { %11607 = sst [smem:[#allocation13_spill]] %s11572_s5 }
   0x7   :  { %11608 = sst [smem:[#allocation14_spill]] %s11573_s6 }
   0x8   :  { %27 = vsyncpa [#allocation3], 0  ;;  %s9103_s3 = smov [#allocation2]   ;;  %s9079_s4 = scalar_lea.hbm %s11588_s21, 16 }
   0x9   :  { %s76_s28 = sshll.u32 %s9103_s3, 4  ;;  %p9080_p0 = scmp.ne.s32.totalorder %s11588_s21, %s9079_s4  ;;  %s77_s28 = int_to_ptr.vmem [resolvable:$true] %s76_s28 }
   0xa   :  { %p9083_p1 = scmp.lt.u32.totalorder %s9079_s4, %s11588_s21 }
   0xc   :  { %p9085_p2 = pnand %p9083_p1, %p9080_p0 }
   0xe   :  { %9088 = shalt.err (!%p9085_p2)
}
   0xf   :  { %s9089_s24 = scalar_lea.vmem %s77_s28, 16  ;;  %s9093_s6 = scalar_lea.vmem %s77_s28, 32 }
  0x10   :  { %p9090_p3 = scmp.ne.s32.totalorder %s77_s28, %s9089_s24  ;;  %p9094_p4 = scmp.lt.s32.totalorder %s77_s28, %s77_s28 }
  0x11   :  { %p9095_p5 = scmp.lt.s32.totalorder %s9093_s6, %s9089_s24 }
  0x13   :  { %p9096_p6 = por %p9095_p5, %p9094_p4 }
  0x15   :  { %p9097_p7 = pnand %p9096_p6, %p9090_p3 }
  0x17   :  { %9100 = shalt.err (!%p9097_p7)
}
  0x18   :  { %79 = dma.hbm_to_vmem [thread:$0]  %s11588_s21, 16, %s77_s28, [#allocation3]  }
  0x19   :  { %9101 = dma.done.wait [#allocation3], 16  }
  0x1a   :  { %9102 = vsyncadd [#allocation3], 4294967280  ;;  %v11594_v0 = vmov 0   ;;  %s11609_s3 = sld [smem:[#allocation10_spill]]  ;;  %s11610_s27 = sld [smem:[#allocation8_spill]]  ;;  %v11596_v31 = vlaneseq  ;;  %v11597_v52 = vmov 0.0  }
  0x1b   :  { %303 = vmatprep.mubr.bf16.mxu0 %v11594_v0  ;;  %s11612_s29 = sld [smem:[#allocation11_spill]]  ;;  %s9106_s30 = smov 64   ;;  %vm9109_vm0 = vmmov 0   ;;  %vm2149_vm1 = vcmask 261120   ;;  %vm2569_vm3 = vcmask 130048   ;;  %vm3702_vm5 = vcmask 523264  }
  0x1c   :  { %v9326_v32 = vshrl.u32 %v11596_v31, 7  ;;  %s9107_s4 = smov 32   ;;  %s11623_s28 = sld [smem:[#allocation12_spill]]  ;;  %vm3707_vm6 = vcmask 785408  }
  0x1d   :  { %s11625_s6 = sld [smem:[#allocation13_spill]]  ;;  %s11626_s21 = sld [smem:[#allocation9_spill]] }
  0x1e   :  { %v9329_v33 = vsub.s32 0, %v9326_v32  ;;  %v9335_v35 = vsub.s32 1, %v9326_v32  ;;  %v138_v55 = vsub.s32 2, %v9326_v32 }
  0x20   :  { %v8803_v1 = vld [vmem:[%s11609_s3 + $0x4] ss:$12 sps:$4 sm:$0xff]   ;;  %v8805_v2 = vld [vmem:[%s11609_s3] ss:$12 sps:$4 sm:$0xff]   ;;  %v8806_v3 = vld [vmem:[%s11609_s3 + $0x1c] ss:$12 sps:$4 sm:$0xff]  }
  0x21   :  { %271 = vmatprep.subr.bf16.mxu0 %v8803_v1  ;;  %v8808_v4 = vld [vmem:[%s11609_s3 + $0x18] ss:$12 sps:$4 sm:$0xff]   ;;  %v8809_v5 = vld [vmem:[%s11609_s3 + $0x34] ss:$12 sps:$4 sm:$0xff]   ;;  %v8811_v6 = vld [vmem:[%s11609_s3 + $0x30] ss:$12 sps:$4 sm:$0xff]  }
  0x22   :  { %272 = vmatpush1.bf16.msra.mxu0 %v8805_v2  ;;  %v8812_v7 = vld [vmem:[%s11609_s3 + $0x4c] ss:$12 sps:$4 sm:$0xff]   ;;  %v84_v8 = vld [vmem:[%s11610_s27] sm:$0xff]  ;;  %v8814_v9 = vld [vmem:[%s11609_s3 + $0x48] ss:$12 sps:$4 sm:$0xff]   ;;  %11611 = vst [vmem:[#allocation5_spill] sm:$0xff] %v9329_v33 }
  0x23   :  { %273 = vmatprep.subr.bf16.mxu0 %v8806_v3  ;;  %v8815_v10 = vld [vmem:[%s11609_s3 + $0x64] ss:$12 sps:$4 sm:$0xff]   ;;  %v85_v11 = vld [vmem:[%s11610_s27 + $0x8] sm:$0xff]  ;;  %v8821_v19 = vld [vmem:[%s11609_s3 + $0x94] ss:$12 sps:$4 sm:$0xff]   ;;  %11613 = vst [vmem:[#allocation6_spill] sm:$0xff] %v9335_v35 }
  0x24   :  { %v124_v12 = vpack.c.bf16 %v85_v11, %v84_v8  ;;  %v8827_v13 = vld [vmem:[%s11609_s3 + $0x8] ss:$12 sps:$4 sm:$0xff]   ;;  %v8828_v14 = vld [vmem:[%s11609_s3 + $0x20] ss:$12 sps:$4 sm:$0xff]   ;;  %v8829_v17 = vld [vmem:[%s11609_s3 + $0x38] ss:$12 sps:$4 sm:$0xff]  }
  0x25   :  { %v8817_v15 = vld [vmem:[%s11609_s3 + $0x60] ss:$12 sps:$4 sm:$0xff]   ;;  %8462 = vmatprep.subr.bf16.mxu1 %v8827_v13  ;;  %v8818_v16 = vld [vmem:[%s11609_s3 + $0x7c] ss:$12 sps:$4 sm:$0xff]   ;;  %v8820_v18 = vld [vmem:[%s11609_s3 + $0x78] ss:$12 sps:$4 sm:$0xff]  }
  0x26   :  { %274 = vmatpush1.bf16.msra.mxu0 %v8808_v4  ;;  %8478 = vmatprep.mubr.bf16.mxu1 %v124_v12  ;;  %v8830_v20 = vld [vmem:[%s11609_s3 + $0x50] ss:$12 sps:$4 sm:$0xff]   ;;  %v8824_v22 = vld [vmem:[%s11609_s3 + $0xac] ss:$12 sps:$4 sm:$0xff]   ;;  %v8831_v23 = vld [vmem:[%s11609_s3 + $0x68] ss:$12 sps:$4 sm:$0xff]  }
  0x27   :  { %275 = vmatprep.subr.bf16.mxu0 %v8809_v5  ;;  %8463 = vmatpush3.bf16.msra.mxu1 %v8827_v13  ;;  %v8823_v21 = vld [vmem:[%s11609_s3 + $0x90] ss:$12 sps:$4 sm:$0xff]   ;;  %v8826_v24 = vld [vmem:[%s11609_s3 + $0xa8] ss:$12 sps:$4 sm:$0xff]   ;;  %v8832_v25 = vld [vmem:[%s11609_s3 + $0x80] ss:$12 sps:$4 sm:$0xff]  }
  0x28   :  { %8464 = vmatprep.subr.bf16.mxu1 %v8828_v14  ;;  %v8833_v26 = vld [vmem:[%s11609_s3 + $0x98] ss:$12 sps:$4 sm:$0xff]   ;;  %v86_v27 = vld [vmem:[%s11610_s27 + $0x10] sm:$0xff]  ;;  %v126_v34 = vld [vmem:[%s11612_s29] sm:$0x7] }
  0x29   :  { %v87_v28 = vld [vmem:[%s11610_s27 + $0x18] sm:$0xff]  ;;  %v131_v36 = vrot.slane %v126_v34, %v9329_v33  ;;  %v135_v37 = vrot.slane %v126_v34, %v9335_v35  ;;  %v139_v58 = vrot.slane %v126_v34, %v138_v55  ;;  %v9110_v1 = vmov 1983009808  }
  0x2a   :  { %276 = vmatpush1.bf16.msra.mxu0 %v8811_v6  ;;  %v125_v29 = vpack.c.bf16 %v87_v28, %v86_v27  ;;  %v8834_v30 = vld [vmem:[%s11609_s3 + $0xb0] ss:$12 sps:$4 sm:$0xff]   ;;  %s9105_s3 = smov 96   ;;  %v416_v2 = vunpack.c.l.s4 %v9110_v1 }
  0x2b   :  { %277 = vmatprep.subr.bf16.mxu0 %v8812_v7  ;;  %8465 = vmatpush3.bf16.msra.mxu1 %v8828_v14  ;;  %v9111_v7 = vmov 1934713408  }
  0x2c   :  { %8466 = vmatprep.subr.bf16.mxu1 %v8829_v17  ;;  %v417_v6 = vunpack.c.0.s8 %v416_v2  ;;  %v448_v8 = vunpack.c.l.s4 %v9111_v7 }
  0x2e   :  { %278 = vmatpush1.bf16.msra.mxu0 %v8814_v9  ;;  %v9435_v11 = vsub.s32 %v417_v6, %v9326_v32  ;;  %v449_v14 = vunpack.c.0.s8 %v448_v8 }
  0x2f   :  { %279 = vmatprep.subr.bf16.mxu0 %v8815_v10  ;;  %8467 = vmatpush3.bf16.msra.mxu1 %v8829_v17 }
  0x30   :  { %8468 = vmatprep.subr.bf16.mxu1 %v8830_v20 }
  0x32   :  { %280 = vmatpush1.bf16.msra.mxu0 %v8817_v15 }
  0x33   :  { %281 = vmatprep.subr.bf16.mxu0 %v8818_v16  ;;  %8469 = vmatpush3.bf16.msra.mxu1 %v8830_v20 }
  0x34   :  { %8470 = vmatprep.subr.bf16.mxu1 %v8831_v23 }
  0x36   :  { %282 = vmatpush1.bf16.msra.mxu0 %v8820_v18 }
  0x37   :  { %283 = vmatprep.subr.bf16.mxu0 %v8821_v19  ;;  %8471 = vmatpush3.bf16.msra.mxu1 %v8831_v23  ;;  %v9444_v23 = vsub.s32 %v449_v14, %v9326_v32 }
  0x38   :  { %8472 = vmatprep.subr.bf16.mxu1 %v8832_v25 }
  0x3a   :  { %284 = vmatpush1.bf16.msra.mxu0 %v8823_v21 }
  0x3b   :  { %285 = vmatprep.subr.bf16.mxu0 %v8824_v22  ;;  %8473 = vmatpush3.bf16.msra.mxu1 %v8832_v25 }
  0x3c   :  { %8474 = vmatprep.subr.bf16.mxu1 %v8833_v26 }
  0x3e   :  { %286 = vmatpush1.bf16.msra.mxu0 %v8826_v24 }
  0x3f   :  { %8475 = vmatpush3.bf16.msra.mxu1 %v8833_v26  ;;  %8512 = vmatprep.subr.bf16.mxu0 %v11597_v52 }
  0x40   :  { %8476 = vmatprep.subr.bf16.mxu1 %v8834_v30 }
  0x41   :  { %304 = vmatmul.mubr.bf16.vlgmr.msra.gmra.mrb[0].mxu0 %v124_v12 }
  0x42   :  { %313 = vmatprep.mubr.bf16.mxu0 %v11594_v0 }
  0x43   :  { %8477 = vmatpush3.bf16.msra.mxu1 %v8834_v30 }
  0x44   :  { %8482 = vmatprep.subr.bf16.mxu1 %v11597_v52 }
  0x46   :  { %8479 = vmatmul.mubr.bf16.vlgmr.msra.gmra.mrb[0].mxu1 %v125_v29 }
  0x47   :  { %8484 = vmatprep.mubr.msk.bf16.mxu1 %vm9109_vm0, %v11597_v52 }
  0x49   :  { %314 = vmatmul.mubr.bf16.gmra.mrb[4].mxu0 %v125_v29 }
  0x4a   :  { %8514 = vmatprep.mubr.msk.bf16.mxu0 %vm9109_vm0, %v11597_v52 }
 0x114   :  { %v305_v38 = vpop.f32.mrb[0].mxu0 }
 0x115   :  { %v9339_v39 = vadd.f32 %v305_v38, %v131_v36  ;;  %v307_v40 = vpop.f32.mrb[1].mxu0 }
 0x116   :  { %v9341_v41 = vadd.f32 %v307_v40, %v135_v37  ;;  %v309_v42 = vpop.f32.mrb[2].mxu0 }
 0x117   :  { %v311_v43 = vpop.f32.mrb[3].mxu0  ;;  %377 = vrot.lane.b32.xlu0 %v9339_v39, %s9105_s3  ;;  %v9347_v44 = vadd.f32 %v309_v42, %v131_v36 }
 0x118   :  { %981 = vrot.lane.b32.xlu1 %v9341_v41, %s9106_s30  ;;  %v9353_v47 = vadd.f32 %v311_v43, %v135_v37 }
 0x119   :  { %v8480_v56 = vpop.f32.mrb[0].mxu1 }
 0x11a   :  { %v358_v57 = vpop.f32.mrb[1].mxu1  ;;  %v9426_v3 = vadd.f32 %v8480_v56, %v139_v58 }
 0x11b   :  { %969 = vrot.lane.b32.xlu0 %v9341_v41, %s9105_s3  ;;  %v8481_v59 = vpop.f32.mrb[2].mxu1  ;;  %v9410_v61 = vadd.f32 %v358_v57, %v139_v58 }
 0x11c   :  { %379 = vrot.lane.b32.xlu1 %v9347_v44, %s9105_s3  ;;  %v315_v45 = vpop.f32.mrb[4].mxu0  ;;  %v361_v60 = vpop.f32.mrb[3].mxu1  ;;  %v9412_v62 = vadd.f32 %v8481_v59, %v139_v58 }
 0x11d   :  { %v317_v46 = vpop.f32.mrb[5].mxu0  ;;  %v9367_v50 = vadd.f32 %v315_v45, %v131_v36  ;;  %v9414_v63 = vadd.f32 %v361_v60, %v139_v58 }
 0x11e   :  { %v319_v48 = vpop.f32.mrb[6].mxu0  ;;  %v9381_v53 = vadd.f32 %v317_v46, %v135_v37 }
 0x11f   :  { %993 = vrot.lane.b32.xlu0 %v9341_v41, %s9107_s4  ;;  %v321_v49 = vpop.f32.mrb[7].mxu0  ;;  %v9373_v51 = vadd.f32 %v319_v48, %v131_v36 }
 0x120   :  { %983 = vrot.lane.b32.xlu1 %v9353_v47, %s9106_s30  ;;  %v9383_v54 = vadd.f32 %v321_v49, %v135_v37 }
 0x123   :  { %971 = vrot.lane.b32.xlu0 %v9353_v47, %s9105_s3 }
 0x124   :  { %995 = vrot.lane.b32.xlu1 %v9353_v47, %s9107_s4 }
 0x127   :  { %389 = vrot.lane.b32.xlu0 %v9339_v39, %s9106_s30 }
 0x128   :  { %391 = vrot.lane.b32.xlu1 %v9347_v44, %s9106_s30 }
 0x12b   :  { %401 = vrot.lane.b32.xlu0 %v9339_v39, %s9107_s4 }
 0x12c   :  { %403 = vrot.lane.b32.xlu1 %v9347_v44, %s9107_s4 }
 0x12f   :  { %381 = vrot.lane.b32.xlu0 %v9367_v50, %s9105_s3 }
 0x130   :  { %383 = vrot.lane.b32.xlu1 %v9373_v51, %s9105_s3 }
 0x133   :  { %973 = vrot.lane.b32.xlu0 %v9381_v53, %s9105_s3 }
 0x134   :  { %975 = vrot.lane.b32.xlu1 %v9383_v54, %s9105_s3 }
 0x137   :  { %985 = vrot.lane.b32.xlu0 %v9381_v53, %s9106_s30 }
 0x138   :  { %987 = vrot.lane.b32.xlu1 %v9383_v54, %s9106_s30 }
 0x13b   :  { %997 = vrot.lane.b32.xlu0 %v9381_v53, %s9107_s4 }
 0x13c   :  { %999 = vrot.lane.b32.xlu1 %v9383_v54, %s9107_s4 }
 0x13f   :  { %393 = vrot.lane.b32.xlu0 %v9367_v50, %s9106_s30 }
 0x140   :  { %395 = vrot.lane.b32.xlu1 %v9373_v51, %s9106_s30 }
 0x143   :  { %405 = vrot.lane.b32.xlu0 %v9367_v50, %s9107_s4 }
 0x144   :  { %407 = vrot.lane.b32.xlu1 %v9373_v51, %s9107_s4 }
 0x147   :  { %1563 = vrot.lane.b32.xlu0 %v9414_v63, %s9105_s3 }
 0x148   :  { %1561 = vrot.lane.b32.xlu1 %v9410_v61, %s9105_s3 }
 0x14b   :  { %1585 = vrot.lane.b32.xlu0 %v9410_v61, %s9107_s4 }
 0x14c   :  { %1573 = vrot.lane.b32.xlu1 %v9410_v61, %s9106_s30 }
 0x150   :  { %1575 = vrot.lane.b32.xlu1 %v9414_v63, %s9106_s30 }
 0x154   :  { %1587 = vrot.lane.b32.xlu1 %v9414_v63, %s9107_s4 }
 0x158   :  { %1565 = vrot.lane.b32.xlu1 %v9426_v3, %s9105_s3 }
 0x189   :  { %v9430_v4 = vpop.permute.xlu0 %377 }
 0x18a   :  { %v982_v5 = vpop.permute.xlu1 %981 }
 0x18b   :  { %v1005_v12 = vcombine.low %v9341_v41, %v982_v5  ;;  %v1006_v13 = vcombine.high %v9341_v41, %v982_v5 }
 0x18d   :  { %v970_v9 = vpop.permute.xlu0 %969  ;;  %v1013_v19 = vrot.slane %v1005_v12, %v9435_v11  ;;  %v1020_v20 = vrot.slane %v1006_v13, %v9435_v11 }
 0x18e   :  { %v380_v10 = vpop.permute.xlu1 %379 }
 0x191   :  { %v994_v15 = vpop.permute.xlu0 %993 }
 0x192   :  { %v1021_v16 = vcombine.low %v970_v9, %v994_v15  ;;  %v1022_v17 = vcombine.high %v970_v9, %v994_v15  ;;  %v984_v18 = vpop.permute.xlu1 %983 }
 0x193   :  { %v1073_v34 = vcombine.low %v9353_v47, %v984_v18  ;;  %v1074_v36 = vcombine.high %v9353_v47, %v984_v18 }
 0x194   :  { %v1029_v21 = vrot.slane %v1021_v16, %v9435_v11  ;;  %v1036_v22 = vrot.slane %v1022_v17, %v9435_v11 }
 0x195   :  { %v972_v24 = vpop.permute.xlu0 %971  ;;  %v1081_v48 = vrot.slane %v1073_v34, %v9435_v11  ;;  %v1088_v49 = vrot.slane %v1074_v36, %v9435_v11 }
 0x196   :  { %v1037_v25 = vcombine.low %v1013_v19, %v1029_v21  ;;  %v1038_v26 = vcombine.high %v1013_v19, %v1029_v21  ;;  %v1053_v27 = vcombine.low %v1020_v20, %v1036_v22  ;;  %v1054_v28 = vcombine.high %v1020_v20, %v1036_v22  ;;  %v996_v29 = vpop.permute.xlu1 %995 }
 0x197   :  { %v1089_v30 = vcombine.low %v972_v24, %v996_v29  ;;  %v1090_v37 = vcombine.high %v972_v24, %v996_v29 }
 0x198   :  { %v1045_v40 = vrot.slane %v1037_v25, %v9444_v23  ;;  %v1052_v41 = vrot.slane %v1038_v26, %v9444_v23  ;;  %v9451_v42 = vrot.slane %v1053_v27, %v9444_v23  ;;  %v9454_v43 = vrot.slane %v1054_v28, %v9444_v23 }
 0x199   :  { %v390_v38 = vpop.permute.xlu0 %389  ;;  %v1097_v46 = vrot.slane %v1089_v30, %v9435_v11  ;;  %v1104_v47 = vrot.slane %v1090_v37, %v9435_v11 }
 0x19a   :  { %v392_v45 = vpop.permute.xlu1 %391  ;;  %v413_v55 = vcombine.low %v9339_v39, %v390_v38  ;;  %v414_v56 = vcombine.high %v9339_v39, %v390_v38  ;;  %v1277_v58 = vcombine.low %v1045_v40, %v1052_v41  ;;  %v8160_v59 = vcombine.high %v1045_v40, %v1052_v41 }
 0x19b   :  { %v1293_v60 = vcombine.low %v9451_v42, %v9454_v43  ;;  %v8161_v1 = vcombine.high %v9451_v42, %v9454_v43  ;;  %v1105_v5 = vcombine.low %v1081_v48, %v1097_v46  ;;  %v1106_v6 = vcombine.high %v1081_v48, %v1097_v46 }
 0x19c   :  { %v481_v7 = vcombine.low %v9347_v44, %v392_v45  ;;  %v482_v8 = vcombine.high %v9347_v44, %v392_v45  ;;  %v1121_v14 = vcombine.low %v1088_v49, %v1104_v47  ;;  %v1122_v15 = vcombine.high %v1088_v49, %v1104_v47 }
 0x19d   :  { %v402_v57 = vpop.permute.xlu0 %401  ;;  %v421_v16 = vrot.slane %v413_v55, %v9435_v11  ;;  %v428_v17 = vrot.slane %v414_v56, %v9435_v11 }
 0x19e   :  { %v404_v2 = vpop.permute.xlu1 %403  ;;  %v429_v9 = vcombine.low %v9430_v4, %v402_v57  ;;  %v430_v39 = vcombine.high %v9430_v4, %v402_v57  ;;  %v1113_v4 = vrot.slane %v1105_v5, %v9444_v23  ;;  %v489_v24 = vrot.slane %v481_v7, %v9435_v11 }
 0x19f   :  { %v497_v12 = vcombine.low %v380_v10, %v404_v2  ;;  %v498_v13 = vcombine.high %v380_v10, %v404_v2  ;;  %v1120_v10 = vrot.slane %v1106_v6, %v9444_v23  ;;  %v496_v25 = vrot.slane %v482_v8, %v9435_v11 }
 0x1a0   :  { %v437_v19 = vrot.slane %v429_v9, %v9435_v11  ;;  %v444_v20 = vrot.slane %v430_v39, %v9435_v11  ;;  %v1129_v46 = vrot.slane %v1121_v14, %v9444_v23  ;;  %v1136_v48 = vrot.slane %v1122_v15, %v9444_v23 }
 0x1a1   :  { %v9472_v18 = vpop.permute.xlu0 %381  ;;  %v505_v44 = vrot.slane %v497_v12, %v9435_v11  ;;  %v512_v21 = vrot.slane %v498_v13, %v9435_v11  ;;  %v9499_v57 = vrot.slane %v1277_v58, %v9435_v11  ;;  %v9502_v2 = vrot.slane %v8160_v59, %v9435_v11 }
 0x1a2   :  { %v9478_v22 = vpop.permute.xlu1 %383  ;;  %v445_v26 = vcombine.low %v421_v16, %v437_v19  ;;  %v446_v27 = vcombine.high %v421_v16, %v437_v19  ;;  %v461_v28 = vcombine.low %v428_v17, %v444_v20  ;;  %v462_v29 = vcombine.high %v428_v17, %v444_v20 }
 0x1a3   :  { %v513_v30 = vcombine.low %v489_v24, %v505_v44  ;;  %v514_v34 = vcombine.high %v489_v24, %v505_v44  ;;  %v529_v36 = vcombine.low %v496_v25, %v512_v21  ;;  %v530_v37 = vcombine.high %v496_v25, %v512_v21 }
 0x1a4   :  { %v453_v40 = vrot.slane %v445_v26, %v9444_v23  ;;  %v460_v41 = vrot.slane %v446_v27, %v9444_v23  ;;  %v469_v42 = vrot.slane %v461_v28, %v9444_v23  ;;  %v476_v43 = vrot.slane %v462_v29, %v9444_v23 }
 0x1a5   :  { %v9484_v38 = vpop.permute.xlu0 %973  ;;  %v521_v49 = vrot.slane %v513_v30, %v9444_v23  ;;  %v528_v47 = vrot.slane %v514_v34, %v9444_v23  ;;  %v537_v55 = vrot.slane %v529_v36, %v9444_v23  ;;  %v544_v56 = vrot.slane %v530_v37, %v9444_v23 }
 0x1a6   :  { %v9490_v45 = vpop.permute.xlu1 %975  ;;  %v1345_v5 = vcombine.low %v1113_v4, %v1120_v10  ;;  %v8162_v6 = vcombine.high %v1113_v4, %v1120_v10  ;;  %v9505_v8 = vrot.slane %v1293_v60, %v9435_v11  ;;  %v9508_v9 = vrot.slane %v8161_v1, %v9435_v11 }
 0x1a7   :  { %v685_v39 = vcombine.low %v453_v40, %v460_v41  ;;  %v8152_v12 = vcombine.high %v453_v40, %v460_v41  ;;  %v701_v13 = vcombine.low %v469_v42, %v476_v43  ;;  %v8153_v14 = vcombine.high %v469_v42, %v476_v43 }
 0x1a8   :  { %v1361_v58 = vcombine.low %v1129_v46, %v1136_v48  ;;  %v8163_v16 = vcombine.high %v1129_v46, %v1136_v48  ;;  %v753_v17 = vcombine.low %v521_v49, %v528_v47  ;;  %v8154_v59 = vcombine.high %v521_v49, %v528_v47 }
 0x1a9   :  { %v986_v7 = vpop.permute.xlu0 %985  ;;  %v769_v19 = vcombine.low %v537_v55, %v544_v56  ;;  %v8155_v20 = vcombine.high %v537_v55, %v544_v56  ;;  %v1309_v44 = vcombine.low %v9499_v57, %v9502_v2  ;;  %v1325_v60 = vcombine.low %v9505_v8, %v9508_v9 }
 0x1aa   :  { %v9510_v15 = vpop.permute.xlu1 %987  ;;  %v9517_v1 = vrot.slane %v1345_v5, %v9435_v11  ;;  %v9520_v21 = vrot.slane %v8162_v6, %v9435_v11  ;;  %v9523_v10 = vrot.slane %v685_v39, %v9435_v11  ;;  %v9526_v24 = vrot.slane %v8152_v12, %v9435_v11 }
 0x1ab   :  { %v9529_v25 = vrot.slane %v701_v13, %v9435_v11  ;;  %v9532_v26 = vrot.slane %v8153_v14, %v9435_v11  ;;  %v9535_v27 = vrot.slane %v753_v17, %v9435_v11  ;;  %v9538_v28 = vrot.slane %v8154_v59, %v9435_v11 }
 0x1ac   :  { %v9541_v29 = vrot.slane %v1361_v58, %v9435_v11  ;;  %v9544_v30 = vrot.slane %v8163_v16, %v9435_v11  ;;  %v9547_v34 = vrot.slane %v769_v19, %v9435_v11  ;;  %v9550_v36 = vrot.slane %v8155_v20, %v9435_v11 }
 0x1ad   :  { %v998_v4 = vpop.permute.xlu0 %997  ;;  %v1141_v37 = vcombine.low %v9381_v53, %v986_v7  ;;  %v9554_v40 = vrot.slane %v1309_v44, %v9444_v23  ;;  %v9557_v42 = vrot.slane %v1325_v60, %v9444_v23  ;;  %v1377_v43 = vcombine.low %v9517_v1, %v9520_v21 }
 0x1ae   :  { %v1000_v41 = vpop.permute.xlu1 %999  ;;  %v1393_v46 = vcombine.low %v9541_v29, %v9544_v30  ;;  %v1157_v48 = vcombine.low %v9484_v38, %v998_v4  ;;  %v717_v49 = vcombine.low %v9523_v10, %v9526_v24  ;;  %v1142_v55 = vcombine.high %v9381_v53, %v986_v7 }
 0x1af   :  { %v1158_v56 = vcombine.high %v9484_v38, %v998_v4  ;;  %v1385_v5 = vrot.slane %v1377_v43, %v9444_v23  ;;  %v1225_v12 = vcombine.low %v9490_v45, %v1000_v41  ;;  %v733_v14 = vcombine.low %v9529_v25, %v9532_v26 }
 0x1b0   :  { %v1401_v6 = vrot.slane %v1393_v46, %v9444_v23  ;;  %v1165_v39 = vrot.slane %v1157_v48, %v9435_v11  ;;  %v1149_v16 = vrot.slane %v1141_v37, %v9435_v11  ;;  %v1209_v53 = vcombine.low %v9383_v54, %v9510_v15 }
 0x1b1   :  { %v394_v13 = vpop.permute.xlu0 %393  ;;  %v1341_v38 = vcombine.low %v9554_v40, %v9557_v42  ;;  %v1172_v17 = vrot.slane %v1158_v56, %v9435_v11  ;;  %v1226_v59 = vcombine.high %v9490_v45, %v1000_v41  ;;  %v785_v19 = vcombine.low %v9535_v27, %v9538_v28 }
 0x1b2   :  { %v1409_v7 = vcombine.low %v1385_v5, %v1401_v6  ;;  %v1210_v20 = vcombine.high %v9383_v54, %v9510_v15  ;;  %v549_v44 = vcombine.low %v9367_v50, %v394_v13  ;;  %v550_v60 = vcombine.high %v9367_v50, %v394_v13  ;;  %v396_v4 = vpop.permute.xlu1 %395 }
 0x1b3   :  { %v1156_v37 = vrot.slane %v1142_v55, %v9435_v11  ;;  %v1173_v46 = vcombine.low %v1149_v16, %v1165_v39  ;;  %v9593_v48 = vrot.slane %v1225_v12, %v9435_v11  ;;  %v801_v41 = vcombine.low %v9547_v34, %v9550_v36 }
 0x1b4   :  { %v1549_v43 = vpack.c.bf16 %v1409_v7, %v1341_v38  ;;  %v9602_v15 = vrot.slane %v1209_v53, %v9435_v11  ;;  %v1174_v55 = vcombine.high %v1149_v16, %v1165_v39  ;;  %v9606_v13 = vrot.slane %v1226_v59, %v9435_v11 }
 0x1b5   :  { %v1189_v56 = vcombine.low %v1156_v37, %v1172_v17  ;;  %v9609_v12 = vrot.slane %v1210_v20, %v9435_v11  ;;  %v1190_v38 = vcombine.high %v1156_v37, %v1172_v17  ;;  %v557_v7 = vrot.slane %v549_v44, %v9435_v11 }
 0x1b6   :  { %v2154_v50 = vsel %vm2149_vm1, %v1549_v43, 0  ;;  %v564_v0 = vrot.slane %v550_v60, %v9435_v11  ;;  %v9614_v31 = vrot.slane %v1173_v46, %v9444_v23  ;;  %v1241_v53 = vcombine.low %v9602_v15, %v9593_v48  ;;  %v406_v60 = vpop.permute.xlu0 %405  ;;  %v408_v37 = vpop.permute.xlu1 %407 }
 0x1b7   :  { %8483 = vmatpush3.bf16.xpose.msra.mxu1 %v2154_v50  ;;  %v1242_v39 = vcombine.high %v9602_v15, %v9593_v48  ;;  %v617_v16 = vcombine.low %v9373_v51, %v396_v4  ;;  %v725_v59 = vrot.slane %v717_v49, %v9444_v23  ;;  %v741_v17 = vrot.slane %v733_v14, %v9444_v23 }
 0x1b8   :  { %8488 = vmatprep.subr.bf16.mxu1 %v11597_v52  ;;  %v793_v20 = vrot.slane %v785_v19, %v9444_v23  ;;  %v809_v44 = vrot.slane %v801_v41, %v9444_v23  ;;  %v9627_v43 = vrot.slane %v1174_v55, %v9444_v23  ;;  %v9630_v46 = vrot.slane %v1189_v56, %v9444_v23 }
 0x1b9   :  { %v1257_v48 = vcombine.low %v9609_v12, %v9606_v13  ;;  %v618_v15 = vcombine.high %v9373_v51, %v396_v4  ;;  %v749_v49 = vcombine.low %v725_v59, %v741_v17  ;;  %v1342_v14 = vcombine.high %v9554_v40, %v9557_v42 }
 0x1ba   :  { %v817_v50 = vcombine.low %v793_v20, %v809_v44  ;;  %v1410_v19 = vcombine.high %v1385_v5, %v1401_v6  ;;  %v565_v41 = vcombine.low %v9472_v18, %v406_v60  ;;  %v566_v54 = vcombine.high %v9472_v18, %v406_v60 }
 0x1bb   :  { %v633_v55 = vcombine.low %v9478_v22, %v408_v37  ;;  %v634_v56 = vcombine.high %v9478_v22, %v408_v37  ;;  %v9642_v45 = vrot.slane %v1190_v38, %v9444_v23  ;;  %v625_v58 = vrot.slane %v617_v16, %v9435_v11 }
 0x1bc   :  { %v957_v51 = vpack.c.bf16 %v817_v50, %v749_v49  ;;  %v1550_v4 = vpack.c.bf16 %v1410_v19, %v1342_v14  ;;  %v573_v47 = vrot.slane %v565_v41, %v9435_v11  ;;  %v580_v40 = vrot.slane %v566_v54, %v9435_v11 }
 0x1bd   :  { %v641_v42 = vrot.slane %v633_v55, %v9435_v11  ;;  %v648_v5 = vrot.slane %v634_v56, %v9435_v11  ;;  %v632_v18 = vrot.slane %v618_v15, %v9435_v11  ;;  %v750_v6 = vcombine.high %v725_v59, %v741_v17 }
 0x1be   :  { %8485 = vmatmul.mubr.msk.bf16.vlgmr.msra.gmra.mrb[4].mxu1 %vm2149_vm1, %v957_v51  ;;  %v2201_v22 = vsel %vm2149_vm1, %v1550_v4, 0  ;;  %v818_v38 = vcombine.high %v793_v20, %v809_v44  ;;  %v581_v16 = vcombine.low %v557_v7, %v573_v47  ;;  %v582_v60 = vcombine.high %v557_v7, %v573_v47 }
 0x1bf   :  { %8489 = vmatpush3.bf16.xpose.msra.mxu1 %v2201_v22  ;;  %v597_v37 = vcombine.low %v564_v0, %v580_v40  ;;  %v598_v49 = vcombine.high %v564_v0, %v580_v40  ;;  %v649_v50 = vcombine.low %v625_v58, %v641_v42  ;;  %v650_v14 = vcombine.high %v625_v58, %v641_v42 }
 0x1c0   :  { %v665_v54 = vcombine.low %v632_v18, %v648_v5  ;;  %v666_v19 = vcombine.high %v632_v18, %v648_v5  ;;  %8490 = vmatprep.mubr.msk.bf16.mxu1 %vm9109_vm0, %v11597_v52  ;;  %v589_v15 = vrot.slane %v581_v16, %v9444_v23  ;;  %v596_v41 = vrot.slane %v582_v60, %v9444_v23 }
 0x1c1   :  { %v605_v55 = vrot.slane %v597_v37, %v9444_v23  ;;  %v612_v59 = vrot.slane %v598_v49, %v9444_v23  ;;  %8494 = vmatprep.subr.bf16.mxu1 %v11597_v52  ;;  %v1249_v47 = vrot.slane %v1241_v53, %v9444_v23  ;;  %v1256_v0 = vrot.slane %v1242_v39, %v9444_v23 }
 0x1c2   :  { %v1258_v58 = vcombine.high %v9609_v12, %v9606_v13  ;;  %v958_v7 = vpack.c.bf16 %v818_v38, %v750_v6  ;;  %v657_v17 = vrot.slane %v649_v50, %v9444_v23  ;;  %v664_v20 = vrot.slane %v650_v14, %v9444_v23 }
 0x1c3   :  { %v673_v44 = vrot.slane %v665_v54, %v9444_v23  ;;  %v680_v56 = vrot.slane %v666_v19, %v9444_v23  ;;  %v821_v51 = vcombine.low %v589_v15, %v596_v41  ;;  %v8156_v4 = vcombine.high %v589_v15, %v596_v41 }
 0x1c4   :  { %v837_v40 = vcombine.low %v605_v55, %v612_v59  ;;  %v8157_v42 = vcombine.high %v605_v55, %v612_v59  ;;  %v1413_v53 = vcombine.low %v9614_v31, %v9627_v43  ;;  %v8164_v39 = vcombine.high %v9614_v31, %v9627_v43 }
 0x1c5   :  { %v1310_v13 = vcombine.high %v9499_v57, %v9502_v2  ;;  %v1326_v12 = vcombine.high %v9505_v8, %v9508_v9  ;;  %v1429_v5 = vcombine.low %v9630_v46, %v9642_v45  ;;  %v8165_v18 = vcombine.high %v9630_v46, %v9642_v45 }
 0x1c6   :  { %v1265_v22 = vrot.slane %v1257_v48, %v9444_v23  ;;  %v1272_v6 = vrot.slane %v1258_v58, %v9444_v23  ;;  %8491 = vmatmul.mubr.msk.bf16.vlgmr.msra.gmra.mrb[8].mxu1 %vm2149_vm1, %v958_v7  ;;  %v889_v38 = vcombine.low %v657_v17, %v664_v20  ;;  %v8158_v31 = vcombine.high %v657_v17, %v664_v20 }
 0x1c7   :  { %v905_v43 = vcombine.low %v673_v44, %v680_v56  ;;  %v8159_v16 = vcombine.high %v673_v44, %v680_v56  ;;  %8496 = vmatprep.mubr.msk.bf16.mxu1 %vm9109_vm0, %v11597_v52  ;;  %v9685_v57 = vrot.slane %v821_v51, %v9435_v11  ;;  %v9688_v2 = vrot.slane %v8156_v4, %v9435_v11 }
 0x1c8   :  { %v9691_v8 = vrot.slane %v837_v40, %v9435_v11  ;;  %v9694_v9 = vrot.slane %v8157_v42, %v9435_v11  ;;  %v1481_v45 = vcombine.low %v1249_v47, %v1256_v0  ;;  %v8166_v46 = vcombine.high %v1249_v47, %v1256_v0 }
 0x1c9   :  { %v1324_v48 = vrot.slane %v1310_v13, %v9444_v23  ;;  %v1340_v60 = vrot.slane %v1326_v12, %v9444_v23  ;;  %v1497_v37 = vcombine.low %v1265_v22, %v1272_v6  ;;  %v8167_v49 = vcombine.high %v1265_v22, %v1272_v6 }
 0x1ca   :  { %v1378_v50 = vcombine.high %v9517_v1, %v9520_v21  ;;  %v1394_v14 = vcombine.high %v9541_v29, %v9544_v30  ;;  %v9703_v54 = vrot.slane %v889_v38, %v9435_v11  ;;  %v9706_v19 = vrot.slane %v8158_v31, %v9435_v11 }
 0x1cb   :  { %v9709_v15 = vrot.slane %v905_v43, %v9435_v11  ;;  %v9712_v41 = vrot.slane %v8159_v16, %v9435_v11  ;;  %v853_v55 = vcombine.low %v9685_v57, %v9688_v2  ;;  %v869_v1 = vcombine.low %v9691_v8, %v9694_v9 }
 0x1cc   :  { %v1392_v21 = vrot.slane %v1378_v50, %v9444_v23  ;;  %v1408_v29 = vrot.slane %v1394_v14, %v9444_v23  ;;  %v1343_v30 = vcombine.low %v1324_v48, %v1340_v60  ;;  %v1420_v59 = vrot.slane %v1413_v53, %v9435_v11 }
 0x1cd   :  { %v1428_v47 = vrot.slane %v8164_v39, %v9435_v11  ;;  %v1436_v0 = vrot.slane %v1429_v5, %v9435_v11  ;;  %v11614_v7 = vcombine.high %v9523_v10, %v9526_v24  ;;  %v11615_v20 = vcombine.high %v9529_v25, %v9532_v26 }
 0x1ce   :  { %v1411_v58 = vcombine.low %v1392_v21, %v1408_v29  ;;  %v1444_v56 = vrot.slane %v8165_v18, %v9435_v11  ;;  %v1488_v4 = vrot.slane %v1481_v45, %v9435_v11  ;;  %v1496_v40 = vrot.slane %v8166_v46, %v9435_v11 }
 0x1cf   :  { %v9727_v17 = vrot.slane %v11614_v7, %v9444_v23  ;;  %v9733_v44 = vrot.slane %v11615_v20, %v9444_v23  ;;  %v1445_v51 = vcombine.low %v1420_v59, %v1428_v47  ;;  %v1504_v42 = vrot.slane %v1497_v37, %v9435_v11 }
 0x1d0   :  { %v1551_v53 = vpack.c.bf16 %v1411_v58, %v1343_v30  ;;  %v11616_v10 = vcombine.high %v9535_v27, %v9538_v28  ;;  %v11617_v25 = vcombine.high %v9547_v34, %v9550_v36  ;;  %v1461_v39 = vcombine.low %v1436_v0, %v1444_v56 }
 0x1d1   :  { %v921_v13 = vcombine.low %v9703_v54, %v9706_v19  ;;  %v1453_v12 = vrot.slane %v1445_v51, %v9444_v23  ;;  %v1512_v5 = vrot.slane %v8167_v49, %v9435_v11  ;;  %v1513_v18 = vcombine.low %v1488_v4, %v1496_v40 }
 0x1d2   :  { %v800_v24 = vrot.slane %v11616_v10, %v9444_v23  ;;  %v816_v26 = vrot.slane %v11617_v25, %v9444_v23  ;;  %v937_v22 = vcombine.low %v9709_v15, %v9712_v41  ;;  %v2248_v27 = vsel %vm2149_vm1, %v1551_v53, 0 }
 0x1d3   :  { %v1412_v28 = vcombine.high %v1392_v21, %v1408_v29  ;;  %v1469_v6 = vrot.slane %v1461_v39, %v9444_v23  ;;  %v9756_v34 = vrot.slane %v853_v55, %v9444_v23  ;;  %v9759_v36 = vrot.slane %v869_v1, %v9444_v23  ;;  %8495 = vmatpush3.bf16.xpose.msra.mxu1 %v2248_v27 }
 0x1d4   :  { %v1521_v38 = vrot.slane %v1513_v18, %v9444_v23  ;;  %v1529_v31 = vcombine.low %v1504_v42, %v1512_v5  ;;  %v751_v43 = vcombine.low %v9727_v17, %v9733_v44  ;;  %v819_v16 = vcombine.low %v800_v24, %v816_v26  ;;  %8500 = vmatprep.subr.bf16.mxu1 %v11597_v52 }
 0x1d5   :  { %v1344_v45 = vcombine.high %v1324_v48, %v1340_v60  ;;  %v1446_v46 = vcombine.high %v1420_v59, %v1428_v47  ;;  %v1478_v37 = vcombine.high %v1453_v12, %v1469_v6  ;;  %v1462_v50 = vcombine.high %v1436_v0, %v1444_v56 }
 0x1d6   :  { %v1537_v49 = vrot.slane %v1529_v31, %v9444_v23  ;;  %v1514_v14 = vcombine.high %v1488_v4, %v1496_v40  ;;  %v929_v55 = vrot.slane %v921_v13, %v9444_v23  ;;  %v945_v1 = vrot.slane %v937_v22, %v9444_v23 }
 0x1d7   :  { %v1552_v21 = vpack.c.bf16 %v1412_v28, %v1344_v45  ;;  %v1530_v29 = vcombine.high %v1504_v42, %v1512_v5  ;;  %v1460_v58 = vrot.slane %v1446_v46, %v9444_v23  ;;  %v1476_v7 = vrot.slane %v1462_v50, %v9444_v23  ;;  %v1564_v45 = vpop.permute.xlu0 %1563 }
 0x1d8   :  { %v1546_v30 = vcombine.high %v1521_v38, %v1537_v49  ;;  %v1528_v20 = vrot.slane %v1514_v14, %v9444_v23  ;;  %v959_v48 = vpack.c.bf16 %v819_v16, %v751_v43  ;;  %v886_v0 = vcombine.high %v9756_v34, %v9759_v36  ;;  %v1562_v16 = vpop.permute.xlu1 %1561 }
 0x1d9   :  { %v1544_v60 = vrot.slane %v1530_v29, %v9444_v23  ;;  %v2295_v47 = vsel %vm2149_vm1, %v1552_v21, 0  ;;  %v1477_v56 = vcombine.low %v1453_v12, %v1469_v6  ;;  %v1545_v51 = vcombine.low %v1521_v38, %v1537_v49 }
 0x1da   :  { %v1554_v59 = vpack.c.bf16 %v1546_v30, %v1478_v37  ;;  %8497 = vmatmul.mubr.msk.bf16.vlgmr.msra.gmra.mrb[12].mxu1 %vm2149_vm1, %v959_v48  ;;  %v954_v40 = vcombine.high %v929_v55, %v945_v1  ;;  %v1480_v42 = vcombine.high %v1460_v58, %v1476_v7  ;;  %v752_v10 = vcombine.high %v9727_v17, %v9733_v44 }
 0x1db   :  { %8501 = vmatpush3.bf16.xpose.msra.mxu1 %v2295_v47  ;;  %8502 = vmatprep.mubr.msk.bf16.mxu1 %vm9109_vm0, %v11597_v52  ;;  %v1548_v53 = vcombine.high %v1528_v20, %v1544_v60  ;;  %v820_v25 = vcombine.high %v800_v24, %v816_v26  ;;  %v854_v39 = vcombine.high %v9685_v57, %v9688_v2  ;;  %v1586_v37 = vpop.permute.xlu0 %1585 }
 0x1dc   :  { %v2389_v4 = vsel %vm2149_vm1, %v1554_v59, 0  ;;  %8506 = vmatprep.subr.bf16.mxu1 %v11597_v52  ;;  %v870_v13 = vcombine.high %v9691_v8, %v9694_v9  ;;  %v922_v12 = vcombine.high %v9703_v54, %v9706_v19  ;;  %v938_v5 = vcombine.high %v9709_v15, %v9712_v41  ;;  %v1574_v46 = vpop.permute.xlu1 %1573 }
 0x1dd   :  { %8513 = vmatpush3.bf16.xpose.msra.mxu0 %v2389_v4  ;;  %v1553_v18 = vpack.c.bf16 %v1545_v51, %v1477_v56  ;;  %v962_v22 = vpack.c.bf16 %v954_v40, %v886_v0  ;;  %v1556_v17 = vpack.c.bf16 %v1548_v53, %v1480_v42  ;;  %v960_v44 = vpack.c.bf16 %v820_v25, %v752_v10 }
 0x1de   :  { %8524 = vmatprep.subr.bf16.mxu0 %v11597_v52  ;;  %v868_v24 = vrot.slane %v854_v39, %v9444_v23  ;;  %v884_v26 = vrot.slane %v870_v13, %v9444_v23  ;;  %v936_v57 = vrot.slane %v922_v12, %v9444_v23  ;;  %v952_v2 = vrot.slane %v938_v5, %v9444_v23 }
 0x1df   :  { %v2342_v8 = vsel %vm2149_vm1, %v1553_v18, 0  ;;  %v1479_v9 = vcombine.low %v1460_v58, %v1476_v7  ;;  %v1547_v54 = vcombine.low %v1528_v20, %v1544_v60  ;;  %v2483_v19 = vsel %vm2149_vm1, %v1556_v17, 0 }
 0x1e0   :  { %v885_v15 = vcombine.low %v9756_v34, %v9759_v36  ;;  %v953_v41 = vcombine.low %v929_v55, %v945_v1  ;;  %v888_v27 = vcombine.high %v868_v24, %v884_v26  ;;  %v956_v28 = vcombine.high %v936_v57, %v952_v2  ;;  %v1576_v7 = vpop.permute.xlu1 %1575 }
 0x1e1   :  { %v1555_v6 = vpack.c.bf16 %v1547_v54, %v1479_v9  ;;  %v887_v34 = vcombine.low %v868_v24, %v884_v26  ;;  %v955_v36 = vcombine.low %v936_v57, %v952_v2  ;;  %v1597_v49 = vcombine.low %v9410_v61, %v1574_v46 }
 0x1e2   :  { %8503 = vmatmul.mubr.msk.bf16.vlgmr.msra.gmra.mrb[16].mxu1 %vm2149_vm1, %v960_v44  ;;  %v961_v38 = vpack.c.bf16 %v953_v41, %v885_v15  ;;  %v964_v31 = vpack.c.bf16 %v956_v28, %v888_v27  ;;  %v1598_v50 = vcombine.high %v9410_v61, %v1574_v46  ;;  %v1613_v14 = vcombine.low %v1562_v16, %v1586_v37 }
 0x1e3   :  { %8507 = vmatpush3.bf16.xpose.msra.mxu1 %v2342_v8  ;;  %8508 = vmatprep.mubr.msk.bf16.mxu1 %vm9109_vm0, %v11597_v52  ;;  %v2436_v43 = vsel %vm2149_vm1, %v1555_v6, 0  ;;  %v1614_v55 = vcombine.high %v1562_v16, %v1586_v37  ;;  %v963_v1 = vpack.c.bf16 %v955_v36, %v887_v34  ;;  %v1605_v21 = vrot.slane %v1597_v49, %v9435_v11 }
 0x1e4   :  { %8515 = vmatmul.mubr.msk.bf16.vlgmr.msra.gmra.mrb[8].mxu0 %vm2149_vm1, %v962_v22  ;;  %8518 = vmatprep.subr.bf16.mxu1 %v11597_v52  ;;  %v1612_v29 = vrot.slane %v1598_v50, %v9435_v11  ;;  %v1621_v30 = vrot.slane %v1613_v14, %v9435_v11  ;;  %v1665_v20 = vcombine.low %v9414_v63, %v1576_v7  ;;  %v1588_v40 = vpop.permute.xlu1 %1587 }
 0x1e5   :  { %8525 = vmatpush3.bf16.xpose.msra.mxu0 %v2483_v19  ;;  %8526 = vmatprep.mubr.msk.bf16.mxu0 %vm9109_vm0, %v11597_v52  ;;  %v1628_v58 = vrot.slane %v1614_v55, %v9435_v11  ;;  %v1666_v48 = vcombine.high %v9414_v63, %v1576_v7  ;;  %v1681_v53 = vcombine.low %v1564_v45, %v1588_v40 }
 0x1e6   :  { %8536 = vmatprep.subr.bf16.mxu0 %v11597_v52  ;;  %v1629_v60 = vcombine.low %v1605_v21, %v1621_v30  ;;  %v1630_v61 = vcombine.high %v1605_v21, %v1621_v30  ;;  %v1673_v51 = vrot.slane %v1665_v20, %v9435_v11  ;;  %v1682_v10 = vcombine.high %v1564_v45, %v1588_v40 }
 0x1e7   :  { %v1645_v59 = vcombine.low %v1612_v29, %v1628_v58  ;;  %v1646_v47 = vcombine.high %v1612_v29, %v1628_v58  ;;  %v1680_v4 = vrot.slane %v1666_v48, %v9435_v11  ;;  %v1689_v5 = vrot.slane %v1681_v53, %v9435_v11 }
 0x1e8   :  { %v1637_v0 = vrot.slane %v1629_v60, %v9444_v23  ;;  %v1644_v56 = vrot.slane %v1630_v61, %v9444_v23  ;;  %v1696_v18 = vrot.slane %v1682_v10, %v9435_v11  ;;  %v11618_v53 = vlaneseq }
 0x1e9   :  { %v1653_v42 = vrot.slane %v1645_v59, %v9444_v23  ;;  %v1660_v63 = vrot.slane %v1646_v47, %v9444_v23  ;;  %v1697_v26 = vcombine.low %v1673_v51, %v1689_v5  ;;  %v1698_v57 = vcombine.high %v1673_v51, %v1689_v5 }
 0x1ea   :  { %8509 = vmatmul.mubr.msk.bf16.vlgmr.msra.gmra.mrb[20].mxu1 %vm2149_vm1, %v961_v38  ;;  %v1869_v25 = vcombine.low %v1637_v0, %v1644_v56  ;;  %v8168_v39 = vcombine.high %v1637_v0, %v1644_v56  ;;  %v1713_v2 = vcombine.low %v1680_v4, %v1696_v18  ;;  %v1714_v8 = vcombine.high %v1680_v4, %v1696_v18 }
 0x1eb   :  { %8519 = vmatpush3.bf16.xpose.msra.mxu1 %v2436_v43  ;;  %8520 = vmatprep.mubr.msk.bf16.mxu1 %vm9109_vm0, %v11597_v52  ;;  %v1885_v13 = vcombine.low %v1653_v42, %v1660_v63  ;;  %v8169_v12 = vcombine.high %v1653_v42, %v1660_v63  ;;  %v1705_v19 = vrot.slane %v1697_v26, %v9444_v23  ;;  %v2546_v10 = vand.u32 127, %v11618_v53 }
 0x1ec   :  { %8527 = vmatmul.mubr.msk.bf16.vlgmr.msra.gmra.mrb[12].mxu0 %vm2149_vm1, %v964_v31  ;;  %8530 = vmatprep.subr.bf16.mxu1 %v11597_v52  ;;  %v1876_v22 = vrot.slane %v1869_v25, %v9435_v11  ;;  %v1884_v17 = vrot.slane %v8168_v39, %v9435_v11  ;;  %v1712_v15 = vrot.slane %v1698_v57, %v9444_v23  ;;  %v2544_v25 = vadd.s32 8, %v9326_v32 }
 0x1ed   :  { %8538 = vmatprep.mubr.msk.bf16.mxu0 %vm9109_vm0, %v11597_v52  ;;  %v1892_v44 = vrot.slane %v1885_v13, %v9435_v11  ;;  %v1900_v24 = vrot.slane %v8169_v12, %v9435_v11  ;;  %v1721_v41 = vrot.slane %v1713_v2, %v9444_v23  ;;  %v1728_v27 = vrot.slane %v1714_v8, %v9444_v23 }
 0x1ee   :  { %v1901_v9 = vcombine.low %v1876_v22, %v1884_v17  ;;  %v1937_v28 = vcombine.low %v1705_v19, %v1712_v15  ;;  %v8170_v6 = vcombine.high %v1705_v19, %v1712_v15  ;;  %v1902_v7 = vcombine.high %v1876_v22, %v1884_v17 }
 0x1ef   :  { %v1917_v54 = vcombine.low %v1892_v44, %v1900_v24  ;;  %v1953_v38 = vcombine.low %v1721_v41, %v1728_v27  ;;  %v8171_v31 = vcombine.high %v1721_v41, %v1728_v27  ;;  %v1918_v20 = vcombine.high %v1892_v44, %v1900_v24 }
 0x1f0   :  { %v1909_v43 = vrot.slane %v1901_v9, %v9444_v23  ;;  %v1944_v45 = vrot.slane %v1937_v28, %v9435_v11  ;;  %v1952_v34 = vrot.slane %v8170_v6, %v9435_v11  ;;  %v1916_v61 = vrot.slane %v1902_v7, %v9444_v23 }
 0x1f1   :  { %v1925_v16 = vrot.slane %v1917_v54, %v9444_v23  ;;  %v1960_v36 = vrot.slane %v1953_v38, %v9435_v11  ;;  %v1968_v46 = vrot.slane %v8171_v31, %v9435_v11  ;;  %v1932_v59 = vrot.slane %v1918_v20, %v9444_v23 }
 0x1f2   :  { %8521 = vmatmul.mubr.msk.bf16.vlgmr.msra.gmra.mrb[24].mxu1 %vm2149_vm1, %v963_v1  ;;  %v1969_v37 = vcombine.low %v1944_v45, %v1952_v34  ;;  %v1970_v48 = vcombine.high %v1944_v45, %v1952_v34  ;;  %vm9863_vm2 = vcmp.le.s32.totalorder %v2546_v10, %v9326_v32  ;;  %vm9867_vm4 = vcmp.le.s32.totalorder %v2546_v10, %v2544_v25 }
 0x1f3   :  { %8532 = vmatprep.mubr.msk.bf16.mxu1 %vm9109_vm0, %v11597_v52  ;;  %v1985_v49 = vcombine.low %v1960_v36, %v1968_v46  ;;  %v1933_v50 = vcombine.low %v1909_v43, %v1925_v16  ;;  %v1934_v1 = vcombine.high %v1909_v43, %v1925_v16  ;;  %v1986_v60 = vcombine.high %v1960_v36, %v1968_v46 }
 0x1f4   :  { %v1977_v14 = vrot.slane %v1969_v37, %v9444_v23  ;;  %v1984_v47 = vrot.slane %v1970_v48, %v9444_v23  ;;  %v1935_v56 = vcombine.low %v1916_v61, %v1932_v59  ;;  %v1936_v4 = vcombine.high %v1916_v61, %v1932_v59 }
 0x1f5   :  { %v1993_v55 = vrot.slane %v1985_v49, %v9444_v23  ;;  %v2000_v0 = vrot.slane %v1986_v60, %v9444_v23 }
 0x1f7   :  { %v2001_v21 = vcombine.low %v1977_v14, %v1993_v55  ;;  %v2002_v29 = vcombine.high %v1977_v14, %v1993_v55  ;;  %v2003_v51 = vcombine.low %v1984_v47, %v2000_v0  ;;  %v2004_v40 = vcombine.high %v1984_v47, %v2000_v0 }
 0x1f9   :  { %v2141_v30 = vpack.c.bf16 %v2001_v21, %v1933_v50  ;;  %v2142_v58 = vpack.c.bf16 %v2002_v29, %v1934_v1  ;;  %v9856_v42 = vpack.c.bf16 %v2003_v51, %v1935_v56  ;;  %v9858_v63 = vpack.c.bf16 %v2004_v40, %v1936_v4 }
 0x1fb   :  { %8531 = vmatpush3.bf16.msra.mxu1 %v2141_v30  ;;  %8537 = vmatpush3.bf16.msra.mxu0 %v2142_v58 }
 0x1fc   :  { %8542 = vmatprep.subr.bf16.mxu1 %v11597_v52  ;;  %8548 = vmatprep.subr.bf16.mxu0 %v11597_v52 }
 0x291   :  { %v2190_v39 = vpop.f32.mrb[4].mxu1 }
 0x292   :  { %v2526_v12 = vmul.f32 0.17677669, %v2190_v39  ;;  %v8486_v5 = vpop.f32.mrb[5].mxu1 }
 0x293   :  { %v2193_v18 = vpop.f32.mrb[6].mxu1 }
 0x294   :  { %v2527_v17 = vmul.f32 0.17677669, %v2193_v18  ;;  %v8487_v44 = vpop.f32.mrb[7].mxu1  ;;  %v9873_v24 = vsel %vm9863_vm2, %v2526_v12, -1e+30 }
 0x295   :  { %v2570_v32 = vsel %vm2569_vm3, %v9873_v24, -inf }
 0x296   :  { %2571 = vmax.xlane.f32.xlu0 %v2570_v32  ;;  %v9879_v26 = vsel %vm9867_vm4, %v2527_v17, -1e+30 }
 0x297   :  { %v2573_v57 = vsel %vm2569_vm3, %v9879_v26, -inf }
 0x298   :  { %2574 = vmax.xlane.f32.xlu1 %v2573_v57 }
 0x299   :  { %v2237_v2 = vpop.f32.mrb[8].mxu1 }
 0x29a   :  { %v2528_v8 = vmul.f32 0.17677669, %v2237_v2  ;;  %v8492_v9 = vpop.f32.mrb[9].mxu1 }
 0x29b   :  { %v2240_v54 = vpop.f32.mrb[10].mxu1 }
 0x29c   :  { %v2529_v19 = vmul.f32 0.17677669, %v2240_v54  ;;  %v8493_v15 = vpop.f32.mrb[11].mxu1  ;;  %v9885_v41 = vsel %vm9863_vm2, %v2528_v8, -1e+30 }
 0x29d   :  { %v2576_v27 = vsel %vm2569_vm3, %v9885_v41, -inf }
 0x29e   :  { %2577 = vmax.xlane.f32.xlu0 %v2576_v27  ;;  %v9891_v28 = vsel %vm9867_vm4, %v2529_v19, -1e+30 }
 0x29f   :  { %v2579_v6 = vsel %vm2569_vm3, %v9891_v28, -inf }
 0x2a2   :  { %2580 = vmax.xlane.f32.xlu0 %v2579_v6 }
 0x2ad   :  { %v2284_v38 = vpop.f32.mrb[12].mxu1 }
 0x2ae   :  { %v8498_v31 = vpop.f32.mrb[13].mxu1  ;;  %v2530_v46 = vmul.f32 0.17677669, %v2284_v38 }
 0x2af   :  { %v2287_v43 = vpop.f32.mrb[14].mxu1 }
 0x2b0   :  { %v8499_v16 = vpop.f32.mrb[15].mxu1  ;;  %v2531_v14 = vmul.f32 0.17677669, %v2287_v43  ;;  %v9907_v20 = vsel %vm9863_vm2, %v2530_v46, -1e+30 }
 0x2b1   :  { %v2582_v47 = vsel %vm2569_vm3, %v9907_v20, -inf }
 0x2b2   :  { %v9913_v61 = vsel %vm9867_vm4, %v2531_v14, -1e+30 }
 0x2b3   :  { %v2585_v25 = vsel %vm2569_vm3, %v9913_v61, -inf }
 0x2b5   :  { %v2331_v45 = vpop.f32.mrb[16].mxu1 }
 0x2b6   :  { %v8504_v36 = vpop.f32.mrb[17].mxu1  ;;  %v2532_v56 = vmul.f32 0.17677669, %v2331_v45 }
 0x2b7   :  { %v2425_v34 = vpop.f32.mrb[8].mxu0  ;;  %v2334_v50 = vpop.f32.mrb[18].mxu1 }
 0x2b8   :  { %v2536_v37 = vmul.f32 0.17677669, %v2425_v34  ;;  %v8516_v49 = vpop.f32.mrb[9].mxu0  ;;  %v8505_v1 = vpop.f32.mrb[19].mxu1  ;;  %v2533_v53 = vmul.f32 0.17677669, %v2334_v50 }
 0x2b9   :  { %v2428_v55 = vpop.f32.mrb[10].mxu0  ;;  %v9931_v57 = vsel %vm9863_vm2, %v2532_v56, -1e+30  ;;  %v9975_v49 = vpop.permute.xlu1 %1565 }
 0x2ba   :  { %v2537_v21 = vmul.f32 0.17677669, %v2428_v55  ;;  %v8517_v29 = vpop.f32.mrb[11].mxu0  ;;  %v9897_v30 = vsel %vm9863_vm2, %v2536_v37, -1e+30  ;;  %v2588_v15 = vsel %vm2569_vm3, %v9931_v57, -inf }
 0x2bb   :  { %v2600_v58 = vsel %vm2569_vm3, %v9897_v30, -inf  ;;  %v9937_v54 = vsel %vm9867_vm4, %v2533_v53, -1e+30 }
 0x2bc   :  { %2601 = vmax.xlane.f32.xlu1 %v2600_v58  ;;  %v9903_v7 = vsel %vm9867_vm4, %v2537_v21, -1e+30  ;;  %v2591_v43 = vsel %vm2569_vm3, %v9937_v54, -inf }
 0x2bd   :  { %v2603_v48 = vsel %vm2569_vm3, %v9903_v7, -inf  ;;  %v2378_v60 = vpop.f32.mrb[20].mxu1 }
 0x2be   :  { %2604 = vmax.xlane.f32.xlu0 %v2603_v48  ;;  %v8510_v0 = vpop.f32.mrb[21].mxu1  ;;  %v2534_v44 = vmul.f32 0.17677669, %v2378_v60 }
 0x2bf   :  { %v2519_v59 = vpop.f32.mrb[12].mxu0  ;;  %v2381_v40 = vpop.f32.mrb[22].mxu1 }
 0x2c0   :  { %v2540_v51 = vmul.f32 0.17677669, %v2519_v59  ;;  %2583 = vmax.xlane.f32.xlu1 %v2582_v47  ;;  %v8528_v4 = vpop.f32.mrb[13].mxu0  ;;  %v8511_v39 = vpop.f32.mrb[23].mxu1  ;;  %v2535_v8 = vmul.f32 0.17677669, %v2381_v40 }
 0x2c1   :  { %v2522_v10 = vpop.f32.mrb[14].mxu0  ;;  %v9943_v38 = vsel %vm9863_vm2, %v2534_v44, -1e+30 }
 0x2c2   :  { %v2541_v12 = vmul.f32 0.17677669, %v2522_v10  ;;  %2586 = vmax.xlane.f32.xlu0 %v2585_v25  ;;  %v8529_v5 = vpop.f32.mrb[15].mxu0  ;;  %v9921_v18 = vsel %vm9863_vm2, %v2540_v51, -1e+30  ;;  %v2594_v36 = vsel %vm2569_vm3, %v9943_v38, -inf }
 0x2c3   :  { %v2612_v17 = vsel %vm2569_vm3, %v9921_v18, -inf  ;;  %v9953_v34 = vsel %vm9867_vm4, %v2535_v8, -1e+30 }
 0x2c4   :  { %2613 = vmax.xlane.f32.xlu1 %v2612_v17  ;;  %v9927_v32 = vsel %vm9867_vm4, %v2541_v12, -1e+30  ;;  %v2597_v37 = vsel %vm2569_vm3, %v9953_v34, -inf }
 0x2c5   :  { %v2615_v2 = vsel %vm2569_vm3, %v9927_v32, -inf  ;;  %v2472_v9 = vpop.f32.mrb[24].mxu1 }
 0x2c6   :  { %2616 = vmax.xlane.f32.xlu0 %v2615_v2  ;;  %v2538_v19 = vmul.f32 0.17677669, %v2472_v9  ;;  %v8522_v27 = vpop.f32.mrb[25].mxu1 }
 0x2c7   :  { %v2475_v6 = vpop.f32.mrb[26].mxu1 }
 0x2c8   :  { %2589 = vmax.xlane.f32.xlu1 %v2588_v15  ;;  %v2539_v31 = vmul.f32 0.17677669, %v2475_v6  ;;  %v8523_v16 = vpop.f32.mrb[27].mxu1  ;;  %v9949_v45 = vsel %vm9863_vm2, %v2538_v19, -1e+30 }
 0x2c9   :  { %v2606_v13 = vsel %vm2569_vm3, %v9949_v45, -inf }
 0x2ca   :  { %2592 = vmax.xlane.f32.xlu0 %v2591_v43  ;;  %v9959_v46 = vsel %vm9867_vm4, %v2539_v31, -1e+30 }
 0x2cb   :  { %v2609_v22 = vsel %vm2569_vm3, %v9959_v46, -inf }
 0x2cc   :  { %2595 = vmax.xlane.f32.xlu1 %v2594_v36 }
 0x2ce   :  { %2598 = vmax.xlane.f32.xlu0 %v2597_v37 }
 0x2dd   :  { %1577 = vrot.lane.b32.xlu1 %v9426_v3, %s9106_s30 }
 0x2e4   :  { %1567 = vrot.lane.b32.xlu0 %v9412_v62, %s9105_s3 }
 0x301   :  { %2607 = vmax.xlane.f32.xlu1 %v2606_v13 }
 0x303   :  { %2610 = vmax.xlane.f32.xlu0 %v2609_v22 }
 0x312   :  { %1579 = vrot.lane.b32.xlu1 %v9412_v62, %s9106_s30 }
 0x319   :  { %1589 = vrot.lane.b32.xlu0 %v9426_v3, %s9107_s4 }
 0x323   :  { %v2572_v50 = vpop.xlane.xlu0 %2571 }
 0x324   :  { %v2618_v14 = vsub.f32 %v9873_v24, %v2572_v50 }
 0x325   :  { %v2575_v55 = vpop.xlane.xlu1 %2574 }
 0x326   :  { %v2634_v1 = vmul.f32 1.442695, %v2618_v14  ;;  %v2619_v21 = vsub.f32 %v9879_v26, %v2575_v55 }
 0x328   :  { %8923 = vpow2.f32 %v2634_v1  ;;  %v2636_v29 = vmul.f32 1.442695, %v2619_v21 }
 0x32a   :  { %8925 = vpow2.f32 %v2636_v29 }
 0x32b   :  { %v2578_v58 = vpop.xlane.xlu0 %2577 }
 0x32c   :  { %v2620_v48 = vsub.f32 %v9885_v41, %v2578_v58 }
 0x32e   :  { %v2638_v60 = vmul.f32 1.442695, %v2620_v48 }
 0x32f   :  { %v2581_v59 = vpop.xlane.xlu0 %2580 }
 0x330   :  { %8927 = vpow2.f32 %v2638_v60  ;;  %v2621_v47 = vsub.f32 %v9891_v28, %v2581_v59 }
 0x332   :  { %v9981_v0 = vpop.eup %8923  ;;  %v2640_v56 = vmul.f32 1.442695, %v2621_v47 }
 0x333   :  { %v2666_v24 = vsel %vm2569_vm3, %v9981_v0, 0.0 }
 0x334   :  { %v9985_v51 = vpop.eup %8925  ;;  %8929 = vpow2.f32 %v2640_v56 }
 0x335   :  { %v2669_v26 = vsel %vm2569_vm3, %v9985_v51, 0.0 }
 0x336   :  { %2667 = vadd.xlane.f32.xlu1 %v2666_v24 }
 0x338   :  { %2670 = vadd.xlane.f32.xlu0 %v2669_v26 }
 0x33a   :  { %v9989_v41 = vpop.eup %8927 }
 0x33b   :  { %v2672_v4 = vsel %vm2569_vm3, %v9989_v41, 0.0 }
 0x33c   :  { %2673 = vadd.xlane.f32.xlu1 %v2672_v4 }
 0x33e   :  { %v9993_v28 = vpop.eup %8929 }
 0x33f   :  { %v2675_v40 = vsel %vm2569_vm3, %v9993_v28, 0.0 }
 0x340   :  { %2676 = vadd.xlane.f32.xlu0 %v2675_v40 }
 0x349   :  { %v2602_v53 = vpop.xlane.xlu1 %2601 }
 0x34a   :  { %v2628_v10 = vsub.f32 %v9897_v30, %v2602_v53 }
 0x34b   :  { %v2605_v25 = vpop.xlane.xlu0 %2604 }
 0x34c   :  { %v2654_v39 = vmul.f32 1.442695, %v2628_v10  ;;  %v2629_v12 = vsub.f32 %v9903_v7, %v2605_v25 }
 0x34d   :  { %v2584_v5 = vpop.xlane.xlu1 %2583 }
 0x34e   :  { %8931 = vpow2.f32 %v2654_v39  ;;  %v2656_v17 = vmul.f32 1.442695, %v2629_v12  ;;  %v2622_v44 = vsub.f32 %v9907_v20, %v2584_v5 }
 0x34f   :  { %v2587_v2 = vpop.xlane.xlu0 %2586 }
 0x350   :  { %8933 = vpow2.f32 %v2656_v17  ;;  %v2642_v8 = vmul.f32 1.442695, %v2622_v44  ;;  %v2623_v9 = vsub.f32 %v9913_v61, %v2587_v2 }
 0x351   :  { %v2614_v19 = vpop.xlane.xlu1 %2613 }
 0x352   :  { %8935 = vpow2.f32 %v2642_v8  ;;  %v2644_v15 = vmul.f32 1.442695, %v2623_v9  ;;  %v2632_v26 = vsub.f32 %v9921_v18, %v2614_v19 }
 0x353   :  { %v2617_v27 = vpop.xlane.xlu0 %2616 }
 0x354   :  { %8937 = vpow2.f32 %v2644_v15  ;;  %v2662_v10 = vmul.f32 1.442695, %v2632_v26  ;;  %v2633_v39 = vsub.f32 %v9927_v32, %v2617_v27 }
 0x355   :  { %v2590_v30 = vpop.xlane.xlu1 %2589 }
 0x356   :  { %v2624_v6 = vsub.f32 %v9931_v57, %v2590_v30  ;;  %v2664_v44 = vmul.f32 1.442695, %v2633_v39 }
 0x357   :  { %v2593_v31 = vpop.xlane.xlu0 %2592 }
 0x358   :  { %v10002_v7 = vpop.eup %8931  ;;  %v2646_v43 = vmul.f32 1.442695, %v2624_v6  ;;  %v2625_v16 = vsub.f32 %v9937_v54, %v2593_v31 }
 0x359   :  { %v2596_v20 = vpop.xlane.xlu1 %2595  ;;  %v2696_v36 = vsel %vm2569_vm3, %v10002_v7, 0.0 }
 0x35a   :  { %v10007_v37 = vpop.eup %8933  ;;  %8939 = vpow2.f32 %v2646_v43  ;;  %v2648_v61 = vmul.f32 1.442695, %v2625_v16  ;;  %v2626_v13 = vsub.f32 %v9943_v38, %v2596_v20  ;;  %2697 = vadd.xlane.f32.xlu1 %v2696_v36 }
 0x35b   :  { %v2599_v22 = vpop.xlane.xlu0 %2598  ;;  %v2699_v57 = vsel %vm2569_vm3, %v10007_v37, 0.0 }
 0x35c   :  { %v10012_v50 = vpop.eup %8935  ;;  %8941 = vpow2.f32 %v2648_v61  ;;  %v2650_v14 = vmul.f32 1.442695, %v2626_v13  ;;  %v2627_v54 = vsub.f32 %v9953_v34, %v2599_v22  ;;  %2700 = vadd.xlane.f32.xlu0 %v2699_v57 }
 0x35d   :  { %v2678_v21 = vsel %vm2569_vm3, %v10012_v50, 0.0  ;;  %v10039_v24 = vpop.permute.xlu1 %1577 }
 0x35e   :  { %v10015_v55 = vpop.eup %8937  ;;  %8943 = vpow2.f32 %v2650_v14  ;;  %v2652_v1 = vmul.f32 1.442695, %v2627_v54 }
 0x35f   :  { %v2681_v38 = vsel %vm2569_vm3, %v10015_v55, 0.0  ;;  %v10042_v4 = vpop.permute.xlu0 %1567 }
 0x360   :  { %8945 = vpow2.f32 %v2652_v1  ;;  %2679 = vadd.xlane.f32.xlu0 %v2678_v21  ;;  %2682 = vadd.xlane.f32.xlu1 %v2681_v38  ;;  %v1733_v21 = vcombine.low %v9426_v3, %v10039_v24 }
 0x364   :  { %v10021_v29 = vpop.eup %8939 }
 0x365   :  { %v2684_v58 = vsel %vm2569_vm3, %v10021_v29, 0.0 }
 0x366   :  { %v10025_v34 = vpop.eup %8941  ;;  %2685 = vadd.xlane.f32.xlu0 %v2684_v58 }
 0x367   :  { %v2687_v59 = vsel %vm2569_vm3, %v10025_v34, 0.0 }
 0x368   :  { %v10027_v48 = vpop.eup %8943 }
 0x369   :  { %v2690_v60 = vsel %vm2569_vm3, %v10027_v48, 0.0 }
 0x36a   :  { %v10033_v47 = vpop.eup %8945  ;;  %2691 = vadd.xlane.f32.xlu1 %v2690_v60  ;;  %2688 = vadd.xlane.f32.xlu0 %v2687_v59  ;;  %v1741_v60 = vrot.slane %v1733_v21, %v9435_v11 }
 0x36b   :  { %v2693_v56 = vsel %vm2569_vm3, %v10033_v47, 0.0 }
 0x36e   :  { %2694 = vadd.xlane.f32.xlu0 %v2693_v56 }
 0x37b   :  { %1591 = vrot.lane.b32.xlu1 %v9412_v62, %s9107_s4 }
 0x38e   :  { %v2608_v40 = vpop.xlane.xlu1 %2607 }
 0x38f   :  { %v2630_v53 = vsub.f32 %v9949_v45, %v2608_v40 }
 0x390   :  { %v2611_v25 = vpop.xlane.xlu0 %2610 }
 0x391   :  { %v2658_v12 = vmul.f32 1.442695, %v2630_v53  ;;  %v2631_v5 = vsub.f32 %v9959_v46, %v2611_v25 }
 0x392   :  { %v10063_v15 = vpop.permute.xlu1 %1579 }
 0x393   :  { %8947 = vpow2.f32 %v2658_v12  ;;  %v2660_v17 = vmul.f32 1.442695, %v2631_v5  ;;  %v1801_v5 = vcombine.low %v9412_v62, %v10063_v15 }
 0x394   :  { %8949 = vpow2.f32 %v2662_v10  ;;  %v1590_v27 = vpop.permute.xlu0 %1589 }
 0x395   :  { %8951 = vpow2.f32 %v2660_v17 }
 0x396   :  { %8953 = vpow2.f32 %v2664_v44 }
 0x39d   :  { %v10047_v2 = vpop.eup %8947 }
 0x39e   :  { %v10049_v18 = vpop.eup %8949  ;;  %v2702_v45 = vsel %vm2569_vm3, %v10047_v2, 0.0 }
 0x39f   :  { %v10053_v8 = vpop.eup %8951  ;;  %2703 = vadd.xlane.f32.xlu0 %v2702_v45  ;;  %v2708_v46 = vsel %vm2569_vm3, %v10049_v18, 0.0 }
 0x3a0   :  { %v2705_v32 = vsel %vm2569_vm3, %v10053_v8, 0.0  ;;  %v10059_v9 = vpop.eup %8953 }
 0x3a1   :  { %2706 = vadd.xlane.f32.xlu1 %v2705_v32  ;;  %v2711_v19 = vsel %vm2569_vm3, %v10059_v9, 0.0 }
 0x3a3   :  { %2709 = vadd.xlane.f32.xlu0 %v2708_v46  ;;  %v1802_v46 = vcombine.high %v9412_v62, %v10063_v15 }
 0x3a7   :  { %2712 = vadd.xlane.f32.xlu0 %v2711_v19 }
 0x3c3   :  { %v2668_v30 = vpop.xlane.xlu1 %2667 }
 0x3c4   :  { %8955 = vrcp.f32 %v2668_v30 }
 0x3c5   :  { %v2671_v6 = vpop.xlane.xlu0 %2670 }
 0x3c6   :  { %8957 = vrcp.f32 %v2671_v6 }
 0x3c9   :  { %v2674_v31 = vpop.xlane.xlu1 %2673 }
 0x3ca   :  { %8959 = vrcp.f32 %v2674_v31 }
 0x3cd   :  { %v2677_v16 = vpop.xlane.xlu0 %2676 }
 0x3ce   :  { %v8956_v43 = vpop.eup %8955  ;;  %8961 = vrcp.f32 %v2677_v16  ;;  %v1809_v16 = vrot.slane %v1801_v5, %v9435_v11 }
 0x3cf   :  { %v2730_v36 = vmul.f32 %v8956_v43, %v9981_v0 }
 0x3d0   :  { %v8958_v20 = vpop.eup %8957 }
 0x3d1   :  { %v2731_v61 = vmul.f32 %v8958_v20, %v9985_v51  ;;  %v1749_v51 = vcombine.low %v9975_v49, %v1590_v27 }
 0x3d3   :  { %v2746_v13 = vpack.c.bf16 %v2731_v61, %v2730_v36  ;;  %v1757_v58 = vrot.slane %v1749_v51, %v9435_v11 }
 0x3d4   :  { %v8960_v22 = vpop.eup %8959 }
 0x3d5   :  { %8533 = vmatmul.mubr.msk.bf16.vlgmr.msra.gmra.mrb[28].mxu1 %vm2569_vm3, %v2746_v13  ;;  %v2732_v14 = vmul.f32 %v8960_v22, %v9989_v41  ;;  %v1750_v41 = vcombine.high %v9975_v49, %v1590_v27  ;;  %v1765_v26 = vcombine.low %v1741_v60, %v1757_v58  ;;  %v1766_v40 = vcombine.high %v1741_v60, %v1757_v58 }
 0x3d6   :  { %8543 = vmatpush3.bf16.msra.mxu1 %v9856_v42  ;;  %8544 = vmatprep.mubr.msk.bf16.mxu1 %vm9109_vm0, %v11597_v52 }
 0x3d7   :  { %8554 = vmatprep.subr.bf16.mxu1 %v11597_v52  ;;  %v1764_v59 = vrot.slane %v1750_v41, %v9435_v11  ;;  %v1773_v25 = vrot.slane %v1765_v26, %v9444_v23  ;;  %v1780_v39 = vrot.slane %v1766_v40, %v9444_v23 }
 0x3d8   :  { %v8962_v57 = vpop.eup %8961 }
 0x3d9   :  { %v2733_v54 = vmul.f32 %v8962_v57, %v9993_v28  ;;  %v2005_v27 = vcombine.low %v1773_v25, %v1780_v39  ;;  %v8172_v20 = vcombine.high %v1773_v25, %v1780_v39 }
 0x3db   :  { %v2747_v1 = vpack.c.bf16 %v2733_v54, %v2732_v14  ;;  %v2012_v15 = vrot.slane %v2005_v27, %v9435_v11 }
 0x3dd   :  { %8539 = vmatmul.mubr.msk.bf16.vlgmr.msra.gmra.mrb[16].mxu0 %vm2569_vm3, %v2747_v1  ;;  %v2020_v1 = vrot.slane %v8172_v20, %v9435_v11 }
 0x3de   :  { %8549 = vmatpush3.bf16.msra.mxu0 %v9858_v63  ;;  %8550 = vmatprep.mubr.msk.bf16.mxu0 %vm9109_vm0, %v11597_v52  ;;  %v1734_v63 = vcombine.high %v9426_v3, %v10039_v24 }
 0x3df   :  { %8560 = vmatprep.subr.bf16.mxu0 %v11597_v52  ;;  %v2037_v40 = vcombine.low %v2012_v15, %v2020_v1 }
 0x3e0   :  { %v1748_v56 = vrot.slane %v1734_v63, %v9435_v11 }
 0x3e2   :  { %v1781_v10 = vcombine.low %v1748_v56, %v1764_v59  ;;  %v1782_v49 = vcombine.high %v1748_v56, %v1764_v59 }
 0x3e4   :  { %v1789_v44 = vrot.slane %v1781_v10, %v9444_v23  ;;  %v1796_v45 = vrot.slane %v1782_v49, %v9444_v23 }
 0x3e6   :  { %v2021_v36 = vcombine.low %v1789_v44, %v1796_v45  ;;  %v8173_v61 = vcombine.high %v1789_v44, %v1796_v45  ;;  %v2045_v44 = vrot.slane %v2037_v40, %v9444_v23 }
 0x3e7   :  { %v2698_v42 = vpop.xlane.xlu1 %2697 }
 0x3e8   :  { %v2036_v51 = vrot.slane %v8173_v61, %v9435_v11 }
 0x3e9   :  { %v2701_v0 = vpop.xlane.xlu0 %2700 }
 0x3ed   :  { %v2683_v28 = vpop.xlane.xlu1 %2682  ;;  %v2680_v38 = vpop.xlane.xlu0 %2679 }
 0x3ee   :  { %8963 = vrcp.f32 %v2683_v28 }
 0x3ef   :  { %8965 = vrcp.f32 %v2680_v38 }
 0x3f3   :  { %v2686_v53 = vpop.xlane.xlu0 %2685 }
 0x3f4   :  { %8967 = vrcp.f32 %v2686_v53 }
 0x3f7   :  { %v2692_v3 = vpop.xlane.xlu1 %2691  ;;  %v2689_v24 = vpop.xlane.xlu0 %2688 }
 0x3f8   :  { %v8964_v12 = vpop.eup %8963  ;;  %8969 = vrcp.f32 %v2689_v24 }
 0x3f9   :  { %v8966_v17 = vpop.eup %8965  ;;  %v2735_v32 = vmul.f32 %v8964_v12, %v10015_v55  ;;  %v1816_v55 = vrot.slane %v1802_v46, %v9435_v11  ;;  %8971 = vrcp.f32 %v2698_v42  ;;  %v2028_v42 = vrot.slane %v2021_v36, %v9435_v11 }
 0x3fa   :  { %v2734_v19 = vmul.f32 %v8966_v17, %v10012_v50  ;;  %8973 = vrcp.f32 %v2701_v0 }
 0x3fb   :  { %v1592_v30 = vpop.permute.xlu1 %1591  ;;  %v2695_v50 = vpop.xlane.xlu0 %2694  ;;  %v2053_v53 = vcombine.low %v2028_v42, %v2036_v51 }
 0x3fc   :  { %v1817_v6 = vcombine.low %v10042_v4, %v1592_v30  ;;  %v1818_v31 = vcombine.high %v10042_v4, %v1592_v30  ;;  %v2748_v43 = vpack.c.bf16 %v2735_v32, %v2734_v19  ;;  %8975 = vrcp.f32 %v2695_v50 }
 0x3fd   :  { %8977 = vrcp.f32 %v2692_v3  ;;  %v2054_v3 = vcombine.high %v2028_v42, %v2036_v51  ;;  %v2061_v45 = vrot.slane %v2053_v53, %v9444_v23 }
 0x3fe   :  { %v1825_v13 = vrot.slane %v1817_v6, %v9435_v11  ;;  %v1832_v62 = vrot.slane %v1818_v31, %v9435_v11  ;;  %8545 = vmatmul.mubr.msk.bf16.vlgmr.msra.gmra.mrb[32].mxu1 %vm2569_vm3, %v2748_v43  ;;  %v8968_v4 = vpop.eup %8967 }
 0x3ff   :  { %8556 = vmatprep.mubr.msk.bf16.mxu1 %vm9109_vm0, %v11597_v52  ;;  %v2736_v63 = vmul.f32 %v8968_v4, %v10021_v29  ;;  %v2069_v36 = vcombine.low %v2045_v44, %v2061_v45 }
 0x400   :  { %v1833_v22 = vcombine.low %v1809_v16, %v1825_v13  ;;  %v1834_v57 = vcombine.high %v1809_v16, %v1825_v13  ;;  %v1849_v14 = vcombine.low %v1816_v55, %v1832_v62  ;;  %v1850_v54 = vcombine.high %v1816_v55, %v1832_v62 }
 0x401   :  { %v2068_v16 = vrot.slane %v2054_v3, %v9444_v23  ;;  %v2070_v55 = vcombine.high %v2045_v44, %v2061_v45 }
 0x402   :  { %v1841_v21 = vrot.slane %v1833_v22, %v9444_v23  ;;  %v1848_v41 = vrot.slane %v1834_v57, %v9444_v23  ;;  %v1857_v0 = vrot.slane %v1849_v14, %v9444_v23  ;;  %v1864_v28 = vrot.slane %v1850_v54, %v9444_v23  ;;  %v8970_v38 = vpop.eup %8969 }
 0x403   :  { %v2737_v58 = vmul.f32 %v8970_v38, %v10025_v34  ;;  %v8972_v12 = vpop.eup %8971  ;;  %v2038_v34 = vcombine.high %v2012_v15, %v2020_v1 }
 0x404   :  { %v2073_v60 = vcombine.low %v1841_v21, %v1848_v41  ;;  %v8174_v59 = vcombine.high %v1841_v21, %v1848_v41  ;;  %v2089_v56 = vcombine.low %v1857_v0, %v1864_v28  ;;  %v8175_v26 = vcombine.high %v1857_v0, %v1864_v28  ;;  %v8974_v17 = vpop.eup %8973 }
 0x405   :  { %v2749_v39 = vpack.c.bf16 %v2737_v58, %v2736_v63  ;;  %v2052_v43 = vrot.slane %v2038_v34, %v9444_v23  ;;  %v2741_v62 = vmul.f32 %v8974_v17, %v10007_v37  ;;  %v2740_v14 = vmul.f32 %v8972_v12, %v10002_v7 }
 0x406   :  { %v2080_v10 = vrot.slane %v2073_v60, %v9435_v11  ;;  %v2088_v49 = vrot.slane %v8174_v59, %v9435_v11  ;;  %v2096_v25 = vrot.slane %v2089_v56, %v9435_v11  ;;  %v2104_v24 = vrot.slane %v8175_v26, %v9435_v11  ;;  %v8976_v27 = vpop.eup %8975 }
 0x407   :  { %8551 = vmatmul.mubr.msk.bf16.vlgmr.msra.gmra.mrb[20].mxu0 %vm2569_vm3, %v2749_v39  ;;  %v8978_v20 = vpop.eup %8977  ;;  %v2739_v50 = vmul.f32 %v8976_v27, %v10033_v47  ;;  %v2071_v1 = vcombine.low %v2052_v43, %v2068_v16  ;;  %v2072_v42 = vcombine.high %v2052_v43, %v2068_v16  ;;  %v2751_v21 = vpack.c.bf16 %v2741_v62, %v2740_v14 }
 0x408   :  { %v2105_v29 = vcombine.low %v2080_v10, %v2088_v49  ;;  %v2106_v5 = vcombine.high %v2080_v10, %v2088_v49  ;;  %v2121_v32 = vcombine.low %v2096_v25, %v2104_v24  ;;  %8562 = vmatprep.mubr.msk.bf16.mxu0 %vm9109_vm0, %v11597_v52  ;;  %v2122_v46 = vcombine.high %v2096_v25, %v2104_v24 }
 0x409   :  { %v2738_v54 = vmul.f32 %v8978_v20, %v10027_v48 }
 0x40a   :  { %v2113_v19 = vrot.slane %v2105_v29, %v9444_v23  ;;  %v2129_v30 = vrot.slane %v2121_v32, %v9444_v23  ;;  %v2120_v6 = vrot.slane %v2106_v5, %v9444_v23  ;;  %v2136_v31 = vrot.slane %v2122_v46, %v9444_v23 }
 0x40b   :  { %v2750_v51 = vpack.c.bf16 %v2739_v50, %v2738_v54 }
 0x40c   :  { %v2137_v61 = vcombine.low %v2113_v19, %v2129_v30  ;;  %v2138_v13 = vcombine.high %v2113_v19, %v2129_v30  ;;  %v2139_v22 = vcombine.low %v2120_v6, %v2136_v31  ;;  %v2140_v57 = vcombine.high %v2120_v6, %v2136_v31 }
 0x40e   :  { %v2145_v15 = vpack.c.bf16 %v2137_v61, %v2069_v36  ;;  %v2146_v4 = vpack.c.bf16 %v2138_v13, %v2070_v55  ;;  %v2147_v37 = vpack.c.bf16 %v2139_v22, %v2071_v1  ;;  %v2148_v47 = vpack.c.bf16 %v2140_v57, %v2072_v42 }
 0x410   :  { %8555 = vmatpush3.bf16.msra.mxu1 %v2145_v15  ;;  %8561 = vmatpush3.bf16.msra.mxu0 %v2146_v4 }
 0x411   :  { %8566 = vmatprep.subr.bf16.mxu1 %v11597_v52  ;;  %8572 = vmatprep.subr.bf16.mxu0 %v11597_v52 }
 0x413   :  { %8557 = vmatmul.mubr.msk.bf16.vlgmr.msra.gmra.mrb[36].mxu1 %vm2569_vm3, %v2750_v51  ;;  %8563 = vmatmul.mubr.msk.bf16.vlgmr.msra.gmra.mrb[24].mxu0 %vm2569_vm3, %v2751_v21 }
 0x414   :  { %8567 = vmatpush3.bf16.msra.mxu1 %v2147_v37  ;;  %8573 = vmatpush3.bf16.msra.mxu0 %v2148_v47 }
 0x415   :  { %8568 = vmatprep.mubr.msk.bf16.mxu1 %vm9109_vm0, %v11597_v52  ;;  %8574 = vmatprep.mubr.msk.bf16.mxu0 %vm9109_vm0, %v11597_v52 }
 0x42c   :  { %v2704_v7 = vpop.xlane.xlu0 %2703 }
 0x42d   :  { %8979 = vrcp.f32 %v2704_v7 }
 0x42e   :  { %v2707_v48 = vpop.xlane.xlu1 %2706 }
 0x42f   :  { %8981 = vrcp.f32 %v2707_v48 }
 0x430   :  { %v2710_v41 = vpop.xlane.xlu0 %2709 }
 0x431   :  { %8983 = vrcp.f32 %v2710_v41 }
 0x434   :  { %v2713_v0 = vpop.xlane.xlu0 %2712 }
 0x435   :  { %8985 = vrcp.f32 %v2713_v0 }
 0x437   :  { %v8980_v28 = vpop.eup %8979 }
 0x438   :  { %v2742_v63 = vmul.f32 %v8980_v28, %v10047_v2 }
 0x439   :  { %v8982_v38 = vpop.eup %8981 }
 0x43a   :  { %v2743_v58 = vmul.f32 %v8982_v38, %v10053_v8 }
 0x43b   :  { %v8984_v59 = vpop.eup %8983 }
 0x43c   :  { %v2752_v60 = vpack.c.bf16 %v2743_v58, %v2742_v63  ;;  %v2744_v26 = vmul.f32 %v8984_v59, %v10049_v18 }
 0x43e   :  { %8569 = vmatmul.mubr.msk.bf16.vlgmr.msra.gmra.mrb[40].mxu1 %vm2569_vm3, %v2752_v60 }
 0x43f   :  { %v8986_v56 = vpop.eup %8985 }
 0x440   :  { %v2745_v40 = vmul.f32 %v8986_v56, %v10059_v9 }
 0x442   :  { %v2753_v53 = vpack.c.bf16 %v2745_v40, %v2744_v26 }
 0x444   :  { %8575 = vmatmul.mubr.msk.bf16.vlgmr.msra.gmra.mrb[28].mxu0 %vm2569_vm3, %v2753_v53 }
 0x4a8   :  { %v2791_v10 = vpop.f32.mrb[28].mxu1 }
 0x4a9   :  { %v8534_v49 = vpop.f32.mrb[29].mxu1 }
 0x4aa   :  { %v2794_v25 = vpop.f32.mrb[30].mxu1 }
 0x4ab   :  { %v8535_v39 = vpop.f32.mrb[31].mxu1 }
 0x4b0   :  { %v2835_v24 = vpop.f32.mrb[16].mxu0 }
 0x4b1   :  { %v8540_v2 = vpop.f32.mrb[17].mxu0 }
 0x4b2   :  { %v2838_v12 = vpop.f32.mrb[18].mxu0 }
 0x4b3   :  { %v8541_v8 = vpop.f32.mrb[19].mxu0 }
 0x4d1   :  { %v2879_v29 = vpop.f32.mrb[32].mxu1 }
 0x4d2   :  { %v3106_v34 = vcombine.low %v2791_v10, %v2879_v29  ;;  %v3107_v3 = vcombine.high %v2791_v10, %v2879_v29  ;;  %v8546_v5 = vpop.f32.mrb[33].mxu1 }
 0x4d3   :  { %v2882_v17 = vpop.f32.mrb[34].mxu1 }
 0x4d4   :  { %v3174_v44 = vcombine.low %v2794_v25, %v2882_v17  ;;  %v3175_v18 = vcombine.high %v2794_v25, %v2882_v17  ;;  %v8547_v45 = vpop.f32.mrb[35].mxu1  ;;  %v3114_v27 = vrot.slane %v3106_v34, %v9435_v11  ;;  %v3121_v30 = vrot.slane %v3107_v3, %v9435_v11 }
 0x4d6   :  { %v3182_v50 = vrot.slane %v3174_v44, %v9435_v11  ;;  %v3189_v15 = vrot.slane %v3175_v18, %v9435_v11 }
 0x4da   :  { %v2923_v9 = vpop.f32.mrb[20].mxu0 }
 0x4db   :  { %v3122_v32 = vcombine.low %v2835_v24, %v2923_v9  ;;  %v3123_v46 = vcombine.high %v2835_v24, %v2923_v9  ;;  %v8552_v19 = vpop.f32.mrb[21].mxu0 }
 0x4dc   :  { %v2926_v6 = vpop.f32.mrb[22].mxu0 }
 0x4dd   :  { %v3130_v31 = vrot.slane %v3122_v32, %v9435_v11  ;;  %v3137_v43 = vrot.slane %v3123_v46, %v9435_v11  ;;  %v3190_v16 = vcombine.low %v2838_v12, %v2926_v6  ;;  %v3191_v20 = vcombine.high %v2838_v12, %v2926_v6  ;;  %v8553_v36 = vpop.f32.mrb[23].mxu0  ;;  %v8836_v6 = vld [vmem:[%s11623_s28 + $0x8] sm:$0xff]  }
 0x4df   :  { %v3138_v61 = vcombine.low %v3114_v27, %v3130_v31  ;;  %v3139_v55 = vcombine.high %v3114_v27, %v3130_v31  ;;  %v3154_v13 = vcombine.low %v3121_v30, %v3137_v43  ;;  %v3155_v62 = vcombine.high %v3121_v30, %v3137_v43  ;;  %v8835_v30 = vld [vmem:[%s11623_s28] sm:$0xff]  }
 0x4e0   :  { %v3198_v4 = vrot.slane %v3190_v16, %v9435_v11  ;;  %v3205_v22 = vrot.slane %v3191_v20, %v9435_v11  ;;  %8578 = vmatprep.subr.bf16.mxu1 %v8835_v30 }
 0x4e1   :  { %v3146_v57 = vrot.slane %v3138_v61, %v9444_v23  ;;  %v3153_v14 = vrot.slane %v3139_v55, %v9444_v23  ;;  %v3162_v54 = vrot.slane %v3154_v13, %v9444_v23  ;;  %v3169_v1 = vrot.slane %v3155_v62, %v9444_v23  ;;  %8579 = vmatpush3.bf16.msra.mxu1 %v8835_v30 }
 0x4e2   :  { %v3206_v42 = vcombine.low %v3182_v50, %v3198_v4  ;;  %v3207_v51 = vcombine.high %v3182_v50, %v3198_v4  ;;  %v3222_v21 = vcombine.low %v3189_v15, %v3205_v22  ;;  %v3223_v37 = vcombine.high %v3189_v15, %v3205_v22  ;;  %8580 = vmatprep.subr.bf16.mxu1 %v8836_v6  ;;  %v8837_v22 = vld [vmem:[%s11623_s28 + $0x10] sm:$0xff]  }
 0x4e3   :  { %v3378_v47 = vcombine.low %v3146_v57, %v3153_v14  ;;  %v8192_v7 = vcombine.high %v3146_v57, %v3153_v14  ;;  %v3394_v48 = vcombine.low %v3162_v54, %v3169_v1  ;;  %v8193_v41 = vcombine.high %v3162_v54, %v3169_v1 }
 0x4e4   :  { %v3214_v0 = vrot.slane %v3206_v42, %v9444_v23  ;;  %v3221_v28 = vrot.slane %v3207_v51, %v9444_v23  ;;  %v3230_v38 = vrot.slane %v3222_v21, %v9444_v23  ;;  %v3237_v63 = vrot.slane %v3223_v37, %v9444_v23  ;;  %v8838_v37 = vld [vmem:[%s11623_s28 + $0x18] sm:$0xff]  }
 0x4e5   :  { %v3385_v58 = vrot.slane %v3378_v47, %v9435_v11  ;;  %v3393_v60 = vrot.slane %v8192_v7, %v9435_v11  ;;  %v3401_v59 = vrot.slane %v3394_v48, %v9435_v11  ;;  %v3409_v56 = vrot.slane %v8193_v41, %v9435_v11  ;;  %8581 = vmatpush3.bf16.msra.mxu1 %v8836_v6  ;;  %v8839_v47 = vld [vmem:[%s11623_s28 + $0x20] sm:$0xff]   ;;  %v8840_v7 = vld [vmem:[%s11623_s28 + $0x28] sm:$0xff]  }
 0x4e6   :  { %v3446_v26 = vcombine.low %v3214_v0, %v3221_v28  ;;  %v8194_v40 = vcombine.high %v3214_v0, %v3221_v28  ;;  %v3462_v53 = vcombine.low %v3230_v38, %v3237_v63  ;;  %v8195_v10 = vcombine.high %v3230_v38, %v3237_v63  ;;  %v10171_v49 = vpop.f32.mrb[36].mxu1  ;;  %v10173_v25 = vpop.f32.mrb[24].mxu0  ;;  %8582 = vmatprep.subr.bf16.mxu1 %v8837_v22 }
 0x4e7   :  { %v8558_v39 = vpop.f32.mrb[37].mxu1  ;;  %v8564_v24 = vpop.f32.mrb[25].mxu0  ;;  %v3410_v2 = vcombine.low %v3385_v58, %v3393_v60  ;;  %v3426_v12 = vcombine.low %v3401_v59, %v3409_v56  ;;  %v3411_v8 = vcombine.high %v3385_v58, %v3393_v60  ;;  %v3427_v29 = vcombine.high %v3401_v59, %v3409_v56 }
 0x4e8   :  { %v3453_v34 = vrot.slane %v3446_v26, %v9435_v11  ;;  %v3461_v3 = vrot.slane %v8194_v40, %v9435_v11  ;;  %v3469_v5 = vrot.slane %v3462_v53, %v9435_v11  ;;  %v3477_v17 = vrot.slane %v8195_v10, %v9435_v11  ;;  %v10179_v44 = vpop.f32.mrb[38].mxu1  ;;  %v10181_v18 = vpop.f32.mrb[26].mxu0 }
 0x4e9   :  { %v8559_v45 = vpop.f32.mrb[39].mxu1  ;;  %v8565_v9 = vpop.f32.mrb[27].mxu0  ;;  %v10184_v32 = vrot.slane %v3410_v2, %v9444_v23  ;;  %v10187_v46 = vrot.slane %v3426_v12, %v9444_v23  ;;  %v3425_v19 = vrot.slane %v3411_v8, %v9444_v23  ;;  %v3441_v27 = vrot.slane %v3427_v29, %v9444_v23  ;;  %8583 = vmatpush3.bf16.msra.mxu1 %v8837_v22 }
 0x4ea   :  { %v3478_v31 = vcombine.low %v3453_v34, %v3461_v3  ;;  %v3494_v43 = vcombine.low %v3469_v5, %v3477_v17  ;;  %v3479_v16 = vcombine.high %v3453_v34, %v3461_v3  ;;  %v3495_v20 = vcombine.high %v3469_v5, %v3477_v17  ;;  %8584 = vmatprep.subr.bf16.mxu1 %v8838_v37 }
 0x4eb   :  { %v3442_v36 = vcombine.low %v10184_v32, %v10187_v46  ;;  %v3443_v61 = vcombine.high %v10184_v32, %v10187_v46  ;;  %v3444_v55 = vcombine.low %v3425_v19, %v3441_v27  ;;  %v3445_v13 = vcombine.high %v3425_v19, %v3441_v27 }
 0x4ec   :  { %v10202_v62 = vrot.slane %v3478_v31, %v9444_v23  ;;  %v10205_v50 = vrot.slane %v3494_v43, %v9444_v23  ;;  %v3493_v15 = vrot.slane %v3479_v16, %v9444_v23  ;;  %v3509_v4 = vrot.slane %v3495_v20, %v9444_v23 }
 0x4ed   :  { %8585 = vmatpush3.bf16.msra.mxu1 %v8838_v37 }
 0x4ee   :  { %v3511_v57 = vcombine.high %v10202_v62, %v10205_v50  ;;  %v3510_v14 = vcombine.low %v10202_v62, %v10205_v50  ;;  %v3512_v54 = vcombine.low %v3493_v15, %v3509_v4  ;;  %v3513_v1 = vcombine.high %v3493_v15, %v3509_v4  ;;  %8586 = vmatprep.subr.bf16.mxu1 %v8839_v47 }
 0x4f0   :  { %v8743_v42 = vpack.i.bf16 %v3511_v57, %v3443_v61  ;;  %v8748_v51 = vpack.i.bf16 %v3512_v54, %v3444_v55  ;;  %v10216_v21 = vpack.i.bf16 %v3513_v1, %v3445_v13 }
 0x4f1   :  { %8587 = vmatpush3.bf16.msra.mxu1 %v8839_v47 }
 0x4f2   :  { %8744 = vrot.lane.b32.xlu1 %v8743_v42, %s9107_s4  ;;  %8588 = vmatprep.subr.bf16.mxu1 %v8840_v7 }
 0x4f5   :  { %8589 = vmatpush3.bf16.msra.mxu1 %v8840_v7 }
 0x4f6   :  { %8749 = vrot.lane.b32.xlu1 %v8748_v51, %s9106_s30 }
 0x511   :  { %v3055_v48 = vpop.f32.mrb[40].mxu1 }
 0x512   :  { %v3242_v41 = vcombine.low %v10171_v49, %v3055_v48  ;;  %v3243_v0 = vcombine.high %v10171_v49, %v3055_v48  ;;  %v8570_v28 = vpop.f32.mrb[41].mxu1 }
 0x513   :  { %v3058_v38 = vpop.f32.mrb[42].mxu1 }
 0x514   :  { %v3310_v63 = vcombine.low %v10179_v44, %v3058_v38  ;;  %v3311_v58 = vcombine.high %v10179_v44, %v3058_v38  ;;  %v8571_v60 = vpop.f32.mrb[43].mxu1  ;;  %v3250_v53 = vrot.slane %v3242_v41, %v9435_v11  ;;  %v3257_v10 = vrot.slane %v3243_v0, %v9435_v11  ;;  %v8841_v38 = vld [vmem:[%s11623_s28 + $0x30] sm:$0xff]  }
 0x515   :  { %8590 = vmatprep.subr.bf16.mxu1 %v8841_v38 }
 0x516   :  { %v3325_v17 = vrot.slane %v3311_v58, %v9435_v11  ;;  %8591 = vmatpush3.bf16.msra.mxu1 %v8841_v38 }
 0x517   :  { %v3099_v59 = vpop.f32.mrb[28].mxu0 }
 0x518   :  { %v3258_v56 = vcombine.low %v10173_v25, %v3099_v59  ;;  %v3259_v26 = vcombine.high %v10173_v25, %v3099_v59  ;;  %v8576_v40 = vpop.f32.mrb[29].mxu0  ;;  %v3318_v25 = vrot.slane %v3310_v63, %v9435_v11 }
 0x519   :  { %v3102_v39 = vpop.f32.mrb[30].mxu0 }
 0x51a   :  { %v3266_v49 = vrot.slane %v3258_v56, %v9435_v11  ;;  %v3273_v24 = vrot.slane %v3259_v26, %v9435_v11  ;;  %v3326_v2 = vcombine.low %v10181_v18, %v3102_v39  ;;  %v3327_v12 = vcombine.high %v10181_v18, %v3102_v39  ;;  %v8577_v8 = vpop.f32.mrb[31].mxu0 }
 0x51c   :  { %v3274_v29 = vcombine.low %v3250_v53, %v3266_v49  ;;  %v3275_v34 = vcombine.high %v3250_v53, %v3266_v49  ;;  %v3290_v3 = vcombine.low %v3257_v10, %v3273_v24  ;;  %v3291_v5 = vcombine.high %v3257_v10, %v3273_v24 }
 0x51d   :  { %v3334_v44 = vrot.slane %v3326_v2, %v9435_v11  ;;  %v3341_v45 = vrot.slane %v3327_v12, %v9435_v11 }
 0x51e   :  { %v3282_v9 = vrot.slane %v3274_v29, %v9444_v23  ;;  %v3289_v19 = vrot.slane %v3275_v34, %v9444_v23  ;;  %v3298_v27 = vrot.slane %v3290_v3, %v9444_v23  ;;  %v3305_v18 = vrot.slane %v3291_v5, %v9444_v23 }
 0x51f   :  { %v3342_v30 = vcombine.low %v3318_v25, %v3334_v44  ;;  %v3343_v6 = vcombine.high %v3318_v25, %v3334_v44  ;;  %v3358_v31 = vcombine.low %v3325_v17, %v3341_v45  ;;  %v3359_v43 = vcombine.high %v3325_v17, %v3341_v45  ;;  %v8842_v17 = vld [vmem:[%s11623_s28 + $0x38] sm:$0xff]  }
 0x520   :  { %v3514_v16 = vcombine.low %v3282_v9, %v3289_v19  ;;  %v8196_v20 = vcombine.high %v3282_v9, %v3289_v19  ;;  %v3530_v61 = vcombine.low %v3298_v27, %v3305_v18  ;;  %v8197_v55 = vcombine.high %v3298_v27, %v3305_v18  ;;  %8592 = vmatprep.subr.bf16.mxu1 %v8842_v17 }
 0x521   :  { %v3350_v13 = vrot.slane %v3342_v30, %v9444_v23  ;;  %v3357_v15 = vrot.slane %v3343_v6, %v9444_v23  ;;  %v3366_v4 = vrot.slane %v3358_v31, %v9444_v23  ;;  %v3373_v22 = vrot.slane %v3359_v43, %v9444_v23  ;;  %8593 = vmatpush3.bf16.msra.mxu1 %v8842_v17  ;;  %v8845_v17 = vld [vmem:[%s11577_s10 + $0x4] ss:$8 sps:$4 sm:$0xff]  }
 0x522   :  { %v3521_v57 = vrot.slane %v3514_v16, %v9435_v11  ;;  %v3529_v54 = vrot.slane %v8196_v20, %v9435_v11  ;;  %v3537_v1 = vrot.slane %v3530_v61, %v9435_v11  ;;  %v3545_v42 = vrot.slane %v8197_v55, %v9435_v11  ;;  %4137 = vmatprep.subr.bf16.mxu1 %v8845_v17 }
 0x523   :  { %v3582_v51 = vcombine.low %v3350_v13, %v3357_v15  ;;  %v8198_v37 = vcombine.high %v3350_v13, %v3357_v15  ;;  %v3598_v47 = vcombine.low %v3366_v4, %v3373_v22  ;;  %v8199_v7 = vcombine.high %v3366_v4, %v3373_v22 }
 0x524   :  { %v3547_v48 = vcombine.high %v3521_v57, %v3529_v54  ;;  %v3563_v41 = vcombine.high %v3537_v1, %v3545_v42  ;;  %v3546_v0 = vcombine.low %v3521_v57, %v3529_v54  ;;  %v3562_v28 = vcombine.low %v3537_v1, %v3545_v42 }
 0x525   :  { %v3589_v63 = vrot.slane %v3582_v51, %v9435_v11  ;;  %v3597_v58 = vrot.slane %v8198_v37, %v9435_v11  ;;  %v3605_v60 = vrot.slane %v3598_v47, %v9435_v11  ;;  %v3613_v59 = vrot.slane %v8199_v7, %v9435_v11 }
 0x526   :  { %v3561_v56 = vrot.slane %v3547_v48, %v9444_v23  ;;  %v3577_v26 = vrot.slane %v3563_v41, %v9444_v23  ;;  %v3554_v40 = vrot.slane %v3546_v0, %v9444_v23  ;;  %v3570_v53 = vrot.slane %v3562_v28, %v9444_v23 }
 0x527   :  { %v3615_v10 = vcombine.high %v3589_v63, %v3597_v58  ;;  %v3631_v39 = vcombine.high %v3605_v60, %v3613_v59  ;;  %v3614_v49 = vcombine.low %v3589_v63, %v3597_v58  ;;  %v3630_v24 = vcombine.low %v3605_v60, %v3613_v59  ;;  %v8200_v60 = vld [vmem:[%s11625_s6] ss:$0 sm:$0xff] }
 0x528   :  { %v3580_v2 = vcombine.low %v3561_v56, %v3577_v26  ;;  %v3578_v12 = vcombine.low %v3554_v40, %v3570_v53  ;;  %v3579_v8 = vcombine.high %v3554_v40, %v3570_v53  ;;  %v3581_v29 = vcombine.high %v3561_v56, %v3577_v26 }
 0x529   :  { %v3629_v34 = vrot.slane %v3615_v10, %v9444_v23  ;;  %v3645_v3 = vrot.slane %v3631_v39, %v9444_v23  ;;  %v3622_v5 = vrot.slane %v3614_v49, %v9444_v23  ;;  %v3638_v25 = vrot.slane %v3630_v24, %v9444_v23  ;;  %v9075_v49 = vld [vmem:[%s11610_s27] sm:$0xff] }
 0x52a   :  { %v11624_v58 = vmov 0  }
 0x52b   :  { %v3648_v44 = vcombine.low %v3629_v34, %v3645_v3  ;;  %v3647_v45 = vcombine.high %v3622_v5, %v3638_v25  ;;  %v3646_v9 = vcombine.low %v3622_v5, %v3638_v25  ;;  %v3649_v19 = vcombine.high %v3629_v34, %v3645_v3  ;;  %v9078_v3 = vld [vmem:[%s11610_s27 + $0x18] sm:$0xff]  ;;  %v8843_v25 = vld [vmem:[%s11577_s10] ss:$8 sps:$4 sm:$0xff]  }
 0x52d   :  { %v8763_v27 = vpack.i.bf16 %v3648_v44, %v3580_v2  ;;  %v8753_v18 = vpack.i.bf16 %v3647_v45, %v3579_v8  ;;  %v8768_v30 = vpack.i.bf16 %v3649_v19, %v3581_v29  ;;  %v9076_v2 = vld [vmem:[%s11610_s27 + $0x8] sm:$0xff]  ;;  %v9077_v29 = vld [vmem:[%s11610_s27 + $0x10] sm:$0xff] }
 0x52e   :  { %v8846_v44 = vld [vmem:[%s11577_s10 + $0x10] ss:$8 sps:$4 sm:$0xff]   ;;  %v8848_v45 = vld [vmem:[%s11577_s10 + $0x14] ss:$8 sps:$4 sm:$0xff]   ;;  %v8849_v19 = vld [vmem:[%s11577_s10 + $0x20] ss:$8 sps:$4 sm:$0xff]  }
 0x52f   :  { %8764 = vrot.lane.b32.xlu1 %v8763_v27, %s9106_s30  ;;  %8754 = vrot.lane.b32.xlu0 %v8753_v18, %s9107_s4  ;;  %v8854_v27 = vld [vmem:[%s11577_s10 + $0x34] ss:$8 sps:$4 sm:$0xff]   ;;  %v8867_v18 = vld [vmem:[%s11575_s8] sm:$0xff]  }
 0x530   :  { %8598 = vmatprep.subr.bf16.mxu0 %v8867_v18 }
 0x531   :  { %8599 = vmatpush3.bf16.msra.mxu0 %v8867_v18 }
 0x533   :  { %8769 = vrot.lane.b32.xlu1 %v8768_v30, %s9105_s3  ;;  %8759 = vrot.lane.b32.xlu0 %v10216_v21, %s9105_s3  ;;  %v8852_v30 = vld [vmem:[%s11577_s10 + $0x30] ss:$8 sps:$4 sm:$0xff]  }
 0x564   :  { %v8745_v6 = vpop.permute.xlu1 %8744 }
 0x565   :  { %v8747_v43 = vunpack.i.h.bf16 %v8745_v6  ;;  %v8746_v16 = vunpack.i.l.bf16 %v8745_v6  ;;  %v8857_v6 = vld [vmem:[%s11577_s10 + $0x44] ss:$8 sps:$4 sm:$0xff]  }
 0x567   :  { %v3698_v21 = vsel %vm2149_vm1, %v3442_v36, %v8746_v16  ;;  %v3699_v42 = vsel %vm2149_vm1, %v3510_v14, %v8747_v43  ;;  %v8860_v43 = vld [vmem:[%s11577_s10 + $0x54] ss:$8 sps:$4 sm:$0xff]   ;;  %v8858_v16 = vld [vmem:[%s11577_s10 + $0x50] ss:$8 sps:$4 sm:$0xff]  }
 0x568   :  { %v8750_v31 = vpop.permute.xlu1 %8749 }
 0x569   :  { %v8752_v15 = vunpack.i.h.bf16 %v8750_v31  ;;  %v8751_v4 = vunpack.i.l.bf16 %v8750_v31  ;;  %v8855_v31 = vld [vmem:[%s11577_s10 + $0x40] ss:$8 sps:$4 sm:$0xff]  }
 0x56b   :  { %v3703_v32 = vsel %vm3702_vm5, %v3698_v21, %v8751_v4  ;;  %v3704_v46 = vsel %vm3702_vm5, %v3699_v42, %v8752_v15  ;;  %v88_v15 = vld [vmem:[%s11626_s21] sm:$0xff]  ;;  %v89_v4 = vld [vmem:[%s11626_s21 + $0x8] sm:$0xff] }
 0x5a1   :  { %v8765_v20 = vpop.permute.xlu1 %8764  ;;  %v8755_v61 = vpop.permute.xlu0 %8754 }
 0x5a2   :  { %v8757_v55 = vunpack.i.h.bf16 %v8755_v61  ;;  %v8756_v13 = vunpack.i.l.bf16 %v8755_v61  ;;  %v8767_v22 = vunpack.i.h.bf16 %v8765_v20  ;;  %v8766_v57 = vunpack.i.l.bf16 %v8765_v20  ;;  %v8863_v20 = vld [vmem:[%s11577_s10 + $0x64] ss:$8 sps:$4 sm:$0xff]   ;;  %v8861_v61 = vld [vmem:[%s11577_s10 + $0x60] ss:$8 sps:$4 sm:$0xff]  }
 0x5a4   :  { %v3700_v54 = vsel %vm2149_vm1, %v3578_v12, %v8756_v13  ;;  %v3701_v1 = vsel %vm2149_vm1, %v3646_v9, %v8757_v55  ;;  %v8851_v9 = vld [vmem:[%s11577_s10 + $0x24] ss:$8 sps:$4 sm:$0xff]   ;;  %v8866_v55 = vld [vmem:[%s11577_s10 + $0x74] ss:$8 sps:$4 sm:$0xff]   ;;  %v8864_v13 = vld [vmem:[%s11577_s10 + $0x70] ss:$8 sps:$4 sm:$0xff]  }
 0x5a5   :  { %v8770_v51 = vpop.permute.xlu1 %8769  ;;  %v8760_v37 = vpop.permute.xlu0 %8759  ;;  %v3705_v0 = vsel %vm3702_vm5, %v3700_v54, %v8766_v57  ;;  %v3706_v28 = vsel %vm3702_vm5, %v3701_v1, %v8767_v22  ;;  %v4043_v22 = vpack.c.bf16 %v89_v4, %v88_v15 }
 0x5a6   :  { %v8772_v47 = vunpack.i.h.bf16 %v8770_v51  ;;  %v8771_v7 = vunpack.i.l.bf16 %v8770_v51  ;;  %v8762_v48 = vunpack.i.h.bf16 %v8760_v37  ;;  %v8761_v41 = vunpack.i.l.bf16 %v8760_v37 }
 0x5a8   :  { %v3710_v36 = vsel %vm3707_vm6, %v3705_v0, %v8771_v7  ;;  %v3711_v62 = vsel %vm3707_vm6, %v3706_v28, %v8772_v47  ;;  %v3708_v50 = vsel %vm3707_vm6, %v3703_v32, %v8761_v41  ;;  %v3709_v14 = vsel %vm3707_vm6, %v3704_v46, %v8762_v48 }
 0x5a9   :  { %v3729_v38 = vpack.c.bf16 %v3711_v62, %v3710_v36  ;;  %v3728_v63 = vpack.c.bf16 %v3709_v14, %v3708_v50  ;;  %v8868_v62 = vld [vmem:[%s11575_s8 + $0x8] sm:$0xff]   ;;  %v8869_v50 = vld [vmem:[%s11575_s8 + $0x10] sm:$0xff]   ;;  %v8870_v14 = vld [vmem:[%s11575_s8 + $0x18] sm:$0xff]  }
 0x5aa   :  { %8600 = vmatprep.subr.bf16.mxu0 %v8868_v62 }
 0x5ab   :  { %8594 = vmatprep.mubr.bf16.mxu1 %v3728_v63  ;;  %8601 = vmatpush3.bf16.msra.mxu0 %v8868_v62  ;;  %v8872_v63 = vld [vmem:[%s11575_s8 + $0x28] sm:$0xff]  }
 0x5ac   :  { %8595 = vmatmul.mubr.bf16.vlgmr.msra.gmra.mrb[44].mxu1 %v3729_v38  ;;  %8602 = vmatprep.subr.bf16.mxu0 %v8869_v50  ;;  %v8871_v38 = vld [vmem:[%s11575_s8 + $0x20] sm:$0xff]  }
 0x5ad   :  { %4169 = vmatprep.mubr.bf16.mxu1 %v11624_v58  ;;  %4138 = vmatpush1.bf16.msra.mxu1 %v8843_v25 }
 0x5ae   :  { %4139 = vmatprep.subr.bf16.mxu1 %v8848_v45 }
 0x5af   :  { %8603 = vmatpush3.bf16.msra.mxu0 %v8869_v50 }
 0x5b0   :  { %8604 = vmatprep.subr.bf16.mxu0 %v8870_v14 }
 0x5b1   :  { %4140 = vmatpush1.bf16.msra.mxu1 %v8846_v44 }
 0x5b2   :  { %4141 = vmatprep.subr.bf16.mxu1 %v8851_v9 }
 0x5b3   :  { %8605 = vmatpush3.bf16.msra.mxu0 %v8870_v14 }
 0x5b4   :  { %8606 = vmatprep.subr.bf16.mxu0 %v8871_v38 }
 0x5b5   :  { %4142 = vmatpush1.bf16.msra.mxu1 %v8849_v19 }
 0x5b6   :  { %4143 = vmatprep.subr.bf16.mxu1 %v8854_v27 }
 0x5b7   :  { %8607 = vmatpush3.bf16.msra.mxu0 %v8871_v38 }
 0x5b8   :  { %8608 = vmatprep.subr.bf16.mxu0 %v8872_v63 }
 0x5b9   :  { %4144 = vmatpush1.bf16.msra.mxu1 %v8852_v30 }
 0x5ba   :  { %4145 = vmatprep.subr.bf16.mxu1 %v8857_v6 }
 0x5bb   :  { %8609 = vmatpush3.bf16.msra.mxu0 %v8872_v63 }
 0x5bd   :  { %4146 = vmatpush1.bf16.msra.mxu1 %v8855_v31 }
 0x5be   :  { %4147 = vmatprep.subr.bf16.mxu1 %v8860_v43 }
 0x5c1   :  { %4148 = vmatpush1.bf16.msra.mxu1 %v8858_v16 }
 0x5c2   :  { %4149 = vmatprep.subr.bf16.mxu1 %v8863_v20 }
 0x5c5   :  { %4150 = vmatpush1.bf16.msra.mxu1 %v8861_v61 }
 0x5c6   :  { %4151 = vmatprep.subr.bf16.mxu1 %v8866_v55  ;;  %v8210_v55 = vld [vmem:[%s11574_s7] ss:$0 sm:$0xff] }
 0x5c9   :  { %4152 = vmatpush1.bf16.msra.mxu1 %v8864_v13 }
 0x5ca   :  { %8648 = vmatprep.subr.bf16.mxu1 %v11597_v52 }
 0x5cc   :  { %4170 = vmatmul.mubr.bf16.vlgmr.msra.gmra.mrb[48].mxu1 %v4043_v22 }
 0x5cd   :  { %4179 = vmatprep.mubr.bf16.mxu1 %v11624_v58 }
 0x67f   :  { %v8596_v59 = vpop.f32.mrb[44].mxu1 }
 0x680   :  { %v3819_v56 = vpop.f32.mrb[45].mxu1  ;;  %v3828_v10 = vadd.f32 %v8596_v59, %v8200_v60  ;;  %v90_v59 = vld [vmem:[%s11626_s21 + $0x10] sm:$0xff] }
 0x681   :  { %v3820_v26 = vadd.f32 %v8200_v60, %v3819_v56  ;;  %v8597_v40 = vpop.f32.mrb[46].mxu1  ;;  %v91_v56 = vld [vmem:[%s11626_s21 + $0x18] sm:$0xff]  ;;  %s11627_s21 = sld [smem:[#allocation14_spill]] }
 0x682   :  { %v3822_v53 = vpop.f32.mrb[47].mxu1  ;;  %v3831_v8 = vadd.f32 %v8597_v40, %v8200_v60  ;;  %v3836_v34 = vadd.f32 %v9077_v29, %v3828_v10  ;;  %v8874_v40 = vld [vmem:[%s11575_s8 + $0x38] sm:$0xff]  }
 0x683   :  { %v3823_v39 = vadd.f32 %v8200_v60, %v3822_v53  ;;  %v3834_v24 = vadd.f32 %v9075_v49, %v3820_v26  ;;  %v8873_v60 = vld [vmem:[%s11575_s8 + $0x30] sm:$0xff]   ;;  %v4044_v26 = vpack.c.bf16 %v91_v56, %v90_v59  ;;  %v10422_v53 = vld [vmem:[%s11578_s11] sm:$0x3] }
 0x684   :  { %v3837_v5 = vadd.f32 %v9078_v3, %v3831_v8  ;;  %8610 = vmatprep.subr.bf16.mxu0 %v8873_v60  ;;  %v10426_v10 = vrot.slane %v10422_v53, %v9329_v33 }
 0x685   :  { %3840 = vadd.xlane.f32.xlu0 %v3834_v24  ;;  %v3835_v12 = vadd.f32 %v9076_v2, %v3823_v39  ;;  %4180 = vmatmul.mubr.bf16.gmra.mrb[52].mxu1 %v4044_v26 }
 0x686   :  { %8650 = vmatprep.mubr.msk.bf16.mxu1 %vm9109_vm0, %v11597_v52  ;;  %8611 = vmatpush3.bf16.msra.mxu0 %v8873_v60 }
 0x687   :  { %3842 = vadd.xlane.f32.xlu1 %v3835_v12  ;;  %8612 = vmatprep.subr.bf16.mxu0 %v8874_v40  ;;  %v8209_v6 = vld [vmem:[%s11627_s21] ss:$0 sm:$0xff] }
 0x689   :  { %3844 = vadd.xlane.f32.xlu0 %v3836_v34 }
 0x68a   :  { %8613 = vmatpush3.bf16.msra.mxu0 %v8874_v40 }
 0x68b   :  { %8618 = vmatprep.subr.bf16.mxu0 %v11597_v52 }
 0x68d   :  { %3846 = vadd.xlane.f32.xlu0 %v3837_v5 }
 0x69f   :  { %v4171_v39 = vpop.f32.mrb[48].mxu1 }
 0x6a0   :  { %v10429_v49 = vadd.f32 %v4171_v39, %v10426_v10 }
 0x712   :  { %v3841_v57 = vpop.xlane.xlu0 %3840 }
 0x713   :  { %v3849_v54 = vmul.f32 0.0078125, %v3841_v57 }
 0x714   :  { %v3843_v1 = vpop.xlane.xlu1 %3842 }
 0x715   :  { %v3850_v21 = vmul.f32 0.0078125, %v3843_v1  ;;  %v10373_v42 = vsub.f32 %v3834_v24, %v3849_v54  ;;  %v10431_v24 = vpop.f32.mrb[49].mxu1 }
 0x716   :  { %v3845_v51 = vpop.xlane.xlu0 %3844  ;;  %v4175_v2 = vpop.f32.mrb[50].mxu1 }
 0x717   :  { %v10375_v37 = vsub.f32 %v3835_v12, %v3850_v21  ;;  %v3851_v47 = vmul.f32 0.0078125, %v3845_v51  ;;  %v3857_v7 = vmul.f32 %v10373_v42, %v10373_v42  ;;  %v10436_v12 = vadd.f32 %v4175_v2, %v10426_v10  ;;  %v10438_v8 = vpop.f32.mrb[51].mxu1 }
 0x719   :  { %v10379_v48 = vsub.f32 %v3836_v34, %v3851_v47  ;;  %3861 = vadd.xlane.f32.xlu1 %v3857_v7  ;;  %v3858_v41 = vmul.f32 %v10375_v37, %v10375_v37 }
 0x71a   :  { %v3847_v0 = vpop.xlane.xlu0 %3846 }
 0x71b   :  { %v3852_v28 = vmul.f32 0.0078125, %v3847_v0  ;;  %3863 = vadd.xlane.f32.xlu0 %v3858_v41  ;;  %v3859_v32 = vmul.f32 %v10379_v48, %v10379_v48 }
 0x71d   :  { %v10385_v46 = vsub.f32 %v3837_v5, %v3852_v28  ;;  %3865 = vadd.xlane.f32.xlu1 %v3859_v32 }
 0x71f   :  { %v3860_v36 = vmul.f32 %v10385_v46, %v10385_v46 }
 0x721   :  { %3867 = vadd.xlane.f32.xlu0 %v3860_v36 }
 0x72e   :  { %4786 = vrot.lane.b32.xlu1 %v10429_v49, %s9105_s3 }
 0x732   :  { %4798 = vrot.lane.b32.xlu1 %v10429_v49, %s9106_s30 }
 0x736   :  { %4800 = vrot.lane.b32.xlu1 %v10436_v12, %s9106_s30 }
 0x737   :  { %4788 = vrot.lane.b32.xlu0 %v10436_v12, %s9105_s3 }
 0x73a   :  { %4812 = vrot.lane.b32.xlu1 %v10436_v12, %s9107_s4 }
 0x73b   :  { %4810 = vrot.lane.b32.xlu0 %v10429_v49, %s9107_s4 }
 0x7a6   :  { %v3862_v29 = vpop.xlane.xlu1 %3861 }
 0x7a7   :  { %v3869_v34 = vmul.f32 0.0078125, %v3862_v29 }
 0x7a8   :  { %v3864_v3 = vpop.xlane.xlu0 %3863 }
 0x7a9   :  { %v3873_v5 = vadd.f32 1e-05, %v3869_v34  ;;  %v3870_v25 = vmul.f32 0.0078125, %v3864_v3 }
 0x7aa   :  { %v3866_v17 = vpop.xlane.xlu1 %3865 }
 0x7ab   :  { %8987 = vrsqrt.f32 %v3873_v5  ;;  %v3874_v44 = vadd.f32 1e-05, %v3870_v25  ;;  %v3871_v45 = vmul.f32 0.0078125, %v3866_v17 }
 0x7ad   :  { %8989 = vrsqrt.f32 %v3874_v44  ;;  %v3875_v9 = vadd.f32 1e-05, %v3871_v45 }
 0x7ae   :  { %v3868_v19 = vpop.xlane.xlu0 %3867  ;;  %v4787_v7 = vpop.permute.xlu1 %4786 }
 0x7af   :  { %8991 = vrsqrt.f32 %v3875_v9  ;;  %v3872_v27 = vmul.f32 0.0078125, %v3868_v19 }
 0x7b1   :  { %v3876_v18 = vadd.f32 1e-05, %v3872_v27 }
 0x7b2   :  { %v4799_v41 = vpop.permute.xlu1 %4798 }
 0x7b3   :  { %8993 = vrsqrt.f32 %v3876_v18  ;;  %v4822_v28 = vcombine.low %v10429_v49, %v4799_v41 }
 0x7b5   :  { %v8988_v30 = vpop.eup %8987  ;;  %v4830_v38 = vrot.slane %v4822_v28, %v9435_v11  ;;  %v4181_v28 = vpop.f32.mrb[52].mxu1 }
 0x7b6   :  { %v3881_v31 = vmul.f32 %v8988_v30, %v10373_v42  ;;  %v4801_v36 = vpop.permute.xlu1 %4800 }
 0x7b7   :  { %v8990_v43 = vpop.eup %8989  ;;  %v4890_v50 = vcombine.low %v10436_v12, %v4801_v36  ;;  %v4891_v14 = vcombine.high %v10436_v12, %v4801_v36 }
 0x7b8   :  { %v3882_v16 = vmul.f32 %v8990_v43, %v10375_v37  ;;  %v3891_v20 = vmul.f32 %v8209_v6, %v3881_v31 }
 0x7b9   :  { %v8992_v61 = vpop.eup %8991  ;;  %v4898_v26 = vrot.slane %v4890_v50, %v9435_v11  ;;  %v4905_v40 = vrot.slane %v4891_v14, %v9435_v11 }
 0x7ba   :  { %v3883_v13 = vmul.f32 %v8992_v61, %v10379_v48  ;;  %v3892_v15 = vmul.f32 %v8209_v6, %v3882_v16  ;;  %v10459_v4 = vadd.f32 %v8210_v55, %v3891_v20  ;;  %v4789_v48 = vpop.permute.xlu0 %4788  ;;  %v4813_v59 = vpop.permute.xlu1 %4812 }
 0x7bb   :  { %v4906_v39 = vcombine.low %v4789_v48, %v4813_v59 }
 0x7bc   :  { %v10461_v22 = vadd.f32 %v8210_v55, %v3892_v15  ;;  %v3893_v21 = vmul.f32 %v8209_v6, %v3883_v13 }
 0x7bd   :  { %v8994_v57 = vpop.eup %8993  ;;  %v4914_v2 = vrot.slane %v4906_v39, %v9435_v11 }
 0x7be   :  { %v3884_v54 = vmul.f32 %v8994_v57, %v10385_v46  ;;  %v3921_v1 = vpack.c.bf16 %v10461_v22, %v10459_v4  ;;  %v10466_v51 = vadd.f32 %v8210_v55, %v3893_v21  ;;  %v4811_v0 = vpop.permute.xlu0 %4810  ;;  %v4823_v46 = vcombine.high %v10429_v49, %v4799_v41 }
 0x7bf   :  { %v4838_v32 = vcombine.low %v4787_v7, %v4811_v0  ;;  %v4839_v62 = vcombine.high %v4787_v7, %v4811_v0  ;;  %v4907_v49 = vcombine.high %v4789_v48, %v4813_v59  ;;  %v4922_v25 = vcombine.low %v4898_v26, %v4914_v2 }
 0x7c0   :  { %8614 = vmatprep.mubr.bf16.mxu0 %v3921_v1  ;;  %v3894_v42 = vmul.f32 %v8209_v6, %v3884_v54  ;;  %v4837_v60 = vrot.slane %v4823_v46, %v9435_v11  ;;  %v4923_v17 = vcombine.high %v4898_v26, %v4914_v2 }
 0x7c1   :  { %v4846_v63 = vrot.slane %v4838_v32, %v9435_v11  ;;  %v4853_v56 = vrot.slane %v4839_v62, %v9435_v11  ;;  %v4921_v29 = vrot.slane %v4907_v49, %v9435_v11  ;;  %v4930_v27 = vrot.slane %v4922_v25, %v9444_v23  ;;  %v10502_v32 = vpop.f32.mrb[53].mxu1 }
 0x7c2   :  { %v10468_v37 = vadd.f32 %v8210_v55, %v3894_v42  ;;  %v4937_v18 = vrot.slane %v4923_v17, %v9444_v23  ;;  %v4185_v46 = vpop.f32.mrb[54].mxu1 }
 0x7c3   :  { %v4854_v12 = vcombine.low %v4830_v38, %v4846_v63  ;;  %v4855_v34 = vcombine.high %v4830_v38, %v4846_v63  ;;  %v4870_v3 = vcombine.low %v4837_v60, %v4853_v56  ;;  %v4871_v5 = vcombine.high %v4837_v60, %v4853_v56  ;;  %v10507_v59 = vpop.f32.mrb[55].mxu1 }
 0x7c4   :  { %11628 = vst [vmem:[#allocation7_spill] sm:$0xff] %v10468_v37  ;;  %v3922_v47 = vpack.c.bf16 %v10468_v37, %v10466_v51  ;;  %v4938_v44 = vcombine.low %v4905_v40, %v4921_v29  ;;  %v4939_v45 = vcombine.high %v4905_v40, %v4921_v29  ;;  %v5162_v61 = vcombine.low %v4930_v27, %v4937_v18 }
 0x7c5   :  { %v4862_v9 = vrot.slane %v4854_v12, %v9444_v23  ;;  %v4869_v19 = vrot.slane %v4855_v34, %v9444_v23  ;;  %v4878_v30 = vrot.slane %v4870_v3, %v9444_v23  ;;  %v4885_v6 = vrot.slane %v4871_v5, %v9444_v23 }
 0x7c6   :  { %8615 = vmatmul.mubr.bf16.vlgmr.msra.gmra.mrb[32].mxu0 %v3922_v47  ;;  %v4946_v31 = vrot.slane %v4938_v44, %v9444_v23  ;;  %v4953_v43 = vrot.slane %v4939_v45, %v9444_v23  ;;  %v8246_v55 = vcombine.high %v4930_v27, %v4937_v18  ;;  %v5169_v42 = vrot.slane %v5162_v61, %v9435_v11 }
 0x7c7   :  { %8620 = vmatprep.mubr.msk.bf16.mxu0 %vm9109_vm0, %v11597_v52  ;;  %v5094_v16 = vcombine.low %v4862_v9, %v4869_v19  ;;  %v8244_v20 = vcombine.high %v4862_v9, %v4869_v19  ;;  %v5110_v13 = vcombine.low %v4878_v30, %v4885_v6  ;;  %v8245_v15 = vcombine.high %v4878_v30, %v4885_v6 }
 0x7c8   :  { %v5178_v57 = vcombine.low %v4946_v31, %v4953_v43  ;;  %v8247_v54 = vcombine.high %v4946_v31, %v4953_v43  ;;  %v5177_v47 = vrot.slane %v8246_v55, %v9435_v11  ;;  %v8211_v43 = vld [vmem:[%s11576_s9] ss:$0 sm:$0xff] }
 0x7c9   :  { %v5101_v1 = vrot.slane %v5094_v16, %v9435_v11  ;;  %v5109_v21 = vrot.slane %v8244_v20, %v9435_v11  ;;  %v5117_v7 = vrot.slane %v5110_v13, %v9435_v11  ;;  %v5125_v48 = vrot.slane %v8245_v15, %v9435_v11 }
 0x7ca   :  { %v5185_v41 = vrot.slane %v5178_v57, %v9435_v11  ;;  %v5193_v0 = vrot.slane %v8247_v54, %v9435_v11  ;;  %v5194_v50 = vcombine.low %v5169_v42, %v5177_v47  ;;  %v5195_v2 = vcombine.high %v5169_v42, %v5177_v47 }
 0x7cb   :  { %v5126_v36 = vcombine.low %v5101_v1, %v5109_v21  ;;  %v5142_v62 = vcombine.low %v5117_v7, %v5125_v48  ;;  %v5127_v39 = vcombine.high %v5101_v1, %v5109_v21  ;;  %v5143_v49 = vcombine.high %v5117_v7, %v5125_v48 }
 0x7cc   :  { %v5210_v14 = vcombine.low %v5185_v41, %v5193_v0  ;;  %v5202_v60 = vrot.slane %v5194_v50, %v9444_v23  ;;  %v5211_v29 = vcombine.high %v5185_v41, %v5193_v0  ;;  %v5209_v5 = vrot.slane %v5195_v2, %v9444_v23 }
 0x7cd   :  { %v5134_v38 = vrot.slane %v5126_v36, %v9444_v23  ;;  %v5150_v63 = vrot.slane %v5142_v62, %v9444_v23  ;;  %v5141_v34 = vrot.slane %v5127_v39, %v9444_v23  ;;  %v5157_v3 = vrot.slane %v5143_v49, %v9444_v23 }
 0x7ce   :  { %v5218_v56 = vrot.slane %v5210_v14, %v9444_v23  ;;  %v5225_v25 = vrot.slane %v5211_v29, %v9444_v23  ;;  %v10531_v57 = vadd.f32 %v4181_v28, %v10426_v10  ;;  %v10535_v54 = vadd.f32 %v4185_v46, %v10426_v10 }
 0x7cf   :  { %v5158_v26 = vcombine.low %v5134_v38, %v5150_v63  ;;  %v5159_v44 = vcombine.high %v5134_v38, %v5150_v63  ;;  %v5160_v9 = vcombine.low %v5141_v34, %v5157_v3  ;;  %v5161_v30 = vcombine.high %v5141_v34, %v5157_v3 }
 0x7d0   :  { %v5226_v40 = vcombine.low %v5202_v60, %v5218_v56  ;;  %v5227_v45 = vcombine.high %v5202_v60, %v5218_v56  ;;  %v5228_v19 = vcombine.low %v5209_v5, %v5225_v25  ;;  %v5229_v6 = vcombine.high %v5209_v5, %v5225_v25 }
 0x7d1   :  { %v10561_v21 = vrot.slane %v10422_v53, %v9335_v35 }
 0x7d2   :  { %v5366_v12 = vpack.c.bf16 %v5226_v40, %v5158_v26  ;;  %v10516_v27 = vpack.c.bf16 %v5227_v45, %v5159_v44  ;;  %v10518_v18 = vpack.c.bf16 %v5228_v19, %v5160_v9  ;;  %v10520_v31 = vpack.c.bf16 %v5229_v6, %v5161_v30 }
 0x7d3   :  { %v10569_v42 = vadd.f32 %v10438_v8, %v10561_v21  ;;  %v10575_v47 = vadd.f32 %v10431_v24, %v10561_v21  ;;  %v10591_v53 = vadd.f32 %v10502_v32, %v10561_v21 }
 0x7d4   :  { %v5970_v17 = vsel %vm2149_vm1, %v5366_v12, 0 }
 0x7d5   :  { %8619 = vmatpush3.bf16.xpose.msra.mxu0 %v5970_v17 }
 0x7d6   :  { %8624 = vmatprep.subr.bf16.mxu0 %v11597_v52 }
 0x899   :  { %v8616_v16 = vpop.f32.mrb[32].mxu0 }
 0x89a   :  { %v4012_v20 = vpop.f32.mrb[33].mxu0  ;;  %v10547_v1 = vadd.f32 %v8616_v16, %v8211_v43 }
 0x89b   :  { %v4013_v61 = vadd.f32 %v8211_v43, %v4012_v20  ;;  %v8617_v55 = vpop.f32.mrb[34].mxu0 }
 0x89c   :  { %v4015_v13 = vpop.f32.mrb[35].mxu0  ;;  %v10551_v10 = vadd.f32 %v8617_v55, %v8211_v43 }
 0x89d   :  { %v4016_v15 = vadd.f32 %v8211_v43, %v4015_v13  ;;  %4194 = vrot.lane.b32.xlu0 %v4013_v61, %s9105_s3 }
 0x89f   :  { %4196 = vrot.lane.b32.xlu1 %v4016_v15, %s9105_s3 }
 0x8a1   :  { %4206 = vrot.lane.b32.xlu0 %v4013_v61, %s9106_s30 }
 0x8a3   :  { %4208 = vrot.lane.b32.xlu1 %v4016_v15, %s9106_s30 }
 0x8a5   :  { %4218 = vrot.lane.b32.xlu0 %v4013_v61, %s9107_s4 }
 0x8a7   :  { %4220 = vrot.lane.b32.xlu1 %v4016_v15, %s9107_s4 }
 0x8a9   :  { %4790 = vrot.lane.b32.xlu0 %v10531_v57, %s9105_s3 }
 0x8ab   :  { %4792 = vrot.lane.b32.xlu1 %v10535_v54, %s9105_s3 }
 0x8ad   :  { %4802 = vrot.lane.b32.xlu0 %v10531_v57, %s9106_s30 }
 0x8af   :  { %4804 = vrot.lane.b32.xlu1 %v10535_v54, %s9106_s30 }
 0x8b1   :  { %4814 = vrot.lane.b32.xlu0 %v10531_v57, %s9107_s4 }
 0x8b3   :  { %4816 = vrot.lane.b32.xlu1 %v10535_v54, %s9107_s4 }
 0x8b5   :  { %4198 = vrot.lane.b32.xlu0 %v10547_v1, %s9105_s3 }
 0x8b7   :  { %4200 = vrot.lane.b32.xlu1 %v10551_v10, %s9105_s3 }
 0x8b9   :  { %4210 = vrot.lane.b32.xlu0 %v10547_v1, %s9106_s30 }
 0x8bb   :  { %4212 = vrot.lane.b32.xlu1 %v10551_v10, %s9106_s30 }
 0x8bd   :  { %4222 = vrot.lane.b32.xlu0 %v10547_v1, %s9107_s4 }
 0x8bf   :  { %4224 = vrot.lane.b32.xlu1 %v10551_v10, %s9107_s4 }
 0x8c1   :  { %5380 = vrot.lane.b32.xlu0 %v10569_v42, %s9105_s3 }
 0x8c3   :  { %5378 = vrot.lane.b32.xlu1 %v10575_v47, %s9105_s3 }
 0x8c5   :  { %5402 = vrot.lane.b32.xlu0 %v10575_v47, %s9107_s4 }
 0x8c7   :  { %5390 = vrot.lane.b32.xlu1 %v10575_v47, %s9106_s30 }
 0x8cb   :  { %5392 = vrot.lane.b32.xlu1 %v10569_v42, %s9106_s30 }
 0x8cf   :  { %5404 = vrot.lane.b32.xlu1 %v10569_v42, %s9107_s4 }
 0x8d3   :  { %5382 = vrot.lane.b32.xlu1 %v10591_v53, %s9105_s3 }
 0x90f   :  { %v4195_v24 = vpop.permute.xlu0 %4194 }
 0x911   :  { %v4197_v8 = vpop.permute.xlu1 %4196 }
 0x913   :  { %v4207_v7 = vpop.permute.xlu0 %4206 }
 0x914   :  { %v4230_v48 = vcombine.low %v4013_v61, %v4207_v7  ;;  %v4231_v41 = vcombine.high %v4013_v61, %v4207_v7 }
 0x915   :  { %v4209_v0 = vpop.permute.xlu1 %4208 }
 0x916   :  { %v4238_v62 = vrot.slane %v4230_v48, %v9435_v11  ;;  %v4245_v50 = vrot.slane %v4231_v41, %v9435_v11  ;;  %v4298_v14 = vcombine.low %v4016_v15, %v4209_v0  ;;  %v4299_v38 = vcombine.high %v4016_v15, %v4209_v0 }
 0x917   :  { %v4219_v28 = vpop.permute.xlu0 %4218 }
 0x918   :  { %v4246_v46 = vcombine.low %v4195_v24, %v4219_v28  ;;  %v4247_v36 = vcombine.high %v4195_v24, %v4219_v28  ;;  %v4306_v12 = vrot.slane %v4298_v14, %v9435_v11  ;;  %v4313_v34 = vrot.slane %v4299_v38, %v9435_v11 }
 0x919   :  { %v4221_v32 = vpop.permute.xlu1 %4220 }
 0x91a   :  { %v4254_v63 = vrot.slane %v4246_v46, %v9435_v11  ;;  %v4261_v60 = vrot.slane %v4247_v36, %v9435_v11  ;;  %v4314_v56 = vcombine.low %v4197_v8, %v4221_v32  ;;  %v4315_v26 = vcombine.high %v4197_v8, %v4221_v32 }
 0x91b   :  { %v10599_v40 = vpop.permute.xlu0 %4790 }
 0x91c   :  { %v4262_v39 = vcombine.low %v4238_v62, %v4254_v63  ;;  %v4263_v49 = vcombine.high %v4238_v62, %v4254_v63  ;;  %v4278_v2 = vcombine.low %v4245_v50, %v4261_v60  ;;  %v4279_v29 = vcombine.high %v4245_v50, %v4261_v60 }
 0x91d   :  { %v4322_v3 = vrot.slane %v4314_v56, %v9435_v11  ;;  %v4329_v5 = vrot.slane %v4315_v26, %v9435_v11  ;;  %v10605_v25 = vpop.permute.xlu1 %4792 }
 0x91e   :  { %v4270_v17 = vrot.slane %v4262_v39, %v9444_v23  ;;  %v4277_v44 = vrot.slane %v4263_v49, %v9444_v23  ;;  %v4286_v45 = vrot.slane %v4278_v2, %v9444_v23  ;;  %v4293_v9 = vrot.slane %v4279_v29, %v9444_v23 }
 0x91f   :  { %v4330_v19 = vcombine.low %v4306_v12, %v4322_v3  ;;  %v4331_v30 = vcombine.high %v4306_v12, %v4322_v3  ;;  %v4346_v6 = vcombine.low %v4313_v34, %v4329_v5  ;;  %v4347_v43 = vcombine.high %v4313_v34, %v4329_v5  ;;  %v4803_v16 = vpop.permute.xlu0 %4802 }
 0x920   :  { %v4502_v20 = vcombine.low %v4270_v17, %v4277_v44  ;;  %v8236_v61 = vcombine.high %v4270_v17, %v4277_v44  ;;  %v4518_v55 = vcombine.low %v4286_v45, %v4293_v9  ;;  %v8237_v13 = vcombine.high %v4286_v45, %v4293_v9 }
 0x921   :  { %v4338_v15 = vrot.slane %v4330_v19, %v9444_v23  ;;  %v4345_v24 = vrot.slane %v4331_v30, %v9444_v23  ;;  %v4354_v8 = vrot.slane %v4346_v6, %v9444_v23  ;;  %v4361_v7 = vrot.slane %v4347_v43, %v9444_v23  ;;  %v4805_v48 = vpop.permute.xlu1 %4804 }
 0x922   :  { %v4509_v41 = vrot.slane %v4502_v20, %v9435_v11  ;;  %v4517_v0 = vrot.slane %v8236_v61, %v9435_v11  ;;  %v4525_v28 = vrot.slane %v4518_v55, %v9435_v11  ;;  %v4533_v46 = vrot.slane %v8237_v13, %v9435_v11 }
 0x923   :  { %v4570_v36 = vcombine.low %v4338_v15, %v4345_v24  ;;  %v8238_v62 = vcombine.high %v4338_v15, %v4345_v24  ;;  %v4586_v50 = vcombine.low %v4354_v8, %v4361_v7  ;;  %v8239_v14 = vcombine.high %v4354_v8, %v4361_v7  ;;  %v4815_v38 = vpop.permute.xlu0 %4814 }
 0x924   :  { %v4534_v32 = vcombine.low %v4509_v41, %v4517_v0  ;;  %v4535_v63 = vcombine.high %v4509_v41, %v4517_v0  ;;  %v4550_v60 = vcombine.low %v4525_v28, %v4533_v46  ;;  %v4551_v56 = vcombine.high %v4525_v28, %v4533_v46 }
 0x925   :  { %v4577_v26 = vrot.slane %v4570_v36, %v9435_v11  ;;  %v4585_v39 = vrot.slane %v8238_v62, %v9435_v11  ;;  %v10622_v49 = vrot.slane %v4586_v50, %v9435_v11  ;;  %v10625_v2 = vrot.slane %v8239_v14, %v9435_v11  ;;  %v4817_v29 = vpop.permute.xlu1 %4816 }
 0x926   :  { %v10631_v34 = vsel %vm2149_vm1, %v10516_v27, 0  ;;  %v4958_v17 = vcombine.low %v10531_v57, %v4803_v16  ;;  %v4959_v44 = vcombine.high %v10531_v57, %v4803_v16  ;;  %v10638_v45 = vrot.slane %v4534_v32, %v9444_v23 }
 0x927   :  { %v10627_v12 = vpop.permute.xlu0 %4198  ;;  %v4602_v3 = vcombine.low %v4577_v26, %v4585_v39  ;;  %v4618_v5 = vcombine.low %v10622_v49, %v10625_v2  ;;  %v10641_v9 = vrot.slane %v4535_v63, %v9444_v23  ;;  %v10644_v19 = vrot.slane %v4550_v60, %v9444_v23 }
 0x928   :  { %v10647_v27 = vrot.slane %v4551_v56, %v9444_v23  ;;  %v4603_v6 = vcombine.high %v4577_v26, %v4585_v39  ;;  %v4619_v43 = vcombine.high %v10622_v49, %v10625_v2  ;;  %v5026_v57 = vcombine.low %v10535_v54, %v4805_v48 }
 0x929   :  { %v10649_v30 = vpop.permute.xlu1 %4200  ;;  %v5027_v16 = vcombine.high %v10535_v54, %v4805_v48  ;;  %v4974_v20 = vcombine.low %v10599_v40, %v4815_v38  ;;  %v4975_v61 = vcombine.high %v10599_v40, %v4815_v38  ;;  %v5042_v55 = vcombine.low %v10605_v25, %v4817_v29 }
 0x92a   :  { %v5043_v13 = vcombine.high %v10605_v25, %v4817_v29  ;;  %v10660_v24 = vrot.slane %v4602_v3, %v9444_v23  ;;  %v10663_v8 = vrot.slane %v4618_v5, %v9444_v23  ;;  %v4966_v7 = vrot.slane %v4958_v17, %v9435_v11 }
 0x92b   :  { %v4211_v15 = vpop.permute.xlu0 %4210  ;;  %v4973_v41 = vrot.slane %v4959_v44, %v9435_v11  ;;  %v4982_v54 = vrot.slane %v4974_v20, %v9435_v11  ;;  %v4989_v48 = vrot.slane %v4975_v61, %v9435_v11  ;;  %v5050_v40 = vrot.slane %v5042_v55, %v9435_v11 }
 0x92c   :  { %v5057_v0 = vrot.slane %v5043_v13, %v9435_v11  ;;  %v5034_v25 = vrot.slane %v5026_v57, %v9435_v11  ;;  %v5041_v28 = vrot.slane %v5027_v16, %v9435_v11  ;;  %v4366_v46 = vcombine.low %v10547_v1, %v4211_v15 }
 0x92d   :  { %v4367_v36 = vcombine.high %v10547_v1, %v4211_v15  ;;  %v4213_v62 = vpop.permute.xlu1 %4212  ;;  %v4990_v50 = vcombine.low %v4966_v7, %v4982_v54  ;;  %v4991_v14 = vcombine.high %v4966_v7, %v4982_v54  ;;  %v5006_v38 = vcombine.low %v4973_v41, %v4989_v48 }
 0x92e   :  { %v5007_v32 = vcombine.high %v4973_v41, %v4989_v48  ;;  %v5058_v60 = vcombine.low %v5034_v25, %v5050_v40  ;;  %v5059_v56 = vcombine.high %v5034_v25, %v5050_v40  ;;  %v5074_v26 = vcombine.low %v5041_v28, %v5057_v0 }
 0x92f   :  { %v4223_v63 = vpop.permute.xlu0 %4222  ;;  %v5075_v39 = vcombine.high %v5041_v28, %v5057_v0  ;;  %v4998_v29 = vrot.slane %v4990_v50, %v9444_v23  ;;  %v5005_v3 = vrot.slane %v4991_v14, %v9444_v23  ;;  %v10678_v5 = vrot.slane %v5006_v38, %v9444_v23 }
 0x930   :  { %v10681_v17 = vrot.slane %v5007_v32, %v9444_v23  ;;  %v10684_v1 = vrot.slane %v5058_v60, %v9444_v23  ;;  %v10687_v44 = vrot.slane %v5059_v56, %v9444_v23  ;;  %v10690_v57 = vrot.slane %v5074_v26, %v9444_v23 }
 0x931   :  { %v10693_v16 = vrot.slane %v5075_v39, %v9444_v23  ;;  %v5230_v20 = vcombine.low %v4998_v29, %v5005_v3  ;;  %v8248_v61 = vcombine.high %v4998_v29, %v5005_v3  ;;  %v4634_v13 = vcombine.low %v10660_v24, %v10663_v8  ;;  %v4225_v40 = vpop.permute.xlu1 %4224 }
 0x932   :  { %v5246_v55 = vcombine.low %v10678_v5, %v10681_v17  ;;  %v10702_v7 = vrot.slane %v4603_v6, %v9444_v23  ;;  %v4374_v41 = vrot.slane %v4366_v46, %v9435_v11  ;;  %v4434_v54 = vcombine.low %v10551_v10, %v4213_v62 }
 0x933   :  { %v10699_v15 = vpop.permute.xlu0 %5380  ;;  %v4566_v48 = vcombine.low %v10638_v45, %v10644_v19  ;;  %v8249_v0 = vcombine.high %v10678_v5, %v10681_v17  ;;  %v5298_v25 = vcombine.low %v10684_v1, %v10687_v44  ;;  %v4381_v28 = vrot.slane %v4367_v36, %v9435_v11 }
 0x934   :  { %v4435_v50 = vcombine.high %v10551_v10, %v4213_v62  ;;  %v10715_v6 = vrot.slane %v5230_v20, %v9435_v11  ;;  %v8250_v46 = vcombine.high %v10684_v1, %v10687_v44  ;;  %v5314_v14 = vcombine.low %v10690_v57, %v10693_v16 }
 0x935   :  { %v8251_v38 = vcombine.high %v10690_v57, %v10693_v16  ;;  %v10724_v32 = vrot.slane %v8248_v61, %v9435_v11  ;;  %v10727_v60 = vrot.slane %v5246_v55, %v9435_v11  ;;  %v4774_v36 = vpack.c.bf16 %v4634_v13, %v4566_v48  ;;  %v10747_v13 = vpop.permute.xlu1 %5378 }
 0x936   :  { %v4382_v10 = vcombine.low %v10627_v12, %v4223_v63  ;;  %v4442_v62 = vrot.slane %v4434_v54, %v9435_v11  ;;  %v4383_v56 = vcombine.high %v10627_v12, %v4223_v63  ;;  %v4450_v26 = vcombine.low %v10649_v30, %v4225_v40 }
 0x937   :  { %v4451_v39 = vcombine.high %v10649_v30, %v4225_v40  ;;  %v10734_v29 = vpop.permute.xlu0 %5402  ;;  %v4449_v3 = vrot.slane %v4435_v50, %v9435_v11  ;;  %8621 = vmatmul.mubr.msk.bf16.vlgmr.msra.gmra.mrb[36].mxu0 %vm2149_vm1, %v4774_v36  ;;  %v4567_v61 = vcombine.high %v10638_v45, %v10644_v19  ;;  %v4635_v55 = vcombine.high %v10660_v24, %v10663_v8 }
 0x938   :  { %v4390_v20 = vrot.slane %v4382_v10, %v9435_v11  ;;  %8625 = vmatpush3.bf16.xpose.msra.mxu0 %v10631_v34  ;;  %v4397_v12 = vrot.slane %v4383_v56, %v9435_v11  ;;  %v4458_v30 = vrot.slane %v4450_v26, %v9435_v11  ;;  %8626 = vmatprep.mubr.msk.bf16.mxu0 %vm9109_vm0, %v11597_v52  ;;  %v6064_v54 = vsel %vm2149_vm1, %v10518_v18, 0 }
 0x939   :  { %v4465_v63 = vrot.slane %v4451_v39, %v9435_v11  ;;  %8630 = vmatprep.subr.bf16.mxu0 %v11597_v52  ;;  %v4775_v24 = vpack.c.bf16 %v4635_v55, %v4567_v61  ;;  %v5430_v34 = vcombine.low %v10747_v13, %v10734_v29  ;;  %v10809_v5 = vrot.slane %v8250_v46, %v9435_v11 }
 0x93a   :  { %v4398_v45 = vcombine.low %v4374_v41, %v4390_v20  ;;  %v4399_v19 = vcombine.high %v4374_v41, %v4390_v20  ;;  %v4414_v8 = vcombine.low %v4381_v28, %v4397_v12  ;;  %v4415_v48 = vcombine.high %v4381_v28, %v4397_v12 }
 0x93b   :  { %v4466_v40 = vcombine.low %v4442_v62, %v4458_v30  ;;  %v4467_v50 = vcombine.high %v4442_v62, %v4458_v30  ;;  %v4482_v56 = vcombine.low %v4449_v3, %v4465_v63  ;;  %v4483_v26 = vcombine.high %v4449_v3, %v4465_v63 }
 0x93c   :  { %v4406_v36 = vrot.slane %v4398_v45, %v9444_v23  ;;  %v4413_v10 = vrot.slane %v4399_v19, %v9444_v23  ;;  %v4422_v18 = vrot.slane %v4414_v8, %v9444_v23  ;;  %v4429_v41 = vrot.slane %v4415_v48, %v9444_v23 }
 0x93d   :  { %v4474_v39 = vrot.slane %v4466_v40, %v9444_v23  ;;  %v4481_v20 = vrot.slane %v4467_v50, %v9444_v23  ;;  %v4490_v28 = vrot.slane %v4482_v56, %v9444_v23  ;;  %v4497_v62 = vrot.slane %v4483_v26, %v9444_v23  ;;  %v5391_v40 = vpop.permute.xlu1 %5390 }
 0x93e   :  { %v4638_v61 = vcombine.low %v4406_v36, %v4413_v10  ;;  %v8240_v55 = vcombine.high %v4406_v36, %v4413_v10  ;;  %v4654_v12 = vcombine.low %v4422_v18, %v4429_v41  ;;  %v8241_v30 = vcombine.high %v4422_v18, %v4429_v41 }
 0x93f   :  { %v4706_v45 = vcombine.low %v4474_v39, %v4481_v20  ;;  %v8242_v19 = vcombine.high %v4474_v39, %v4481_v20  ;;  %v4722_v8 = vcombine.low %v4490_v28, %v4497_v62  ;;  %v8243_v48 = vcombine.high %v4490_v28, %v4497_v62  ;;  %8627 = vmatmul.mubr.msk.bf16.vlgmr.msra.gmra.mrb[40].mxu0 %vm2149_vm1, %v4775_v24 }
 0x940   :  { %v10765_v3 = vrot.slane %v4638_v61, %v9435_v11  ;;  %v10768_v63 = vrot.slane %v8240_v55, %v9435_v11  ;;  %v10772_v50 = vrot.slane %v4654_v12, %v9435_v11  ;;  %v10775_v36 = vrot.slane %v8241_v30, %v9435_v11  ;;  %8631 = vmatpush3.bf16.xpose.msra.mxu0 %v6064_v54 }
 0x941   :  { %v10778_v10 = vrot.slane %v4706_v45, %v9435_v11  ;;  %v10781_v56 = vrot.slane %v8242_v19, %v9435_v11  ;;  %v10787_v26 = vrot.slane %v8249_v0, %v9435_v11  ;;  %v10792_v18 = vrot.slane %v4722_v8, %v9435_v11  ;;  %8632 = vmatprep.mubr.msk.bf16.mxu0 %vm9109_vm0, %v11597_v52  ;;  %v5393_v2 = vpop.permute.xlu1 %5392 }
 0x942   :  { %v4670_v24 = vcombine.low %v10765_v3, %v10768_v63  ;;  %v10795_v41 = vrot.slane %v8243_v48, %v9435_v11  ;;  %v10803_v54 = vrot.slane %v5298_v25, %v9435_v11  ;;  %v4686_v17 = vcombine.low %v10772_v50, %v10775_v36  ;;  %8636 = vmatprep.subr.bf16.mxu0 %v11597_v52 }
 0x943   :  { %v4738_v0 = vcombine.low %v10778_v10, %v10781_v56  ;;  %v10820_v25 = vrot.slane %v5314_v14, %v9435_v11  ;;  %v10826_v1 = vrot.slane %v8251_v38, %v9435_v11  ;;  %v5431_v46 = vcombine.high %v10747_v13, %v10734_v29 }
 0x944   :  { %v4754_v44 = vcombine.low %v10792_v18, %v10795_v41  ;;  %v10836_v39 = vrot.slane %v4619_v43, %v9444_v23  ;;  %v10839_v14 = vrot.slane %v4670_v24, %v9444_v23  ;;  %v10842_v20 = vrot.slane %v4686_v17, %v9444_v23 }
 0x945   :  { %v5438_v57 = vrot.slane %v5430_v34, %v9435_v11  ;;  %v10848_v38 = vrot.slane %v4738_v0, %v9444_v23  ;;  %v5414_v49 = vcombine.low %v10575_v47, %v5391_v40  ;;  %v5415_v13 = vcombine.high %v10575_v47, %v5391_v40  ;;  %v5405_v16 = vpop.permute.xlu1 %5404 }
 0x946   :  { %v10854_v43 = vrot.slane %v4754_v44, %v9444_v23  ;;  %v5262_v34 = vcombine.low %v10715_v6, %v10724_v32  ;;  %v5278_v61 = vcombine.low %v10727_v60, %v10787_v26  ;;  %v5445_v55 = vrot.slane %v5431_v46, %v9435_v11 }
 0x947   :  { %v5422_v28 = vrot.slane %v5414_v49, %v9435_v11  ;;  %v5330_v62 = vcombine.low %v10803_v54, %v10809_v5  ;;  %v5346_v12 = vcombine.low %v10820_v25, %v10826_v1  ;;  %v4703_v30 = vcombine.high %v10839_v14, %v10842_v20 }
 0x948   :  { %v5429_v47 = vrot.slane %v5415_v13, %v9435_v11  ;;  %v5270_v45 = vrot.slane %v5262_v34, %v9444_v23  ;;  %v5286_v19 = vrot.slane %v5278_v61, %v9444_v23  ;;  %v5482_v46 = vcombine.low %v10569_v42, %v5393_v2 }
 0x949   :  { %v5446_v8 = vcombine.low %v5422_v28, %v5438_v57  ;;  %v5447_v48 = vcombine.high %v5422_v28, %v5438_v57  ;;  %v5338_v40 = vrot.slane %v5330_v62, %v9444_v23  ;;  %v5354_v24 = vrot.slane %v5346_v12, %v9444_v23 }
 0x94a   :  { %v5462_v17 = vcombine.low %v5429_v47, %v5445_v55  ;;  %v5463_v0 = vcombine.high %v5429_v47, %v5445_v55  ;;  %v5295_v44 = vcombine.high %v5270_v45, %v5286_v19  ;;  %v5483_v34 = vcombine.high %v10569_v42, %v5393_v2 }
 0x94b   :  { %v5454_v49 = vrot.slane %v5446_v8, %v9444_v23  ;;  %v5461_v29 = vrot.slane %v5447_v48, %v9444_v23  ;;  %v5363_v13 = vcombine.high %v5338_v40, %v5354_v24  ;;  %v4771_v57 = vcombine.high %v10848_v38, %v10854_v43 }
 0x94c   :  { %v5470_v61 = vrot.slane %v5462_v17, %v9444_v23  ;;  %v5477_v28 = vrot.slane %v5463_v0, %v9444_v23  ;;  %v4568_v55 = vcombine.low %v10641_v9, %v10647_v27  ;;  %v4636_v8 = vcombine.low %v10702_v7, %v10836_v39 }
 0x94d   :  { %v5686_v62 = vcombine.low %v5454_v49, %v5461_v29  ;;  %v8252_v12 = vcombine.high %v5454_v49, %v5461_v29  ;;  %v5371_v47 = vpack.c.bf16 %v5363_v13, %v5295_v44  ;;  %v5490_v42 = vrot.slane %v5482_v46, %v9435_v11 }
 0x94e   :  { %v5702_v48 = vcombine.low %v5470_v61, %v5477_v28  ;;  %v5498_v2 = vcombine.low %v10699_v15, %v5405_v16  ;;  %v5499_v52 = vcombine.high %v10699_v15, %v5405_v16  ;;  %v8253_v35 = vcombine.high %v5470_v61, %v5477_v28 }
 0x94f   :  { %v6205_v17 = vsel %vm2149_vm1, %v5371_v47, 0  ;;  %v5497_v0 = vrot.slane %v5483_v34, %v9435_v11  ;;  %v4776_v33 = vpack.c.bf16 %v4636_v8, %v4568_v55  ;;  %v10892_v37 = vrot.slane %v5686_v62, %v9435_v11 }
 0x950   :  { %v10895_v29 = vrot.slane %v8252_v12, %v9435_v11  ;;  %8649 = vmatpush3.bf16.xpose.msra.mxu1 %v6205_v17  ;;  %v5506_v44 = vrot.slane %v5498_v2, %v9435_v11  ;;  %v5513_v46 = vrot.slane %v5499_v52, %v9435_v11  ;;  %v10900_v49 = vrot.slane %v5702_v48, %v9435_v11 }
 0x951   :  { %8633 = vmatmul.mubr.msk.bf16.vlgmr.msra.gmra.mrb[44].mxu0 %vm2149_vm1, %v4776_v33  ;;  %v6111_v15 = vsel %vm2149_vm1, %v10520_v31, 0  ;;  %v11629_v16 = vmov 0.0   ;;  %v4569_v13 = vcombine.high %v10641_v9, %v10647_v27  ;;  %v4637_v34 = vcombine.high %v10702_v7, %v10836_v39 }
 0x952   :  { %8660 = vmatprep.subr.bf16.mxu1 %v11629_v16  ;;  %8637 = vmatpush3.bf16.xpose.msra.mxu0 %v6111_v15  ;;  %v5514_v61 = vcombine.low %v5490_v42, %v5506_v44  ;;  %v5515_v28 = vcombine.high %v5490_v42, %v5506_v44  ;;  %v5530_v52 = vcombine.low %v5497_v0, %v5513_v46 }
 0x953   :  { %v5531_v55 = vcombine.high %v5497_v0, %v5513_v46  ;;  %8638 = vmatprep.mubr.msk.bf16.mxu0 %vm9109_vm0, %v11629_v16  ;;  %8642 = vmatprep.subr.bf16.mxu0 %v11629_v16  ;;  %v5294_v33 = vcombine.low %v5270_v45, %v5286_v19  ;;  %v5362_v31 = vcombine.low %v5338_v40, %v5354_v24 }
 0x954   :  { %v4779_v62 = vpack.c.bf16 %v4771_v57, %v4703_v30  ;;  %v5522_v12 = vrot.slane %v5514_v61, %v9444_v23  ;;  %v5529_v9 = vrot.slane %v5515_v28, %v9444_v23  ;;  %v5538_v27 = vrot.slane %v5530_v52, %v9444_v23 }
 0x955   :  { %v5545_v7 = vrot.slane %v5531_v55, %v9444_v23  ;;  %v5370_v39 = vpack.c.bf16 %v5362_v31, %v5294_v33  ;;  %v5263_v47 = vcombine.high %v10715_v6, %v10724_v32  ;;  %v5279_v8 = vcombine.high %v10727_v60, %v10787_v26 }
 0x956   :  { %v5331_v45 = vcombine.high %v10803_v54, %v10809_v5  ;;  %v5754_v19 = vcombine.low %v5522_v12, %v5529_v9  ;;  %v8254_v30 = vcombine.high %v5522_v12, %v5529_v9  ;;  %v5717_v57 = vrot.slane %v8253_v35, %v9435_v11 }
 0x957   :  { %v5770_v40 = vcombine.low %v5538_v27, %v5545_v7  ;;  %v8255_v24 = vcombine.high %v5538_v27, %v5545_v7  ;;  %v4777_v48 = vpack.c.bf16 %v4637_v34, %v4569_v13  ;;  %8651 = vmatmul.mubr.msk.bf16.vlgmr.msra.gmra.mrb[56].mxu1 %vm2149_vm1, %v4779_v62  ;;  %v5277_v42 = vrot.slane %v5263_v47, %v9444_v23 }
 0x958   :  { %v5293_v2 = vrot.slane %v5279_v8, %v9444_v23  ;;  %v5761_v6 = vrot.slane %v5754_v19, %v9435_v11  ;;  %v5769_v32 = vrot.slane %v8254_v30, %v9435_v11  ;;  %v6158_v60 = vsel %vm2149_vm1, %v5370_v39, 0  ;;  %8662 = vmatprep.mubr.msk.bf16.mxu1 %vm9109_vm0, %v11629_v16 }
 0x959   :  { %v5345_v26 = vrot.slane %v5331_v45, %v9444_v23  ;;  %v5777_v35 = vrot.slane %v5770_v40, %v9435_v11  ;;  %v5785_v54 = vrot.slane %v8255_v24, %v9435_v11  ;;  %8639 = vmatmul.mubr.msk.bf16.vlgmr.msra.gmra.mrb[48].mxu0 %vm2149_vm1, %v4777_v48  ;;  %v5347_v5 = vcombine.high %v10820_v25, %v10826_v1 }
 0x95a   :  { %v4770_v17 = vcombine.low %v10848_v38, %v10854_v43  ;;  %v4671_v0 = vcombine.high %v10765_v3, %v10768_v63  ;;  %v4687_v44 = vcombine.high %v10772_v50, %v10775_v36  ;;  %v11630_v46 = vcombine.high %v10778_v10, %v10781_v56  ;;  %8643 = vmatpush3.bf16.xpose.msra.mxu0 %v6158_v60 }
 0x95b   :  { %8644 = vmatprep.mubr.msk.bf16.mxu0 %vm9109_vm0, %v11629_v16  ;;  %v11631_v25 = vcombine.high %v10792_v18, %v10795_v41  ;;  %v5297_v38 = vcombine.high %v5277_v42, %v5293_v2  ;;  %v5361_v3 = vrot.slane %v5347_v5, %v9444_v23  ;;  %8654 = vmatprep.subr.bf16.mxu0 %v11629_v16 }
 0x95c   :  { %v4753_v15 = vrot.slane %v11630_v46, %v9444_v23  ;;  %v4702_v63 = vcombine.low %v10839_v14, %v10842_v20  ;;  %v5296_v50 = vcombine.low %v5277_v42, %v5293_v2  ;;  %v5718_v36 = vcombine.low %v10892_v37, %v10895_v29 }
 0x95d   :  { %v4769_v1 = vrot.slane %v11631_v25, %v9444_v23  ;;  %v5734_v10 = vcombine.low %v10900_v49, %v5717_v57  ;;  %v5786_v56 = vcombine.low %v5761_v6, %v5769_v32  ;;  %v5365_v43 = vcombine.high %v5345_v26, %v5361_v3 }
 0x95e   :  { %v4778_v13 = vpack.c.bf16 %v4770_v17, %v4702_v63  ;;  %v5364_v34 = vcombine.low %v5345_v26, %v5361_v3  ;;  %v5802_v18 = vcombine.low %v5777_v35, %v5785_v54  ;;  %v5726_v41 = vrot.slane %v5718_v36, %v9444_v23 }
 0x95f   :  { %v5742_v61 = vrot.slane %v5734_v10, %v9444_v23  ;;  %v5794_v28 = vrot.slane %v5786_v56, %v9444_v23  ;;  %v5719_v14 = vcombine.high %v10892_v37, %v10895_v29  ;;  %v5373_v20 = vpack.c.bf16 %v5365_v43, %v5297_v38 }
 0x960   :  { %v5372_v52 = vpack.c.bf16 %v5364_v34, %v5296_v50  ;;  %v5810_v55 = vrot.slane %v5802_v18, %v9444_v23  ;;  %v5735_v33 = vcombine.high %v10900_v49, %v5717_v57  ;;  %v4685_v31 = vrot.slane %v4671_v0, %v9444_v23 }
 0x961   :  { %v4701_v62 = vrot.slane %v4687_v44, %v9444_v23  ;;  %v5733_v12 = vrot.slane %v5719_v14, %v9444_v23  ;;  %v5787_v9 = vcombine.high %v5761_v6, %v5769_v32  ;;  %v6299_v27 = vsel %vm2149_vm1, %v5373_v20, 0  ;;  %8645 = vmatmul.mubr.msk.bf16.vlgmr.msra.gmra.mrb[52].mxu0 %vm2149_vm1, %v4778_v13 }
 0x962   :  { %v6252_v7 = vsel %vm2149_vm1, %v5372_v52, 0  ;;  %v5818_v37 = vcombine.low %v5794_v28, %v5810_v55  ;;  %v5819_v29 = vcombine.high %v5794_v28, %v5810_v55  ;;  %8661 = vmatpush3.bf16.xpose.msra.mxu1 %v6299_v27  ;;  %v5749_v39 = vrot.slane %v5735_v33, %v9444_v23  ;;  %8656 = vmatprep.mubr.msk.bf16.mxu0 %vm9109_vm0, %v11629_v16 }
 0x963   :  { %8655 = vmatpush3.bf16.xpose.msra.mxu0 %v6252_v7  ;;  %v5801_v49 = vrot.slane %v5787_v9, %v9444_v23  ;;  %v5803_v47 = vcombine.high %v5777_v35, %v5785_v54  ;;  %v4773_v8 = vcombine.high %v4753_v15, %v4769_v1  ;;  %v4772_v45 = vcombine.low %v4753_v15, %v4769_v1 }
 0x964   :  { %8666 = vmatprep.subr.bf16.mxu0 %v11629_v16  ;;  %v5750_v19 = vcombine.low %v5726_v41, %v5742_v61  ;;  %8672 = vmatprep.subr.bf16.mxu1 %v11629_v16  ;;  %v5751_v30 = vcombine.high %v5726_v41, %v5742_v61  ;;  %v5752_v40 = vcombine.low %v5733_v12, %v5749_v39 }
 0x965   :  { %v5817_v24 = vrot.slane %v5803_v47, %v9444_v23  ;;  %v5753_v57 = vcombine.high %v5733_v12, %v5749_v39  ;;  %v4705_v48 = vcombine.high %v4685_v31, %v4701_v62  ;;  %v4704_v42 = vcombine.low %v4685_v31, %v4701_v62 }
 0x966   :  { %v5958_v2 = vpack.c.bf16 %v5818_v37, %v5750_v19  ;;  %v5959_v6 = vpack.c.bf16 %v5819_v29, %v5751_v30 }
 0x967   :  { %v5820_v32 = vcombine.low %v5801_v49, %v5817_v24  ;;  %v5821_v60 = vcombine.high %v5801_v49, %v5817_v24  ;;  %v4781_v26 = vpack.c.bf16 %v4773_v8, %v4705_v48  ;;  %v4780_v35 = vpack.c.bf16 %v4772_v45, %v4704_v42 }
 0x969   :  { %v10981_v54 = vpack.c.bf16 %v5820_v32, %v5752_v40  ;;  %v10983_v5 = vpack.c.bf16 %v5821_v60, %v5753_v57  ;;  %8663 = vmatmul.mubr.msk.bf16.vlgmr.msra.gmra.mrb[60].mxu1 %vm2149_vm1, %v4781_v26 }
 0x96a   :  { %8657 = vmatmul.mubr.msk.bf16.vlgmr.msra.gmra.mrb[56].mxu0 %vm2149_vm1, %v4780_v35  ;;  %8673 = vmatpush3.bf16.msra.mxu1 %v5959_v6 }
 0x96b   :  { %8667 = vmatpush3.bf16.msra.mxu0 %v5958_v2  ;;  %8668 = vmatprep.mubr.msk.bf16.mxu0 %vm9109_vm0, %v11629_v16 }
 0x96c   :  { %8678 = vmatprep.subr.bf16.mxu0 %v11629_v16  ;;  %8674 = vmatprep.mubr.msk.bf16.mxu1 %vm9109_vm0, %v11629_v16 }
 0x96d   :  { %8684 = vmatprep.subr.bf16.mxu1 %v11629_v16 }
 0xa0a   :  { %v6006_v17 = vpop.f32.mrb[36].mxu0 }
 0xa0b   :  { %v10993_v0 = vmul.f32 0.17677669, %v6006_v17  ;;  %v8622_v44 = vpop.f32.mrb[37].mxu0 }
 0xa0c   :  { %v6009_v46 = vpop.f32.mrb[38].mxu0 }
 0xa0d   :  { %v8623_v15 = vpop.f32.mrb[39].mxu0  ;;  %v6358_v25 = vsel %vm2569_vm3, %v10993_v0, -inf  ;;  %v11001_v20 = vmul.f32 0.17677669, %v6009_v46 }
 0xa0e   :  { %6359 = vmax.xlane.f32.xlu0 %v6358_v25 }
 0xa0f   :  { %v6361_v12 = vsel %vm2569_vm3, %v11001_v20, -inf }
 0xa12   :  { %v6053_v1 = vpop.f32.mrb[40].mxu0 }
 0xa13   :  { %v8628_v38 = vpop.f32.mrb[41].mxu0  ;;  %v11005_v33 = vmul.f32 0.17677669, %v6053_v1 }
 0xa14   :  { %v6056_v3 = vpop.f32.mrb[42].mxu0 }
 0xa15   :  { %v8629_v63 = vpop.f32.mrb[43].mxu0  ;;  %v6364_v9 = vsel %vm2569_vm3, %v11005_v33, -inf  ;;  %v11021_v2 = vmul.f32 0.17677669, %v6056_v3 }
 0xa16   :  { %v11053_v63 = vadd.f32 %v10507_v59, %v10561_v21  ;;  %v11069_v59 = vpop.permute.xlu1 %5382 }
 0xa17   :  { %v6367_v35 = vsel %vm2569_vm3, %v11021_v2, -inf }
 0xa24   :  { %v6100_v50 = vpop.f32.mrb[44].mxu0 }
 0xa25   :  { %v8634_v36 = vpop.f32.mrb[45].mxu0  ;;  %v11015_v40 = vmul.f32 0.17677669, %v6100_v50 }
 0xa26   :  { %v6103_v10 = vpop.f32.mrb[46].mxu0 }
 0xa27   :  { %v8635_v56 = vpop.f32.mrb[47].mxu0  ;;  %v6370_v60 = vsel %vm2569_vm3, %v11015_v40, -inf  ;;  %v11029_v26 = vmul.f32 0.17677669, %v6103_v10 }
 0xa29   :  { %v6373_v15 = vsel %vm2569_vm3, %v11029_v26, -inf }
 0xa2a   :  { %v6241_v43 = vpop.f32.mrb[56].mxu1 }
 0xa2b   :  { %v10997_v13 = vmul.f32 0.17677669, %v6241_v43  ;;  %v8652_v34 = vpop.f32.mrb[57].mxu1 }
 0xa2c   :  { %v6147_v18 = vpop.f32.mrb[48].mxu0  ;;  %v6244_v41 = vpop.f32.mrb[58].mxu1 }
 0xa2d   :  { %v8640_v61 = vpop.f32.mrb[49].mxu0  ;;  %v10999_v28 = vmul.f32 0.17677669, %v6244_v41  ;;  %v8653_v14 = vpop.f32.mrb[59].mxu1  ;;  %v6388_v55 = vsel %vm2569_vm3, %v10997_v13, -inf }
 0xa2e   :  { %v6150_v52 = vpop.f32.mrb[50].mxu0  ;;  %6389 = vmax.xlane.f32.xlu1 %v6388_v55  ;;  %v11025_v32 = vmul.f32 0.17677669, %v6147_v18 }
 0xa2f   :  { %v8641_v31 = vpop.f32.mrb[51].mxu0  ;;  %v6391_v62 = vsel %vm2569_vm3, %v10999_v28, -inf  ;;  %v11037_v46 = vmul.f32 0.17677669, %v6150_v52 }
 0xa30   :  { %6392 = vmax.xlane.f32.xlu0 %v6391_v62  ;;  %v6376_v44 = vsel %vm2569_vm3, %v11025_v32, -inf }
 0xa31   :  { %v6379_v38 = vsel %vm2569_vm3, %v11037_v46, -inf }
 0xa32   :  { %6362 = vmax.xlane.f32.xlu1 %v6361_v12 }
 0xa34   :  { %v6194_v27 = vpop.f32.mrb[52].mxu0  ;;  %6365 = vmax.xlane.f32.xlu0 %v6364_v9 }
 0xa35   :  { %v8646_v7 = vpop.f32.mrb[53].mxu0  ;;  %v11033_v17 = vmul.f32 0.17677669, %v6194_v27 }
 0xa36   :  { %v6197_v37 = vpop.f32.mrb[54].mxu0 }
 0xa37   :  { %v8647_v29 = vpop.f32.mrb[55].mxu0  ;;  %v6382_v25 = vsel %vm2569_vm3, %v11033_v17, -inf  ;;  %v11043_v1 = vmul.f32 0.17677669, %v6197_v37 }
 0xa39   :  { %v6385_v3 = vsel %vm2569_vm3, %v11043_v1, -inf }
 0xa3c   :  { %v6335_v39 = vpop.f32.mrb[60].mxu1 }
 0xa3d   :  { %v6288_v49 = vpop.f32.mrb[56].mxu0  ;;  %v11013_v47 = vmul.f32 0.17677669, %v6335_v39  ;;  %v8664_v8 = vpop.f32.mrb[61].mxu1 }
 0xa3e   :  { %v8658_v45 = vpop.f32.mrb[57].mxu0  ;;  %v6338_v19 = vpop.f32.mrb[62].mxu1  ;;  %v11057_v50 = vmul.f32 0.17677669, %v6288_v49 }
 0xa3f   :  { %v6291_v30 = vpop.f32.mrb[58].mxu0  ;;  %v11017_v24 = vmul.f32 0.17677669, %v6338_v19  ;;  %v8665_v57 = vpop.f32.mrb[63].mxu1  ;;  %v6400_v48 = vsel %vm2569_vm3, %v11013_v47, -inf }
 0xa40   :  { %6401 = vmax.xlane.f32.xlu1 %v6400_v48  ;;  %v8659_v42 = vpop.f32.mrb[59].mxu0  ;;  %v6394_v36 = vsel %vm2569_vm3, %v11057_v50, -inf  ;;  %v11061_v10 = vmul.f32 0.17677669, %v6291_v30 }
 0xa41   :  { %v6403_v6 = vsel %vm2569_vm3, %v11017_v24, -inf }
 0xa42   :  { %6404 = vmax.xlane.f32.xlu0 %v6403_v6  ;;  %v6397_v56 = vsel %vm2569_vm3, %v11061_v10, -inf }
 0xa44   :  { %6371 = vmax.xlane.f32.xlu1 %v6370_v60 }
 0xa46   :  { %6368 = vmax.xlane.f32.xlu0 %v6367_v35 }
 0xa48   :  { %6377 = vmax.xlane.f32.xlu1 %v6376_v44 }
 0xa4a   :  { %6374 = vmax.xlane.f32.xlu0 %v6373_v15 }
 0xa4c   :  { %6383 = vmax.xlane.f32.xlu1 %v6382_v25 }
 0xa4e   :  { %6380 = vmax.xlane.f32.xlu0 %v6379_v38 }
 0xa52   :  { %6386 = vmax.xlane.f32.xlu0 %v6385_v3 }
 0xa5d   :  { %5394 = vrot.lane.b32.xlu1 %v10591_v53, %s9106_s30 }
 0xa68   :  { %5384 = vrot.lane.b32.xlu0 %v11053_v63, %s9105_s3 }
 0xa81   :  { %6395 = vmax.xlane.f32.xlu1 %v6394_v36 }
 0xa87   :  { %6398 = vmax.xlane.f32.xlu0 %v6397_v56 }
 0xa92   :  { %5396 = vrot.lane.b32.xlu1 %v11053_v63, %s9106_s30 }
 0xa9b   :  { %v6360_v21 = vpop.xlane.xlu0 %6359 }
 0xa9c   :  { %v6406_v43 = vsub.f32 %v10993_v0, %v6360_v21 }
 0xa9d   :  { %5406 = vrot.lane.b32.xlu0 %v10591_v53, %s9107_s4 }
 0xa9e   :  { %v6422_v14 = vmul.f32 1.442695, %v6406_v43 }
 0xabb   :  { %v6390_v34 = vpop.xlane.xlu1 %6389 }
 0xabc   :  { %v6416_v18 = vsub.f32 %v10997_v13, %v6390_v34 }
 0xabd   :  { %v6393_v41 = vpop.xlane.xlu0 %6392 }
 0xabe   :  { %v6417_v61 = vsub.f32 %v10999_v28, %v6393_v41  ;;  %v6442_v52 = vmul.f32 1.442695, %v6416_v18 }
 0xabf   :  { %v6363_v31 = vpop.xlane.xlu1 %6362 }
 0xac0   :  { %v6444_v55 = vmul.f32 1.442695, %v6417_v61  ;;  %8995 = vpow2.f32 %v6442_v52  ;;  %v6407_v62 = vsub.f32 %v11001_v20, %v6363_v31 }
 0xac1   :  { %v6366_v12 = vpop.xlane.xlu0 %6365 }
 0xac2   :  { %8997 = vpow2.f32 %v6444_v55  ;;  %v6408_v9 = vsub.f32 %v11005_v33, %v6366_v12  ;;  %v6424_v27 = vmul.f32 1.442695, %v6407_v62 }
 0xac3   :  { %8999 = vpow2.f32 %v6422_v14 }
 0xac4   :  { %v6426_v0 = vmul.f32 1.442695, %v6408_v9  ;;  %9001 = vpow2.f32 %v6424_v27 }
 0xac6   :  { %9003 = vpow2.f32 %v6426_v0 }
 0xaca   :  { %v11076_v13 = vpop.eup %8995 }
 0xacb   :  { %v6484_v28 = vsel %vm2569_vm3, %v11076_v13, 0.0 }
 0xacc   :  { %v11078_v7 = vpop.eup %8997  ;;  %6485 = vadd.xlane.f32.xlu1 %v6484_v28 }
 0xacd   :  { %v11082_v37 = vpop.eup %8999  ;;  %v11084_v29 = vpop.xlane.xlu1 %6401  ;;  %v6487_v20 = vsel %vm2569_vm3, %v11078_v7, 0.0 }
 0xace   :  { %6488 = vadd.xlane.f32.xlu0 %v6487_v20  ;;  %v11088_v33 = vpop.eup %9001  ;;  %v6454_v49 = vsel %vm2569_vm3, %v11082_v37, 0.0  ;;  %v6420_v28 = vsub.f32 %v11013_v47, %v11084_v29 }
 0xacf   :  { %v11090_v39 = vpop.xlane.xlu0 %6404  ;;  %v6457_v19 = vsel %vm2569_vm3, %v11088_v33, 0.0 }
 0xad0   :  { %v11094_v8 = vpop.eup %9003  ;;  %6455 = vadd.xlane.f32.xlu1 %v6454_v49 }
 0xad1   :  { %v6372_v45 = vpop.xlane.xlu1 %6371  ;;  %v6460_v42 = vsel %vm2569_vm3, %v11094_v8, 0.0 }
 0xad2   :  { %v6410_v30 = vsub.f32 %v11015_v40, %v6372_v45  ;;  %6458 = vadd.xlane.f32.xlu0 %v6457_v19  ;;  %v6421_v45 = vsub.f32 %v11017_v24, %v11090_v39 }
 0xad3   :  { %v6369_v57 = vpop.xlane.xlu0 %6368 }
 0xad4   :  { %v6409_v48 = vsub.f32 %v11021_v2, %v6369_v57  ;;  %6461 = vadd.xlane.f32.xlu1 %v6460_v42  ;;  %v6430_v60 = vmul.f32 1.442695, %v6410_v30  ;;  %v6450_v30 = vmul.f32 1.442695, %v6420_v28 }
 0xad5   :  { %v6378_v6 = vpop.xlane.xlu1 %6377 }
 0xad6   :  { %v6428_v35 = vmul.f32 1.442695, %v6409_v48  ;;  %v6412_v44 = vsub.f32 %v11025_v32, %v6378_v6  ;;  %v6452_v48 = vmul.f32 1.442695, %v6421_v45 }
 0xad7   :  { %v6375_v15 = vpop.xlane.xlu0 %6374 }
 0xad8   :  { %9005 = vpow2.f32 %v6428_v35  ;;  %v6411_v25 = vsub.f32 %v11029_v26, %v6375_v15  ;;  %v6434_v38 = vmul.f32 1.442695, %v6412_v44 }
 0xad9   :  { %v6384_v3 = vpop.xlane.xlu1 %6383  ;;  %9007 = vpow2.f32 %v6430_v60 }
 0xada   :  { %v6432_v40 = vmul.f32 1.442695, %v6411_v25  ;;  %v6414_v36 = vsub.f32 %v11033_v17, %v6384_v3 }
 0xadb   :  { %v6381_v2 = vpop.xlane.xlu0 %6380 }
 0xadc   :  { %9009 = vpow2.f32 %v6432_v40  ;;  %v6438_v56 = vmul.f32 1.442695, %v6414_v36  ;;  %v6413_v21 = vsub.f32 %v11037_v46, %v6381_v2 }
 0xadd   :  { %9011 = vpow2.f32 %v6434_v38  ;;  %v5395_v0 = vpop.permute.xlu1 %5394 }
 0xade   :  { %9013 = vpow2.f32 %v6438_v56  ;;  %v6436_v43 = vmul.f32 1.442695, %v6413_v21 }
 0xadf   :  { %v6387_v34 = vpop.xlane.xlu0 %6386 }
 0xae0   :  { %v6415_v32 = vsub.f32 %v11043_v1, %v6387_v34  ;;  %9015 = vpow2.f32 %v6436_v43 }
 0xae2   :  { %v11107_v18 = vpop.eup %9005  ;;  %v6440_v26 = vmul.f32 1.442695, %v6415_v32 }
 0xae3   :  { %v6463_v41 = vsel %vm2569_vm3, %v11107_v18, 0.0  ;;  %v11111_v61 = vpop.eup %9007  ;;  %v11142_v19 = vpop.permute.xlu0 %5384 }
 0xae4   :  { %6464 = vadd.xlane.f32.xlu0 %v6463_v41  ;;  %9017 = vpow2.f32 %v6440_v26  ;;  %v6466_v14 = vsel %vm2569_vm3, %v11111_v61, 0.0  ;;  %v5550_v41 = vcombine.low %v10591_v53, %v5395_v0 }
 0xae6   :  { %v11113_v17 = vpop.eup %9009 }
 0xae7   :  { %v11115_v46 = vpop.eup %9011  ;;  %v6469_v1 = vsel %vm2569_vm3, %v11113_v17, 0.0 }
 0xae8   :  { %v11121_v52 = vpop.eup %9013  ;;  %6467 = vadd.xlane.f32.xlu0 %v6466_v14  ;;  %6470 = vadd.xlane.f32.xlu1 %v6469_v1  ;;  %v6472_v55 = vsel %vm2569_vm3, %v11115_v46, 0.0 }
 0xae9   :  { %v6478_v31 = vsel %vm2569_vm3, %v11121_v52, 0.0 }
 0xaea   :  { %v11127_v62 = vpop.eup %9015 }
 0xaeb   :  { %v6475_v12 = vsel %vm2569_vm3, %v11127_v62, 0.0 }
 0xaec   :  { %6473 = vadd.xlane.f32.xlu0 %v6472_v55  ;;  %6479 = vadd.xlane.f32.xlu1 %v6478_v31  ;;  %v5558_v55 = vrot.slane %v5550_v41, %v9435_v11 }
 0xaee   :  { %v11131_v9 = vpop.eup %9017 }
 0xaef   :  { %v6481_v27 = vsel %vm2569_vm3, %v11131_v9, 0.0 }
 0xaf0   :  { %6476 = vadd.xlane.f32.xlu0 %v6475_v12 }
 0xaf4   :  { %6482 = vadd.xlane.f32.xlu0 %v6481_v27 }
 0xafd   :  { %5408 = vrot.lane.b32.xlu1 %v11053_v63, %s9107_s4 }
 0xb0e   :  { %v6396_v20 = vpop.xlane.xlu1 %6395 }
 0xb0f   :  { %v6418_v49 = vsub.f32 %v11057_v50, %v6396_v20 }
 0xb11   :  { %v6446_v57 = vmul.f32 1.442695, %v6418_v49 }
 0xb12   :  { %v11161_v15 = vpop.permute.xlu1 %5396 }
 0xb13   :  { %9019 = vpow2.f32 %v6446_v57 }
 0xb14   :  { %v6399_v42 = vpop.xlane.xlu0 %6398  ;;  %9021 = vpow2.f32 %v6450_v30 }
 0xb15   :  { %v6419_v6 = vsub.f32 %v11061_v10, %v6399_v42  ;;  %9023 = vpow2.f32 %v6452_v48  ;;  %v5618_v48 = vcombine.low %v11053_v63, %v11161_v15 }
 0xb17   :  { %v6448_v60 = vmul.f32 1.442695, %v6419_v6 }
 0xb18   :  { %v5407_v25 = vpop.permute.xlu0 %5406 }
 0xb19   :  { %9025 = vpow2.f32 %v6448_v60  ;;  %v5566_v34 = vcombine.low %v11069_v59, %v5407_v25  ;;  %v5567_v14 = vcombine.high %v11069_v59, %v5407_v25 }
 0xb1b   :  { %v5581_v59 = vrot.slane %v5567_v14, %v9435_v11 }
 0xb1d   :  { %v11145_v47 = vpop.eup %9019 }
 0xb1e   :  { %v6490_v50 = vsel %vm2569_vm3, %v11145_v47, 0.0  ;;  %v11149_v29 = vpop.eup %9021 }
 0xb1f   :  { %6491 = vadd.xlane.f32.xlu0 %v6490_v50  ;;  %v11151_v24 = vpop.eup %9023  ;;  %v6496_v39 = vsel %vm2569_vm3, %v11149_v29, 0.0  ;;  %v5619_v50 = vcombine.high %v11053_v63, %v11161_v15 }
 0xb20   :  { %v6499_v44 = vsel %vm2569_vm3, %v11151_v24, 0.0 }
 0xb21   :  { %v5633_v15 = vrot.slane %v5619_v50, %v9435_v11 }
 0xb23   :  { %v11155_v35 = vpop.eup %9025  ;;  %6497 = vadd.xlane.f32.xlu0 %v6496_v39 }
 0xb24   :  { %v6493_v10 = vsel %vm2569_vm3, %v11155_v35, 0.0 }
 0xb25   :  { %6494 = vadd.xlane.f32.xlu1 %v6493_v10 }
 0xb27   :  { %6500 = vadd.xlane.f32.xlu0 %v6499_v44 }
 0xb59   :  { %v6486_v38 = vpop.xlane.xlu1 %6485 }
 0xb5b   :  { %v11163_v3 = vpop.xlane.xlu0 %6488 }
 0xb5d   :  { %v6456_v40 = vpop.xlane.xlu1 %6455 }
 0xb5e   :  { %9027 = vrcp.f32 %v6456_v40 }
 0xb5f   :  { %v6459_v36 = vpop.xlane.xlu0 %6458 }
 0xb60   :  { %9029 = vrcp.f32 %v6459_v36 }
 0xb61   :  { %v6462_v32 = vpop.xlane.xlu1 %6461 }
 0xb62   :  { %9031 = vrcp.f32 %v6462_v32 }
 0xb68   :  { %v9028_v2 = vpop.eup %9027 }
 0xb69   :  { %v6518_v21 = vmul.f32 %v9028_v2, %v11082_v37  ;;  %v5551_v37 = vcombine.high %v10591_v53, %v5395_v0 }
 0xb6a   :  { %v9030_v56 = vpop.eup %9029 }
 0xb6b   :  { %v6519_v43 = vmul.f32 %v9030_v56, %v11088_v33  ;;  %v5574_v33 = vrot.slane %v5566_v34, %v9435_v11  ;;  %v5565_v31 = vrot.slane %v5551_v37, %v9435_v11 }
 0xb6c   :  { %v9032_v57 = vpop.eup %9031 }
 0xb6d   :  { %v6534_v26 = vpack.c.bf16 %v6519_v43, %v6518_v21  ;;  %v5582_v12 = vcombine.low %v5558_v55, %v5574_v33  ;;  %v5583_v27 = vcombine.high %v5558_v55, %v5574_v33  ;;  %v5598_v20 = vcombine.low %v5565_v31, %v5581_v59 }
 0xb6e   :  { %v5599_v49 = vcombine.high %v5565_v31, %v5581_v59  ;;  %v6520_v44 = vmul.f32 %v9032_v57, %v11094_v8  ;;  %v5626_v21 = vrot.slane %v5618_v48, %v9435_v11 }
 0xb6f   :  { %8669 = vmatmul.mubr.msk.bf16.vlgmr.msra.gmra.mrb[60].mxu0 %vm2569_vm3, %v6534_v26  ;;  %v5590_v53 = vrot.slane %v5582_v12, %v9444_v23  ;;  %v5597_v0 = vrot.slane %v5583_v27, %v9444_v23  ;;  %v5606_v42 = vrot.slane %v5598_v20, %v9444_v23 }
 0xb70   :  { %8679 = vmatpush3.bf16.msra.mxu0 %v10981_v54  ;;  %8680 = vmatprep.mubr.msk.bf16.mxu0 %vm9109_vm0, %v11629_v16  ;;  %v5613_v6 = vrot.slane %v5599_v49, %v9444_v23 }
 0xb71   :  { %v6465_v1 = vpop.xlane.xlu0 %6464  ;;  %8690 = vmatprep.subr.bf16.mxu0 %v11629_v16  ;;  %v5822_v39 = vcombine.low %v5590_v53, %v5597_v0  ;;  %v8256_v10 = vcombine.high %v5590_v53, %v5597_v0 }
 0xb72   :  { %9033 = vrcp.f32 %v6465_v1  ;;  %v5838_v43 = vcombine.low %v5606_v42, %v5613_v6  ;;  %v8257_v34 = vcombine.high %v5606_v42, %v5613_v6 }
 0xb73   :  { %v5829_v41 = vrot.slane %v5822_v39, %v9435_v11  ;;  %v5837_v14 = vrot.slane %v8256_v10, %v9435_v11 }
 0xb74   :  { %v5845_v59 = vrot.slane %v5838_v43, %v9435_v11  ;;  %v5853_v31 = vrot.slane %v8257_v34, %v9435_v11 }
 0xb75   :  { %v6471_v54 = vpop.xlane.xlu1 %6470  ;;  %v6468_v28 = vpop.xlane.xlu0 %6467  ;;  %v5854_v49 = vcombine.low %v5829_v41, %v5837_v14 }
 0xb76   :  { %9035 = vrcp.f32 %v6471_v54 }
 0xb77   :  { %9037 = vrcp.f32 %v6468_v28 }
 0xb79   :  { %v6480_v45 = vpop.xlane.xlu1 %6479  ;;  %v6474_v30 = vpop.xlane.xlu0 %6473 }
 0xb7a   :  { %9039 = vrcp.f32 %v6474_v30  ;;  %v5870_v30 = vcombine.low %v5845_v59, %v5853_v31 }
 0xb7c   :  { %v9034_v60 = vpop.eup %9033 }
 0xb7d   :  { %v6521_v25 = vmul.f32 %v9034_v60, %v11107_v18  ;;  %v5409_v40 = vpop.permute.xlu1 %5408  ;;  %v6477_v36 = vpop.xlane.xlu0 %6476 }
 0xb7e   :  { %v5634_v2 = vcombine.low %v11142_v19, %v5409_v40  ;;  %v5635_v56 = vcombine.high %v11142_v19, %v5409_v40  ;;  %9041 = vrcp.f32 %v6477_v36  ;;  %v5871_v40 = vcombine.high %v5845_v59, %v5853_v31 }
 0xb7f   :  { %v6535_v32 = vpack.c.bf16 %v6521_v25, %v6520_v44  ;;  %9043 = vrcp.f32 %v6486_v38  ;;  %v5862_v44 = vrot.slane %v5854_v49, %v9444_v23 }
 0xb80   :  { %v9036_v63 = vpop.eup %9035  ;;  %v5642_v8 = vrot.slane %v5634_v2, %v9435_v11  ;;  %v5649_v18 = vrot.slane %v5635_v56, %v9435_v11  ;;  %9045 = vrcp.f32 %v11163_v3 }
 0xb81   :  { %v9038_v26 = vpop.eup %9037  ;;  %v6523_v19 = vmul.f32 %v9036_v63, %v11113_v17  ;;  %8675 = vmatmul.mubr.msk.bf16.vlgmr.msra.gmra.mrb[64].mxu1 %vm2569_vm3, %v6535_v32  ;;  %v6483_v37 = vpop.xlane.xlu0 %6482 }
 0xb82   :  { %v6522_v33 = vmul.f32 %v9038_v26, %v11111_v61  ;;  %v5650_v1 = vcombine.low %v5626_v21, %v5642_v8  ;;  %v5651_v38 = vcombine.high %v5626_v21, %v5642_v8  ;;  %v5666_v55 = vcombine.low %v5633_v15, %v5649_v18  ;;  %8685 = vmatpush3.bf16.msra.mxu1 %v10983_v5 }
 0xb83   :  { %v5667_v12 = vcombine.high %v5633_v15, %v5649_v18  ;;  %9047 = vrcp.f32 %v6483_v37  ;;  %8686 = vmatprep.mubr.msk.bf16.mxu1 %vm9109_vm0, %v11629_v16  ;;  %8696 = vmatprep.subr.bf16.mxu1 %v11629_v16  ;;  %v5878_v21 = vrot.slane %v5870_v30, %v9444_v23  ;;  %v5885_v18 = vrot.slane %v5871_v40, %v9444_v23 }
 0xb84   :  { %v5658_v17 = vrot.slane %v5650_v1, %v9444_v23  ;;  %v5665_v61 = vrot.slane %v5651_v38, %v9444_v23  ;;  %v5674_v3 = vrot.slane %v5666_v55, %v9444_v23  ;;  %v6536_v27 = vpack.c.bf16 %v6523_v19, %v6522_v33  ;;  %v9040_v54 = vpop.eup %9039 }
 0xb85   :  { %9049 = vrcp.f32 %v6480_v45  ;;  %v5681_v5 = vrot.slane %v5667_v12, %v9444_v23  ;;  %v5855_v45 = vcombine.high %v5829_v41, %v5837_v14  ;;  %v6524_v6 = vmul.f32 %v9040_v54, %v11115_v46 }
 0xb86   :  { %v5890_v28 = vcombine.low %v5658_v17, %v5665_v61  ;;  %v8258_v20 = vcombine.high %v5658_v17, %v5665_v61  ;;  %8681 = vmatmul.mubr.msk.bf16.vlgmr.msra.gmra.mrb[64].mxu0 %vm2569_vm3, %v6536_v27  ;;  %v5886_v41 = vcombine.low %v5862_v44, %v5878_v21  ;;  %v5887_v19 = vcombine.high %v5862_v44, %v5878_v21 }
 0xb87   :  { %v5906_v53 = vcombine.low %v5674_v3, %v5681_v5  ;;  %v8259_v0 = vcombine.high %v5674_v3, %v5681_v5  ;;  %8692 = vmatprep.mubr.msk.bf16.mxu0 %vm9109_vm0, %v11629_v16  ;;  %v5869_v8 = vrot.slane %v5855_v45, %v9444_v23 }
 0xb88   :  { %v9042_v57 = vpop.eup %9041  ;;  %v5897_v48 = vrot.slane %v5890_v28, %v9435_v11  ;;  %v5905_v42 = vrot.slane %v8258_v20, %v9435_v11 }
 0xb89   :  { %v5913_v60 = vrot.slane %v5906_v53, %v9435_v11  ;;  %v5921_v50 = vrot.slane %v8259_v0, %v9435_v11  ;;  %v6525_v39 = vmul.f32 %v9042_v57, %v11127_v62  ;;  %v9044_v10 = vpop.eup %9043  ;;  %v5888_v61 = vcombine.low %v5869_v8, %v5885_v18 }
 0xb8a   :  { %v5922_v25 = vcombine.low %v5897_v48, %v5905_v42  ;;  %v5923_v36 = vcombine.high %v5897_v48, %v5905_v42  ;;  %v9046_v2 = vpop.eup %9045  ;;  %v6528_v12 = vmul.f32 %v9044_v10, %v11076_v13  ;;  %v5889_v3 = vcombine.high %v5869_v8, %v5885_v18 }
 0xb8b   :  { %v6537_v56 = vpack.c.bf16 %v6525_v39, %v6524_v6  ;;  %v5938_v43 = vcombine.low %v5913_v60, %v5921_v50  ;;  %v5939_v34 = vcombine.high %v5913_v60, %v5921_v50  ;;  %v6529_v33 = vmul.f32 %v9046_v2, %v11078_v7 }
 0xb8c   :  { %v5930_v46 = vrot.slane %v5922_v25, %v9444_v23  ;;  %v5937_v62 = vrot.slane %v5923_v36, %v9444_v23 }
 0xb8d   :  { %v9048_v32 = vpop.eup %9047  ;;  %8687 = vmatmul.mubr.msk.bf16.vlgmr.msra.gmra.mrb[68].mxu1 %vm2569_vm3, %v6537_v56  ;;  %v5946_v63 = vrot.slane %v5938_v43, %v9444_v23  ;;  %v5953_v15 = vrot.slane %v5939_v34, %v9444_v23  ;;  %v6539_v5 = vpack.c.bf16 %v6529_v33, %v6528_v12 }
 0xb8e   :  { %8698 = vmatprep.mubr.msk.bf16.mxu1 %vm9109_vm0, %v11629_v16  ;;  %v6527_v1 = vmul.f32 %v9048_v32, %v11131_v9 }
 0xb8f   :  { %v9050_v26 = vpop.eup %9049  ;;  %v5954_v14 = vcombine.low %v5930_v46, %v5946_v63  ;;  %v5955_v37 = vcombine.high %v5930_v46, %v5946_v63  ;;  %v5956_v59 = vcombine.low %v5937_v62, %v5953_v15  ;;  %v5957_v31 = vcombine.high %v5937_v62, %v5953_v15 }
 0xb90   :  { %v6526_v17 = vmul.f32 %v9050_v26, %v11121_v52 }
 0xb91   :  { %v5962_v38 = vpack.c.bf16 %v5954_v14, %v5886_v41  ;;  %v5963_v55 = vpack.c.bf16 %v5955_v37, %v5887_v19  ;;  %v5964_v7 = vpack.c.bf16 %v5956_v59, %v5888_v61  ;;  %v5965_v9 = vpack.c.bf16 %v5957_v31, %v5889_v3 }
 0xb92   :  { %v6538_v27 = vpack.c.bf16 %v6527_v1, %v6526_v17 }
 0xb93   :  { %8691 = vmatpush3.bf16.msra.mxu0 %v5962_v38  ;;  %8697 = vmatpush3.bf16.msra.mxu1 %v5963_v55 }
 0xb94   :  { %8702 = vmatprep.subr.bf16.mxu0 %v11629_v16  ;;  %8708 = vmatprep.subr.bf16.mxu1 %v11629_v16 }
 0xb96   :  { %8693 = vmatmul.mubr.msk.bf16.vlgmr.msra.gmra.mrb[68].mxu0 %vm2569_vm3, %v6538_v27  ;;  %8699 = vmatmul.mubr.msk.bf16.vlgmr.msra.gmra.mrb[72].mxu1 %vm2569_vm3, %v6539_v5 }
 0xb97   :  { %8703 = vmatpush3.bf16.msra.mxu0 %v5964_v7  ;;  %8709 = vmatpush3.bf16.msra.mxu1 %v5965_v9 }
 0xb98   :  { %8704 = vmatprep.mubr.msk.bf16.mxu0 %vm9109_vm0, %v11629_v16  ;;  %8710 = vmatprep.mubr.msk.bf16.mxu1 %vm9109_vm0, %v11629_v16 }
 0xbac   :  { %v6492_v13 = vpop.xlane.xlu0 %6491 }
 0xbad   :  { %9051 = vrcp.f32 %v6492_v13 }
 0xbb0   :  { %v6498_v52 = vpop.xlane.xlu0 %6497 }
 0xbb1   :  { %9053 = vrcp.f32 %v6498_v52 }
 0xbb2   :  { %v6495_v54 = vpop.xlane.xlu1 %6494 }
 0xbb3   :  { %9055 = vrcp.f32 %v6495_v54 }
 0xbb4   :  { %v6501_v28 = vpop.xlane.xlu0 %6500 }
 0xbb5   :  { %9057 = vrcp.f32 %v6501_v28 }
 0xbb7   :  { %v9052_v20 = vpop.eup %9051 }
 0xbb8   :  { %v6530_v0 = vmul.f32 %v9052_v20, %v11145_v47 }
 0xbbb   :  { %v9054_v49 = vpop.eup %9053 }
 0xbbc   :  { %v6532_v48 = vmul.f32 %v9054_v49, %v11149_v29 }
 0xbbd   :  { %v9056_v53 = vpop.eup %9055 }
 0xbbe   :  { %v6531_v30 = vmul.f32 %v9056_v53, %v11155_v35 }
 0xbbf   :  { %v9058_v57 = vpop.eup %9057 }
 0xbc0   :  { %v6533_v16 = vmul.f32 %v9058_v57, %v11151_v24  ;;  %v6540_v42 = vpack.c.bf16 %v6531_v30, %v6530_v0 }
 0xbc2   :  { %8705 = vmatmul.mubr.msk.bf16.vlgmr.msra.gmra.mrb[72].mxu0 %vm2569_vm3, %v6540_v42  ;;  %v6541_v45 = vpack.c.bf16 %v6533_v16, %v6532_v48 }
 0xbc4   :  { %8711 = vmatmul.mubr.msk.bf16.vlgmr.msra.gmra.mrb[76].mxu1 %vm2569_vm3, %v6541_v45 }
 0xbc5   :  { %7832 = vmatprep.mubr.bf16.mxu1 %v11624_v58 }
 0xc42   :  { %v6579_v6 = vpop.f32.mrb[60].mxu0 }
 0xc43   :  { %v8670_v60 = vpop.f32.mrb[61].mxu0 }
 0xc44   :  { %v6582_v50 = vpop.f32.mrb[62].mxu0 }
 0xc45   :  { %v8671_v39 = vpop.f32.mrb[63].mxu0 }
 0xc54   :  { %v6623_v47 = vpop.f32.mrb[64].mxu1 }
 0xc55   :  { %v8676_v10 = vpop.f32.mrb[65].mxu1 }
 0xc56   :  { %v6626_v35 = vpop.f32.mrb[66].mxu1 }
 0xc57   :  { %v8677_v44 = vpop.f32.mrb[67].mxu1 }
 0xc59   :  { %v6667_v25 = vpop.f32.mrb[64].mxu0 }
 0xc5a   :  { %v6894_v29 = vcombine.low %v6579_v6, %v6667_v25  ;;  %v6895_v40 = vcombine.high %v6579_v6, %v6667_v25  ;;  %v8682_v24 = vpop.f32.mrb[65].mxu0 }
 0xc5b   :  { %v6670_v36 = vpop.f32.mrb[66].mxu0 }
 0xc5c   :  { %v6962_v2 = vcombine.low %v6582_v50, %v6670_v36  ;;  %v6963_v56 = vcombine.high %v6582_v50, %v6670_v36  ;;  %v8683_v21 = vpop.f32.mrb[67].mxu0  ;;  %v6902_v63 = vrot.slane %v6894_v29, %v9435_v11  ;;  %v6909_v62 = vrot.slane %v6895_v40, %v9435_v11 }
 0xc5e   :  { %v6970_v38 = vrot.slane %v6962_v2, %v9435_v11  ;;  %v6977_v55 = vrot.slane %v6963_v56, %v9435_v11 }
 0xc60   :  { %v6711_v43 = vpop.f32.mrb[68].mxu1 }
 0xc61   :  { %v6910_v34 = vcombine.low %v6623_v47, %v6711_v43  ;;  %v6911_v46 = vcombine.high %v6623_v47, %v6711_v43  ;;  %v8688_v32 = vpop.f32.mrb[69].mxu1 }
 0xc62   :  { %v6714_v15 = vpop.f32.mrb[70].mxu1 }
 0xc63   :  { %v6918_v8 = vrot.slane %v6910_v34, %v9435_v11  ;;  %v6925_v18 = vrot.slane %v6911_v46, %v9435_v11  ;;  %v6978_v26 = vcombine.low %v6626_v35, %v6714_v15  ;;  %v6979_v41 = vcombine.high %v6626_v35, %v6714_v15  ;;  %v8689_v14 = vpop.f32.mrb[71].mxu1 }
 0xc65   :  { %v6926_v19 = vcombine.low %v6902_v63, %v6918_v8  ;;  %v6927_v37 = vcombine.high %v6902_v63, %v6918_v8  ;;  %v6942_v33 = vcombine.low %v6909_v62, %v6925_v18  ;;  %v6943_v1 = vcombine.high %v6909_v62, %v6925_v18 }
 0xc66   :  { %v6986_v59 = vrot.slane %v6978_v26, %v9435_v11  ;;  %v6993_v31 = vrot.slane %v6979_v41, %v9435_v11 }
 0xc67   :  { %v6934_v12 = vrot.slane %v6926_v19, %v9444_v23  ;;  %v6941_v17 = vrot.slane %v6927_v37, %v9444_v23  ;;  %v6950_v61 = vrot.slane %v6942_v33, %v9444_v23  ;;  %v6957_v3 = vrot.slane %v6943_v1, %v9444_v23  ;;  %v8875_v33 = vld [vmem:[%s11579_s12] sm:$0xff]   ;;  %v8876_v1 = vld [vmem:[%s11579_s12 + $0x8] sm:$0xff]  }
 0xc68   :  { %v6994_v27 = vcombine.low %v6970_v38, %v6986_v59  ;;  %v6995_v5 = vcombine.high %v6970_v38, %v6986_v59  ;;  %v7010_v7 = vcombine.low %v6977_v55, %v6993_v31  ;;  %v7011_v9 = vcombine.high %v6977_v55, %v6993_v31  ;;  %8714 = vmatprep.subr.bf16.mxu0 %v8875_v33 }
 0xc69   :  { %v7166_v13 = vcombine.low %v6934_v12, %v6941_v17  ;;  %v8276_v52 = vcombine.high %v6934_v12, %v6941_v17  ;;  %v7182_v54 = vcombine.low %v6950_v61, %v6957_v3  ;;  %v8277_v28 = vcombine.high %v6950_v61, %v6957_v3  ;;  %v11263_v20 = vpop.f32.mrb[68].mxu0  ;;  %v11265_v49 = vpop.f32.mrb[72].mxu1  ;;  %8715 = vmatpush3.bf16.msra.mxu0 %v8875_v33 }
 0xc6a   :  { %v7002_v53 = vrot.slane %v6994_v27, %v9444_v23  ;;  %v7009_v0 = vrot.slane %v6995_v5, %v9444_v23  ;;  %v7018_v30 = vrot.slane %v7010_v7, %v9444_v23  ;;  %v7025_v57 = vrot.slane %v7011_v9, %v9444_v23  ;;  %v8694_v48 = vpop.f32.mrb[69].mxu0  ;;  %v8700_v16 = vpop.f32.mrb[73].mxu1  ;;  %8716 = vmatprep.subr.bf16.mxu0 %v8876_v1  ;;  %v8877_v27 = vld [vmem:[%s11579_s12 + $0x10] sm:$0xff]  }
 0xc6b   :  { %v7173_v42 = vrot.slane %v7166_v13, %v9435_v11  ;;  %v7181_v45 = vrot.slane %v8276_v52, %v9435_v11  ;;  %v7189_v6 = vrot.slane %v7182_v54, %v9435_v11  ;;  %v7197_v60 = vrot.slane %v8277_v28, %v9435_v11  ;;  %v11275_v50 = vpop.f32.mrb[70].mxu0  ;;  %v11277_v39 = vpop.f32.mrb[74].mxu1  ;;  %v8878_v13 = vld [vmem:[%s11579_s12 + $0x18] sm:$0xff]   ;;  %v8879_v52 = vld [vmem:[%s11579_s12 + $0x20] sm:$0xff]   ;;  %v8880_v54 = vld [vmem:[%s11579_s12 + $0x28] sm:$0xff]  }
 0xc6c   :  { %v7234_v47 = vcombine.low %v7002_v53, %v7009_v0  ;;  %v8278_v10 = vcombine.high %v7002_v53, %v7009_v0  ;;  %v7250_v35 = vcombine.low %v7018_v30, %v7025_v57  ;;  %v8279_v44 = vcombine.high %v7018_v30, %v7025_v57  ;;  %v8695_v25 = vpop.f32.mrb[71].mxu0  ;;  %v8701_v29 = vpop.f32.mrb[75].mxu1 }
 0xc6d   :  { %v7198_v40 = vcombine.low %v7173_v42, %v7181_v45  ;;  %v7214_v24 = vcombine.low %v7189_v6, %v7197_v60  ;;  %v7199_v36 = vcombine.high %v7173_v42, %v7181_v45  ;;  %v7215_v2 = vcombine.high %v7189_v6, %v7197_v60  ;;  %8717 = vmatpush3.bf16.msra.mxu0 %v8876_v1 }
 0xc6e   :  { %v7241_v56 = vrot.slane %v7234_v47, %v9435_v11  ;;  %v7249_v21 = vrot.slane %v8278_v10, %v9435_v11  ;;  %v7257_v43 = vrot.slane %v7250_v35, %v9435_v11  ;;  %v7265_v34 = vrot.slane %v8279_v44, %v9435_v11  ;;  %8718 = vmatprep.subr.bf16.mxu0 %v8877_v27 }
 0xc6f   :  { %v11284_v46 = vrot.slane %v7198_v40, %v9444_v23  ;;  %v11287_v32 = vrot.slane %v7214_v24, %v9444_v23  ;;  %v7213_v63 = vrot.slane %v7199_v36, %v9444_v23  ;;  %v7229_v62 = vrot.slane %v7215_v2, %v9444_v23 }
 0xc70   :  { %v7266_v15 = vcombine.low %v7241_v56, %v7249_v21  ;;  %v7282_v8 = vcombine.low %v7257_v43, %v7265_v34  ;;  %v7267_v18 = vcombine.high %v7241_v56, %v7249_v21  ;;  %v7283_v26 = vcombine.high %v7257_v43, %v7265_v34 }
 0xc71   :  { %v7231_v41 = vcombine.high %v11284_v46, %v11287_v32  ;;  %v7232_v14 = vcombine.low %v7213_v63, %v7229_v62  ;;  %v7233_v19 = vcombine.high %v7213_v63, %v7229_v62  ;;  %v7230_v37 = vcombine.low %v11284_v46, %v11287_v32  ;;  %8719 = vmatpush3.bf16.msra.mxu0 %v8877_v27 }
 0xc72   :  { %v11302_v38 = vrot.slane %v7266_v15, %v9444_v23  ;;  %v11305_v55 = vrot.slane %v7282_v8, %v9444_v23  ;;  %v7281_v59 = vrot.slane %v7267_v18, %v9444_v23  ;;  %v7297_v31 = vrot.slane %v7283_v26, %v9444_v23  ;;  %8720 = vmatprep.subr.bf16.mxu0 %v8878_v13 }
 0xc74   :  { %v7299_v12 = vcombine.high %v11302_v38, %v11305_v55  ;;  %v7300_v17 = vcombine.low %v7281_v59, %v7297_v31  ;;  %v7301_v61 = vcombine.high %v7281_v59, %v7297_v31  ;;  %v7298_v3 = vcombine.low %v11302_v38, %v11305_v55 }
 0xc75   :  { %8721 = vmatpush3.bf16.msra.mxu0 %v8878_v13 }
 0xc76   :  { %v8773_v5 = vpack.i.bf16 %v7299_v12, %v7231_v41  ;;  %v8778_v7 = vpack.i.bf16 %v7300_v17, %v7232_v14  ;;  %v11316_v9 = vpack.i.bf16 %v7301_v61, %v7233_v19  ;;  %8722 = vmatprep.subr.bf16.mxu0 %v8879_v52 }
 0xc78   :  { %8774 = vrot.lane.b32.xlu1 %v8773_v5, %s9107_s4 }
 0xc79   :  { %8723 = vmatpush3.bf16.msra.mxu0 %v8879_v52 }
 0xc7a   :  { %8724 = vmatprep.subr.bf16.mxu0 %v8880_v54 }
 0xc7c   :  { %8779 = vrot.lane.b32.xlu1 %v8778_v7, %s9106_s30 }
 0xc7d   :  { %8725 = vmatpush3.bf16.msra.mxu0 %v8880_v54 }
 0xc95   :  { %v6843_v28 = vpop.f32.mrb[72].mxu0 }
 0xc96   :  { %v7030_v53 = vcombine.low %v11263_v20, %v6843_v28  ;;  %v7031_v0 = vcombine.high %v11263_v20, %v6843_v28  ;;  %v8706_v30 = vpop.f32.mrb[73].mxu0 }
 0xc97   :  { %v6846_v57 = vpop.f32.mrb[74].mxu0  ;;  %v6887_v48 = vpop.f32.mrb[76].mxu1 }
 0xc98   :  { %v7098_v16 = vcombine.low %v11275_v50, %v6846_v57  ;;  %v7099_v42 = vcombine.high %v11275_v50, %v6846_v57  ;;  %v8707_v45 = vpop.f32.mrb[75].mxu0  ;;  %v8712_v6 = vpop.f32.mrb[77].mxu1  ;;  %v7046_v60 = vcombine.low %v11265_v49, %v6887_v48  ;;  %v7047_v47 = vcombine.high %v11265_v49, %v6887_v48 }
 0xc99   :  { %v6890_v10 = vpop.f32.mrb[78].mxu1  ;;  %v7038_v20 = vrot.slane %v7030_v53, %v9435_v11  ;;  %v7045_v29 = vrot.slane %v7031_v0, %v9435_v11  ;;  %v8881_v53 = vld [vmem:[%s11579_s12 + $0x30] sm:$0xff]  }
 0xc9a   :  { %v7114_v35 = vcombine.low %v11277_v39, %v6890_v10  ;;  %v7115_v44 = vcombine.high %v11277_v39, %v6890_v10  ;;  %v8713_v25 = vpop.f32.mrb[79].mxu1  ;;  %v7054_v40 = vrot.slane %v7046_v60, %v9435_v11  ;;  %v7061_v50 = vrot.slane %v7047_v47, %v9435_v11  ;;  %8726 = vmatprep.subr.bf16.mxu0 %v8881_v53 }
 0xc9b   :  { %v7106_v24 = vrot.slane %v7098_v16, %v9435_v11  ;;  %v7113_v36 = vrot.slane %v7099_v42, %v9435_v11  ;;  %8727 = vmatpush3.bf16.msra.mxu0 %v8881_v53 }
 0xc9c   :  { %v7122_v49 = vrot.slane %v7114_v35, %v9435_v11  ;;  %v7129_v2 = vrot.slane %v7115_v44, %v9435_v11  ;;  %v7062_v56 = vcombine.low %v7038_v20, %v7054_v40  ;;  %v7063_v21 = vcombine.high %v7038_v20, %v7054_v40 }
 0xc9d   :  { %v7078_v39 = vcombine.low %v7045_v29, %v7061_v50  ;;  %v7079_v43 = vcombine.high %v7045_v29, %v7061_v50 }
 0xc9e   :  { %v7130_v34 = vcombine.low %v7106_v24, %v7122_v49  ;;  %v7131_v63 = vcombine.high %v7106_v24, %v7122_v49  ;;  %v7146_v62 = vcombine.low %v7113_v36, %v7129_v2  ;;  %v7147_v15 = vcombine.high %v7113_v36, %v7129_v2  ;;  %v8882_v36 = vld [vmem:[%s11579_s12 + $0x38] sm:$0xff]  }
 0xc9f   :  { %v7070_v8 = vrot.slane %v7062_v56, %v9444_v23  ;;  %v7077_v18 = vrot.slane %v7063_v21, %v9444_v23  ;;  %v7086_v26 = vrot.slane %v7078_v39, %v9444_v23  ;;  %v7093_v41 = vrot.slane %v7079_v43, %v9444_v23  ;;  %8728 = vmatprep.subr.bf16.mxu0 %v8882_v36 }
 0xca0   :  { %v7138_v14 = vrot.slane %v7130_v34, %v9444_v23  ;;  %v7145_v19 = vrot.slane %v7131_v63, %v9444_v23  ;;  %v7154_v33 = vrot.slane %v7146_v62, %v9444_v23  ;;  %v7161_v1 = vrot.slane %v7147_v15, %v9444_v23  ;;  %8729 = vmatpush3.bf16.msra.mxu0 %v8882_v36 }
 0xca1   :  { %v7302_v59 = vcombine.low %v7070_v8, %v7077_v18  ;;  %v8280_v31 = vcombine.high %v7070_v8, %v7077_v18  ;;  %v7318_v12 = vcombine.low %v7086_v26, %v7093_v41  ;;  %v8281_v17 = vcombine.high %v7086_v26, %v7093_v41 }
 0xca2   :  { %v7370_v61 = vcombine.low %v7138_v14, %v7145_v19  ;;  %v8282_v27 = vcombine.high %v7138_v14, %v7145_v19  ;;  %v7386_v5 = vcombine.low %v7154_v33, %v7161_v1  ;;  %v8283_v7 = vcombine.high %v7154_v33, %v7161_v1 }
 0xca3   :  { %v7309_v13 = vrot.slane %v7302_v59, %v9435_v11  ;;  %v7317_v52 = vrot.slane %v8280_v31, %v9435_v11  ;;  %v7325_v54 = vrot.slane %v7318_v12, %v9435_v11  ;;  %v7333_v28 = vrot.slane %v8281_v17, %v9435_v11 }
 0xca4   :  { %v7377_v0 = vrot.slane %v7370_v61, %v9435_v11  ;;  %v7385_v30 = vrot.slane %v8282_v27, %v9435_v11  ;;  %v7393_v57 = vrot.slane %v7386_v5, %v9435_v11  ;;  %v7401_v48 = vrot.slane %v8283_v7, %v9435_v11 }
 0xca5   :  { %v7335_v16 = vcombine.high %v7309_v13, %v7317_v52  ;;  %v7351_v42 = vcombine.high %v7325_v54, %v7333_v28  ;;  %v7334_v45 = vcombine.low %v7309_v13, %v7317_v52  ;;  %v7350_v6 = vcombine.low %v7325_v54, %v7333_v28 }
 0xca6   :  { %v7403_v60 = vcombine.high %v7377_v0, %v7385_v30  ;;  %v7419_v47 = vcombine.high %v7393_v57, %v7401_v48  ;;  %v7402_v10 = vcombine.low %v7377_v0, %v7385_v30  ;;  %v7418_v35 = vcombine.low %v7393_v57, %v7401_v48 }
 0xca7   :  { %v7349_v44 = vrot.slane %v7335_v16, %v9444_v23  ;;  %v7365_v25 = vrot.slane %v7351_v42, %v9444_v23  ;;  %v7342_v20 = vrot.slane %v7334_v45, %v9444_v23  ;;  %v7358_v29 = vrot.slane %v7350_v6, %v9444_v23  ;;  %v8284_v16 = vld [vmem:[%s11580_s13] ss:$0 sm:$0xff] }
 0xca8   :  { %v7417_v11 = vrot.slane %v7403_v60, %v9444_v23  ;;  %v7433_v40 = vrot.slane %v7419_v47, %v9444_v23  ;;  %v7410_v50 = vrot.slane %v7402_v10, %v9444_v23  ;;  %v7426_v24 = vrot.slane %v7418_v35, %v9444_v23 }
 0xca9   :  { %v7368_v49 = vcombine.low %v7349_v44, %v7365_v25  ;;  %v7367_v2 = vcombine.high %v7342_v20, %v7358_v29  ;;  %v7369_v56 = vcombine.high %v7349_v44, %v7365_v25  ;;  %v7366_v21 = vcombine.low %v7342_v20, %v7358_v29 }
 0xcaa   :  { %v7436_v39 = vcombine.low %v7417_v11, %v7433_v40  ;;  %v7435_v43 = vcombine.high %v7410_v50, %v7426_v24  ;;  %v7437_v34 = vcombine.high %v7417_v11, %v7433_v40  ;;  %v7434_v63 = vcombine.low %v7410_v50, %v7426_v24  ;;  %v11632_v11 = vld [vmem:[#allocation7_spill] sm:$0xff]  ;;  %v8883_v50 = vld [vmem:[%s11583_s16] ss:$8 sps:$4 sm:$0xff]  }
 0xcac   :  { %v8793_v62 = vpack.i.bf16 %v7436_v39, %v7368_v49  ;;  %v8783_v15 = vpack.i.bf16 %v7435_v43, %v7367_v2  ;;  %v8798_v8 = vpack.i.bf16 %v7437_v34, %v7369_v56 }
 0xcae   :  { %8794 = vrot.lane.b32.xlu1 %v8793_v62, %s9106_s30  ;;  %8784 = vrot.lane.b32.xlu0 %v8783_v15, %s9107_s4 }
 0xcb2   :  { %8799 = vrot.lane.b32.xlu1 %v8798_v8, %s9105_s3  ;;  %8789 = vrot.lane.b32.xlu0 %v11316_v9, %s9105_s3 }
 0xcea   :  { %v8775_v23 = vpop.permute.xlu1 %8774 }
 0xceb   :  { %v8777_v26 = vunpack.i.h.bf16 %v8775_v23  ;;  %v8776_v41 = vunpack.i.l.bf16 %v8775_v23 }
 0xced   :  { %v7486_v9 = vsel %vm2149_vm1, %v7230_v37, %v8776_v41  ;;  %v7487_v5 = vsel %vm2149_vm1, %v7298_v3, %v8777_v26  ;;  %v8891_v41 = vld [vmem:[%s11583_s16 + $0x24] ss:$8 sps:$4 sm:$0xff]  }
 0xcee   :  { %v8780_v18 = vpop.permute.xlu1 %8779 }
 0xcef   :  { %v8782_v59 = vunpack.i.h.bf16 %v8780_v18  ;;  %v8781_v31 = vunpack.i.l.bf16 %v8780_v18 }
 0xcf1   :  { %v7490_v0 = vsel %vm3702_vm5, %v7486_v9, %v8781_v31  ;;  %v7491_v30 = vsel %vm3702_vm5, %v7487_v5, %v8782_v59  ;;  %v8895_v59 = vld [vmem:[%s11583_s16 + $0x40] ss:$8 sps:$4 sm:$0xff]   ;;  %v8900_v31 = vld [vmem:[%s11583_s16 + $0x54] ss:$8 sps:$4 sm:$0xff]   ;;  %v8904_v9 = vld [vmem:[%s11583_s16 + $0x70] ss:$8 sps:$4 sm:$0xff]  }
 0xcf2   :  { %v8907_v5 = vld [vmem:[%s11585_s18 + $0x40] sm:$0xff]  }
 0xcf3   :  { %8434 = vmatprep.subr.bf16.mxu0 %v8907_v5 }
 0xd20   :  { %v8795_v14 = vpop.permute.xlu1 %8794  ;;  %v8785_v19 = vpop.permute.xlu0 %8784 }
 0xd21   :  { %v8787_v33 = vunpack.i.h.bf16 %v8785_v19  ;;  %v8786_v1 = vunpack.i.l.bf16 %v8785_v19  ;;  %v8797_v12 = vunpack.i.h.bf16 %v8795_v14  ;;  %v8796_v17 = vunpack.i.l.bf16 %v8795_v14  ;;  %v8889_v14 = vld [vmem:[%s11583_s16 + $0x20] ss:$8 sps:$4 sm:$0xff]   ;;  %v8892_v19 = vld [vmem:[%s11583_s16 + $0x30] ss:$8 sps:$4 sm:$0xff]  }
 0xd23   :  { %v7488_v61 = vsel %vm2149_vm1, %v7366_v21, %v8786_v1  ;;  %v7489_v27 = vsel %vm2149_vm1, %v7434_v63, %v8787_v33  ;;  %v8894_v33 = vld [vmem:[%s11583_s16 + $0x34] ss:$8 sps:$4 sm:$0xff]   ;;  %v8897_v1 = vld [vmem:[%s11583_s16 + $0x44] ss:$8 sps:$4 sm:$0xff]  }
 0xd24   :  { %v8800_v7 = vpop.permute.xlu1 %8799  ;;  %v8790_v13 = vpop.permute.xlu0 %8789  ;;  %v7492_v57 = vsel %vm3702_vm5, %v7488_v61, %v8796_v17  ;;  %v7493_v46 = vsel %vm3702_vm5, %v7489_v27, %v8797_v12  ;;  %v8898_v12 = vld [vmem:[%s11583_s16 + $0x50] ss:$8 sps:$4 sm:$0xff]   ;;  %v8903_v17 = vld [vmem:[%s11583_s16 + $0x64] ss:$8 sps:$4 sm:$0xff]   ;;  %v8901_v61 = vld [vmem:[%s11583_s16 + $0x60] ss:$8 sps:$4 sm:$0xff]  }
 0xd25   :  { %v8802_v52 = vunpack.i.h.bf16 %v8800_v7  ;;  %v8801_v54 = vunpack.i.l.bf16 %v8800_v7  ;;  %v8792_v28 = vunpack.i.h.bf16 %v8790_v13  ;;  %v8791_v53 = vunpack.i.l.bf16 %v8790_v13  ;;  %v8906_v27 = vld [vmem:[%s11583_s16 + $0x74] ss:$8 sps:$4 sm:$0xff]   ;;  %v8908_v7 = vld [vmem:[%s11585_s18] sm:$0xff]   ;;  %v8909_v13 = vld [vmem:[%s11585_s18 + $0x48] sm:$0xff]  }
 0xd27   :  { %v7496_v32 = vsel %vm3707_vm6, %v7492_v57, %v8801_v54  ;;  %v7497_v37 = vsel %vm3707_vm6, %v7493_v46, %v8802_v52  ;;  %v7494_v38 = vsel %vm3707_vm6, %v7490_v0, %v8791_v53  ;;  %v7495_v55 = vsel %vm3707_vm6, %v7491_v30, %v8792_v28  ;;  %v8910_v52 = vld [vmem:[%s11585_s18 + $0x8] sm:$0xff]   ;;  %v8911_v54 = vld [vmem:[%s11585_s18 + $0x50] sm:$0xff]   ;;  %v8913_v53 = vld [vmem:[%s11585_s18 + $0x58] sm:$0xff]  }
 0xd28   :  { %v7515_v3 = vpack.c.bf16 %v7497_v37, %v7496_v32  ;;  %v7514_v48 = vpack.c.bf16 %v7495_v55, %v7494_v38  ;;  %v8912_v28 = vld [vmem:[%s11585_s18 + $0x10] sm:$0xff]   ;;  %v8914_v0 = vld [vmem:[%s11585_s18 + $0x18] sm:$0xff]   ;;  %v8915_v30 = vld [vmem:[%s11585_s18 + $0x60] sm:$0xff]  }
 0xd29   :  { %v8916_v57 = vld [vmem:[%s11585_s18 + $0x20] sm:$0xff]   ;;  %v8917_v46 = vld [vmem:[%s11585_s18 + $0x68] sm:$0xff]  }
 0xd2a   :  { %8730 = vmatprep.mubr.bf16.mxu0 %v7514_v48 }
 0xd2b   :  { %8731 = vmatmul.mubr.bf16.vlgmr.msra.gmra.mrb[76].mxu0 %v7515_v3 }
 0xd2c   :  { %8435 = vmatpush3.bf16.msra.mxu0 %v8908_v7 }
 0xd2d   :  { %8436 = vmatprep.subr.bf16.mxu0 %v8909_v13 }
 0xd30   :  { %8437 = vmatpush3.bf16.msra.mxu0 %v8910_v52 }
 0xd31   :  { %8438 = vmatprep.subr.bf16.mxu0 %v8911_v54 }
 0xd34   :  { %8439 = vmatpush3.bf16.msra.mxu0 %v8912_v28 }
 0xd35   :  { %8440 = vmatprep.subr.bf16.mxu0 %v8913_v53 }
 0xd38   :  { %8441 = vmatpush3.bf16.msra.mxu0 %v8914_v0 }
 0xd39   :  { %8442 = vmatprep.subr.bf16.mxu0 %v8915_v30 }
 0xd3c   :  { %8443 = vmatpush3.bf16.msra.mxu0 %v8916_v57 }
 0xd3d   :  { %8444 = vmatprep.subr.bf16.mxu0 %v8917_v46 }
 0xdfe   :  { %v8732_v42 = vpop.f32.mrb[76].mxu0 }
 0xdff   :  { %v7605_v45 = vpop.f32.mrb[77].mxu0  ;;  %v7614_v10 = vadd.f32 %v8732_v42, %v8284_v16 }
 0xe00   :  { %v7606_v6 = vadd.f32 %v8284_v16, %v7605_v45  ;;  %v8733_v60 = vpop.f32.mrb[78].mxu0 }
 0xe01   :  { %v7608_v47 = vpop.f32.mrb[79].mxu0  ;;  %v7622_v20 = vadd.f32 %v7614_v10, %v10466_v51  ;;  %v7617_v29 = vadd.f32 %v8733_v60, %v8284_v16  ;;  %v8886_v51 = vld [vmem:[%s11583_s16 + $0x10] ss:$8 sps:$4 sm:$0xff]  }
 0xe02   :  { %v7620_v35 = vadd.f32 %v7606_v6, %v10459_v4  ;;  %v7609_v44 = vadd.f32 %v8284_v16, %v7608_v47  ;;  %v8885_v4 = vld [vmem:[%s11583_s16 + $0x4] ss:$8 sps:$4 sm:$0xff]  }
 0xe03   :  { %v7623_v40 = vadd.f32 %v7617_v29, %v11632_v11  ;;  %7800 = vmatprep.subr.bf16.mxu1 %v8885_v4 }
 0xe04   :  { %v7621_v25 = vadd.f32 %v7609_v44, %v10461_v22  ;;  %7626 = vadd.xlane.f32.xlu0 %v7620_v35  ;;  %v8888_v22 = vld [vmem:[%s11583_s16 + $0x14] ss:$8 sps:$4 sm:$0xff]   ;;  %7801 = vmatpush1.bf16.msra.mxu1 %v8883_v50 }
 0xe05   :  { %7802 = vmatprep.subr.bf16.mxu1 %v8888_v22 }
 0xe06   :  { %7628 = vadd.xlane.f32.xlu1 %v7621_v25 }
 0xe08   :  { %7630 = vadd.xlane.f32.xlu0 %v7622_v20  ;;  %7803 = vmatpush1.bf16.msra.mxu1 %v8886_v51 }
 0xe09   :  { %7804 = vmatprep.subr.bf16.mxu1 %v8891_v41 }
 0xe0c   :  { %7632 = vadd.xlane.f32.xlu0 %v7623_v40  ;;  %7805 = vmatpush1.bf16.msra.mxu1 %v8889_v14 }
 0xe0d   :  { %7806 = vmatprep.subr.bf16.mxu1 %v8894_v33 }
 0xe10   :  { %7807 = vmatpush1.bf16.msra.mxu1 %v8892_v19 }
 0xe11   :  { %7808 = vmatprep.subr.bf16.mxu1 %v8897_v1 }
 0xe14   :  { %7809 = vmatpush1.bf16.msra.mxu1 %v8895_v59 }
 0xe15   :  { %7810 = vmatprep.subr.bf16.mxu1 %v8900_v31 }
 0xe18   :  { %7811 = vmatpush1.bf16.msra.mxu1 %v8898_v12 }
 0xe19   :  { %7812 = vmatprep.subr.bf16.mxu1 %v8903_v17 }
 0xe1c   :  { %7813 = vmatpush1.bf16.msra.mxu1 %v8901_v61 }
 0xe1d   :  { %7814 = vmatprep.subr.bf16.mxu1 %v8906_v27 }
 0xe20   :  { %7815 = vmatpush1.bf16.msra.mxu1 %v8904_v9 }
 0xe91   :  { %v7627_v24 = vpop.xlane.xlu0 %7626 }
 0xe92   :  { %v7634_v36 = vmul.f32 0.0078125, %v7627_v24 }
 0xe93   :  { %v7629_v49 = vpop.xlane.xlu1 %7628 }
 0xe94   :  { %v11417_v2 = vsub.f32 %v7620_v35, %v7634_v36  ;;  %v7635_v56 = vmul.f32 0.0078125, %v7629_v49  ;;  %v8293_v35 = vld [vmem:[%s11581_s14] ss:$0 sm:$0xff] }
 0xe95   :  { %v7631_v21 = vpop.xlane.xlu0 %7630 }
 0xe96   :  { %v11419_v39 = vsub.f32 %v7621_v25, %v7635_v56  ;;  %v7636_v43 = vmul.f32 0.0078125, %v7631_v21  ;;  %v7642_v34 = vmul.f32 %v11417_v2, %v11417_v2 }
 0xe98   :  { %v11423_v63 = vsub.f32 %v7622_v20, %v7636_v43  ;;  %7646 = vadd.xlane.f32.xlu1 %v7642_v34  ;;  %v7643_v62 = vmul.f32 %v11419_v39, %v11419_v39  ;;  %v8918_v34 = vld [vmem:[%s11585_s18 + $0x28] sm:$0xff]  }
 0xe99   :  { %v7633_v15 = vpop.xlane.xlu0 %7632  ;;  %8445 = vmatpush3.bf16.msra.mxu0 %v8918_v34 }
 0xe9a   :  { %v7637_v8 = vmul.f32 0.0078125, %v7633_v15  ;;  %7648 = vadd.xlane.f32.xlu0 %v7643_v62  ;;  %v7644_v23 = vmul.f32 %v11423_v63, %v11423_v63  ;;  %v8921_v62 = vld [vmem:[%s11585_s18 + $0x78] sm:$0xff]  }
 0xe9b   :  { %v8922_v15 = vld [vmem:[%s11585_s18 + $0x38] sm:$0xff]  }
 0xe9c   :  { %v11429_v18 = vsub.f32 %v7623_v40, %v7637_v8  ;;  %7650 = vadd.xlane.f32.xlu1 %v7644_v23  ;;  %v8294_v40 = vld [vmem:[%s11582_s15] ss:$0 sm:$0xff]  ;;  %v11633_v23 = vld [vmem:[#allocation5_spill] sm:$0xff] }
 0xe9d   :  { %v7708_v8 = vld [vmem:[%s11584_s17] sm:$0x3] }
 0xe9e   :  { %v7645_v26 = vmul.f32 %v11429_v18, %v11429_v18 }
 0xea0   :  { %7652 = vadd.xlane.f32.xlu0 %v7645_v26  ;;  %v11634_v26 = vld [vmem:[#allocation6_spill] sm:$0xff] }
 0xea1   :  { %v7717_v41 = vrot.slane %v7708_v8, %v11634_v26 }
 0xf25   :  { %v7647_v32 = vpop.xlane.xlu1 %7646 }
 0xf26   :  { %v7654_v37 = vmul.f32 0.0078125, %v7647_v32 }
 0xf27   :  { %v7649_v38 = vpop.xlane.xlu0 %7648 }
 0xf28   :  { %v7658_v55 = vadd.f32 1e-05, %v7654_v37  ;;  %v7655_v3 = vmul.f32 0.0078125, %v7649_v38 }
 0xf29   :  { %v7651_v48 = vpop.xlane.xlu1 %7650 }
 0xf2a   :  { %9059 = vrsqrt.f32 %v7658_v55  ;;  %v7659_v16 = vadd.f32 1e-05, %v7655_v3  ;;  %v7656_v42 = vmul.f32 0.0078125, %v7651_v48 }
 0xf2c   :  { %9061 = vrsqrt.f32 %v7659_v16  ;;  %v7660_v45 = vadd.f32 1e-05, %v7656_v42  ;;  %v8311_v42 = vld [vmem:[%s11586_s19] ss:$0 sm:$0xff] }
 0xf2d   :  { %v7653_v6 = vpop.xlane.xlu0 %7652 }
 0xf2e   :  { %9063 = vrsqrt.f32 %v7660_v45  ;;  %v7657_v60 = vmul.f32 0.0078125, %v7653_v6 }
 0xf30   :  { %v7661_v47 = vadd.f32 1e-05, %v7657_v60 }
 0xf32   :  { %9065 = vrsqrt.f32 %v7661_v47 }
 0xf34   :  { %v9060_v10 = vpop.eup %9059 }
 0xf35   :  { %v7666_v44 = vmul.f32 %v9060_v10, %v11417_v2 }
 0xf36   :  { %v9062_v25 = vpop.eup %9061 }
 0xf37   :  { %v7667_v20 = vmul.f32 %v9062_v25, %v11419_v39  ;;  %v7676_v29 = vmul.f32 %v8293_v35, %v7666_v44 }
 0xf38   :  { %v9064_v11 = vpop.eup %9063 }
 0xf39   :  { %v7677_v50 = vmul.f32 %v8293_v35, %v7667_v20  ;;  %v11510_v4 = vadd.f32 %v8294_v40, %v7676_v29  ;;  %v7668_v51 = vmul.f32 %v9064_v11, %v11423_v63  ;;  %v8919_v63 = vld [vmem:[%s11585_s18 + $0x70] sm:$0xff]  }
 0xf3a   :  { %8446 = vmatprep.subr.bf16.mxu0 %v8919_v63 }
 0xf3b   :  { %v11512_v22 = vadd.f32 %v8294_v40, %v7677_v50  ;;  %v7678_v2 = vmul.f32 %v8293_v35, %v7668_v51 }
 0xf3c   :  { %v9066_v24 = vpop.eup %9065 }
 0xf3d   :  { %v7706_v36 = vpack.c.bf16 %v11512_v22, %v11510_v4  ;;  %v7669_v49 = vmul.f32 %v9066_v24, %v11429_v18  ;;  %v11521_v39 = vadd.f32 %v8294_v40, %v7678_v2  ;;  %v7713_v18 = vrot.slane %v7708_v8, %v11633_v23 }
 0xf3f   :  { %7833 = vmatmul.mubr.bf16.vlgmr.msra.gmra.mrb[80].mxu1 %v7706_v36  ;;  %v7679_v56 = vmul.f32 %v8293_v35, %v7669_v49 }
 0xf40   :  { %7842 = vmatprep.mubr.bf16.mxu1 %v11624_v58  ;;  %v8920_v58 = vld [vmem:[%s11585_s18 + $0x30] sm:$0xff]  }
 0xf41   :  { %v11519_v21 = vadd.f32 %v8294_v40, %v7679_v56  ;;  %8447 = vmatpush3.bf16.msra.mxu0 %v8920_v58 }
 0xf42   :  { %8448 = vmatprep.subr.bf16.mxu0 %v8921_v62 }
 0xf43   :  { %v7707_v43 = vpack.c.bf16 %v11519_v21, %v11521_v39 }
 0xf45   :  { %8449 = vmatpush3.bf16.msra.mxu0 %v8922_v15 }
 0xf47   :  { %7843 = vmatmul.mubr.bf16.gmra.mrb[84].mxu1 %v7707_v43 }
0x1012   :  { %v7834_v14 = vpop.f32.mrb[80].mxu1 }
0x1013   :  { %v7835_v19 = vadd.f32 %v7834_v14, %v7713_v18  ;;  %v7836_v33 = vpop.f32.mrb[81].mxu1 }
0x1014   :  { %v7837_v1 = vadd.f32 %v7836_v33, %v7717_v41  ;;  %v7838_v59 = vpop.f32.mrb[82].mxu1 }
0x1015   :  { %v7839_v31 = vadd.f32 %v7838_v59, %v7713_v18  ;;  %v7840_v12 = vpop.f32.mrb[83].mxu1  ;;  %v7853_v61 = vmax.f32 %v7835_v19, 0.0 }
0x1016   :  { %v7841_v17 = vadd.f32 %v7840_v12, %v7717_v41  ;;  %v7854_v9 = vmax.f32 %v7837_v1, 0.0 }
0x1017   :  { %v7855_v27 = vmax.f32 %v7839_v31, 0.0 }
0x1018   :  { %v7856_v5 = vmax.f32 %v7841_v17, 0.0 }
0x1019   :  { %v7893_v7 = vpack.c.bf16 %v7855_v27, %v7853_v61 }
0x101a   :  { %v7894_v13 = vpack.c.bf16 %v7856_v5, %v7854_v9  ;;  %v7844_v52 = vpop.f32.mrb[84].mxu1 }
0x101b   :  { %v7845_v54 = vadd.f32 %v7844_v52, %v7713_v18  ;;  %v7846_v28 = vpop.f32.mrb[85].mxu1  ;;  %v8328_v52 = vld [vmem:[%s11587_s20] ss:$0 sm:$0xff] }
0x101c   :  { %v7847_v53 = vadd.f32 %v7846_v28, %v7717_v41  ;;  %v7848_v0 = vpop.f32.mrb[86].mxu1  ;;  %8032 = vmatprep.mubr.bf16.mxu0 %v7894_v13 }
0x101d   :  { %v7849_v30 = vadd.f32 %v7848_v0, %v7713_v18  ;;  %v7850_v57 = vpop.f32.mrb[87].mxu1  ;;  %8033 = vmatmul.mubr.bf16.vlgmr.msra.gmra.mrb[80].mxu0 %v7893_v7  ;;  %v7857_v32 = vmax.f32 %v7845_v54, 0.0 }
0x101e   :  { %v7851_v46 = vadd.f32 %v7850_v57, %v7717_v41  ;;  %v7858_v38 = vmax.f32 %v7847_v53, 0.0  ;;  %v8329_v53 = vld [vmem:[#allocation2] ss:$0 sm:$0xff] }
0x101f   :  { %v7859_v37 = vmax.f32 %v7849_v30, 0.0 }
0x1020   :  { %v7860_v55 = vmax.f32 %v7851_v46, 0.0 }
0x1021   :  { %v7895_v3 = vpack.c.bf16 %v7859_v37, %v7857_v32 }
0x1022   :  { %v7896_v48 = vpack.c.bf16 %v7860_v55, %v7858_v38 }
0x1024   :  { %8040 = vmatprep.mubr.bf16.mxu0 %v7896_v48 }
0x1025   :  { %8041 = vmatmul.mubr.bf16.gmra.mrb[84].mxu0 %v7895_v3 }
0x10f0   :  { %v8450_v16 = vpop.f32.mrb[80].mxu0 }
0x10f1   :  { %v8451_v45 = vpop.f32.mrb[81].mxu0 }
0x10f2   :  { %v8452_v6 = vadd.f32 %v8451_v45, %v8450_v16  ;;  %v8453_v60 = vpop.f32.mrb[82].mxu0 }
0x10f3   :  { %v8454_v47 = vpop.f32.mrb[83].mxu0 }
0x10f4   :  { %v8035_v10 = vadd.f32 %v8452_v6, %v8311_v42  ;;  %v8455_v35 = vadd.f32 %v8454_v47, %v8453_v60 }
0x10f6   :  { %v8038_v44 = vadd.f32 %v8455_v35, %v8311_v42  ;;  %v8049_v25 = vadd.f32 %v8035_v10, %v11510_v4 }
0x10f8   :  { %v8456_v20 = vpop.f32.mrb[84].mxu0  ;;  %8055 = vadd.xlane.f32.xlu1 %v8049_v25  ;;  %v8050_v29 = vadd.f32 %v8038_v44, %v11512_v22 }
0x10f9   :  { %v8457_v11 = vpop.f32.mrb[85].mxu0 }
0x10fa   :  { %v8458_v40 = vadd.f32 %v8457_v11, %v8456_v20  ;;  %v8459_v50 = vpop.f32.mrb[86].mxu0  ;;  %8057 = vadd.xlane.f32.xlu0 %v8050_v29 }
0x10fb   :  { %v8460_v51 = vpop.f32.mrb[87].mxu0 }
0x10fc   :  { %v8043_v24 = vadd.f32 %v8458_v40, %v8311_v42  ;;  %v8461_v36 = vadd.f32 %v8460_v51, %v8459_v50 }
0x10fe   :  { %v8046_v49 = vadd.f32 %v8461_v36, %v8311_v42  ;;  %v8051_v2 = vadd.f32 %v8043_v24, %v11521_v39 }
0x1100   :  { %8059 = vadd.xlane.f32.xlu1 %v8051_v2  ;;  %v8052_v56 = vadd.f32 %v8046_v49, %v11519_v21 }
0x1102   :  { %8061 = vadd.xlane.f32.xlu0 %v8052_v56 }
0x1185   :  { %v8056_v43 = vpop.xlane.xlu1 %8055 }
0x1186   :  { %v8063_v4 = vmul.f32 0.0078125, %v8056_v43 }
0x1187   :  { %v8058_v34 = vpop.xlane.xlu0 %8057 }
0x1188   :  { %v8067_v63 = vsub.f32 %v8049_v25, %v8063_v4  ;;  %v8064_v58 = vmul.f32 0.0078125, %v8058_v34 }
0x118a   :  { %v8068_v22 = vsub.f32 %v8050_v29, %v8064_v58  ;;  %v8071_v62 = vmul.f32 %v8067_v63, %v8067_v63 }
0x118c   :  { %8075 = vadd.xlane.f32.xlu1 %v8071_v62  ;;  %v8072_v15 = vmul.f32 %v8068_v22, %v8068_v22 }
0x118d   :  { %v8060_v8 = vpop.xlane.xlu1 %8059 }
0x118e   :  { %v8065_v23 = vmul.f32 0.0078125, %v8060_v8  ;;  %8077 = vadd.xlane.f32.xlu0 %v8072_v15 }
0x118f   :  { %v8062_v18 = vpop.xlane.xlu0 %8061 }
0x1190   :  { %v8069_v26 = vsub.f32 %v8051_v2, %v8065_v23  ;;  %v8066_v41 = vmul.f32 0.0078125, %v8062_v18 }
0x1192   :  { %v8070_v39 = vsub.f32 %v8052_v56, %v8066_v41  ;;  %v8073_v14 = vmul.f32 %v8069_v26, %v8069_v26 }
0x1194   :  { %8079 = vadd.xlane.f32.xlu1 %v8073_v14  ;;  %v8074_v21 = vmul.f32 %v8070_v39, %v8070_v39 }
0x1196   :  { %8081 = vadd.xlane.f32.xlu0 %v8074_v21 }
0x1219   :  { %v8076_v19 = vpop.xlane.xlu1 %8075 }
0x121a   :  { %v8083_v33 = vmul.f32 0.0078125, %v8076_v19 }
0x121b   :  { %v8078_v1 = vpop.xlane.xlu0 %8077 }
0x121c   :  { %v8087_v59 = vadd.f32 1e-05, %v8083_v33  ;;  %v8084_v31 = vmul.f32 0.0078125, %v8078_v1 }
0x121e   :  { %9067 = vrsqrt.f32 %v8087_v59  ;;  %v8088_v12 = vadd.f32 1e-05, %v8084_v31 }
0x1220   :  { %9069 = vrsqrt.f32 %v8088_v12 }
0x1221   :  { %v8080_v17 = vpop.xlane.xlu1 %8079 }
0x1222   :  { %v8085_v61 = vmul.f32 0.0078125, %v8080_v17 }
0x1223   :  { %v8082_v27 = vpop.xlane.xlu0 %8081 }
0x1224   :  { %v8089_v9 = vadd.f32 1e-05, %v8085_v61  ;;  %v8086_v5 = vmul.f32 0.0078125, %v8082_v27 }
0x1226   :  { %9071 = vrsqrt.f32 %v8089_v9  ;;  %v8090_v7 = vadd.f32 1e-05, %v8086_v5 }
0x1228   :  { %v9068_v13 = vpop.eup %9067  ;;  %9073 = vrsqrt.f32 %v8090_v7 }
0x1229   :  { %v8095_v54 = vmul.f32 %v9068_v13, %v8067_v63 }
0x122a   :  { %v9070_v28 = vpop.eup %9069 }
0x122b   :  { %v8105_v0 = vmul.f32 %v8328_v52, %v8095_v54  ;;  %v8096_v30 = vmul.f32 %v9070_v28, %v8068_v22 }
0x122d   :  { %v8115_v57 = vadd.f32 %v8329_v53, %v8105_v0  ;;  %v8106_v46 = vmul.f32 %v8328_v52, %v8096_v30 }
0x122f   :  { %8119 = vst [vmem:[%s11589_s22] sm:$0xff] %v8115_v57  ;;  %v8116_v32 = vadd.f32 %v8329_v53, %v8106_v46 }
0x1230   :  { %v9072_v37 = vpop.eup %9071 }
0x1231   :  { %8120 = vst [vmem:[%s11589_s22 + $0x8] sm:$0xff] %v8116_v32  ;;  %v8097_v38 = vmul.f32 %v9072_v37, %v8069_v26 }
0x1232   :  { %v9074_v55 = vpop.eup %9073 }
0x1233   :  { %v8107_v3 = vmul.f32 %v8328_v52, %v8097_v38  ;;  %v8098_v48 = vmul.f32 %v9074_v55, %v8070_v39 }
0x1235   :  { %v8117_v16 = vadd.f32 %v8329_v53, %v8107_v3  ;;  %v8108_v42 = vmul.f32 %v8328_v52, %v8098_v48 }
0x1237   :  { %8121 = vst [vmem:[%s11589_s22 + $0x10] sm:$0xff] %v8117_v16  ;;  %v8118_v45 = vadd.f32 %v8329_v53, %v8108_v42 }
0x1239   :  { %8122 = vst [vmem:[%s11589_s22 + $0x18] sm:$0xff] %v8118_v45 }
0x123a   :  { %8127 = vsyncpa [#allocation3], 1 }

// kernel: html_generator_forward.3
= control target key start
LH: loop header
LB: loop body
LE: loop exit
PB: predicated region body
PF: predicated region fallthrough
CT: control target
= control target key end

     0   :  { %v11547_v1 = vmov 0   ;;  %v11549_v31 = vlaneseq  ;;  %s9068_s24 = smov 32   ;;  %v11550_v52 = vmov 0.0   ;;  %vm9070_vm0 = vmmov 0   ;;  %s11519_s2 = inlined_call_operand.vmem [shape: bf16[128,384], index: 2, kind: input, shape index: {}]   ;;  %s11520_s0 = inlined_call_operand.vmem [shape: f32[2,16,128], index: 0, kind: input, shape index: {}]   ;;  %s11521_s3 = inlined_call_operand.vmem [shape: f32[1,384], index: 3, kind: input, shape index: {}]   ;;  %s11522_s4 = inlined_call_operand.vmem [shape: bf16[128,128], index: 4, kind: input, shape index: {}]   ;;  %s11523_s5 = inlined_call_operand.vmem [shape: f32[1,128], index: 5, kind: input, shape index: {}]   ;;  %s11524_s10 = inlined_call_operand.vmem [shape: bf16[128,256], index: 10, kind: input, shape index: {}]   ;;  %s11525_s8 = inlined_call_operand.vmem [shape: bf16[128,128], index: 8, kind: input, shape index: {}]   ;;  %s11526_s1 = inlined_call_operand.vmem [shape: f32[2,16,128], index: 1, kind: input, shape index: {}]   ;;  %s11527_s11 = inlined_call_operand.vmem [shape: f32[1,256], index: 11, kind: input, shape index: {}]   ;;  %s11528_s6 = inlined_call_operand.vmem [shape: f32[1,128], index: 6, kind: input, shape index: {}]   ;;  %s11529_s7 = inlined_call_operand.vmem [shape: f32[1,128], index: 7, kind: input, shape index: {}]   ;;  %s11530_s9 = inlined_call_operand.vmem [shape: f32[1,128], index: 9, kind: input, shape index: {}]   ;;  %s11531_s12 = inlined_call_operand.vmem [shape: bf16[128,128], index: 12, kind: input, shape index: {}]   ;;  %s11532_s13 = inlined_call_operand.vmem [shape: f32[1,128], index: 13, kind: input, shape index: {}]   ;;  %s11533_s16 = inlined_call_operand.vmem [shape: bf16[128,256], index: 16, kind: input, shape index: {}]   ;;  %s11534_s18 = inlined_call_operand.vmem [shape: bf16[256,128], index: 18, kind: input, shape index: {}]   ;;  %s11535_s14 = inlined_call_operand.vmem [shape: f32[1,128], index: 14, kind: input, shape index: {}]   ;;  %s11536_s15 = inlined_call_operand.vmem [shape: f32[1,128], index: 15, kind: input, shape index: {}]   ;;  %s11537_s17 = inlined_call_operand.vmem [shape: f32[1,256], index: 17, kind: input, shape index: {}]   ;;  %s11538_s19 = inlined_call_operand.vmem [shape: f32[1,128], index: 19, kind: input, shape index: {}]   ;;  %s11539_s20 = inlined_call_operand.vmem [shape: f32[1,128], index: 20, kind: input, shape index: {}]   ;;  %s11540_s21 = inlined_call_operand.vmem [shape: f32[1,128], index: 21, kind: input, shape index: {}]   ;;  %s11541_s22 = inlined_call_operand.vmem [shape: f32[2,16,128], index: 22, kind: output, shape index: {}]  }
   0x1   :  { %11555 = sst [smem:[#allocation5_spill]] %s11519_s2  ;;  %291 = vmatprep.mubr.bf16.mxu0 %v11547_v1  ;;  %vm2137_vm1 = vcmask 261120   ;;  %vm2557_vm3 = vcmask 130048   ;;  %vm3690_vm5 = vcmask 523264   ;;  %vm3695_vm6 = vcmask 785408  }
   0x2   :  { %11556 = sst [smem:[#allocation6_spill]] %s11520_s0  ;;  %s11562_s29 = sld [smem:[#allocation5_spill]]  ;;  %v9275_v32 = vshrl.u32 %v11549_v31, 7 }
   0x3   :  { %11557 = sst [smem:[#allocation7_spill]] %s11521_s3  ;;  %s11563_s30 = sld [smem:[#allocation6_spill]] }
   0x4   :  { %11558 = sst [smem:[#allocation8_spill]] %s11522_s4  ;;  %v9278_v33 = vsub.s32 0, %v9275_v32  ;;  %s11565_s0 = sld [smem:[#allocation7_spill]]  ;;  %v9284_v35 = vsub.s32 1, %v9275_v32  ;;  %v126_v55 = vsub.s32 2, %v9275_v32 }
   0x5   :  { %11559 = sst [smem:[#allocation9_spill]] %s11523_s5  ;;  %s11576_s26 = sld [smem:[#allocation8_spill]] }
   0x6   :  { %11560 = sst [smem:[#allocation10_spill]] %s11524_s10  ;;  %11564 = vst [vmem:[#allocation2_spill] sm:$0xff] %v9278_v33  ;;  %11566 = vst [vmem:[#allocation3_spill] sm:$0xff] %v9284_v35  ;;  %s9067_s10 = smov 64  }
   0x7   :  { %11561 = sst [smem:[#allocation11_spill]] %s11525_s8  ;;  %s11578_s2 = sld [smem:[#allocation9_spill]] }
   0x8   :  { %v8789_v0 = vld [vmem:[%s11562_s29 + $0x4] ss:$12 sps:$4 sm:$0xff]   ;;  %v8791_v2 = vld [vmem:[%s11562_s29] ss:$12 sps:$4 sm:$0xff]   ;;  %v8792_v3 = vld [vmem:[%s11562_s29 + $0x1c] ss:$12 sps:$4 sm:$0xff]  }
   0x9   :  { %259 = vmatprep.subr.bf16.mxu0 %v8789_v0  ;;  %v8794_v4 = vld [vmem:[%s11562_s29 + $0x18] ss:$12 sps:$4 sm:$0xff]   ;;  %v8795_v5 = vld [vmem:[%s11562_s29 + $0x34] ss:$12 sps:$4 sm:$0xff]   ;;  %v8797_v6 = vld [vmem:[%s11562_s29 + $0x30] ss:$12 sps:$4 sm:$0xff]  }
   0xa   :  { %260 = vmatpush1.bf16.msra.mxu0 %v8791_v2  ;;  %v8798_v7 = vld [vmem:[%s11562_s29 + $0x4c] ss:$12 sps:$4 sm:$0xff]   ;;  %v72_v8 = vld [vmem:[%s11563_s30] sm:$0xff]  ;;  %v8800_v9 = vld [vmem:[%s11562_s29 + $0x48] ss:$12 sps:$4 sm:$0xff]   ;;  %s11580_s4 = sld [smem:[#allocation11_spill]] }
   0xb   :  { %261 = vmatprep.subr.bf16.mxu0 %v8792_v3  ;;  %v8801_v10 = vld [vmem:[%s11562_s29 + $0x64] ss:$12 sps:$4 sm:$0xff]   ;;  %v73_v11 = vld [vmem:[%s11563_s30 + $0x8] sm:$0xff]  ;;  %v8807_v19 = vld [vmem:[%s11562_s29 + $0x94] ss:$12 sps:$4 sm:$0xff]  }
   0xc   :  { %v112_v12 = vpack.c.bf16 %v73_v11, %v72_v8  ;;  %v8813_v13 = vld [vmem:[%s11562_s29 + $0x8] ss:$12 sps:$4 sm:$0xff]   ;;  %v8814_v14 = vld [vmem:[%s11562_s29 + $0x20] ss:$12 sps:$4 sm:$0xff]   ;;  %v8815_v17 = vld [vmem:[%s11562_s29 + $0x38] ss:$12 sps:$4 sm:$0xff]  }
   0xd   :  { %v8803_v15 = vld [vmem:[%s11562_s29 + $0x60] ss:$12 sps:$4 sm:$0xff]   ;;  %8449 = vmatprep.subr.bf16.mxu1 %v8813_v13  ;;  %v8804_v16 = vld [vmem:[%s11562_s29 + $0x7c] ss:$12 sps:$4 sm:$0xff]   ;;  %v8806_v18 = vld [vmem:[%s11562_s29 + $0x78] ss:$12 sps:$4 sm:$0xff]  }
   0xe   :  { %262 = vmatpush1.bf16.msra.mxu0 %v8794_v4  ;;  %8465 = vmatprep.mubr.bf16.mxu1 %v112_v12  ;;  %v8816_v20 = vld [vmem:[%s11562_s29 + $0x50] ss:$12 sps:$4 sm:$0xff]   ;;  %v8810_v22 = vld [vmem:[%s11562_s29 + $0xac] ss:$12 sps:$4 sm:$0xff]   ;;  %v8817_v23 = vld [vmem:[%s11562_s29 + $0x68] ss:$12 sps:$4 sm:$0xff]  }
   0xf   :  { %263 = vmatprep.subr.bf16.mxu0 %v8795_v5  ;;  %8450 = vmatpush3.bf16.msra.mxu1 %v8813_v13  ;;  %v8809_v21 = vld [vmem:[%s11562_s29 + $0x90] ss:$12 sps:$4 sm:$0xff]   ;;  %v8812_v24 = vld [vmem:[%s11562_s29 + $0xa8] ss:$12 sps:$4 sm:$0xff]   ;;  %v8818_v25 = vld [vmem:[%s11562_s29 + $0x80] ss:$12 sps:$4 sm:$0xff]  }
  0x10   :  { %8451 = vmatprep.subr.bf16.mxu1 %v8814_v14  ;;  %v8819_v26 = vld [vmem:[%s11562_s29 + $0x98] ss:$12 sps:$4 sm:$0xff]   ;;  %v74_v27 = vld [vmem:[%s11563_s30 + $0x10] sm:$0xff]  ;;  %v114_v34 = vld [vmem:[%s11565_s0] sm:$0x7] }
  0x11   :  { %v75_v28 = vld [vmem:[%s11563_s30 + $0x18] sm:$0xff]  ;;  %v119_v36 = vrot.slane %v114_v34, %v9278_v33  ;;  %v123_v37 = vrot.slane %v114_v34, %v9284_v35  ;;  %v127_v58 = vrot.slane %v114_v34, %v126_v55  ;;  %v9071_v0 = vmov 1983009808  }
  0x12   :  { %264 = vmatpush1.bf16.msra.mxu0 %v8797_v6  ;;  %v113_v29 = vpack.c.bf16 %v75_v28, %v74_v27  ;;  %v8820_v30 = vld [vmem:[%s11562_s29 + $0xb0] ss:$12 sps:$4 sm:$0xff]   ;;  %s9066_s29 = smov 96   ;;  %v404_v2 = vunpack.c.l.s4 %v9071_v0 }
  0x13   :  { %265 = vmatprep.subr.bf16.mxu0 %v8798_v7  ;;  %8452 = vmatpush3.bf16.msra.mxu1 %v8814_v14  ;;  %v9072_v7 = vmov 1934713408  }
  0x14   :  { %8453 = vmatprep.subr.bf16.mxu1 %v8815_v17  ;;  %v405_v6 = vunpack.c.0.s8 %v404_v2  ;;  %v436_v8 = vunpack.c.l.s4 %v9072_v7 }
  0x16   :  { %266 = vmatpush1.bf16.msra.mxu0 %v8800_v9  ;;  %v9384_v11 = vsub.s32 %v405_v6, %v9275_v32  ;;  %v437_v14 = vunpack.c.0.s8 %v436_v8 }
  0x17   :  { %267 = vmatprep.subr.bf16.mxu0 %v8801_v10  ;;  %8454 = vmatpush3.bf16.msra.mxu1 %v8815_v17 }
  0x18   :  { %8455 = vmatprep.subr.bf16.mxu1 %v8816_v20 }
  0x1a   :  { %268 = vmatpush1.bf16.msra.mxu0 %v8803_v15 }
  0x1b   :  { %269 = vmatprep.subr.bf16.mxu0 %v8804_v16  ;;  %8456 = vmatpush3.bf16.msra.mxu1 %v8816_v20 }
  0x1c   :  { %8457 = vmatprep.subr.bf16.mxu1 %v8817_v23 }
  0x1e   :  { %270 = vmatpush1.bf16.msra.mxu0 %v8806_v18 }
  0x1f   :  { %271 = vmatprep.subr.bf16.mxu0 %v8807_v19  ;;  %8458 = vmatpush3.bf16.msra.mxu1 %v8817_v23  ;;  %v9393_v23 = vsub.s32 %v437_v14, %v9275_v32 }
  0x20   :  { %8459 = vmatprep.subr.bf16.mxu1 %v8818_v25 }
  0x22   :  { %272 = vmatpush1.bf16.msra.mxu0 %v8809_v21 }
  0x23   :  { %273 = vmatprep.subr.bf16.mxu0 %v8810_v22  ;;  %8460 = vmatpush3.bf16.msra.mxu1 %v8818_v25 }
  0x24   :  { %8461 = vmatprep.subr.bf16.mxu1 %v8819_v26 }
  0x26   :  { %274 = vmatpush1.bf16.msra.mxu0 %v8812_v24 }
  0x27   :  { %8462 = vmatpush3.bf16.msra.mxu1 %v8819_v26  ;;  %8499 = vmatprep.subr.bf16.mxu0 %v11550_v52 }
  0x28   :  { %8463 = vmatprep.subr.bf16.mxu1 %v8820_v30 }
  0x29   :  { %292 = vmatmul.mubr.bf16.vlgmr.msra.gmra.mrb[0].mxu0 %v112_v12 }
  0x2a   :  { %301 = vmatprep.mubr.bf16.mxu0 %v11547_v1 }
  0x2b   :  { %8464 = vmatpush3.bf16.msra.mxu1 %v8820_v30 }
  0x2c   :  { %8469 = vmatprep.subr.bf16.mxu1 %v11550_v52 }
  0x2e   :  { %8466 = vmatmul.mubr.bf16.vlgmr.msra.gmra.mrb[0].mxu1 %v113_v29 }
  0x2f   :  { %8471 = vmatprep.mubr.msk.bf16.mxu1 %vm9070_vm0, %v11550_v52 }
  0x31   :  { %302 = vmatmul.mubr.bf16.gmra.mrb[4].mxu0 %v113_v29 }
  0x32   :  { %8501 = vmatprep.mubr.msk.bf16.mxu0 %vm9070_vm0, %v11550_v52 }
  0xfc   :  { %v293_v38 = vpop.f32.mrb[0].mxu0 }
  0xfd   :  { %v9288_v39 = vadd.f32 %v293_v38, %v119_v36  ;;  %v295_v40 = vpop.f32.mrb[1].mxu0 }
  0xfe   :  { %v9290_v41 = vadd.f32 %v295_v40, %v123_v37  ;;  %v297_v42 = vpop.f32.mrb[2].mxu0 }
  0xff   :  { %v299_v43 = vpop.f32.mrb[3].mxu0  ;;  %365 = vrot.lane.b32.xlu0 %v9288_v39, %s9066_s29  ;;  %v9296_v44 = vadd.f32 %v297_v42, %v119_v36 }
 0x100   :  { %969 = vrot.lane.b32.xlu1 %v9290_v41, %s9067_s10  ;;  %v9302_v47 = vadd.f32 %v299_v43, %v123_v37 }
 0x101   :  { %v8467_v56 = vpop.f32.mrb[0].mxu1 }
 0x102   :  { %v346_v57 = vpop.f32.mrb[1].mxu1  ;;  %v9375_v3 = vadd.f32 %v8467_v56, %v127_v58 }
 0x103   :  { %957 = vrot.lane.b32.xlu0 %v9290_v41, %s9066_s29  ;;  %v8468_v59 = vpop.f32.mrb[2].mxu1  ;;  %v9359_v61 = vadd.f32 %v346_v57, %v127_v58 }
 0x104   :  { %367 = vrot.lane.b32.xlu1 %v9296_v44, %s9066_s29  ;;  %v303_v45 = vpop.f32.mrb[4].mxu0  ;;  %v349_v60 = vpop.f32.mrb[3].mxu1  ;;  %v9361_v62 = vadd.f32 %v8468_v59, %v127_v58 }
 0x105   :  { %v305_v46 = vpop.f32.mrb[5].mxu0  ;;  %v9316_v50 = vadd.f32 %v303_v45, %v119_v36  ;;  %v9363_v63 = vadd.f32 %v349_v60, %v127_v58 }
 0x106   :  { %v307_v48 = vpop.f32.mrb[6].mxu0  ;;  %v9330_v53 = vadd.f32 %v305_v46, %v123_v37 }
 0x107   :  { %981 = vrot.lane.b32.xlu0 %v9290_v41, %s9068_s24  ;;  %v309_v49 = vpop.f32.mrb[7].mxu0  ;;  %v9322_v51 = vadd.f32 %v307_v48, %v119_v36 }
 0x108   :  { %971 = vrot.lane.b32.xlu1 %v9302_v47, %s9067_s10  ;;  %v9332_v54 = vadd.f32 %v309_v49, %v123_v37 }
 0x10b   :  { %959 = vrot.lane.b32.xlu0 %v9302_v47, %s9066_s29 }
 0x10c   :  { %983 = vrot.lane.b32.xlu1 %v9302_v47, %s9068_s24 }
 0x10f   :  { %377 = vrot.lane.b32.xlu0 %v9288_v39, %s9067_s10 }
 0x110   :  { %379 = vrot.lane.b32.xlu1 %v9296_v44, %s9067_s10 }
 0x113   :  { %389 = vrot.lane.b32.xlu0 %v9288_v39, %s9068_s24 }
 0x114   :  { %391 = vrot.lane.b32.xlu1 %v9296_v44, %s9068_s24 }
 0x117   :  { %369 = vrot.lane.b32.xlu0 %v9316_v50, %s9066_s29 }
 0x118   :  { %371 = vrot.lane.b32.xlu1 %v9322_v51, %s9066_s29 }
 0x11b   :  { %961 = vrot.lane.b32.xlu0 %v9330_v53, %s9066_s29 }
 0x11c   :  { %963 = vrot.lane.b32.xlu1 %v9332_v54, %s9066_s29 }
 0x11f   :  { %973 = vrot.lane.b32.xlu0 %v9330_v53, %s9067_s10 }
 0x120   :  { %975 = vrot.lane.b32.xlu1 %v9332_v54, %s9067_s10 }
 0x123   :  { %985 = vrot.lane.b32.xlu0 %v9330_v53, %s9068_s24 }
 0x124   :  { %987 = vrot.lane.b32.xlu1 %v9332_v54, %s9068_s24 }
 0x127   :  { %381 = vrot.lane.b32.xlu0 %v9316_v50, %s9067_s10 }
 0x128   :  { %383 = vrot.lane.b32.xlu1 %v9322_v51, %s9067_s10 }
 0x12b   :  { %393 = vrot.lane.b32.xlu0 %v9316_v50, %s9068_s24 }
 0x12c   :  { %395 = vrot.lane.b32.xlu1 %v9322_v51, %s9068_s24 }
 0x12f   :  { %1551 = vrot.lane.b32.xlu0 %v9363_v63, %s9066_s29 }
 0x130   :  { %1549 = vrot.lane.b32.xlu1 %v9359_v61, %s9066_s29 }
 0x133   :  { %1573 = vrot.lane.b32.xlu0 %v9359_v61, %s9068_s24 }
 0x134   :  { %1561 = vrot.lane.b32.xlu1 %v9359_v61, %s9067_s10 }
 0x138   :  { %1563 = vrot.lane.b32.xlu1 %v9363_v63, %s9067_s10 }
 0x13c   :  { %1575 = vrot.lane.b32.xlu1 %v9363_v63, %s9068_s24 }
 0x140   :  { %1553 = vrot.lane.b32.xlu1 %v9375_v3, %s9066_s29 }
 0x171   :  { %v9379_v4 = vpop.permute.xlu0 %365 }
 0x172   :  { %v970_v5 = vpop.permute.xlu1 %969 }
 0x173   :  { %v993_v12 = vcombine.low %v9290_v41, %v970_v5  ;;  %v994_v13 = vcombine.high %v9290_v41, %v970_v5 }
 0x175   :  { %v958_v9 = vpop.permute.xlu0 %957  ;;  %v1001_v19 = vrot.slane %v993_v12, %v9384_v11  ;;  %v1008_v20 = vrot.slane %v994_v13, %v9384_v11 }
 0x176   :  { %v368_v10 = vpop.permute.xlu1 %367 }
 0x179   :  { %v982_v15 = vpop.permute.xlu0 %981 }
 0x17a   :  { %v1009_v16 = vcombine.low %v958_v9, %v982_v15  ;;  %v1010_v17 = vcombine.high %v958_v9, %v982_v15  ;;  %v972_v18 = vpop.permute.xlu1 %971 }
 0x17b   :  { %v1061_v34 = vcombine.low %v9302_v47, %v972_v18  ;;  %v1062_v36 = vcombine.high %v9302_v47, %v972_v18 }
 0x17c   :  { %v1017_v21 = vrot.slane %v1009_v16, %v9384_v11  ;;  %v1024_v22 = vrot.slane %v1010_v17, %v9384_v11 }
 0x17d   :  { %v960_v24 = vpop.permute.xlu0 %959  ;;  %v1069_v48 = vrot.slane %v1061_v34, %v9384_v11  ;;  %v1076_v49 = vrot.slane %v1062_v36, %v9384_v11 }
 0x17e   :  { %v1025_v25 = vcombine.low %v1001_v19, %v1017_v21  ;;  %v1026_v26 = vcombine.high %v1001_v19, %v1017_v21  ;;  %v1041_v27 = vcombine.low %v1008_v20, %v1024_v22  ;;  %v1042_v28 = vcombine.high %v1008_v20, %v1024_v22  ;;  %v984_v29 = vpop.permute.xlu1 %983 }
 0x17f   :  { %v1077_v30 = vcombine.low %v960_v24, %v984_v29  ;;  %v1078_v37 = vcombine.high %v960_v24, %v984_v29 }
 0x180   :  { %v1033_v40 = vrot.slane %v1025_v25, %v9393_v23  ;;  %v1040_v41 = vrot.slane %v1026_v26, %v9393_v23  ;;  %v9400_v42 = vrot.slane %v1041_v27, %v9393_v23  ;;  %v9403_v43 = vrot.slane %v1042_v28, %v9393_v23 }
 0x181   :  { %v378_v38 = vpop.permute.xlu0 %377  ;;  %v1085_v46 = vrot.slane %v1077_v30, %v9384_v11  ;;  %v1092_v47 = vrot.slane %v1078_v37, %v9384_v11 }
 0x182   :  { %v380_v45 = vpop.permute.xlu1 %379  ;;  %v401_v55 = vcombine.low %v9288_v39, %v378_v38  ;;  %v402_v56 = vcombine.high %v9288_v39, %v378_v38  ;;  %v1265_v58 = vcombine.low %v1033_v40, %v1040_v41  ;;  %v8147_v59 = vcombine.high %v1033_v40, %v1040_v41 }
 0x183   :  { %v1281_v60 = vcombine.low %v9400_v42, %v9403_v43  ;;  %v8148_v0 = vcombine.high %v9400_v42, %v9403_v43  ;;  %v1093_v5 = vcombine.low %v1069_v48, %v1085_v46  ;;  %v1094_v6 = vcombine.high %v1069_v48, %v1085_v46 }
 0x184   :  { %v469_v7 = vcombine.low %v9296_v44, %v380_v45  ;;  %v470_v8 = vcombine.high %v9296_v44, %v380_v45  ;;  %v1109_v14 = vcombine.low %v1076_v49, %v1092_v47  ;;  %v1110_v15 = vcombine.high %v1076_v49, %v1092_v47 }
 0x185   :  { %v390_v57 = vpop.permute.xlu0 %389  ;;  %v409_v16 = vrot.slane %v401_v55, %v9384_v11  ;;  %v416_v17 = vrot.slane %v402_v56, %v9384_v11 }
 0x186   :  { %v392_v2 = vpop.permute.xlu1 %391  ;;  %v417_v9 = vcombine.low %v9379_v4, %v390_v57  ;;  %v418_v39 = vcombine.high %v9379_v4, %v390_v57  ;;  %v1101_v4 = vrot.slane %v1093_v5, %v9393_v23  ;;  %v477_v24 = vrot.slane %v469_v7, %v9384_v11 }
 0x187   :  { %v485_v12 = vcombine.low %v368_v10, %v392_v2  ;;  %v486_v13 = vcombine.high %v368_v10, %v392_v2  ;;  %v1108_v10 = vrot.slane %v1094_v6, %v9393_v23  ;;  %v484_v25 = vrot.slane %v470_v8, %v9384_v11 }
 0x188   :  { %v425_v19 = vrot.slane %v417_v9, %v9384_v11  ;;  %v432_v20 = vrot.slane %v418_v39, %v9384_v11  ;;  %v1117_v46 = vrot.slane %v1109_v14, %v9393_v23  ;;  %v1124_v48 = vrot.slane %v1110_v15, %v9393_v23 }
 0x189   :  { %v9421_v18 = vpop.permute.xlu0 %369  ;;  %v493_v44 = vrot.slane %v485_v12, %v9384_v11  ;;  %v500_v21 = vrot.slane %v486_v13, %v9384_v11  ;;  %v9448_v57 = vrot.slane %v1265_v58, %v9384_v11  ;;  %v9451_v2 = vrot.slane %v8147_v59, %v9384_v11 }
 0x18a   :  { %v9427_v22 = vpop.permute.xlu1 %371  ;;  %v433_v26 = vcombine.low %v409_v16, %v425_v19  ;;  %v434_v27 = vcombine.high %v409_v16, %v425_v19  ;;  %v449_v28 = vcombine.low %v416_v17, %v432_v20  ;;  %v450_v29 = vcombine.high %v416_v17, %v432_v20 }
 0x18b   :  { %v501_v30 = vcombine.low %v477_v24, %v493_v44  ;;  %v502_v34 = vcombine.high %v477_v24, %v493_v44  ;;  %v517_v36 = vcombine.low %v484_v25, %v500_v21  ;;  %v518_v37 = vcombine.high %v484_v25, %v500_v21 }
 0x18c   :  { %v441_v40 = vrot.slane %v433_v26, %v9393_v23  ;;  %v448_v41 = vrot.slane %v434_v27, %v9393_v23  ;;  %v457_v42 = vrot.slane %v449_v28, %v9393_v23  ;;  %v464_v43 = vrot.slane %v450_v29, %v9393_v23 }
 0x18d   :  { %v9433_v38 = vpop.permute.xlu0 %961  ;;  %v509_v49 = vrot.slane %v501_v30, %v9393_v23  ;;  %v516_v47 = vrot.slane %v502_v34, %v9393_v23  ;;  %v525_v55 = vrot.slane %v517_v36, %v9393_v23  ;;  %v532_v56 = vrot.slane %v518_v37, %v9393_v23 }
 0x18e   :  { %v9439_v45 = vpop.permute.xlu1 %963  ;;  %v1333_v5 = vcombine.low %v1101_v4, %v1108_v10  ;;  %v8149_v6 = vcombine.high %v1101_v4, %v1108_v10  ;;  %v9454_v8 = vrot.slane %v1281_v60, %v9384_v11  ;;  %v9457_v9 = vrot.slane %v8148_v0, %v9384_v11 }
 0x18f   :  { %v673_v39 = vcombine.low %v441_v40, %v448_v41  ;;  %v8139_v12 = vcombine.high %v441_v40, %v448_v41  ;;  %v689_v13 = vcombine.low %v457_v42, %v464_v43  ;;  %v8140_v14 = vcombine.high %v457_v42, %v464_v43 }
 0x190   :  { %v1349_v58 = vcombine.low %v1117_v46, %v1124_v48  ;;  %v8150_v16 = vcombine.high %v1117_v46, %v1124_v48  ;;  %v741_v17 = vcombine.low %v509_v49, %v516_v47  ;;  %v8141_v59 = vcombine.high %v509_v49, %v516_v47 }
 0x191   :  { %v974_v7 = vpop.permute.xlu0 %973  ;;  %v757_v19 = vcombine.low %v525_v55, %v532_v56  ;;  %v8142_v20 = vcombine.high %v525_v55, %v532_v56  ;;  %v1297_v44 = vcombine.low %v9448_v57, %v9451_v2  ;;  %v1313_v60 = vcombine.low %v9454_v8, %v9457_v9 }
 0x192   :  { %v9459_v15 = vpop.permute.xlu1 %975  ;;  %v9466_v0 = vrot.slane %v1333_v5, %v9384_v11  ;;  %v9469_v21 = vrot.slane %v8149_v6, %v9384_v11  ;;  %v9472_v10 = vrot.slane %v673_v39, %v9384_v11  ;;  %v9475_v24 = vrot.slane %v8139_v12, %v9384_v11 }
 0x193   :  { %v9478_v25 = vrot.slane %v689_v13, %v9384_v11  ;;  %v9481_v26 = vrot.slane %v8140_v14, %v9384_v11  ;;  %v9484_v27 = vrot.slane %v741_v17, %v9384_v11  ;;  %v9487_v28 = vrot.slane %v8141_v59, %v9384_v11 }
 0x194   :  { %v9490_v29 = vrot.slane %v1349_v58, %v9384_v11  ;;  %v9493_v30 = vrot.slane %v8150_v16, %v9384_v11  ;;  %v9496_v34 = vrot.slane %v757_v19, %v9384_v11  ;;  %v9499_v36 = vrot.slane %v8142_v20, %v9384_v11 }
 0x195   :  { %v986_v4 = vpop.permute.xlu0 %985  ;;  %v1129_v37 = vcombine.low %v9330_v53, %v974_v7  ;;  %v9503_v40 = vrot.slane %v1297_v44, %v9393_v23  ;;  %v9506_v42 = vrot.slane %v1313_v60, %v9393_v23  ;;  %v1365_v43 = vcombine.low %v9466_v0, %v9469_v21 }
 0x196   :  { %v988_v41 = vpop.permute.xlu1 %987  ;;  %v1381_v46 = vcombine.low %v9490_v29, %v9493_v30  ;;  %v1145_v48 = vcombine.low %v9433_v38, %v986_v4  ;;  %v705_v49 = vcombine.low %v9472_v10, %v9475_v24  ;;  %v1130_v55 = vcombine.high %v9330_v53, %v974_v7 }
 0x197   :  { %v1146_v56 = vcombine.high %v9433_v38, %v986_v4  ;;  %v1373_v5 = vrot.slane %v1365_v43, %v9393_v23  ;;  %v1213_v12 = vcombine.low %v9439_v45, %v988_v41  ;;  %v721_v14 = vcombine.low %v9478_v25, %v9481_v26 }
 0x198   :  { %v1389_v6 = vrot.slane %v1381_v46, %v9393_v23  ;;  %v1153_v39 = vrot.slane %v1145_v48, %v9384_v11  ;;  %v1137_v16 = vrot.slane %v1129_v37, %v9384_v11  ;;  %v1197_v53 = vcombine.low %v9332_v54, %v9459_v15 }
 0x199   :  { %v382_v13 = vpop.permute.xlu0 %381  ;;  %v1329_v38 = vcombine.low %v9503_v40, %v9506_v42  ;;  %v1160_v17 = vrot.slane %v1146_v56, %v9384_v11  ;;  %v1214_v59 = vcombine.high %v9439_v45, %v988_v41  ;;  %v773_v19 = vcombine.low %v9484_v27, %v9487_v28 }
 0x19a   :  { %v1397_v7 = vcombine.low %v1373_v5, %v1389_v6  ;;  %v1198_v20 = vcombine.high %v9332_v54, %v9459_v15  ;;  %v537_v44 = vcombine.low %v9316_v50, %v382_v13  ;;  %v538_v60 = vcombine.high %v9316_v50, %v382_v13  ;;  %v384_v4 = vpop.permute.xlu1 %383 }
 0x19b   :  { %v1144_v37 = vrot.slane %v1130_v55, %v9384_v11  ;;  %v1161_v46 = vcombine.low %v1137_v16, %v1153_v39  ;;  %v9542_v48 = vrot.slane %v1213_v12, %v9384_v11  ;;  %v789_v41 = vcombine.low %v9496_v34, %v9499_v36 }
 0x19c   :  { %v1537_v43 = vpack.c.bf16 %v1397_v7, %v1329_v38  ;;  %v9551_v15 = vrot.slane %v1197_v53, %v9384_v11  ;;  %v1162_v55 = vcombine.high %v1137_v16, %v1153_v39  ;;  %v9555_v13 = vrot.slane %v1214_v59, %v9384_v11 }
 0x19d   :  { %v1177_v56 = vcombine.low %v1144_v37, %v1160_v17  ;;  %v9558_v12 = vrot.slane %v1198_v20, %v9384_v11  ;;  %v1178_v38 = vcombine.high %v1144_v37, %v1160_v17  ;;  %v545_v7 = vrot.slane %v537_v44, %v9384_v11 }
 0x19e   :  { %v2142_v50 = vsel %vm2137_vm1, %v1537_v43, 0  ;;  %v552_v1 = vrot.slane %v538_v60, %v9384_v11  ;;  %v9563_v31 = vrot.slane %v1161_v46, %v9393_v23  ;;  %v1229_v53 = vcombine.low %v9551_v15, %v9542_v48  ;;  %v394_v60 = vpop.permute.xlu0 %393  ;;  %v396_v37 = vpop.permute.xlu1 %395 }
 0x19f   :  { %8470 = vmatpush3.bf16.xpose.msra.mxu1 %v2142_v50  ;;  %v1230_v39 = vcombine.high %v9551_v15, %v9542_v48  ;;  %v605_v16 = vcombine.low %v9322_v51, %v384_v4  ;;  %v713_v59 = vrot.slane %v705_v49, %v9393_v23  ;;  %v729_v17 = vrot.slane %v721_v14, %v9393_v23 }
 0x1a0   :  { %8475 = vmatprep.subr.bf16.mxu1 %v11550_v52  ;;  %v781_v20 = vrot.slane %v773_v19, %v9393_v23  ;;  %v797_v44 = vrot.slane %v789_v41, %v9393_v23  ;;  %v9576_v43 = vrot.slane %v1162_v55, %v9393_v23  ;;  %v9579_v46 = vrot.slane %v1177_v56, %v9393_v23 }
 0x1a1   :  { %v1245_v48 = vcombine.low %v9558_v12, %v9555_v13  ;;  %v606_v15 = vcombine.high %v9322_v51, %v384_v4  ;;  %v737_v49 = vcombine.low %v713_v59, %v729_v17  ;;  %v1330_v14 = vcombine.high %v9503_v40, %v9506_v42 }
 0x1a2   :  { %v805_v50 = vcombine.low %v781_v20, %v797_v44  ;;  %v1398_v19 = vcombine.high %v1373_v5, %v1389_v6  ;;  %v553_v41 = vcombine.low %v9421_v18, %v394_v60  ;;  %v554_v54 = vcombine.high %v9421_v18, %v394_v60 }
 0x1a3   :  { %v621_v55 = vcombine.low %v9427_v22, %v396_v37  ;;  %v622_v56 = vcombine.high %v9427_v22, %v396_v37  ;;  %v9591_v45 = vrot.slane %v1178_v38, %v9393_v23  ;;  %v613_v58 = vrot.slane %v605_v16, %v9384_v11 }
 0x1a4   :  { %v945_v51 = vpack.c.bf16 %v805_v50, %v737_v49  ;;  %v1538_v4 = vpack.c.bf16 %v1398_v19, %v1330_v14  ;;  %v561_v47 = vrot.slane %v553_v41, %v9384_v11  ;;  %v568_v40 = vrot.slane %v554_v54, %v9384_v11 }
 0x1a5   :  { %v629_v42 = vrot.slane %v621_v55, %v9384_v11  ;;  %v636_v5 = vrot.slane %v622_v56, %v9384_v11  ;;  %v620_v18 = vrot.slane %v606_v15, %v9384_v11  ;;  %v738_v6 = vcombine.high %v713_v59, %v729_v17 }
 0x1a6   :  { %8472 = vmatmul.mubr.msk.bf16.vlgmr.msra.gmra.mrb[4].mxu1 %vm2137_vm1, %v945_v51  ;;  %v2189_v22 = vsel %vm2137_vm1, %v1538_v4, 0  ;;  %v806_v38 = vcombine.high %v781_v20, %v797_v44  ;;  %v569_v16 = vcombine.low %v545_v7, %v561_v47  ;;  %v570_v60 = vcombine.high %v545_v7, %v561_v47 }
 0x1a7   :  { %8476 = vmatpush3.bf16.xpose.msra.mxu1 %v2189_v22  ;;  %v585_v37 = vcombine.low %v552_v1, %v568_v40  ;;  %v586_v49 = vcombine.high %v552_v1, %v568_v40  ;;  %v637_v50 = vcombine.low %v613_v58, %v629_v42  ;;  %v638_v14 = vcombine.high %v613_v58, %v629_v42 }
 0x1a8   :  { %v653_v54 = vcombine.low %v620_v18, %v636_v5  ;;  %v654_v19 = vcombine.high %v620_v18, %v636_v5  ;;  %8477 = vmatprep.mubr.msk.bf16.mxu1 %vm9070_vm0, %v11550_v52  ;;  %v577_v15 = vrot.slane %v569_v16, %v9393_v23  ;;  %v584_v41 = vrot.slane %v570_v60, %v9393_v23 }
 0x1a9   :  { %v593_v55 = vrot.slane %v585_v37, %v9393_v23  ;;  %v600_v59 = vrot.slane %v586_v49, %v9393_v23  ;;  %8481 = vmatprep.subr.bf16.mxu1 %v11550_v52  ;;  %v1237_v47 = vrot.slane %v1229_v53, %v9393_v23  ;;  %v1244_v1 = vrot.slane %v1230_v39, %v9393_v23 }
 0x1aa   :  { %v1246_v58 = vcombine.high %v9558_v12, %v9555_v13  ;;  %v946_v7 = vpack.c.bf16 %v806_v38, %v738_v6  ;;  %v645_v17 = vrot.slane %v637_v50, %v9393_v23  ;;  %v652_v20 = vrot.slane %v638_v14, %v9393_v23 }
 0x1ab   :  { %v661_v44 = vrot.slane %v653_v54, %v9393_v23  ;;  %v668_v56 = vrot.slane %v654_v19, %v9393_v23  ;;  %v809_v51 = vcombine.low %v577_v15, %v584_v41  ;;  %v8143_v4 = vcombine.high %v577_v15, %v584_v41 }
 0x1ac   :  { %v825_v40 = vcombine.low %v593_v55, %v600_v59  ;;  %v8144_v42 = vcombine.high %v593_v55, %v600_v59  ;;  %v1401_v53 = vcombine.low %v9563_v31, %v9576_v43  ;;  %v8151_v39 = vcombine.high %v9563_v31, %v9576_v43 }
 0x1ad   :  { %v1298_v13 = vcombine.high %v9448_v57, %v9451_v2  ;;  %v1314_v12 = vcombine.high %v9454_v8, %v9457_v9  ;;  %v1417_v5 = vcombine.low %v9579_v46, %v9591_v45  ;;  %v8152_v18 = vcombine.high %v9579_v46, %v9591_v45 }
 0x1ae   :  { %v1253_v22 = vrot.slane %v1245_v48, %v9393_v23  ;;  %v1260_v6 = vrot.slane %v1246_v58, %v9393_v23  ;;  %8478 = vmatmul.mubr.msk.bf16.vlgmr.msra.gmra.mrb[8].mxu1 %vm2137_vm1, %v946_v7  ;;  %v877_v38 = vcombine.low %v645_v17, %v652_v20  ;;  %v8145_v31 = vcombine.high %v645_v17, %v652_v20 }
 0x1af   :  { %v893_v43 = vcombine.low %v661_v44, %v668_v56  ;;  %v8146_v16 = vcombine.high %v661_v44, %v668_v56  ;;  %8483 = vmatprep.mubr.msk.bf16.mxu1 %vm9070_vm0, %v11550_v52  ;;  %v9634_v57 = vrot.slane %v809_v51, %v9384_v11  ;;  %v9637_v2 = vrot.slane %v8143_v4, %v9384_v11 }
 0x1b0   :  { %v9640_v8 = vrot.slane %v825_v40, %v9384_v11  ;;  %v9643_v9 = vrot.slane %v8144_v42, %v9384_v11  ;;  %v1469_v45 = vcombine.low %v1237_v47, %v1244_v1  ;;  %v8153_v46 = vcombine.high %v1237_v47, %v1244_v1 }
 0x1b1   :  { %v1312_v48 = vrot.slane %v1298_v13, %v9393_v23  ;;  %v1328_v60 = vrot.slane %v1314_v12, %v9393_v23  ;;  %v1485_v37 = vcombine.low %v1253_v22, %v1260_v6  ;;  %v8154_v49 = vcombine.high %v1253_v22, %v1260_v6 }
 0x1b2   :  { %v1366_v50 = vcombine.high %v9466_v0, %v9469_v21  ;;  %v1382_v14 = vcombine.high %v9490_v29, %v9493_v30  ;;  %v9652_v54 = vrot.slane %v877_v38, %v9384_v11  ;;  %v9655_v19 = vrot.slane %v8145_v31, %v9384_v11 }
 0x1b3   :  { %v9658_v15 = vrot.slane %v893_v43, %v9384_v11  ;;  %v9661_v41 = vrot.slane %v8146_v16, %v9384_v11  ;;  %v841_v55 = vcombine.low %v9634_v57, %v9637_v2  ;;  %v857_v0 = vcombine.low %v9640_v8, %v9643_v9 }
 0x1b4   :  { %v1380_v21 = vrot.slane %v1366_v50, %v9393_v23  ;;  %v1396_v29 = vrot.slane %v1382_v14, %v9393_v23  ;;  %v1331_v30 = vcombine.low %v1312_v48, %v1328_v60  ;;  %v1408_v59 = vrot.slane %v1401_v53, %v9384_v11 }
 0x1b5   :  { %v1416_v47 = vrot.slane %v8151_v39, %v9384_v11  ;;  %v1424_v1 = vrot.slane %v1417_v5, %v9384_v11  ;;  %v11567_v7 = vcombine.high %v9472_v10, %v9475_v24  ;;  %v11568_v20 = vcombine.high %v9478_v25, %v9481_v26 }
 0x1b6   :  { %v1399_v58 = vcombine.low %v1380_v21, %v1396_v29  ;;  %v1432_v56 = vrot.slane %v8152_v18, %v9384_v11  ;;  %v1476_v4 = vrot.slane %v1469_v45, %v9384_v11  ;;  %v1484_v40 = vrot.slane %v8153_v46, %v9384_v11 }
 0x1b7   :  { %v9676_v17 = vrot.slane %v11567_v7, %v9393_v23  ;;  %v9682_v44 = vrot.slane %v11568_v20, %v9393_v23  ;;  %v1433_v51 = vcombine.low %v1408_v59, %v1416_v47  ;;  %v1492_v42 = vrot.slane %v1485_v37, %v9384_v11 }
 0x1b8   :  { %v1539_v53 = vpack.c.bf16 %v1399_v58, %v1331_v30  ;;  %v11569_v10 = vcombine.high %v9484_v27, %v9487_v28  ;;  %v11570_v25 = vcombine.high %v9496_v34, %v9499_v36  ;;  %v1449_v39 = vcombine.low %v1424_v1, %v1432_v56 }
 0x1b9   :  { %v909_v13 = vcombine.low %v9652_v54, %v9655_v19  ;;  %v1441_v12 = vrot.slane %v1433_v51, %v9393_v23  ;;  %v1500_v5 = vrot.slane %v8154_v49, %v9384_v11  ;;  %v1501_v18 = vcombine.low %v1476_v4, %v1484_v40 }
 0x1ba   :  { %v788_v24 = vrot.slane %v11569_v10, %v9393_v23  ;;  %v804_v26 = vrot.slane %v11570_v25, %v9393_v23  ;;  %v925_v22 = vcombine.low %v9658_v15, %v9661_v41  ;;  %v2236_v27 = vsel %vm2137_vm1, %v1539_v53, 0 }
 0x1bb   :  { %v1400_v28 = vcombine.high %v1380_v21, %v1396_v29  ;;  %v1457_v6 = vrot.slane %v1449_v39, %v9393_v23  ;;  %v9705_v34 = vrot.slane %v841_v55, %v9393_v23  ;;  %v9708_v36 = vrot.slane %v857_v0, %v9393_v23  ;;  %8482 = vmatpush3.bf16.xpose.msra.mxu1 %v2236_v27 }
 0x1bc   :  { %v1509_v38 = vrot.slane %v1501_v18, %v9393_v23  ;;  %v1517_v31 = vcombine.low %v1492_v42, %v1500_v5  ;;  %v739_v43 = vcombine.low %v9676_v17, %v9682_v44  ;;  %v807_v16 = vcombine.low %v788_v24, %v804_v26  ;;  %8487 = vmatprep.subr.bf16.mxu1 %v11550_v52 }
 0x1bd   :  { %v1332_v45 = vcombine.high %v1312_v48, %v1328_v60  ;;  %v1434_v46 = vcombine.high %v1408_v59, %v1416_v47  ;;  %v1466_v37 = vcombine.high %v1441_v12, %v1457_v6  ;;  %v1450_v50 = vcombine.high %v1424_v1, %v1432_v56 }
 0x1be   :  { %v1525_v49 = vrot.slane %v1517_v31, %v9393_v23  ;;  %v1502_v14 = vcombine.high %v1476_v4, %v1484_v40  ;;  %v917_v55 = vrot.slane %v909_v13, %v9393_v23  ;;  %v933_v0 = vrot.slane %v925_v22, %v9393_v23 }
 0x1bf   :  { %v1540_v21 = vpack.c.bf16 %v1400_v28, %v1332_v45  ;;  %v1518_v29 = vcombine.high %v1492_v42, %v1500_v5  ;;  %v1448_v58 = vrot.slane %v1434_v46, %v9393_v23  ;;  %v1464_v7 = vrot.slane %v1450_v50, %v9393_v23  ;;  %v1552_v45 = vpop.permute.xlu0 %1551 }
 0x1c0   :  { %v1534_v30 = vcombine.high %v1509_v38, %v1525_v49  ;;  %v1516_v20 = vrot.slane %v1502_v14, %v9393_v23  ;;  %v947_v48 = vpack.c.bf16 %v807_v16, %v739_v43  ;;  %v874_v1 = vcombine.high %v9705_v34, %v9708_v36  ;;  %v1550_v16 = vpop.permute.xlu1 %1549 }
 0x1c1   :  { %v1532_v60 = vrot.slane %v1518_v29, %v9393_v23  ;;  %v2283_v47 = vsel %vm2137_vm1, %v1540_v21, 0  ;;  %v1465_v56 = vcombine.low %v1441_v12, %v1457_v6  ;;  %v1533_v51 = vcombine.low %v1509_v38, %v1525_v49 }
 0x1c2   :  { %v1542_v59 = vpack.c.bf16 %v1534_v30, %v1466_v37  ;;  %8484 = vmatmul.mubr.msk.bf16.vlgmr.msra.gmra.mrb[12].mxu1 %vm2137_vm1, %v947_v48  ;;  %v942_v40 = vcombine.high %v917_v55, %v933_v0  ;;  %v1468_v42 = vcombine.high %v1448_v58, %v1464_v7  ;;  %v740_v10 = vcombine.high %v9676_v17, %v9682_v44 }
 0x1c3   :  { %8488 = vmatpush3.bf16.xpose.msra.mxu1 %v2283_v47  ;;  %8489 = vmatprep.mubr.msk.bf16.mxu1 %vm9070_vm0, %v11550_v52  ;;  %v1536_v53 = vcombine.high %v1516_v20, %v1532_v60  ;;  %v808_v25 = vcombine.high %v788_v24, %v804_v26  ;;  %v842_v39 = vcombine.high %v9634_v57, %v9637_v2  ;;  %v1574_v37 = vpop.permute.xlu0 %1573 }
 0x1c4   :  { %v2377_v4 = vsel %vm2137_vm1, %v1542_v59, 0  ;;  %8493 = vmatprep.subr.bf16.mxu1 %v11550_v52  ;;  %v858_v13 = vcombine.high %v9640_v8, %v9643_v9  ;;  %v910_v12 = vcombine.high %v9652_v54, %v9655_v19  ;;  %v926_v5 = vcombine.high %v9658_v15, %v9661_v41  ;;  %v1562_v46 = vpop.permute.xlu1 %1561 }
 0x1c5   :  { %8500 = vmatpush3.bf16.xpose.msra.mxu0 %v2377_v4  ;;  %v1541_v18 = vpack.c.bf16 %v1533_v51, %v1465_v56  ;;  %v950_v22 = vpack.c.bf16 %v942_v40, %v874_v1  ;;  %v1544_v17 = vpack.c.bf16 %v1536_v53, %v1468_v42  ;;  %v948_v44 = vpack.c.bf16 %v808_v25, %v740_v10 }
 0x1c6   :  { %8511 = vmatprep.subr.bf16.mxu0 %v11550_v52  ;;  %v856_v24 = vrot.slane %v842_v39, %v9393_v23  ;;  %v872_v26 = vrot.slane %v858_v13, %v9393_v23  ;;  %v924_v57 = vrot.slane %v910_v12, %v9393_v23  ;;  %v940_v2 = vrot.slane %v926_v5, %v9393_v23 }
 0x1c7   :  { %v2330_v8 = vsel %vm2137_vm1, %v1541_v18, 0  ;;  %v1467_v9 = vcombine.low %v1448_v58, %v1464_v7  ;;  %v1535_v54 = vcombine.low %v1516_v20, %v1532_v60  ;;  %v2471_v19 = vsel %vm2137_vm1, %v1544_v17, 0 }
 0x1c8   :  { %v873_v15 = vcombine.low %v9705_v34, %v9708_v36  ;;  %v941_v41 = vcombine.low %v917_v55, %v933_v0  ;;  %v876_v27 = vcombine.high %v856_v24, %v872_v26  ;;  %v944_v28 = vcombine.high %v924_v57, %v940_v2  ;;  %v1564_v7 = vpop.permute.xlu1 %1563 }
 0x1c9   :  { %v1543_v6 = vpack.c.bf16 %v1535_v54, %v1467_v9  ;;  %v875_v34 = vcombine.low %v856_v24, %v872_v26  ;;  %v943_v36 = vcombine.low %v924_v57, %v940_v2  ;;  %v1585_v49 = vcombine.low %v9359_v61, %v1562_v46 }
 0x1ca   :  { %8490 = vmatmul.mubr.msk.bf16.vlgmr.msra.gmra.mrb[16].mxu1 %vm2137_vm1, %v948_v44  ;;  %v949_v38 = vpack.c.bf16 %v941_v41, %v873_v15  ;;  %v952_v31 = vpack.c.bf16 %v944_v28, %v876_v27  ;;  %v1586_v50 = vcombine.high %v9359_v61, %v1562_v46  ;;  %v1601_v14 = vcombine.low %v1550_v16, %v1574_v37 }
 0x1cb   :  { %8494 = vmatpush3.bf16.xpose.msra.mxu1 %v2330_v8  ;;  %8495 = vmatprep.mubr.msk.bf16.mxu1 %vm9070_vm0, %v11550_v52  ;;  %v2424_v43 = vsel %vm2137_vm1, %v1543_v6, 0  ;;  %v1602_v55 = vcombine.high %v1550_v16, %v1574_v37  ;;  %v951_v0 = vpack.c.bf16 %v943_v36, %v875_v34  ;;  %v1593_v21 = vrot.slane %v1585_v49, %v9384_v11 }
 0x1cc   :  { %8502 = vmatmul.mubr.msk.bf16.vlgmr.msra.gmra.mrb[8].mxu0 %vm2137_vm1, %v950_v22  ;;  %8505 = vmatprep.subr.bf16.mxu1 %v11550_v52  ;;  %v1600_v29 = vrot.slane %v1586_v50, %v9384_v11  ;;  %v1609_v30 = vrot.slane %v1601_v14, %v9384_v11  ;;  %v1653_v20 = vcombine.low %v9363_v63, %v1564_v7  ;;  %v1576_v40 = vpop.permute.xlu1 %1575 }
 0x1cd   :  { %8512 = vmatpush3.bf16.xpose.msra.mxu0 %v2471_v19  ;;  %8513 = vmatprep.mubr.msk.bf16.mxu0 %vm9070_vm0, %v11550_v52  ;;  %v1616_v58 = vrot.slane %v1602_v55, %v9384_v11  ;;  %v1654_v48 = vcombine.high %v9363_v63, %v1564_v7  ;;  %v1669_v53 = vcombine.low %v1552_v45, %v1576_v40 }
 0x1ce   :  { %8523 = vmatprep.subr.bf16.mxu0 %v11550_v52  ;;  %v1617_v60 = vcombine.low %v1593_v21, %v1609_v30  ;;  %v1618_v61 = vcombine.high %v1593_v21, %v1609_v30  ;;  %v1661_v51 = vrot.slane %v1653_v20, %v9384_v11  ;;  %v1670_v10 = vcombine.high %v1552_v45, %v1576_v40 }
 0x1cf   :  { %v1633_v59 = vcombine.low %v1600_v29, %v1616_v58  ;;  %v1634_v47 = vcombine.high %v1600_v29, %v1616_v58  ;;  %v1668_v4 = vrot.slane %v1654_v48, %v9384_v11  ;;  %v1677_v5 = vrot.slane %v1669_v53, %v9384_v11 }
 0x1d0   :  { %v1625_v1 = vrot.slane %v1617_v60, %v9393_v23  ;;  %v1632_v56 = vrot.slane %v1618_v61, %v9393_v23  ;;  %v1684_v18 = vrot.slane %v1670_v10, %v9384_v11  ;;  %v11571_v53 = vlaneseq }
 0x1d1   :  { %v1641_v42 = vrot.slane %v1633_v59, %v9393_v23  ;;  %v1648_v63 = vrot.slane %v1634_v47, %v9393_v23  ;;  %v1685_v26 = vcombine.low %v1661_v51, %v1677_v5  ;;  %v1686_v57 = vcombine.high %v1661_v51, %v1677_v5 }
 0x1d2   :  { %8496 = vmatmul.mubr.msk.bf16.vlgmr.msra.gmra.mrb[20].mxu1 %vm2137_vm1, %v949_v38  ;;  %v1857_v25 = vcombine.low %v1625_v1, %v1632_v56  ;;  %v8155_v39 = vcombine.high %v1625_v1, %v1632_v56  ;;  %v1701_v2 = vcombine.low %v1668_v4, %v1684_v18  ;;  %v1702_v8 = vcombine.high %v1668_v4, %v1684_v18 }
 0x1d3   :  { %8506 = vmatpush3.bf16.xpose.msra.mxu1 %v2424_v43  ;;  %8507 = vmatprep.mubr.msk.bf16.mxu1 %vm9070_vm0, %v11550_v52  ;;  %v1873_v13 = vcombine.low %v1641_v42, %v1648_v63  ;;  %v8156_v12 = vcombine.high %v1641_v42, %v1648_v63  ;;  %v1693_v19 = vrot.slane %v1685_v26, %v9393_v23  ;;  %v2534_v10 = vand.u32 127, %v11571_v53 }
 0x1d4   :  { %8514 = vmatmul.mubr.msk.bf16.vlgmr.msra.gmra.mrb[12].mxu0 %vm2137_vm1, %v952_v31  ;;  %8517 = vmatprep.subr.bf16.mxu1 %v11550_v52  ;;  %v1864_v22 = vrot.slane %v1857_v25, %v9384_v11  ;;  %v1872_v17 = vrot.slane %v8155_v39, %v9384_v11  ;;  %v1700_v15 = vrot.slane %v1686_v57, %v9393_v23  ;;  %v2532_v25 = vadd.s32 8, %v9275_v32 }
 0x1d5   :  { %8525 = vmatprep.mubr.msk.bf16.mxu0 %vm9070_vm0, %v11550_v52  ;;  %v1880_v44 = vrot.slane %v1873_v13, %v9384_v11  ;;  %v1888_v24 = vrot.slane %v8156_v12, %v9384_v11  ;;  %v1709_v41 = vrot.slane %v1701_v2, %v9393_v23  ;;  %v1716_v27 = vrot.slane %v1702_v8, %v9393_v23 }
 0x1d6   :  { %v1889_v9 = vcombine.low %v1864_v22, %v1872_v17  ;;  %v1925_v28 = vcombine.low %v1693_v19, %v1700_v15  ;;  %v8157_v6 = vcombine.high %v1693_v19, %v1700_v15  ;;  %v1890_v7 = vcombine.high %v1864_v22, %v1872_v17 }
 0x1d7   :  { %v1905_v54 = vcombine.low %v1880_v44, %v1888_v24  ;;  %v1941_v38 = vcombine.low %v1709_v41, %v1716_v27  ;;  %v8158_v31 = vcombine.high %v1709_v41, %v1716_v27  ;;  %v1906_v20 = vcombine.high %v1880_v44, %v1888_v24 }
 0x1d8   :  { %v1897_v43 = vrot.slane %v1889_v9, %v9393_v23  ;;  %v1932_v45 = vrot.slane %v1925_v28, %v9384_v11  ;;  %v1940_v34 = vrot.slane %v8157_v6, %v9384_v11  ;;  %v1904_v61 = vrot.slane %v1890_v7, %v9393_v23 }
 0x1d9   :  { %v1913_v16 = vrot.slane %v1905_v54, %v9393_v23  ;;  %v1948_v36 = vrot.slane %v1941_v38, %v9384_v11  ;;  %v1956_v46 = vrot.slane %v8158_v31, %v9384_v11  ;;  %v1920_v59 = vrot.slane %v1906_v20, %v9393_v23 }
 0x1da   :  { %8508 = vmatmul.mubr.msk.bf16.vlgmr.msra.gmra.mrb[24].mxu1 %vm2137_vm1, %v951_v0  ;;  %v1957_v37 = vcombine.low %v1932_v45, %v1940_v34  ;;  %v1958_v48 = vcombine.high %v1932_v45, %v1940_v34  ;;  %vm9812_vm2 = vcmp.le.s32.totalorder %v2534_v10, %v9275_v32  ;;  %vm9816_vm4 = vcmp.le.s32.totalorder %v2534_v10, %v2532_v25 }
 0x1db   :  { %8519 = vmatprep.mubr.msk.bf16.mxu1 %vm9070_vm0, %v11550_v52  ;;  %v1973_v49 = vcombine.low %v1948_v36, %v1956_v46  ;;  %v1921_v50 = vcombine.low %v1897_v43, %v1913_v16  ;;  %v1922_v0 = vcombine.high %v1897_v43, %v1913_v16  ;;  %v1974_v60 = vcombine.high %v1948_v36, %v1956_v46 }
 0x1dc   :  { %v1965_v14 = vrot.slane %v1957_v37, %v9393_v23  ;;  %v1972_v47 = vrot.slane %v1958_v48, %v9393_v23  ;;  %v1923_v56 = vcombine.low %v1904_v61, %v1920_v59  ;;  %v1924_v4 = vcombine.high %v1904_v61, %v1920_v59 }
 0x1dd   :  { %v1981_v55 = vrot.slane %v1973_v49, %v9393_v23  ;;  %v1988_v1 = vrot.slane %v1974_v60, %v9393_v23 }
 0x1df   :  { %v1989_v21 = vcombine.low %v1965_v14, %v1981_v55  ;;  %v1990_v29 = vcombine.high %v1965_v14, %v1981_v55  ;;  %v1991_v51 = vcombine.low %v1972_v47, %v1988_v1  ;;  %v1992_v40 = vcombine.high %v1972_v47, %v1988_v1 }
 0x1e1   :  { %v2129_v30 = vpack.c.bf16 %v1989_v21, %v1921_v50  ;;  %v2130_v58 = vpack.c.bf16 %v1990_v29, %v1922_v0  ;;  %v9805_v42 = vpack.c.bf16 %v1991_v51, %v1923_v56  ;;  %v9807_v63 = vpack.c.bf16 %v1992_v40, %v1924_v4 }
 0x1e3   :  { %8518 = vmatpush3.bf16.msra.mxu1 %v2129_v30  ;;  %8524 = vmatpush3.bf16.msra.mxu0 %v2130_v58 }
 0x1e4   :  { %8529 = vmatprep.subr.bf16.mxu1 %v11550_v52  ;;  %8535 = vmatprep.subr.bf16.mxu0 %v11550_v52 }
 0x279   :  { %v2178_v39 = vpop.f32.mrb[4].mxu1 }
 0x27a   :  { %v2514_v12 = vmul.f32 0.17677669, %v2178_v39  ;;  %v8473_v5 = vpop.f32.mrb[5].mxu1 }
 0x27b   :  { %v2181_v18 = vpop.f32.mrb[6].mxu1 }
 0x27c   :  { %v2515_v17 = vmul.f32 0.17677669, %v2181_v18  ;;  %v8474_v44 = vpop.f32.mrb[7].mxu1  ;;  %v9822_v24 = vsel %vm9812_vm2, %v2514_v12, -1e+30 }
 0x27d   :  { %v2558_v32 = vsel %vm2557_vm3, %v9822_v24, -inf }
 0x27e   :  { %2559 = vmax.xlane.f32.xlu0 %v2558_v32  ;;  %v9828_v26 = vsel %vm9816_vm4, %v2515_v17, -1e+30 }
 0x27f   :  { %v2561_v57 = vsel %vm2557_vm3, %v9828_v26, -inf }
 0x280   :  { %2562 = vmax.xlane.f32.xlu1 %v2561_v57 }
 0x281   :  { %v2225_v2 = vpop.f32.mrb[8].mxu1 }
 0x282   :  { %v2516_v8 = vmul.f32 0.17677669, %v2225_v2  ;;  %v8479_v9 = vpop.f32.mrb[9].mxu1 }
 0x283   :  { %v2228_v54 = vpop.f32.mrb[10].mxu1 }
 0x284   :  { %v2517_v19 = vmul.f32 0.17677669, %v2228_v54  ;;  %v8480_v15 = vpop.f32.mrb[11].mxu1  ;;  %v9834_v41 = vsel %vm9812_vm2, %v2516_v8, -1e+30 }
 0x285   :  { %v2564_v27 = vsel %vm2557_vm3, %v9834_v41, -inf }
 0x286   :  { %2565 = vmax.xlane.f32.xlu0 %v2564_v27  ;;  %v9840_v28 = vsel %vm9816_vm4, %v2517_v19, -1e+30 }
 0x287   :  { %v2567_v6 = vsel %vm2557_vm3, %v9840_v28, -inf }
 0x28a   :  { %2568 = vmax.xlane.f32.xlu0 %v2567_v6 }
 0x295   :  { %v2272_v38 = vpop.f32.mrb[12].mxu1 }
 0x296   :  { %v8485_v31 = vpop.f32.mrb[13].mxu1  ;;  %v2518_v46 = vmul.f32 0.17677669, %v2272_v38 }
 0x297   :  { %v2275_v43 = vpop.f32.mrb[14].mxu1 }
 0x298   :  { %v8486_v16 = vpop.f32.mrb[15].mxu1  ;;  %v2519_v14 = vmul.f32 0.17677669, %v2275_v43  ;;  %v9856_v20 = vsel %vm9812_vm2, %v2518_v46, -1e+30 }
 0x299   :  { %v2570_v47 = vsel %vm2557_vm3, %v9856_v20, -inf }
 0x29a   :  { %v9862_v61 = vsel %vm9816_vm4, %v2519_v14, -1e+30 }
 0x29b   :  { %v2573_v25 = vsel %vm2557_vm3, %v9862_v61, -inf }
 0x29d   :  { %v2319_v45 = vpop.f32.mrb[16].mxu1 }
 0x29e   :  { %v8491_v36 = vpop.f32.mrb[17].mxu1  ;;  %v2520_v56 = vmul.f32 0.17677669, %v2319_v45 }
 0x29f   :  { %v2413_v34 = vpop.f32.mrb[8].mxu0  ;;  %v2322_v50 = vpop.f32.mrb[18].mxu1 }
 0x2a0   :  { %v2524_v37 = vmul.f32 0.17677669, %v2413_v34  ;;  %v8503_v49 = vpop.f32.mrb[9].mxu0  ;;  %v8492_v0 = vpop.f32.mrb[19].mxu1  ;;  %v2521_v53 = vmul.f32 0.17677669, %v2322_v50 }
 0x2a1   :  { %v2416_v55 = vpop.f32.mrb[10].mxu0  ;;  %v9880_v57 = vsel %vm9812_vm2, %v2520_v56, -1e+30  ;;  %v9924_v49 = vpop.permute.xlu1 %1553 }
 0x2a2   :  { %v2525_v21 = vmul.f32 0.17677669, %v2416_v55  ;;  %v8504_v29 = vpop.f32.mrb[11].mxu0  ;;  %v9846_v30 = vsel %vm9812_vm2, %v2524_v37, -1e+30  ;;  %v2576_v15 = vsel %vm2557_vm3, %v9880_v57, -inf }
 0x2a3   :  { %v2588_v58 = vsel %vm2557_vm3, %v9846_v30, -inf  ;;  %v9886_v54 = vsel %vm9816_vm4, %v2521_v53, -1e+30 }
 0x2a4   :  { %2589 = vmax.xlane.f32.xlu1 %v2588_v58  ;;  %v9852_v7 = vsel %vm9816_vm4, %v2525_v21, -1e+30  ;;  %v2579_v43 = vsel %vm2557_vm3, %v9886_v54, -inf }
 0x2a5   :  { %v2591_v48 = vsel %vm2557_vm3, %v9852_v7, -inf  ;;  %v2366_v60 = vpop.f32.mrb[20].mxu1 }
 0x2a6   :  { %2592 = vmax.xlane.f32.xlu0 %v2591_v48  ;;  %v8497_v1 = vpop.f32.mrb[21].mxu1  ;;  %v2522_v44 = vmul.f32 0.17677669, %v2366_v60 }
 0x2a7   :  { %v2507_v59 = vpop.f32.mrb[12].mxu0  ;;  %v2369_v40 = vpop.f32.mrb[22].mxu1 }
 0x2a8   :  { %v2528_v51 = vmul.f32 0.17677669, %v2507_v59  ;;  %2571 = vmax.xlane.f32.xlu1 %v2570_v47  ;;  %v8515_v4 = vpop.f32.mrb[13].mxu0  ;;  %v8498_v39 = vpop.f32.mrb[23].mxu1  ;;  %v2523_v8 = vmul.f32 0.17677669, %v2369_v40 }
 0x2a9   :  { %v2510_v10 = vpop.f32.mrb[14].mxu0  ;;  %v9892_v38 = vsel %vm9812_vm2, %v2522_v44, -1e+30 }
 0x2aa   :  { %v2529_v12 = vmul.f32 0.17677669, %v2510_v10  ;;  %2574 = vmax.xlane.f32.xlu0 %v2573_v25  ;;  %v8516_v5 = vpop.f32.mrb[15].mxu0  ;;  %v9870_v18 = vsel %vm9812_vm2, %v2528_v51, -1e+30  ;;  %v2582_v36 = vsel %vm2557_vm3, %v9892_v38, -inf }
 0x2ab   :  { %v2600_v17 = vsel %vm2557_vm3, %v9870_v18, -inf  ;;  %v9902_v34 = vsel %vm9816_vm4, %v2523_v8, -1e+30 }
 0x2ac   :  { %2601 = vmax.xlane.f32.xlu1 %v2600_v17  ;;  %v9876_v32 = vsel %vm9816_vm4, %v2529_v12, -1e+30  ;;  %v2585_v37 = vsel %vm2557_vm3, %v9902_v34, -inf }
 0x2ad   :  { %v2603_v2 = vsel %vm2557_vm3, %v9876_v32, -inf  ;;  %v2460_v9 = vpop.f32.mrb[24].mxu1 }
 0x2ae   :  { %2604 = vmax.xlane.f32.xlu0 %v2603_v2  ;;  %v2526_v19 = vmul.f32 0.17677669, %v2460_v9  ;;  %v8509_v27 = vpop.f32.mrb[25].mxu1 }
 0x2af   :  { %v2463_v6 = vpop.f32.mrb[26].mxu1 }
 0x2b0   :  { %2577 = vmax.xlane.f32.xlu1 %v2576_v15  ;;  %v2527_v31 = vmul.f32 0.17677669, %v2463_v6  ;;  %v8510_v16 = vpop.f32.mrb[27].mxu1  ;;  %v9898_v45 = vsel %vm9812_vm2, %v2526_v19, -1e+30 }
 0x2b1   :  { %v2594_v13 = vsel %vm2557_vm3, %v9898_v45, -inf }
 0x2b2   :  { %2580 = vmax.xlane.f32.xlu0 %v2579_v43  ;;  %v9908_v46 = vsel %vm9816_vm4, %v2527_v31, -1e+30 }
 0x2b3   :  { %v2597_v22 = vsel %vm2557_vm3, %v9908_v46, -inf }
 0x2b4   :  { %2583 = vmax.xlane.f32.xlu1 %v2582_v36 }
 0x2b6   :  { %2586 = vmax.xlane.f32.xlu0 %v2585_v37 }
 0x2c5   :  { %1565 = vrot.lane.b32.xlu1 %v9375_v3, %s9067_s10 }
 0x2cc   :  { %1555 = vrot.lane.b32.xlu0 %v9361_v62, %s9066_s29 }
 0x2e9   :  { %2595 = vmax.xlane.f32.xlu1 %v2594_v13 }
 0x2eb   :  { %2598 = vmax.xlane.f32.xlu0 %v2597_v22 }
 0x2fa   :  { %1567 = vrot.lane.b32.xlu1 %v9361_v62, %s9067_s10 }
 0x301   :  { %1577 = vrot.lane.b32.xlu0 %v9375_v3, %s9068_s24 }
 0x30b   :  { %v2560_v50 = vpop.xlane.xlu0 %2559 }
 0x30c   :  { %v2606_v14 = vsub.f32 %v9822_v24, %v2560_v50 }
 0x30d   :  { %v2563_v55 = vpop.xlane.xlu1 %2562 }
 0x30e   :  { %v2622_v0 = vmul.f32 1.442695, %v2606_v14  ;;  %v2607_v21 = vsub.f32 %v9828_v26, %v2563_v55 }
 0x310   :  { %8909 = vpow2.f32 %v2622_v0  ;;  %v2624_v29 = vmul.f32 1.442695, %v2607_v21 }
 0x312   :  { %8911 = vpow2.f32 %v2624_v29 }
 0x313   :  { %v2566_v58 = vpop.xlane.xlu0 %2565 }
 0x314   :  { %v2608_v48 = vsub.f32 %v9834_v41, %v2566_v58 }
 0x316   :  { %v2626_v60 = vmul.f32 1.442695, %v2608_v48 }
 0x317   :  { %v2569_v59 = vpop.xlane.xlu0 %2568 }
 0x318   :  { %8913 = vpow2.f32 %v2626_v60  ;;  %v2609_v47 = vsub.f32 %v9840_v28, %v2569_v59 }
 0x31a   :  { %v9930_v1 = vpop.eup %8909  ;;  %v2628_v56 = vmul.f32 1.442695, %v2609_v47 }
 0x31b   :  { %v2654_v24 = vsel %vm2557_vm3, %v9930_v1, 0.0 }
 0x31c   :  { %v9934_v51 = vpop.eup %8911  ;;  %8915 = vpow2.f32 %v2628_v56 }
 0x31d   :  { %v2657_v26 = vsel %vm2557_vm3, %v9934_v51, 0.0 }
 0x31e   :  { %2655 = vadd.xlane.f32.xlu1 %v2654_v24 }
 0x320   :  { %2658 = vadd.xlane.f32.xlu0 %v2657_v26 }
 0x322   :  { %v9938_v41 = vpop.eup %8913 }
 0x323   :  { %v2660_v4 = vsel %vm2557_vm3, %v9938_v41, 0.0 }
 0x324   :  { %2661 = vadd.xlane.f32.xlu1 %v2660_v4 }
 0x326   :  { %v9942_v28 = vpop.eup %8915 }
 0x327   :  { %v2663_v40 = vsel %vm2557_vm3, %v9942_v28, 0.0 }
 0x328   :  { %2664 = vadd.xlane.f32.xlu0 %v2663_v40 }
 0x331   :  { %v2590_v53 = vpop.xlane.xlu1 %2589 }
 0x332   :  { %v2616_v10 = vsub.f32 %v9846_v30, %v2590_v53 }
 0x333   :  { %v2593_v25 = vpop.xlane.xlu0 %2592 }
 0x334   :  { %v2642_v39 = vmul.f32 1.442695, %v2616_v10  ;;  %v2617_v12 = vsub.f32 %v9852_v7, %v2593_v25 }
 0x335   :  { %v2572_v5 = vpop.xlane.xlu1 %2571 }
 0x336   :  { %8917 = vpow2.f32 %v2642_v39  ;;  %v2644_v17 = vmul.f32 1.442695, %v2617_v12  ;;  %v2610_v44 = vsub.f32 %v9856_v20, %v2572_v5 }
 0x337   :  { %v2575_v2 = vpop.xlane.xlu0 %2574 }
 0x338   :  { %8919 = vpow2.f32 %v2644_v17  ;;  %v2630_v8 = vmul.f32 1.442695, %v2610_v44  ;;  %v2611_v9 = vsub.f32 %v9862_v61, %v2575_v2 }
 0x339   :  { %v2602_v19 = vpop.xlane.xlu1 %2601 }
 0x33a   :  { %8921 = vpow2.f32 %v2630_v8  ;;  %v2632_v15 = vmul.f32 1.442695, %v2611_v9  ;;  %v2620_v26 = vsub.f32 %v9870_v18, %v2602_v19 }
 0x33b   :  { %v2605_v27 = vpop.xlane.xlu0 %2604 }
 0x33c   :  { %8923 = vpow2.f32 %v2632_v15  ;;  %v2650_v10 = vmul.f32 1.442695, %v2620_v26  ;;  %v2621_v39 = vsub.f32 %v9876_v32, %v2605_v27 }
 0x33d   :  { %v2578_v30 = vpop.xlane.xlu1 %2577 }
 0x33e   :  { %v2612_v6 = vsub.f32 %v9880_v57, %v2578_v30  ;;  %v2652_v44 = vmul.f32 1.442695, %v2621_v39 }
 0x33f   :  { %v2581_v31 = vpop.xlane.xlu0 %2580 }
 0x340   :  { %v9951_v7 = vpop.eup %8917  ;;  %v2634_v43 = vmul.f32 1.442695, %v2612_v6  ;;  %v2613_v16 = vsub.f32 %v9886_v54, %v2581_v31 }
 0x341   :  { %v2584_v20 = vpop.xlane.xlu1 %2583  ;;  %v2684_v36 = vsel %vm2557_vm3, %v9951_v7, 0.0 }
 0x342   :  { %v9956_v37 = vpop.eup %8919  ;;  %8925 = vpow2.f32 %v2634_v43  ;;  %v2636_v61 = vmul.f32 1.442695, %v2613_v16  ;;  %v2614_v13 = vsub.f32 %v9892_v38, %v2584_v20  ;;  %2685 = vadd.xlane.f32.xlu1 %v2684_v36 }
 0x343   :  { %v2587_v22 = vpop.xlane.xlu0 %2586  ;;  %v2687_v57 = vsel %vm2557_vm3, %v9956_v37, 0.0 }
 0x344   :  { %v9961_v50 = vpop.eup %8921  ;;  %8927 = vpow2.f32 %v2636_v61  ;;  %v2638_v14 = vmul.f32 1.442695, %v2614_v13  ;;  %v2615_v54 = vsub.f32 %v9902_v34, %v2587_v22  ;;  %2688 = vadd.xlane.f32.xlu0 %v2687_v57 }
 0x345   :  { %v2666_v21 = vsel %vm2557_vm3, %v9961_v50, 0.0  ;;  %v9988_v24 = vpop.permute.xlu1 %1565 }
 0x346   :  { %v9964_v55 = vpop.eup %8923  ;;  %8929 = vpow2.f32 %v2638_v14  ;;  %v2640_v0 = vmul.f32 1.442695, %v2615_v54 }
 0x347   :  { %v2669_v38 = vsel %vm2557_vm3, %v9964_v55, 0.0  ;;  %v9991_v4 = vpop.permute.xlu0 %1555 }
 0x348   :  { %8931 = vpow2.f32 %v2640_v0  ;;  %2667 = vadd.xlane.f32.xlu0 %v2666_v21  ;;  %2670 = vadd.xlane.f32.xlu1 %v2669_v38  ;;  %v1721_v21 = vcombine.low %v9375_v3, %v9988_v24 }
 0x34c   :  { %v9970_v29 = vpop.eup %8925 }
 0x34d   :  { %v2672_v58 = vsel %vm2557_vm3, %v9970_v29, 0.0 }
 0x34e   :  { %v9974_v34 = vpop.eup %8927  ;;  %2673 = vadd.xlane.f32.xlu0 %v2672_v58 }
 0x34f   :  { %v2675_v59 = vsel %vm2557_vm3, %v9974_v34, 0.0 }
 0x350   :  { %v9976_v48 = vpop.eup %8929 }
 0x351   :  { %v2678_v60 = vsel %vm2557_vm3, %v9976_v48, 0.0 }
 0x352   :  { %v9982_v47 = vpop.eup %8931  ;;  %2679 = vadd.xlane.f32.xlu1 %v2678_v60  ;;  %2676 = vadd.xlane.f32.xlu0 %v2675_v59  ;;  %v1729_v60 = vrot.slane %v1721_v21, %v9384_v11 }
 0x353   :  { %v2681_v56 = vsel %vm2557_vm3, %v9982_v47, 0.0 }
 0x356   :  { %2682 = vadd.xlane.f32.xlu0 %v2681_v56 }
 0x363   :  { %1579 = vrot.lane.b32.xlu1 %v9361_v62, %s9068_s24 }
 0x376   :  { %v2596_v40 = vpop.xlane.xlu1 %2595 }
 0x377   :  { %v2618_v53 = vsub.f32 %v9898_v45, %v2596_v40 }
 0x378   :  { %v2599_v25 = vpop.xlane.xlu0 %2598 }
 0x379   :  { %v2646_v12 = vmul.f32 1.442695, %v2618_v53  ;;  %v2619_v5 = vsub.f32 %v9908_v46, %v2599_v25 }
 0x37a   :  { %v10012_v15 = vpop.permute.xlu1 %1567 }
 0x37b   :  { %8933 = vpow2.f32 %v2646_v12  ;;  %v2648_v17 = vmul.f32 1.442695, %v2619_v5  ;;  %v1789_v5 = vcombine.low %v9361_v62, %v10012_v15 }
 0x37c   :  { %8935 = vpow2.f32 %v2650_v10  ;;  %v1578_v27 = vpop.permute.xlu0 %1577 }
 0x37d   :  { %8937 = vpow2.f32 %v2648_v17 }
 0x37e   :  { %8939 = vpow2.f32 %v2652_v44 }
 0x385   :  { %v9996_v2 = vpop.eup %8933 }
 0x386   :  { %v9998_v18 = vpop.eup %8935  ;;  %v2690_v45 = vsel %vm2557_vm3, %v9996_v2, 0.0 }
 0x387   :  { %v10002_v8 = vpop.eup %8937  ;;  %2691 = vadd.xlane.f32.xlu0 %v2690_v45  ;;  %v2696_v46 = vsel %vm2557_vm3, %v9998_v18, 0.0 }
 0x388   :  { %v2693_v32 = vsel %vm2557_vm3, %v10002_v8, 0.0  ;;  %v10008_v9 = vpop.eup %8939 }
 0x389   :  { %2694 = vadd.xlane.f32.xlu1 %v2693_v32  ;;  %v2699_v19 = vsel %vm2557_vm3, %v10008_v9, 0.0 }
 0x38b   :  { %2697 = vadd.xlane.f32.xlu0 %v2696_v46  ;;  %v1790_v46 = vcombine.high %v9361_v62, %v10012_v15 }
 0x38f   :  { %2700 = vadd.xlane.f32.xlu0 %v2699_v19 }
 0x3ab   :  { %v2656_v30 = vpop.xlane.xlu1 %2655 }
 0x3ac   :  { %8941 = vrcp.f32 %v2656_v30 }
 0x3ad   :  { %v2659_v6 = vpop.xlane.xlu0 %2658 }
 0x3ae   :  { %8943 = vrcp.f32 %v2659_v6 }
 0x3b1   :  { %v2662_v31 = vpop.xlane.xlu1 %2661 }
 0x3b2   :  { %8945 = vrcp.f32 %v2662_v31 }
 0x3b5   :  { %v2665_v16 = vpop.xlane.xlu0 %2664 }
 0x3b6   :  { %v8942_v43 = vpop.eup %8941  ;;  %8947 = vrcp.f32 %v2665_v16  ;;  %v1797_v16 = vrot.slane %v1789_v5, %v9384_v11 }
 0x3b7   :  { %v2718_v36 = vmul.f32 %v8942_v43, %v9930_v1 }
 0x3b8   :  { %v8944_v20 = vpop.eup %8943 }
 0x3b9   :  { %v2719_v61 = vmul.f32 %v8944_v20, %v9934_v51  ;;  %v1737_v51 = vcombine.low %v9924_v49, %v1578_v27 }
 0x3bb   :  { %v2734_v13 = vpack.c.bf16 %v2719_v61, %v2718_v36  ;;  %v1745_v58 = vrot.slane %v1737_v51, %v9384_v11 }
 0x3bc   :  { %v8946_v22 = vpop.eup %8945 }
 0x3bd   :  { %8520 = vmatmul.mubr.msk.bf16.vlgmr.msra.gmra.mrb[28].mxu1 %vm2557_vm3, %v2734_v13  ;;  %v2720_v14 = vmul.f32 %v8946_v22, %v9938_v41  ;;  %v1738_v41 = vcombine.high %v9924_v49, %v1578_v27  ;;  %v1753_v26 = vcombine.low %v1729_v60, %v1745_v58  ;;  %v1754_v40 = vcombine.high %v1729_v60, %v1745_v58 }
 0x3be   :  { %8530 = vmatpush3.bf16.msra.mxu1 %v9805_v42  ;;  %8531 = vmatprep.mubr.msk.bf16.mxu1 %vm9070_vm0, %v11550_v52 }
 0x3bf   :  { %8541 = vmatprep.subr.bf16.mxu1 %v11550_v52  ;;  %v1752_v59 = vrot.slane %v1738_v41, %v9384_v11  ;;  %v1761_v25 = vrot.slane %v1753_v26, %v9393_v23  ;;  %v1768_v39 = vrot.slane %v1754_v40, %v9393_v23 }
 0x3c0   :  { %v8948_v57 = vpop.eup %8947 }
 0x3c1   :  { %v2721_v54 = vmul.f32 %v8948_v57, %v9942_v28  ;;  %v1993_v27 = vcombine.low %v1761_v25, %v1768_v39  ;;  %v8159_v20 = vcombine.high %v1761_v25, %v1768_v39 }
 0x3c3   :  { %v2735_v0 = vpack.c.bf16 %v2721_v54, %v2720_v14  ;;  %v2000_v15 = vrot.slane %v1993_v27, %v9384_v11 }
 0x3c5   :  { %8526 = vmatmul.mubr.msk.bf16.vlgmr.msra.gmra.mrb[16].mxu0 %vm2557_vm3, %v2735_v0  ;;  %v2008_v0 = vrot.slane %v8159_v20, %v9384_v11 }
 0x3c6   :  { %8536 = vmatpush3.bf16.msra.mxu0 %v9807_v63  ;;  %8537 = vmatprep.mubr.msk.bf16.mxu0 %vm9070_vm0, %v11550_v52  ;;  %v1722_v63 = vcombine.high %v9375_v3, %v9988_v24 }
 0x3c7   :  { %8547 = vmatprep.subr.bf16.mxu0 %v11550_v52  ;;  %v2025_v40 = vcombine.low %v2000_v15, %v2008_v0 }
 0x3c8   :  { %v1736_v56 = vrot.slane %v1722_v63, %v9384_v11 }
 0x3ca   :  { %v1769_v10 = vcombine.low %v1736_v56, %v1752_v59  ;;  %v1770_v49 = vcombine.high %v1736_v56, %v1752_v59 }
 0x3cc   :  { %v1777_v44 = vrot.slane %v1769_v10, %v9393_v23  ;;  %v1784_v45 = vrot.slane %v1770_v49, %v9393_v23 }
 0x3ce   :  { %v2009_v36 = vcombine.low %v1777_v44, %v1784_v45  ;;  %v8160_v61 = vcombine.high %v1777_v44, %v1784_v45  ;;  %v2033_v44 = vrot.slane %v2025_v40, %v9393_v23 }
 0x3cf   :  { %v2686_v42 = vpop.xlane.xlu1 %2685 }
 0x3d0   :  { %v2024_v51 = vrot.slane %v8160_v61, %v9384_v11 }
 0x3d1   :  { %v2689_v1 = vpop.xlane.xlu0 %2688 }
 0x3d5   :  { %v2671_v28 = vpop.xlane.xlu1 %2670  ;;  %v2668_v38 = vpop.xlane.xlu0 %2667 }
 0x3d6   :  { %8949 = vrcp.f32 %v2671_v28 }
 0x3d7   :  { %8951 = vrcp.f32 %v2668_v38 }
 0x3db   :  { %v2674_v53 = vpop.xlane.xlu0 %2673 }
 0x3dc   :  { %8953 = vrcp.f32 %v2674_v53 }
 0x3df   :  { %v2680_v3 = vpop.xlane.xlu1 %2679  ;;  %v2677_v24 = vpop.xlane.xlu0 %2676 }
 0x3e0   :  { %v8950_v12 = vpop.eup %8949  ;;  %8955 = vrcp.f32 %v2677_v24 }
 0x3e1   :  { %v8952_v17 = vpop.eup %8951  ;;  %v2723_v32 = vmul.f32 %v8950_v12, %v9964_v55  ;;  %v1804_v55 = vrot.slane %v1790_v46, %v9384_v11  ;;  %8957 = vrcp.f32 %v2686_v42  ;;  %v2016_v42 = vrot.slane %v2009_v36, %v9384_v11 }
 0x3e2   :  { %v2722_v19 = vmul.f32 %v8952_v17, %v9961_v50  ;;  %8959 = vrcp.f32 %v2689_v1 }
 0x3e3   :  { %v1580_v30 = vpop.permute.xlu1 %1579  ;;  %v2683_v50 = vpop.xlane.xlu0 %2682  ;;  %v2041_v53 = vcombine.low %v2016_v42, %v2024_v51 }
 0x3e4   :  { %v1805_v6 = vcombine.low %v9991_v4, %v1580_v30  ;;  %v1806_v31 = vcombine.high %v9991_v4, %v1580_v30  ;;  %v2736_v43 = vpack.c.bf16 %v2723_v32, %v2722_v19  ;;  %8961 = vrcp.f32 %v2683_v50 }
 0x3e5   :  { %8963 = vrcp.f32 %v2680_v3  ;;  %v2042_v3 = vcombine.high %v2016_v42, %v2024_v51  ;;  %v2049_v45 = vrot.slane %v2041_v53, %v9393_v23 }
 0x3e6   :  { %v1813_v13 = vrot.slane %v1805_v6, %v9384_v11  ;;  %v1820_v62 = vrot.slane %v1806_v31, %v9384_v11  ;;  %8532 = vmatmul.mubr.msk.bf16.vlgmr.msra.gmra.mrb[32].mxu1 %vm2557_vm3, %v2736_v43  ;;  %v8954_v4 = vpop.eup %8953 }
 0x3e7   :  { %8543 = vmatprep.mubr.msk.bf16.mxu1 %vm9070_vm0, %v11550_v52  ;;  %v2724_v63 = vmul.f32 %v8954_v4, %v9970_v29  ;;  %v2057_v36 = vcombine.low %v2033_v44, %v2049_v45 }
 0x3e8   :  { %v1821_v22 = vcombine.low %v1797_v16, %v1813_v13  ;;  %v1822_v57 = vcombine.high %v1797_v16, %v1813_v13  ;;  %v1837_v14 = vcombine.low %v1804_v55, %v1820_v62  ;;  %v1838_v54 = vcombine.high %v1804_v55, %v1820_v62 }
 0x3e9   :  { %v2056_v16 = vrot.slane %v2042_v3, %v9393_v23  ;;  %v2058_v55 = vcombine.high %v2033_v44, %v2049_v45 }
 0x3ea   :  { %v1829_v21 = vrot.slane %v1821_v22, %v9393_v23  ;;  %v1836_v41 = vrot.slane %v1822_v57, %v9393_v23  ;;  %v1845_v1 = vrot.slane %v1837_v14, %v9393_v23  ;;  %v1852_v28 = vrot.slane %v1838_v54, %v9393_v23  ;;  %v8956_v38 = vpop.eup %8955 }
 0x3eb   :  { %v2725_v58 = vmul.f32 %v8956_v38, %v9974_v34  ;;  %v8958_v12 = vpop.eup %8957  ;;  %v2026_v34 = vcombine.high %v2000_v15, %v2008_v0 }
 0x3ec   :  { %v2061_v60 = vcombine.low %v1829_v21, %v1836_v41  ;;  %v8161_v59 = vcombine.high %v1829_v21, %v1836_v41  ;;  %v2077_v56 = vcombine.low %v1845_v1, %v1852_v28  ;;  %v8162_v26 = vcombine.high %v1845_v1, %v1852_v28  ;;  %v8960_v17 = vpop.eup %8959 }
 0x3ed   :  { %v2737_v39 = vpack.c.bf16 %v2725_v58, %v2724_v63  ;;  %v2040_v43 = vrot.slane %v2026_v34, %v9393_v23  ;;  %v2729_v62 = vmul.f32 %v8960_v17, %v9956_v37  ;;  %v2728_v14 = vmul.f32 %v8958_v12, %v9951_v7 }
 0x3ee   :  { %v2068_v10 = vrot.slane %v2061_v60, %v9384_v11  ;;  %v2076_v49 = vrot.slane %v8161_v59, %v9384_v11  ;;  %v2084_v25 = vrot.slane %v2077_v56, %v9384_v11  ;;  %v2092_v24 = vrot.slane %v8162_v26, %v9384_v11  ;;  %v8962_v27 = vpop.eup %8961 }
 0x3ef   :  { %8538 = vmatmul.mubr.msk.bf16.vlgmr.msra.gmra.mrb[20].mxu0 %vm2557_vm3, %v2737_v39  ;;  %v8964_v20 = vpop.eup %8963  ;;  %v2727_v50 = vmul.f32 %v8962_v27, %v9982_v47  ;;  %v2059_v0 = vcombine.low %v2040_v43, %v2056_v16  ;;  %v2060_v42 = vcombine.high %v2040_v43, %v2056_v16  ;;  %v2739_v21 = vpack.c.bf16 %v2729_v62, %v2728_v14 }
 0x3f0   :  { %v2093_v29 = vcombine.low %v2068_v10, %v2076_v49  ;;  %v2094_v5 = vcombine.high %v2068_v10, %v2076_v49  ;;  %v2109_v32 = vcombine.low %v2084_v25, %v2092_v24  ;;  %8549 = vmatprep.mubr.msk.bf16.mxu0 %vm9070_vm0, %v11550_v52  ;;  %v2110_v46 = vcombine.high %v2084_v25, %v2092_v24 }
 0x3f1   :  { %v2726_v54 = vmul.f32 %v8964_v20, %v9976_v48 }
 0x3f2   :  { %v2101_v19 = vrot.slane %v2093_v29, %v9393_v23  ;;  %v2117_v30 = vrot.slane %v2109_v32, %v9393_v23  ;;  %v2108_v6 = vrot.slane %v2094_v5, %v9393_v23  ;;  %v2124_v31 = vrot.slane %v2110_v46, %v9393_v23 }
 0x3f3   :  { %v2738_v51 = vpack.c.bf16 %v2727_v50, %v2726_v54 }
 0x3f4   :  { %v2125_v61 = vcombine.low %v2101_v19, %v2117_v30  ;;  %v2126_v13 = vcombine.high %v2101_v19, %v2117_v30  ;;  %v2127_v22 = vcombine.low %v2108_v6, %v2124_v31  ;;  %v2128_v57 = vcombine.high %v2108_v6, %v2124_v31 }
 0x3f6   :  { %v2133_v15 = vpack.c.bf16 %v2125_v61, %v2057_v36  ;;  %v2134_v4 = vpack.c.bf16 %v2126_v13, %v2058_v55  ;;  %v2135_v37 = vpack.c.bf16 %v2127_v22, %v2059_v0  ;;  %v2136_v47 = vpack.c.bf16 %v2128_v57, %v2060_v42 }
 0x3f8   :  { %8542 = vmatpush3.bf16.msra.mxu1 %v2133_v15  ;;  %8548 = vmatpush3.bf16.msra.mxu0 %v2134_v4 }
 0x3f9   :  { %8553 = vmatprep.subr.bf16.mxu1 %v11550_v52  ;;  %8559 = vmatprep.subr.bf16.mxu0 %v11550_v52 }
 0x3fb   :  { %8544 = vmatmul.mubr.msk.bf16.vlgmr.msra.gmra.mrb[36].mxu1 %vm2557_vm3, %v2738_v51  ;;  %8550 = vmatmul.mubr.msk.bf16.vlgmr.msra.gmra.mrb[24].mxu0 %vm2557_vm3, %v2739_v21 }
 0x3fc   :  { %8554 = vmatpush3.bf16.msra.mxu1 %v2135_v37  ;;  %8560 = vmatpush3.bf16.msra.mxu0 %v2136_v47 }
 0x3fd   :  { %8555 = vmatprep.mubr.msk.bf16.mxu1 %vm9070_vm0, %v11550_v52  ;;  %8561 = vmatprep.mubr.msk.bf16.mxu0 %vm9070_vm0, %v11550_v52 }
 0x414   :  { %v2692_v7 = vpop.xlane.xlu0 %2691 }
 0x415   :  { %8965 = vrcp.f32 %v2692_v7 }
 0x416   :  { %v2695_v48 = vpop.xlane.xlu1 %2694 }
 0x417   :  { %8967 = vrcp.f32 %v2695_v48 }
 0x418   :  { %v2698_v41 = vpop.xlane.xlu0 %2697 }
 0x419   :  { %8969 = vrcp.f32 %v2698_v41 }
 0x41c   :  { %v2701_v1 = vpop.xlane.xlu0 %2700 }
 0x41d   :  { %8971 = vrcp.f32 %v2701_v1 }
 0x41f   :  { %v8966_v28 = vpop.eup %8965 }
 0x420   :  { %v2730_v63 = vmul.f32 %v8966_v28, %v9996_v2 }
 0x421   :  { %v8968_v38 = vpop.eup %8967 }
 0x422   :  { %v2731_v58 = vmul.f32 %v8968_v38, %v10002_v8 }
 0x423   :  { %v8970_v59 = vpop.eup %8969 }
 0x424   :  { %v2740_v60 = vpack.c.bf16 %v2731_v58, %v2730_v63  ;;  %v2732_v26 = vmul.f32 %v8970_v59, %v9998_v18 }
 0x426   :  { %8556 = vmatmul.mubr.msk.bf16.vlgmr.msra.gmra.mrb[40].mxu1 %vm2557_vm3, %v2740_v60 }
 0x427   :  { %v8972_v56 = vpop.eup %8971 }
 0x428   :  { %v2733_v40 = vmul.f32 %v8972_v56, %v10008_v9 }
 0x42a   :  { %v2741_v53 = vpack.c.bf16 %v2733_v40, %v2732_v26 }
 0x42c   :  { %8562 = vmatmul.mubr.msk.bf16.vlgmr.msra.gmra.mrb[28].mxu0 %vm2557_vm3, %v2741_v53 }
 0x490   :  { %v2779_v10 = vpop.f32.mrb[28].mxu1 }
 0x491   :  { %v8521_v49 = vpop.f32.mrb[29].mxu1 }
 0x492   :  { %v2782_v25 = vpop.f32.mrb[30].mxu1 }
 0x493   :  { %v8522_v39 = vpop.f32.mrb[31].mxu1 }
 0x498   :  { %v2823_v24 = vpop.f32.mrb[16].mxu0 }
 0x499   :  { %v8527_v2 = vpop.f32.mrb[17].mxu0 }
 0x49a   :  { %v2826_v12 = vpop.f32.mrb[18].mxu0 }
 0x49b   :  { %v8528_v8 = vpop.f32.mrb[19].mxu0 }
 0x4b9   :  { %v2867_v29 = vpop.f32.mrb[32].mxu1 }
 0x4ba   :  { %v3094_v34 = vcombine.low %v2779_v10, %v2867_v29  ;;  %v3095_v3 = vcombine.high %v2779_v10, %v2867_v29  ;;  %v8533_v5 = vpop.f32.mrb[33].mxu1 }
 0x4bb   :  { %v2870_v17 = vpop.f32.mrb[34].mxu1 }
 0x4bc   :  { %v3162_v44 = vcombine.low %v2782_v25, %v2870_v17  ;;  %v3163_v18 = vcombine.high %v2782_v25, %v2870_v17  ;;  %v8534_v45 = vpop.f32.mrb[35].mxu1  ;;  %v3102_v27 = vrot.slane %v3094_v34, %v9384_v11  ;;  %v3109_v30 = vrot.slane %v3095_v3, %v9384_v11 }
 0x4be   :  { %v3170_v50 = vrot.slane %v3162_v44, %v9384_v11  ;;  %v3177_v15 = vrot.slane %v3163_v18, %v9384_v11 }
 0x4c2   :  { %v2911_v9 = vpop.f32.mrb[20].mxu0 }
 0x4c3   :  { %v3110_v32 = vcombine.low %v2823_v24, %v2911_v9  ;;  %v3111_v46 = vcombine.high %v2823_v24, %v2911_v9  ;;  %v8539_v19 = vpop.f32.mrb[21].mxu0 }
 0x4c4   :  { %v2914_v6 = vpop.f32.mrb[22].mxu0 }
 0x4c5   :  { %v3118_v31 = vrot.slane %v3110_v32, %v9384_v11  ;;  %v3125_v43 = vrot.slane %v3111_v46, %v9384_v11  ;;  %v3178_v16 = vcombine.low %v2826_v12, %v2914_v6  ;;  %v3179_v20 = vcombine.high %v2826_v12, %v2914_v6  ;;  %v8540_v36 = vpop.f32.mrb[23].mxu0 }
 0x4c7   :  { %v3126_v61 = vcombine.low %v3102_v27, %v3118_v31  ;;  %v3127_v55 = vcombine.high %v3102_v27, %v3118_v31  ;;  %v3142_v13 = vcombine.low %v3109_v30, %v3125_v43  ;;  %v3143_v62 = vcombine.high %v3109_v30, %v3125_v43 }
 0x4c8   :  { %v3186_v4 = vrot.slane %v3178_v16, %v9384_v11  ;;  %v3193_v22 = vrot.slane %v3179_v20, %v9384_v11  ;;  %v8821_v16 = vld [vmem:[%s11576_s26] sm:$0xff]  }
 0x4c9   :  { %v3134_v57 = vrot.slane %v3126_v61, %v9393_v23  ;;  %v3141_v14 = vrot.slane %v3127_v55, %v9393_v23  ;;  %v3150_v54 = vrot.slane %v3142_v13, %v9393_v23  ;;  %v3157_v0 = vrot.slane %v3143_v62, %v9393_v23  ;;  %v8822_v13 = vld [vmem:[%s11576_s26 + $0x8] sm:$0xff]   ;;  %8565 = vmatprep.subr.bf16.mxu1 %v8821_v16 }
 0x4ca   :  { %v3194_v42 = vcombine.low %v3170_v50, %v3186_v4  ;;  %v3195_v51 = vcombine.high %v3170_v50, %v3186_v4  ;;  %v3210_v21 = vcombine.low %v3177_v15, %v3193_v22  ;;  %v3211_v37 = vcombine.high %v3177_v15, %v3193_v22  ;;  %8566 = vmatpush3.bf16.msra.mxu1 %v8821_v16 }
 0x4cb   :  { %v3366_v47 = vcombine.low %v3134_v57, %v3141_v14  ;;  %v8179_v7 = vcombine.high %v3134_v57, %v3141_v14  ;;  %v3382_v48 = vcombine.low %v3150_v54, %v3157_v0  ;;  %v8180_v41 = vcombine.high %v3150_v54, %v3157_v0  ;;  %8567 = vmatprep.subr.bf16.mxu1 %v8822_v13  ;;  %v8823_v0 = vld [vmem:[%s11576_s26 + $0x10] sm:$0xff]  }
 0x4cc   :  { %v3202_v1 = vrot.slane %v3194_v42, %v9393_v23  ;;  %v3209_v28 = vrot.slane %v3195_v51, %v9393_v23  ;;  %v3218_v38 = vrot.slane %v3210_v21, %v9393_v23  ;;  %v3225_v63 = vrot.slane %v3211_v37, %v9393_v23  ;;  %v8824_v37 = vld [vmem:[%s11576_s26 + $0x18] sm:$0xff]  }
 0x4cd   :  { %v3373_v58 = vrot.slane %v3366_v47, %v9384_v11  ;;  %v3381_v60 = vrot.slane %v8179_v7, %v9384_v11  ;;  %v3389_v59 = vrot.slane %v3382_v48, %v9384_v11  ;;  %v3397_v56 = vrot.slane %v8180_v41, %v9384_v11  ;;  %v8825_v47 = vld [vmem:[%s11576_s26 + $0x20] sm:$0xff]   ;;  %v8826_v7 = vld [vmem:[%s11576_s26 + $0x28] sm:$0xff]  }
 0x4ce   :  { %v3434_v26 = vcombine.low %v3202_v1, %v3209_v28  ;;  %v8181_v40 = vcombine.high %v3202_v1, %v3209_v28  ;;  %v3450_v53 = vcombine.low %v3218_v38, %v3225_v63  ;;  %v8182_v10 = vcombine.high %v3218_v38, %v3225_v63  ;;  %v10120_v49 = vpop.f32.mrb[36].mxu1  ;;  %v10122_v25 = vpop.f32.mrb[24].mxu0  ;;  %8568 = vmatpush3.bf16.msra.mxu1 %v8822_v13 }
 0x4cf   :  { %v8545_v39 = vpop.f32.mrb[37].mxu1  ;;  %v8551_v24 = vpop.f32.mrb[25].mxu0  ;;  %v3398_v2 = vcombine.low %v3373_v58, %v3381_v60  ;;  %v3414_v12 = vcombine.low %v3389_v59, %v3397_v56  ;;  %v3399_v8 = vcombine.high %v3373_v58, %v3381_v60  ;;  %v3415_v29 = vcombine.high %v3389_v59, %v3397_v56  ;;  %8569 = vmatprep.subr.bf16.mxu1 %v8823_v0 }
 0x4d0   :  { %v3441_v34 = vrot.slane %v3434_v26, %v9384_v11  ;;  %v3449_v3 = vrot.slane %v8181_v40, %v9384_v11  ;;  %v3457_v5 = vrot.slane %v3450_v53, %v9384_v11  ;;  %v3465_v17 = vrot.slane %v8182_v10, %v9384_v11  ;;  %v10128_v44 = vpop.f32.mrb[38].mxu1  ;;  %v10130_v18 = vpop.f32.mrb[26].mxu0 }
 0x4d1   :  { %v8546_v45 = vpop.f32.mrb[39].mxu1  ;;  %v8552_v9 = vpop.f32.mrb[27].mxu0  ;;  %v10133_v32 = vrot.slane %v3398_v2, %v9393_v23  ;;  %v10136_v46 = vrot.slane %v3414_v12, %v9393_v23  ;;  %v3413_v19 = vrot.slane %v3399_v8, %v9393_v23  ;;  %v3429_v27 = vrot.slane %v3415_v29, %v9393_v23 }
 0x4d2   :  { %v3466_v30 = vcombine.low %v3441_v34, %v3449_v3  ;;  %v3482_v6 = vcombine.low %v3457_v5, %v3465_v17  ;;  %v3467_v31 = vcombine.high %v3441_v34, %v3449_v3  ;;  %v3483_v43 = vcombine.high %v3457_v5, %v3465_v17  ;;  %8570 = vmatpush3.bf16.msra.mxu1 %v8823_v0 }
 0x4d3   :  { %v3430_v20 = vcombine.low %v10133_v32, %v10136_v46  ;;  %v3431_v36 = vcombine.high %v10133_v32, %v10136_v46  ;;  %v3432_v61 = vcombine.low %v3413_v19, %v3429_v27  ;;  %v3433_v55 = vcombine.high %v3413_v19, %v3429_v27  ;;  %8571 = vmatprep.subr.bf16.mxu1 %v8824_v37 }
 0x4d4   :  { %v10151_v62 = vrot.slane %v3466_v30, %v9393_v23  ;;  %v10154_v50 = vrot.slane %v3482_v6, %v9393_v23  ;;  %v3481_v15 = vrot.slane %v3467_v31, %v9393_v23  ;;  %v3497_v4 = vrot.slane %v3483_v43, %v9393_v23 }
 0x4d6   :  { %v3499_v22 = vcombine.high %v10151_v62, %v10154_v50  ;;  %v3498_v57 = vcombine.low %v10151_v62, %v10154_v50  ;;  %v3500_v14 = vcombine.low %v3481_v15, %v3497_v4  ;;  %v3501_v54 = vcombine.high %v3481_v15, %v3497_v4  ;;  %8572 = vmatpush3.bf16.msra.mxu1 %v8824_v37 }
 0x4d7   :  { %8573 = vmatprep.subr.bf16.mxu1 %v8825_v47 }
 0x4d8   :  { %v8729_v42 = vpack.i.bf16 %v3499_v22, %v3431_v36  ;;  %v8734_v51 = vpack.i.bf16 %v3500_v14, %v3432_v61  ;;  %v10165_v21 = vpack.i.bf16 %v3501_v54, %v3433_v55 }
 0x4da   :  { %8730 = vrot.lane.b32.xlu1 %v8729_v42, %s9068_s24  ;;  %8574 = vmatpush3.bf16.msra.mxu1 %v8825_v47 }
 0x4db   :  { %8575 = vmatprep.subr.bf16.mxu1 %v8826_v7 }
 0x4de   :  { %8735 = vrot.lane.b32.xlu1 %v8734_v51, %s9067_s10  ;;  %8576 = vmatpush3.bf16.msra.mxu1 %v8826_v7 }
 0x4f9   :  { %v3043_v48 = vpop.f32.mrb[40].mxu1 }
 0x4fa   :  { %v3230_v41 = vcombine.low %v10120_v49, %v3043_v48  ;;  %v3231_v1 = vcombine.high %v10120_v49, %v3043_v48  ;;  %v8557_v28 = vpop.f32.mrb[41].mxu1 }
 0x4fb   :  { %v3046_v38 = vpop.f32.mrb[42].mxu1 }
 0x4fc   :  { %v3298_v63 = vcombine.low %v10128_v44, %v3046_v38  ;;  %v3299_v58 = vcombine.high %v10128_v44, %v3046_v38  ;;  %v8558_v60 = vpop.f32.mrb[43].mxu1  ;;  %v3238_v53 = vrot.slane %v3230_v41, %v9384_v11  ;;  %v3245_v10 = vrot.slane %v3231_v1, %v9384_v11  ;;  %v8827_v38 = vld [vmem:[%s11576_s26 + $0x30] sm:$0xff]  }
 0x4fd   :  { %8577 = vmatprep.subr.bf16.mxu1 %v8827_v38 }
 0x4fe   :  { %v3313_v17 = vrot.slane %v3299_v58, %v9384_v11  ;;  %8578 = vmatpush3.bf16.msra.mxu1 %v8827_v38 }
 0x4ff   :  { %v3087_v59 = vpop.f32.mrb[28].mxu0 }
 0x500   :  { %v3246_v56 = vcombine.low %v10122_v25, %v3087_v59  ;;  %v3247_v26 = vcombine.high %v10122_v25, %v3087_v59  ;;  %v8563_v40 = vpop.f32.mrb[29].mxu0  ;;  %v3306_v25 = vrot.slane %v3298_v63, %v9384_v11 }
 0x501   :  { %v3090_v39 = vpop.f32.mrb[30].mxu0 }
 0x502   :  { %v3254_v49 = vrot.slane %v3246_v56, %v9384_v11  ;;  %v3261_v24 = vrot.slane %v3247_v26, %v9384_v11  ;;  %v3314_v2 = vcombine.low %v10130_v18, %v3090_v39  ;;  %v3315_v12 = vcombine.high %v10130_v18, %v3090_v39  ;;  %v8564_v8 = vpop.f32.mrb[31].mxu0 }
 0x504   :  { %v3262_v29 = vcombine.low %v3238_v53, %v3254_v49  ;;  %v3263_v34 = vcombine.high %v3238_v53, %v3254_v49  ;;  %v3278_v3 = vcombine.low %v3245_v10, %v3261_v24  ;;  %v3279_v5 = vcombine.high %v3245_v10, %v3261_v24 }
 0x505   :  { %v3322_v44 = vrot.slane %v3314_v2, %v9384_v11  ;;  %v3329_v45 = vrot.slane %v3315_v12, %v9384_v11 }
 0x506   :  { %v3270_v9 = vrot.slane %v3262_v29, %v9393_v23  ;;  %v3277_v19 = vrot.slane %v3263_v34, %v9393_v23  ;;  %v3286_v27 = vrot.slane %v3278_v3, %v9393_v23  ;;  %v3293_v18 = vrot.slane %v3279_v5, %v9393_v23 }
 0x507   :  { %v3330_v30 = vcombine.low %v3306_v25, %v3322_v44  ;;  %v3331_v6 = vcombine.high %v3306_v25, %v3322_v44  ;;  %v3346_v31 = vcombine.low %v3313_v17, %v3329_v45  ;;  %v3347_v43 = vcombine.high %v3313_v17, %v3329_v45  ;;  %v8828_v17 = vld [vmem:[%s11576_s26 + $0x38] sm:$0xff]  }
 0x508   :  { %v3502_v16 = vcombine.low %v3270_v9, %v3277_v19  ;;  %v8183_v36 = vcombine.high %v3270_v9, %v3277_v19  ;;  %v3518_v61 = vcombine.low %v3286_v27, %v3293_v18  ;;  %v8184_v55 = vcombine.high %v3286_v27, %v3293_v18  ;;  %8579 = vmatprep.subr.bf16.mxu1 %v8828_v17 }
 0x509   :  { %v3338_v13 = vrot.slane %v3330_v30, %v9393_v23  ;;  %v3345_v15 = vrot.slane %v3331_v6, %v9393_v23  ;;  %v3354_v4 = vrot.slane %v3346_v31, %v9393_v23  ;;  %v3361_v22 = vrot.slane %v3347_v43, %v9393_v23  ;;  %8580 = vmatpush3.bf16.msra.mxu1 %v8828_v17 }
 0x50a   :  { %v3509_v14 = vrot.slane %v3502_v16, %v9384_v11  ;;  %v3517_v54 = vrot.slane %v8183_v36, %v9384_v11  ;;  %v3525_v0 = vrot.slane %v3518_v61, %v9384_v11  ;;  %v3533_v42 = vrot.slane %v8184_v55, %v9384_v11 }
 0x50b   :  { %v3570_v51 = vcombine.low %v3338_v13, %v3345_v15  ;;  %v8185_v37 = vcombine.high %v3338_v13, %v3345_v15  ;;  %v3586_v47 = vcombine.low %v3354_v4, %v3361_v22  ;;  %v8186_v7 = vcombine.high %v3354_v4, %v3361_v22 }
 0x50c   :  { %v3535_v48 = vcombine.high %v3509_v14, %v3517_v54  ;;  %v3551_v41 = vcombine.high %v3525_v0, %v3533_v42  ;;  %v3534_v1 = vcombine.low %v3509_v14, %v3517_v54  ;;  %v3550_v28 = vcombine.low %v3525_v0, %v3533_v42 }
 0x50d   :  { %v3577_v63 = vrot.slane %v3570_v51, %v9384_v11  ;;  %v3585_v58 = vrot.slane %v8185_v37, %v9384_v11  ;;  %v3593_v60 = vrot.slane %v3586_v47, %v9384_v11  ;;  %v3601_v59 = vrot.slane %v8186_v7, %v9384_v11 }
 0x50e   :  { %v3549_v56 = vrot.slane %v3535_v48, %v9393_v23  ;;  %v3565_v26 = vrot.slane %v3551_v41, %v9393_v23  ;;  %v3542_v40 = vrot.slane %v3534_v1, %v9393_v23  ;;  %v3558_v53 = vrot.slane %v3550_v28, %v9393_v23 }
 0x50f   :  { %v3603_v10 = vcombine.high %v3577_v63, %v3585_v58  ;;  %v3619_v39 = vcombine.high %v3593_v60, %v3601_v59  ;;  %v3602_v49 = vcombine.low %v3577_v63, %v3585_v58  ;;  %v3618_v24 = vcombine.low %v3593_v60, %v3601_v59  ;;  %v8187_v60 = vld [vmem:[%s11578_s2] ss:$0 sm:$0xff]  ;;  %s11579_s2 = sld [smem:[#allocation10_spill]] }
 0x510   :  { %v3568_v2 = vcombine.low %v3549_v56, %v3565_v26  ;;  %v3566_v12 = vcombine.low %v3542_v40, %v3558_v53  ;;  %v3567_v8 = vcombine.high %v3542_v40, %v3558_v53  ;;  %v3569_v29 = vcombine.high %v3549_v56, %v3565_v26 }
 0x511   :  { %v3617_v34 = vrot.slane %v3603_v10, %v9393_v23  ;;  %v3633_v3 = vrot.slane %v3619_v39, %v9393_v23  ;;  %v3610_v5 = vrot.slane %v3602_v49, %v9393_v23  ;;  %v3626_v25 = vrot.slane %v3618_v24, %v9393_v23  ;;  %v9061_v49 = vld [vmem:[%s11563_s30] sm:$0xff] }
 0x512   :  { %v11577_v58 = vmov 0  }
 0x513   :  { %v3636_v44 = vcombine.low %v3617_v34, %v3633_v3  ;;  %v3635_v45 = vcombine.high %v3610_v5, %v3626_v25  ;;  %v3634_v9 = vcombine.low %v3610_v5, %v3626_v25  ;;  %v3637_v19 = vcombine.high %v3617_v34, %v3633_v3  ;;  %v9064_v3 = vld [vmem:[%s11563_s30 + $0x18] sm:$0xff] }
 0x515   :  { %v8749_v27 = vpack.i.bf16 %v3636_v44, %v3568_v2  ;;  %v8739_v18 = vpack.i.bf16 %v3635_v45, %v3567_v8  ;;  %v8754_v30 = vpack.i.bf16 %v3637_v19, %v3569_v29  ;;  %v9062_v2 = vld [vmem:[%s11563_s30 + $0x8] sm:$0xff]  ;;  %v9063_v29 = vld [vmem:[%s11563_s30 + $0x10] sm:$0xff] }
 0x516   :  { %v8829_v25 = vld [vmem:[%s11579_s2] ss:$8 sps:$4 sm:$0xff]   ;;  %v8831_v17 = vld [vmem:[%s11579_s2 + $0x4] ss:$8 sps:$4 sm:$0xff]   ;;  %v8834_v44 = vld [vmem:[%s11579_s2 + $0x14] ss:$8 sps:$4 sm:$0xff]  }
 0x517   :  { %8750 = vrot.lane.b32.xlu1 %v8749_v27, %s9067_s10  ;;  %8740 = vrot.lane.b32.xlu0 %v8739_v18, %s9068_s24  ;;  %v8832_v45 = vld [vmem:[%s11579_s2 + $0x10] ss:$8 sps:$4 sm:$0xff]   ;;  %v8835_v19 = vld [vmem:[%s11579_s2 + $0x20] ss:$8 sps:$4 sm:$0xff]  }
 0x518   :  { %4125 = vmatprep.subr.bf16.mxu1 %v8831_v17  ;;  %v8840_v27 = vld [vmem:[%s11579_s2 + $0x34] ss:$8 sps:$4 sm:$0xff]   ;;  %v8838_v18 = vld [vmem:[%s11579_s2 + $0x30] ss:$8 sps:$4 sm:$0xff]  }
 0x51b   :  { %8755 = vrot.lane.b32.xlu1 %v8754_v30, %s9066_s29  ;;  %8745 = vrot.lane.b32.xlu0 %v10165_v21, %s9066_s29  ;;  %v8843_v30 = vld [vmem:[%s11579_s2 + $0x44] ss:$8 sps:$4 sm:$0xff]  }
 0x54c   :  { %v8731_v6 = vpop.permute.xlu1 %8730 }
 0x54d   :  { %v8733_v43 = vunpack.i.h.bf16 %v8731_v6  ;;  %v8732_v16 = vunpack.i.l.bf16 %v8731_v6  ;;  %v8853_v6 = vld [vmem:[%s11580_s4] sm:$0xff]  }
 0x54e   :  { %8585 = vmatprep.subr.bf16.mxu0 %v8853_v6 }
 0x54f   :  { %v3686_v21 = vsel %vm2137_vm1, %v3430_v20, %v8732_v16  ;;  %v3687_v42 = vsel %vm2137_vm1, %v3498_v57, %v8733_v43  ;;  %8586 = vmatpush3.bf16.msra.mxu0 %v8853_v6  ;;  %v8846_v43 = vld [vmem:[%s11579_s2 + $0x54] ss:$8 sps:$4 sm:$0xff]   ;;  %v8844_v16 = vld [vmem:[%s11579_s2 + $0x50] ss:$8 sps:$4 sm:$0xff]   ;;  %v8196_v6 = vld [vmem:[%s11528_s6] ss:$0 sm:$0xff] }
 0x550   :  { %v8736_v31 = vpop.permute.xlu1 %8735 }
 0x551   :  { %v8738_v15 = vunpack.i.h.bf16 %v8736_v31  ;;  %v8737_v4 = vunpack.i.l.bf16 %v8736_v31  ;;  %v8841_v31 = vld [vmem:[%s11579_s2 + $0x40] ss:$8 sps:$4 sm:$0xff]  }
 0x553   :  { %v3691_v32 = vsel %vm3690_vm5, %v3686_v21, %v8737_v4  ;;  %v3692_v46 = vsel %vm3690_vm5, %v3687_v42, %v8738_v15  ;;  %v76_v15 = vld [vmem:[%s11526_s1] sm:$0xff]  ;;  %v77_v4 = vld [vmem:[%s11526_s1 + $0x8] sm:$0xff] }
 0x589   :  { %v8751_v36 = vpop.permute.xlu1 %8750  ;;  %v8741_v61 = vpop.permute.xlu0 %8740 }
 0x58a   :  { %v8743_v55 = vunpack.i.h.bf16 %v8741_v61  ;;  %v8742_v13 = vunpack.i.l.bf16 %v8741_v61  ;;  %v8753_v22 = vunpack.i.h.bf16 %v8751_v36  ;;  %v8752_v14 = vunpack.i.l.bf16 %v8751_v36  ;;  %v8849_v36 = vld [vmem:[%s11579_s2 + $0x64] ss:$8 sps:$4 sm:$0xff]   ;;  %v8847_v61 = vld [vmem:[%s11579_s2 + $0x60] ss:$8 sps:$4 sm:$0xff]  }
 0x58c   :  { %v3688_v54 = vsel %vm2137_vm1, %v3566_v12, %v8742_v13  ;;  %v3689_v0 = vsel %vm2137_vm1, %v3634_v9, %v8743_v55  ;;  %v8837_v9 = vld [vmem:[%s11579_s2 + $0x24] ss:$8 sps:$4 sm:$0xff]   ;;  %v8852_v55 = vld [vmem:[%s11579_s2 + $0x74] ss:$8 sps:$4 sm:$0xff]   ;;  %v8850_v13 = vld [vmem:[%s11579_s2 + $0x70] ss:$8 sps:$4 sm:$0xff]  }
 0x58d   :  { %v8756_v51 = vpop.permute.xlu1 %8755  ;;  %v8746_v37 = vpop.permute.xlu0 %8745  ;;  %v3693_v1 = vsel %vm3690_vm5, %v3688_v54, %v8752_v14  ;;  %v3694_v28 = vsel %vm3690_vm5, %v3689_v0, %v8753_v22  ;;  %v4031_v22 = vpack.c.bf16 %v77_v4, %v76_v15 }
 0x58e   :  { %v8758_v47 = vunpack.i.h.bf16 %v8756_v51  ;;  %v8757_v7 = vunpack.i.l.bf16 %v8756_v51  ;;  %v8748_v48 = vunpack.i.h.bf16 %v8746_v37  ;;  %v8747_v41 = vunpack.i.l.bf16 %v8746_v37 }
 0x590   :  { %v3698_v20 = vsel %vm3695_vm6, %v3693_v1, %v8757_v7  ;;  %v3699_v62 = vsel %vm3695_vm6, %v3694_v28, %v8758_v47  ;;  %v3696_v50 = vsel %vm3695_vm6, %v3691_v32, %v8747_v41  ;;  %v3697_v57 = vsel %vm3695_vm6, %v3692_v46, %v8748_v48 }
 0x591   :  { %v3717_v38 = vpack.c.bf16 %v3699_v62, %v3698_v20  ;;  %v3716_v63 = vpack.c.bf16 %v3697_v57, %v3696_v50  ;;  %v8854_v62 = vld [vmem:[%s11580_s4 + $0x8] sm:$0xff]   ;;  %v8855_v50 = vld [vmem:[%s11580_s4 + $0x10] sm:$0xff]   ;;  %v8856_v57 = vld [vmem:[%s11580_s4 + $0x18] sm:$0xff]  }
 0x592   :  { %8587 = vmatprep.subr.bf16.mxu0 %v8854_v62 }
 0x593   :  { %8581 = vmatprep.mubr.bf16.mxu1 %v3716_v63  ;;  %8588 = vmatpush3.bf16.msra.mxu0 %v8854_v62  ;;  %v8858_v63 = vld [vmem:[%s11580_s4 + $0x28] sm:$0xff]  }
 0x594   :  { %8582 = vmatmul.mubr.bf16.vlgmr.msra.gmra.mrb[44].mxu1 %v3717_v38  ;;  %8589 = vmatprep.subr.bf16.mxu0 %v8855_v50  ;;  %v8857_v38 = vld [vmem:[%s11580_s4 + $0x20] sm:$0xff]  }
 0x595   :  { %4157 = vmatprep.mubr.bf16.mxu1 %v11577_v58  ;;  %4126 = vmatpush1.bf16.msra.mxu1 %v8829_v25 }
 0x596   :  { %4127 = vmatprep.subr.bf16.mxu1 %v8834_v44 }
 0x597   :  { %8590 = vmatpush3.bf16.msra.mxu0 %v8855_v50 }
 0x598   :  { %8591 = vmatprep.subr.bf16.mxu0 %v8856_v57 }
 0x599   :  { %4128 = vmatpush1.bf16.msra.mxu1 %v8832_v45 }
 0x59a   :  { %4129 = vmatprep.subr.bf16.mxu1 %v8837_v9 }
 0x59b   :  { %8592 = vmatpush3.bf16.msra.mxu0 %v8856_v57 }
 0x59c   :  { %8593 = vmatprep.subr.bf16.mxu0 %v8857_v38 }
 0x59d   :  { %4130 = vmatpush1.bf16.msra.mxu1 %v8835_v19 }
 0x59e   :  { %4131 = vmatprep.subr.bf16.mxu1 %v8840_v27 }
 0x59f   :  { %8594 = vmatpush3.bf16.msra.mxu0 %v8857_v38 }
 0x5a0   :  { %8595 = vmatprep.subr.bf16.mxu0 %v8858_v63 }
 0x5a1   :  { %4132 = vmatpush1.bf16.msra.mxu1 %v8838_v18 }
 0x5a2   :  { %4133 = vmatprep.subr.bf16.mxu1 %v8843_v30 }
 0x5a3   :  { %8596 = vmatpush3.bf16.msra.mxu0 %v8858_v63 }
 0x5a5   :  { %4134 = vmatpush1.bf16.msra.mxu1 %v8841_v31 }
 0x5a6   :  { %4135 = vmatprep.subr.bf16.mxu1 %v8846_v43 }
 0x5a9   :  { %4136 = vmatpush1.bf16.msra.mxu1 %v8844_v16 }
 0x5aa   :  { %4137 = vmatprep.subr.bf16.mxu1 %v8849_v36 }
 0x5ad   :  { %4138 = vmatpush1.bf16.msra.mxu1 %v8847_v61 }
 0x5ae   :  { %4139 = vmatprep.subr.bf16.mxu1 %v8852_v55  ;;  %v8197_v55 = vld [vmem:[%s11529_s7] ss:$0 sm:$0xff] }
 0x5b1   :  { %4140 = vmatpush1.bf16.msra.mxu1 %v8850_v13 }
 0x5b2   :  { %8635 = vmatprep.subr.bf16.mxu1 %v11550_v52 }
 0x5b4   :  { %4158 = vmatmul.mubr.bf16.vlgmr.msra.gmra.mrb[48].mxu1 %v4031_v22 }
 0x5b5   :  { %4167 = vmatprep.mubr.bf16.mxu1 %v11577_v58 }
 0x667   :  { %v8583_v59 = vpop.f32.mrb[44].mxu1 }
 0x668   :  { %v3807_v56 = vpop.f32.mrb[45].mxu1  ;;  %v3816_v10 = vadd.f32 %v8583_v59, %v8187_v60  ;;  %v78_v59 = vld [vmem:[%s11526_s1 + $0x10] sm:$0xff] }
 0x669   :  { %v3808_v26 = vadd.f32 %v8187_v60, %v3807_v56  ;;  %v8584_v40 = vpop.f32.mrb[46].mxu1  ;;  %v79_v56 = vld [vmem:[%s11526_s1 + $0x18] sm:$0xff] }
 0x66a   :  { %v3810_v53 = vpop.f32.mrb[47].mxu1  ;;  %v3819_v8 = vadd.f32 %v8584_v40, %v8187_v60  ;;  %v3824_v34 = vadd.f32 %v9063_v29, %v3816_v10  ;;  %v8860_v40 = vld [vmem:[%s11580_s4 + $0x38] sm:$0xff]  }
 0x66b   :  { %v3811_v39 = vadd.f32 %v8187_v60, %v3810_v53  ;;  %v3822_v24 = vadd.f32 %v9061_v49, %v3808_v26  ;;  %v8859_v60 = vld [vmem:[%s11580_s4 + $0x30] sm:$0xff]   ;;  %v4032_v26 = vpack.c.bf16 %v79_v56, %v78_v59  ;;  %v10371_v53 = vld [vmem:[%s11527_s11] sm:$0x3] }
 0x66c   :  { %v3825_v5 = vadd.f32 %v9064_v3, %v3819_v8  ;;  %8597 = vmatprep.subr.bf16.mxu0 %v8859_v60  ;;  %v10375_v10 = vrot.slane %v10371_v53, %v9278_v33 }
 0x66d   :  { %3828 = vadd.xlane.f32.xlu0 %v3822_v24  ;;  %v3823_v12 = vadd.f32 %v9062_v2, %v3811_v39  ;;  %4168 = vmatmul.mubr.bf16.gmra.mrb[52].mxu1 %v4032_v26 }
 0x66e   :  { %8637 = vmatprep.mubr.msk.bf16.mxu1 %vm9070_vm0, %v11550_v52  ;;  %8598 = vmatpush3.bf16.msra.mxu0 %v8859_v60 }
 0x66f   :  { %3830 = vadd.xlane.f32.xlu1 %v3823_v12  ;;  %8599 = vmatprep.subr.bf16.mxu0 %v8860_v40 }
 0x671   :  { %3832 = vadd.xlane.f32.xlu0 %v3824_v34 }
 0x672   :  { %8600 = vmatpush3.bf16.msra.mxu0 %v8860_v40 }
 0x673   :  { %8605 = vmatprep.subr.bf16.mxu0 %v11550_v52 }
 0x675   :  { %3834 = vadd.xlane.f32.xlu0 %v3825_v5 }
 0x687   :  { %v4159_v39 = vpop.f32.mrb[48].mxu1 }
 0x688   :  { %v10378_v49 = vadd.f32 %v4159_v39, %v10375_v10 }
 0x6fa   :  { %v3829_v14 = vpop.xlane.xlu0 %3828 }
 0x6fb   :  { %v3837_v54 = vmul.f32 0.0078125, %v3829_v14 }
 0x6fc   :  { %v3831_v0 = vpop.xlane.xlu1 %3830 }
 0x6fd   :  { %v3838_v21 = vmul.f32 0.0078125, %v3831_v0  ;;  %v10322_v42 = vsub.f32 %v3822_v24, %v3837_v54  ;;  %v10380_v24 = vpop.f32.mrb[49].mxu1 }
 0x6fe   :  { %v3833_v51 = vpop.xlane.xlu0 %3832  ;;  %v4163_v2 = vpop.f32.mrb[50].mxu1 }
 0x6ff   :  { %v10324_v37 = vsub.f32 %v3823_v12, %v3838_v21  ;;  %v3839_v47 = vmul.f32 0.0078125, %v3833_v51  ;;  %v3845_v7 = vmul.f32 %v10322_v42, %v10322_v42  ;;  %v10385_v12 = vadd.f32 %v4163_v2, %v10375_v10  ;;  %v10387_v8 = vpop.f32.mrb[51].mxu1 }
 0x701   :  { %v10328_v48 = vsub.f32 %v3824_v34, %v3839_v47  ;;  %3849 = vadd.xlane.f32.xlu1 %v3845_v7  ;;  %v3846_v41 = vmul.f32 %v10324_v37, %v10324_v37 }
 0x702   :  { %v3835_v1 = vpop.xlane.xlu0 %3834 }
 0x703   :  { %v3840_v28 = vmul.f32 0.0078125, %v3835_v1  ;;  %3851 = vadd.xlane.f32.xlu0 %v3846_v41  ;;  %v3847_v32 = vmul.f32 %v10328_v48, %v10328_v48 }
 0x705   :  { %v10334_v46 = vsub.f32 %v3825_v5, %v3840_v28  ;;  %3853 = vadd.xlane.f32.xlu1 %v3847_v32 }
 0x707   :  { %v3848_v20 = vmul.f32 %v10334_v46, %v10334_v46 }
 0x709   :  { %3855 = vadd.xlane.f32.xlu0 %v3848_v20 }
 0x716   :  { %4774 = vrot.lane.b32.xlu1 %v10378_v49, %s9066_s29 }
 0x71a   :  { %4786 = vrot.lane.b32.xlu1 %v10378_v49, %s9067_s10 }
 0x71e   :  { %4788 = vrot.lane.b32.xlu1 %v10385_v12, %s9067_s10 }
 0x71f   :  { %4776 = vrot.lane.b32.xlu0 %v10385_v12, %s9066_s29 }
 0x722   :  { %4800 = vrot.lane.b32.xlu1 %v10385_v12, %s9068_s24 }
 0x723   :  { %4798 = vrot.lane.b32.xlu0 %v10378_v49, %s9068_s24 }
 0x78e   :  { %v3850_v29 = vpop.xlane.xlu1 %3849 }
 0x78f   :  { %v3857_v34 = vmul.f32 0.0078125, %v3850_v29 }
 0x790   :  { %v3852_v3 = vpop.xlane.xlu0 %3851 }
 0x791   :  { %v3861_v5 = vadd.f32 1e-05, %v3857_v34  ;;  %v3858_v25 = vmul.f32 0.0078125, %v3852_v3 }
 0x792   :  { %v3854_v17 = vpop.xlane.xlu1 %3853 }
 0x793   :  { %8973 = vrsqrt.f32 %v3861_v5  ;;  %v3862_v44 = vadd.f32 1e-05, %v3858_v25  ;;  %v3859_v45 = vmul.f32 0.0078125, %v3854_v17 }
 0x795   :  { %8975 = vrsqrt.f32 %v3862_v44  ;;  %v3863_v9 = vadd.f32 1e-05, %v3859_v45 }
 0x796   :  { %v3856_v19 = vpop.xlane.xlu0 %3855  ;;  %v4775_v7 = vpop.permute.xlu1 %4774 }
 0x797   :  { %8977 = vrsqrt.f32 %v3863_v9  ;;  %v3860_v27 = vmul.f32 0.0078125, %v3856_v19 }
 0x799   :  { %v3864_v18 = vadd.f32 1e-05, %v3860_v27 }
 0x79a   :  { %v4787_v41 = vpop.permute.xlu1 %4786 }
 0x79b   :  { %8979 = vrsqrt.f32 %v3864_v18  ;;  %v4810_v1 = vcombine.low %v10378_v49, %v4787_v41  ;;  %v4811_v28 = vcombine.high %v10378_v49, %v4787_v41 }
 0x79d   :  { %v8974_v30 = vpop.eup %8973  ;;  %v4818_v62 = vrot.slane %v4810_v1, %v9384_v11  ;;  %v4825_v60 = vrot.slane %v4811_v28, %v9384_v11  ;;  %v4169_v28 = vpop.f32.mrb[52].mxu1 }
 0x79e   :  { %v3869_v31 = vmul.f32 %v8974_v30, %v10322_v42  ;;  %v4789_v50 = vpop.permute.xlu1 %4788 }
 0x79f   :  { %v8976_v43 = vpop.eup %8975  ;;  %v4878_v57 = vcombine.low %v10385_v12, %v4789_v50  ;;  %v4879_v38 = vcombine.high %v10385_v12, %v4789_v50 }
 0x7a0   :  { %v3870_v16 = vmul.f32 %v8976_v43, %v10324_v37  ;;  %v3879_v36 = vmul.f32 %v8196_v6, %v3869_v31 }
 0x7a1   :  { %v8978_v61 = vpop.eup %8977  ;;  %v4886_v39 = vrot.slane %v4878_v57, %v9384_v11  ;;  %v4893_v49 = vrot.slane %v4879_v38, %v9384_v11 }
 0x7a2   :  { %v3871_v13 = vmul.f32 %v8978_v61, %v10328_v48  ;;  %v3880_v15 = vmul.f32 %v8196_v6, %v3870_v16  ;;  %v10408_v4 = vadd.f32 %v8197_v55, %v3879_v36  ;;  %v4777_v48 = vpop.permute.xlu0 %4776  ;;  %v4801_v56 = vpop.permute.xlu1 %4800 }
 0x7a3   :  { %v4894_v2 = vcombine.low %v4777_v48, %v4801_v56  ;;  %v4895_v29 = vcombine.high %v4777_v48, %v4801_v56 }
 0x7a4   :  { %v10410_v22 = vadd.f32 %v8197_v55, %v3880_v15  ;;  %v3881_v21 = vmul.f32 %v8196_v6, %v3871_v13 }
 0x7a5   :  { %v8980_v14 = vpop.eup %8979  ;;  %v4902_v5 = vrot.slane %v4894_v2, %v9384_v11  ;;  %v4909_v12 = vrot.slane %v4895_v29, %v9384_v11 }
 0x7a6   :  { %v3872_v54 = vmul.f32 %v8980_v14, %v10334_v46  ;;  %v3909_v0 = vpack.c.bf16 %v10410_v22, %v10408_v4  ;;  %v10415_v51 = vadd.f32 %v8197_v55, %v3881_v21  ;;  %v4799_v32 = vpop.permute.xlu0 %4798 }
 0x7a7   :  { %v4826_v46 = vcombine.low %v4775_v7, %v4799_v32  ;;  %v4827_v20 = vcombine.high %v4775_v7, %v4799_v32  ;;  %v4910_v44 = vcombine.low %v4886_v39, %v4902_v5  ;;  %v4911_v45 = vcombine.high %v4886_v39, %v4902_v5  ;;  %v10451_v32 = vpop.f32.mrb[53].mxu1 }
 0x7a8   :  { %8601 = vmatprep.mubr.bf16.mxu0 %v3909_v0  ;;  %v3882_v42 = vmul.f32 %v8196_v6, %v3872_v54  ;;  %v4926_v9 = vcombine.low %v4893_v49, %v4909_v12  ;;  %v4927_v19 = vcombine.high %v4893_v49, %v4909_v12 }
 0x7a9   :  { %v4834_v63 = vrot.slane %v4826_v46, %v9384_v11  ;;  %v4841_v59 = vrot.slane %v4827_v20, %v9384_v11  ;;  %v4918_v30 = vrot.slane %v4910_v44, %v9393_v23  ;;  %v4925_v6 = vrot.slane %v4911_v45, %v9393_v23  ;;  %v4173_v46 = vpop.f32.mrb[54].mxu1 }
 0x7aa   :  { %v10417_v37 = vadd.f32 %v8197_v55, %v3882_v42  ;;  %v4934_v31 = vrot.slane %v4926_v9, %v9393_v23  ;;  %v4941_v43 = vrot.slane %v4927_v19, %v9393_v23 }
 0x7ab   :  { %v4842_v26 = vcombine.low %v4818_v62, %v4834_v63  ;;  %v4843_v40 = vcombine.high %v4818_v62, %v4834_v63  ;;  %v4858_v34 = vcombine.low %v4825_v60, %v4841_v59  ;;  %v4859_v3 = vcombine.high %v4825_v60, %v4841_v59  ;;  %v10456_v59 = vpop.f32.mrb[55].mxu1 }
 0x7ac   :  { %11581 = vst [vmem:[#allocation4_spill] sm:$0xff] %v10417_v37  ;;  %v3910_v47 = vpack.c.bf16 %v10417_v37, %v10415_v51  ;;  %v5150_v61 = vcombine.low %v4918_v30, %v4925_v6  ;;  %v8233_v55 = vcombine.high %v4918_v30, %v4925_v6  ;;  %v5166_v14 = vcombine.low %v4934_v31, %v4941_v43 }
 0x7ad   :  { %v4850_v25 = vrot.slane %v4842_v26, %v9393_v23  ;;  %v4857_v17 = vrot.slane %v4843_v40, %v9393_v23  ;;  %v4866_v27 = vrot.slane %v4858_v34, %v9393_v23  ;;  %v4873_v18 = vrot.slane %v4859_v3, %v9393_v23 }
 0x7ae   :  { %8602 = vmatmul.mubr.bf16.vlgmr.msra.gmra.mrb[32].mxu0 %v3910_v47  ;;  %v8234_v54 = vcombine.high %v4934_v31, %v4941_v43  ;;  %v5157_v42 = vrot.slane %v5150_v61, %v9384_v11  ;;  %v5165_v47 = vrot.slane %v8233_v55, %v9384_v11  ;;  %v5173_v41 = vrot.slane %v5166_v14, %v9384_v11  ;;  %v8198_v43 = vld [vmem:[%s11530_s9] ss:$0 sm:$0xff] }
 0x7af   :  { %8607 = vmatprep.mubr.msk.bf16.mxu0 %vm9070_vm0, %v11550_v52  ;;  %v5082_v16 = vcombine.low %v4850_v25, %v4857_v17  ;;  %v8231_v36 = vcombine.high %v4850_v25, %v4857_v17  ;;  %v5098_v13 = vcombine.low %v4866_v27, %v4873_v18  ;;  %v8232_v15 = vcombine.high %v4866_v27, %v4873_v18 }
 0x7b0   :  { %v5181_v1 = vrot.slane %v8234_v54, %v9384_v11  ;;  %v5182_v50 = vcombine.low %v5157_v42, %v5165_v47  ;;  %v5183_v2 = vcombine.high %v5157_v42, %v5165_v47  ;;  %v10480_v14 = vadd.f32 %v4169_v28, %v10375_v10 }
 0x7b1   :  { %v5089_v0 = vrot.slane %v5082_v16, %v9384_v11  ;;  %v5097_v21 = vrot.slane %v8231_v36, %v9384_v11  ;;  %v5105_v7 = vrot.slane %v5098_v13, %v9384_v11  ;;  %v5113_v48 = vrot.slane %v8232_v15, %v9384_v11 }
 0x7b2   :  { %v5198_v57 = vcombine.low %v5173_v41, %v5181_v1  ;;  %v5190_v60 = vrot.slane %v5182_v50, %v9393_v23  ;;  %v5199_v29 = vcombine.high %v5173_v41, %v5181_v1  ;;  %v5197_v12 = vrot.slane %v5183_v2, %v9393_v23 }
 0x7b3   :  { %v5114_v20 = vcombine.low %v5089_v0, %v5097_v21  ;;  %v5130_v62 = vcombine.low %v5105_v7, %v5113_v48  ;;  %v5115_v39 = vcombine.high %v5089_v0, %v5097_v21  ;;  %v5131_v49 = vcombine.high %v5105_v7, %v5113_v48 }
 0x7b4   :  { %v5206_v56 = vrot.slane %v5198_v57, %v9393_v23  ;;  %v5213_v25 = vrot.slane %v5199_v29, %v9393_v23  ;;  %v10484_v54 = vadd.f32 %v4173_v46, %v10375_v10  ;;  %v10510_v21 = vrot.slane %v10371_v53, %v9284_v35 }
 0x7b5   :  { %v5122_v38 = vrot.slane %v5114_v20, %v9393_v23  ;;  %v5138_v63 = vrot.slane %v5130_v62, %v9393_v23  ;;  %v5129_v3 = vrot.slane %v5115_v39, %v9393_v23  ;;  %v5145_v5 = vrot.slane %v5131_v49, %v9393_v23 }
 0x7b6   :  { %v5214_v40 = vcombine.low %v5190_v60, %v5206_v56  ;;  %v5215_v45 = vcombine.high %v5190_v60, %v5206_v56  ;;  %v5216_v19 = vcombine.low %v5197_v12, %v5213_v25  ;;  %v5217_v6 = vcombine.high %v5197_v12, %v5213_v25 }
 0x7b7   :  { %v5146_v26 = vcombine.low %v5122_v38, %v5138_v63  ;;  %v5147_v44 = vcombine.high %v5122_v38, %v5138_v63  ;;  %v5148_v9 = vcombine.low %v5129_v3, %v5145_v5  ;;  %v5149_v30 = vcombine.high %v5129_v3, %v5145_v5 }
 0x7b8   :  { %v10518_v42 = vadd.f32 %v10387_v8, %v10510_v21  ;;  %v10524_v47 = vadd.f32 %v10380_v24, %v10510_v21  ;;  %v10540_v53 = vadd.f32 %v10451_v32, %v10510_v21 }
 0x7b9   :  { %v5354_v34 = vpack.c.bf16 %v5214_v40, %v5146_v26  ;;  %v10465_v27 = vpack.c.bf16 %v5215_v45, %v5147_v44  ;;  %v10467_v18 = vpack.c.bf16 %v5216_v19, %v5148_v9  ;;  %v10469_v31 = vpack.c.bf16 %v5217_v6, %v5149_v30 }
 0x7bb   :  { %v5958_v17 = vsel %vm2137_vm1, %v5354_v34, 0 }
 0x7bc   :  { %8606 = vmatpush3.bf16.xpose.msra.mxu0 %v5958_v17 }
 0x7bd   :  { %8611 = vmatprep.subr.bf16.mxu0 %v11550_v52 }
 0x881   :  { %v8603_v16 = vpop.f32.mrb[32].mxu0 }
 0x882   :  { %v4000_v36 = vpop.f32.mrb[33].mxu0  ;;  %v10496_v0 = vadd.f32 %v8603_v16, %v8198_v43 }
 0x883   :  { %v4001_v61 = vadd.f32 %v8198_v43, %v4000_v36  ;;  %v8604_v55 = vpop.f32.mrb[34].mxu0 }
 0x884   :  { %v4003_v13 = vpop.f32.mrb[35].mxu0  ;;  %v10500_v10 = vadd.f32 %v8604_v55, %v8198_v43 }
 0x885   :  { %v4004_v15 = vadd.f32 %v8198_v43, %v4003_v13  ;;  %4182 = vrot.lane.b32.xlu0 %v4001_v61, %s9066_s29 }
 0x887   :  { %4184 = vrot.lane.b32.xlu1 %v4004_v15, %s9066_s29 }
 0x889   :  { %4194 = vrot.lane.b32.xlu0 %v4001_v61, %s9067_s10 }
 0x88b   :  { %4196 = vrot.lane.b32.xlu1 %v4004_v15, %s9067_s10 }
 0x88d   :  { %4206 = vrot.lane.b32.xlu0 %v4001_v61, %s9068_s24 }
 0x88f   :  { %4208 = vrot.lane.b32.xlu1 %v4004_v15, %s9068_s24 }
 0x891   :  { %4778 = vrot.lane.b32.xlu0 %v10480_v14, %s9066_s29 }
 0x893   :  { %4780 = vrot.lane.b32.xlu1 %v10484_v54, %s9066_s29 }
 0x895   :  { %4790 = vrot.lane.b32.xlu0 %v10480_v14, %s9067_s10 }
 0x897   :  { %4792 = vrot.lane.b32.xlu1 %v10484_v54, %s9067_s10 }
 0x899   :  { %4802 = vrot.lane.b32.xlu0 %v10480_v14, %s9068_s24 }
 0x89b   :  { %4804 = vrot.lane.b32.xlu1 %v10484_v54, %s9068_s24 }
 0x89d   :  { %4186 = vrot.lane.b32.xlu0 %v10496_v0, %s9066_s29 }
 0x89f   :  { %4188 = vrot.lane.b32.xlu1 %v10500_v10, %s9066_s29 }
 0x8a1   :  { %4198 = vrot.lane.b32.xlu0 %v10496_v0, %s9067_s10 }
 0x8a3   :  { %4200 = vrot.lane.b32.xlu1 %v10500_v10, %s9067_s10 }
 0x8a5   :  { %4210 = vrot.lane.b32.xlu0 %v10496_v0, %s9068_s24 }
 0x8a7   :  { %4212 = vrot.lane.b32.xlu1 %v10500_v10, %s9068_s24 }
 0x8a9   :  { %5368 = vrot.lane.b32.xlu0 %v10518_v42, %s9066_s29 }
 0x8ab   :  { %5366 = vrot.lane.b32.xlu1 %v10524_v47, %s9066_s29 }
 0x8ad   :  { %5390 = vrot.lane.b32.xlu0 %v10524_v47, %s9068_s24 }
 0x8af   :  { %5378 = vrot.lane.b32.xlu1 %v10524_v47, %s9067_s10 }
 0x8b3   :  { %5380 = vrot.lane.b32.xlu1 %v10518_v42, %s9067_s10 }
 0x8b7   :  { %5392 = vrot.lane.b32.xlu1 %v10518_v42, %s9068_s24 }
 0x8bb   :  { %5370 = vrot.lane.b32.xlu1 %v10540_v53, %s9066_s29 }
 0x8f7   :  { %v4183_v24 = vpop.permute.xlu0 %4182 }
 0x8f9   :  { %v4185_v8 = vpop.permute.xlu1 %4184 }
 0x8fb   :  { %v4195_v7 = vpop.permute.xlu0 %4194 }
 0x8fc   :  { %v4218_v48 = vcombine.low %v4001_v61, %v4195_v7  ;;  %v4219_v41 = vcombine.high %v4001_v61, %v4195_v7 }
 0x8fd   :  { %v4197_v1 = vpop.permute.xlu1 %4196 }
 0x8fe   :  { %v4226_v62 = vrot.slane %v4218_v48, %v9384_v11  ;;  %v4233_v50 = vrot.slane %v4219_v41, %v9384_v11  ;;  %v4286_v57 = vcombine.low %v4004_v15, %v4197_v1  ;;  %v4287_v38 = vcombine.high %v4004_v15, %v4197_v1 }
 0x8ff   :  { %v4207_v28 = vpop.permute.xlu0 %4206 }
 0x900   :  { %v4234_v46 = vcombine.low %v4183_v24, %v4207_v28  ;;  %v4235_v20 = vcombine.high %v4183_v24, %v4207_v28  ;;  %v4294_v34 = vrot.slane %v4286_v57, %v9384_v11  ;;  %v4301_v3 = vrot.slane %v4287_v38, %v9384_v11 }
 0x901   :  { %v4209_v32 = vpop.permute.xlu1 %4208 }
 0x902   :  { %v4242_v63 = vrot.slane %v4234_v46, %v9384_v11  ;;  %v4249_v60 = vrot.slane %v4235_v20, %v9384_v11  ;;  %v4302_v56 = vcombine.low %v4185_v8, %v4209_v32  ;;  %v4303_v26 = vcombine.high %v4185_v8, %v4209_v32 }
 0x903   :  { %v10548_v40 = vpop.permute.xlu0 %4778 }
 0x904   :  { %v4250_v39 = vcombine.low %v4226_v62, %v4242_v63  ;;  %v4251_v49 = vcombine.high %v4226_v62, %v4242_v63  ;;  %v4266_v2 = vcombine.low %v4233_v50, %v4249_v60  ;;  %v4267_v29 = vcombine.high %v4233_v50, %v4249_v60 }
 0x905   :  { %v4310_v5 = vrot.slane %v4302_v56, %v9384_v11  ;;  %v4317_v12 = vrot.slane %v4303_v26, %v9384_v11  ;;  %v10554_v25 = vpop.permute.xlu1 %4780 }
 0x906   :  { %v4258_v17 = vrot.slane %v4250_v39, %v9393_v23  ;;  %v4265_v44 = vrot.slane %v4251_v49, %v9393_v23  ;;  %v4274_v45 = vrot.slane %v4266_v2, %v9393_v23  ;;  %v4281_v9 = vrot.slane %v4267_v29, %v9393_v23 }
 0x907   :  { %v4318_v19 = vcombine.low %v4294_v34, %v4310_v5  ;;  %v4319_v30 = vcombine.high %v4294_v34, %v4310_v5  ;;  %v4334_v6 = vcombine.low %v4301_v3, %v4317_v12  ;;  %v4335_v43 = vcombine.high %v4301_v3, %v4317_v12  ;;  %v4791_v16 = vpop.permute.xlu0 %4790 }
 0x908   :  { %v4490_v36 = vcombine.low %v4258_v17, %v4265_v44  ;;  %v8223_v61 = vcombine.high %v4258_v17, %v4265_v44  ;;  %v4506_v55 = vcombine.low %v4274_v45, %v4281_v9  ;;  %v8224_v13 = vcombine.high %v4274_v45, %v4281_v9 }
 0x909   :  { %v4326_v15 = vrot.slane %v4318_v19, %v9393_v23  ;;  %v4333_v24 = vrot.slane %v4319_v30, %v9393_v23  ;;  %v4342_v8 = vrot.slane %v4334_v6, %v9393_v23  ;;  %v4349_v7 = vrot.slane %v4335_v43, %v9393_v23  ;;  %v4793_v48 = vpop.permute.xlu1 %4792 }
 0x90a   :  { %v4497_v41 = vrot.slane %v4490_v36, %v9384_v11  ;;  %v4505_v1 = vrot.slane %v8223_v61, %v9384_v11  ;;  %v4513_v28 = vrot.slane %v4506_v55, %v9384_v11  ;;  %v4521_v46 = vrot.slane %v8224_v13, %v9384_v11 }
 0x90b   :  { %v4558_v20 = vcombine.low %v4326_v15, %v4333_v24  ;;  %v8225_v62 = vcombine.high %v4326_v15, %v4333_v24  ;;  %v4574_v50 = vcombine.low %v4342_v8, %v4349_v7  ;;  %v8226_v57 = vcombine.high %v4342_v8, %v4349_v7  ;;  %v4803_v38 = vpop.permute.xlu0 %4802 }
 0x90c   :  { %v4522_v32 = vcombine.low %v4497_v41, %v4505_v1  ;;  %v4523_v63 = vcombine.high %v4497_v41, %v4505_v1  ;;  %v4538_v60 = vcombine.low %v4513_v28, %v4521_v46  ;;  %v4539_v56 = vcombine.high %v4513_v28, %v4521_v46 }
 0x90d   :  { %v4565_v26 = vrot.slane %v4558_v20, %v9384_v11  ;;  %v4573_v39 = vrot.slane %v8225_v62, %v9384_v11  ;;  %v10571_v49 = vrot.slane %v4574_v50, %v9384_v11  ;;  %v10574_v2 = vrot.slane %v8226_v57, %v9384_v11  ;;  %v4805_v29 = vpop.permute.xlu1 %4804 }
 0x90e   :  { %v10580_v3 = vsel %vm2137_vm1, %v10465_v27, 0  ;;  %v4946_v17 = vcombine.low %v10480_v14, %v4791_v16  ;;  %v4947_v44 = vcombine.high %v10480_v14, %v4791_v16  ;;  %v10587_v45 = vrot.slane %v4522_v32, %v9393_v23 }
 0x90f   :  { %v10576_v34 = vpop.permute.xlu0 %4186  ;;  %v4590_v5 = vcombine.low %v4565_v26, %v4573_v39  ;;  %v4606_v12 = vcombine.low %v10571_v49, %v10574_v2  ;;  %v10590_v9 = vrot.slane %v4523_v63, %v9393_v23  ;;  %v10593_v19 = vrot.slane %v4538_v60, %v9393_v23 }
 0x910   :  { %v10596_v27 = vrot.slane %v4539_v56, %v9393_v23  ;;  %v4591_v6 = vcombine.high %v4565_v26, %v4573_v39  ;;  %v4607_v43 = vcombine.high %v10571_v49, %v10574_v2  ;;  %v5014_v14 = vcombine.low %v10484_v54, %v4793_v48 }
 0x911   :  { %v10598_v30 = vpop.permute.xlu1 %4188  ;;  %v5015_v16 = vcombine.high %v10484_v54, %v4793_v48  ;;  %v4962_v36 = vcombine.low %v10548_v40, %v4803_v38  ;;  %v4963_v61 = vcombine.high %v10548_v40, %v4803_v38  ;;  %v5030_v55 = vcombine.low %v10554_v25, %v4805_v29 }
 0x912   :  { %v5031_v13 = vcombine.high %v10554_v25, %v4805_v29  ;;  %v10609_v24 = vrot.slane %v4590_v5, %v9393_v23  ;;  %v10612_v8 = vrot.slane %v4606_v12, %v9393_v23  ;;  %v4954_v7 = vrot.slane %v4946_v17, %v9384_v11 }
 0x913   :  { %v4199_v15 = vpop.permute.xlu0 %4198  ;;  %v4961_v41 = vrot.slane %v4947_v44, %v9384_v11  ;;  %v4970_v54 = vrot.slane %v4962_v36, %v9384_v11  ;;  %v4977_v48 = vrot.slane %v4963_v61, %v9384_v11  ;;  %v5038_v40 = vrot.slane %v5030_v55, %v9384_v11 }
 0x914   :  { %v5045_v1 = vrot.slane %v5031_v13, %v9384_v11  ;;  %v5022_v25 = vrot.slane %v5014_v14, %v9384_v11  ;;  %v5029_v28 = vrot.slane %v5015_v16, %v9384_v11  ;;  %v4354_v46 = vcombine.low %v10496_v0, %v4199_v15 }
 0x915   :  { %v4355_v20 = vcombine.high %v10496_v0, %v4199_v15  ;;  %v4201_v62 = vpop.permute.xlu1 %4200  ;;  %v4978_v50 = vcombine.low %v4954_v7, %v4970_v54  ;;  %v4979_v57 = vcombine.high %v4954_v7, %v4970_v54  ;;  %v4994_v38 = vcombine.low %v4961_v41, %v4977_v48 }
 0x916   :  { %v4995_v32 = vcombine.high %v4961_v41, %v4977_v48  ;;  %v5046_v60 = vcombine.low %v5022_v25, %v5038_v40  ;;  %v5047_v56 = vcombine.high %v5022_v25, %v5038_v40  ;;  %v5062_v26 = vcombine.low %v5029_v28, %v5045_v1 }
 0x917   :  { %v4211_v63 = vpop.permute.xlu0 %4210  ;;  %v5063_v39 = vcombine.high %v5029_v28, %v5045_v1  ;;  %v4986_v29 = vrot.slane %v4978_v50, %v9393_v23  ;;  %v4993_v5 = vrot.slane %v4979_v57, %v9393_v23  ;;  %v10627_v12 = vrot.slane %v4994_v38, %v9393_v23 }
 0x918   :  { %v10630_v17 = vrot.slane %v4995_v32, %v9393_v23  ;;  %v10633_v0 = vrot.slane %v5046_v60, %v9393_v23  ;;  %v10636_v44 = vrot.slane %v5047_v56, %v9393_v23  ;;  %v10639_v14 = vrot.slane %v5062_v26, %v9393_v23 }
 0x919   :  { %v10642_v16 = vrot.slane %v5063_v39, %v9393_v23  ;;  %v5218_v36 = vcombine.low %v4986_v29, %v4993_v5  ;;  %v8235_v61 = vcombine.high %v4986_v29, %v4993_v5  ;;  %v4622_v13 = vcombine.low %v10609_v24, %v10612_v8  ;;  %v4213_v40 = vpop.permute.xlu1 %4212 }
 0x91a   :  { %v5234_v55 = vcombine.low %v10627_v12, %v10630_v17  ;;  %v10651_v7 = vrot.slane %v4591_v6, %v9393_v23  ;;  %v4362_v41 = vrot.slane %v4354_v46, %v9384_v11  ;;  %v4422_v54 = vcombine.low %v10500_v10, %v4201_v62 }
 0x91b   :  { %v10648_v15 = vpop.permute.xlu0 %5368  ;;  %v4554_v48 = vcombine.low %v10587_v45, %v10593_v19  ;;  %v8236_v1 = vcombine.high %v10627_v12, %v10630_v17  ;;  %v5286_v25 = vcombine.low %v10633_v0, %v10636_v44  ;;  %v4369_v28 = vrot.slane %v4355_v20, %v9384_v11 }
 0x91c   :  { %v4423_v50 = vcombine.high %v10500_v10, %v4201_v62  ;;  %v10664_v6 = vrot.slane %v5218_v36, %v9384_v11  ;;  %v8237_v46 = vcombine.high %v10633_v0, %v10636_v44  ;;  %v5302_v57 = vcombine.low %v10639_v14, %v10642_v16 }
 0x91d   :  { %v8238_v38 = vcombine.high %v10639_v14, %v10642_v16  ;;  %v10673_v32 = vrot.slane %v8235_v61, %v9384_v11  ;;  %v10676_v60 = vrot.slane %v5234_v55, %v9384_v11  ;;  %v4762_v20 = vpack.c.bf16 %v4622_v13, %v4554_v48  ;;  %v10696_v13 = vpop.permute.xlu1 %5366 }
 0x91e   :  { %v4370_v10 = vcombine.low %v10576_v34, %v4211_v63  ;;  %v4430_v62 = vrot.slane %v4422_v54, %v9384_v11  ;;  %v4371_v56 = vcombine.high %v10576_v34, %v4211_v63  ;;  %v4438_v26 = vcombine.low %v10598_v30, %v4213_v40 }
 0x91f   :  { %v4439_v39 = vcombine.high %v10598_v30, %v4213_v40  ;;  %v10683_v29 = vpop.permute.xlu0 %5390  ;;  %v4437_v5 = vrot.slane %v4423_v50, %v9384_v11  ;;  %8608 = vmatmul.mubr.msk.bf16.vlgmr.msra.gmra.mrb[36].mxu0 %vm2137_vm1, %v4762_v20  ;;  %v4555_v61 = vcombine.high %v10587_v45, %v10593_v19  ;;  %v4623_v55 = vcombine.high %v10609_v24, %v10612_v8 }
 0x920   :  { %v4378_v36 = vrot.slane %v4370_v10, %v9384_v11  ;;  %8612 = vmatpush3.bf16.xpose.msra.mxu0 %v10580_v3  ;;  %v4385_v34 = vrot.slane %v4371_v56, %v9384_v11  ;;  %v4446_v30 = vrot.slane %v4438_v26, %v9384_v11  ;;  %8613 = vmatprep.mubr.msk.bf16.mxu0 %vm9070_vm0, %v11550_v52  ;;  %v6052_v54 = vsel %vm2137_vm1, %v10467_v18, 0 }
 0x921   :  { %v4453_v63 = vrot.slane %v4439_v39, %v9384_v11  ;;  %8617 = vmatprep.subr.bf16.mxu0 %v11550_v52  ;;  %v4763_v24 = vpack.c.bf16 %v4623_v55, %v4555_v61  ;;  %v5418_v3 = vcombine.low %v10696_v13, %v10683_v29  ;;  %v10758_v12 = vrot.slane %v8237_v46, %v9384_v11 }
 0x922   :  { %v4386_v45 = vcombine.low %v4362_v41, %v4378_v36  ;;  %v4387_v19 = vcombine.high %v4362_v41, %v4378_v36  ;;  %v4402_v8 = vcombine.low %v4369_v28, %v4385_v34  ;;  %v4403_v48 = vcombine.high %v4369_v28, %v4385_v34 }
 0x923   :  { %v4454_v40 = vcombine.low %v4430_v62, %v4446_v30  ;;  %v4455_v50 = vcombine.high %v4430_v62, %v4446_v30  ;;  %v4470_v56 = vcombine.low %v4437_v5, %v4453_v63  ;;  %v4471_v26 = vcombine.high %v4437_v5, %v4453_v63 }
 0x924   :  { %v4394_v20 = vrot.slane %v4386_v45, %v9393_v23  ;;  %v4401_v10 = vrot.slane %v4387_v19, %v9393_v23  ;;  %v4410_v18 = vrot.slane %v4402_v8, %v9393_v23  ;;  %v4417_v41 = vrot.slane %v4403_v48, %v9393_v23 }
 0x925   :  { %v4462_v39 = vrot.slane %v4454_v40, %v9393_v23  ;;  %v4469_v36 = vrot.slane %v4455_v50, %v9393_v23  ;;  %v4478_v28 = vrot.slane %v4470_v56, %v9393_v23  ;;  %v4485_v62 = vrot.slane %v4471_v26, %v9393_v23  ;;  %v5379_v40 = vpop.permute.xlu1 %5378 }
 0x926   :  { %v4626_v61 = vcombine.low %v4394_v20, %v4401_v10  ;;  %v8227_v55 = vcombine.high %v4394_v20, %v4401_v10  ;;  %v4642_v34 = vcombine.low %v4410_v18, %v4417_v41  ;;  %v8228_v30 = vcombine.high %v4410_v18, %v4417_v41 }
 0x927   :  { %v4694_v45 = vcombine.low %v4462_v39, %v4469_v36  ;;  %v8229_v19 = vcombine.high %v4462_v39, %v4469_v36  ;;  %v4710_v8 = vcombine.low %v4478_v28, %v4485_v62  ;;  %v8230_v48 = vcombine.high %v4478_v28, %v4485_v62  ;;  %8614 = vmatmul.mubr.msk.bf16.vlgmr.msra.gmra.mrb[40].mxu0 %vm2137_vm1, %v4763_v24 }
 0x928   :  { %v10714_v5 = vrot.slane %v4626_v61, %v9384_v11  ;;  %v10717_v63 = vrot.slane %v8227_v55, %v9384_v11  ;;  %v10721_v50 = vrot.slane %v4642_v34, %v9384_v11  ;;  %v10724_v20 = vrot.slane %v8228_v30, %v9384_v11  ;;  %8618 = vmatpush3.bf16.xpose.msra.mxu0 %v6052_v54 }
 0x929   :  { %v10727_v10 = vrot.slane %v4694_v45, %v9384_v11  ;;  %v10730_v56 = vrot.slane %v8229_v19, %v9384_v11  ;;  %v10736_v26 = vrot.slane %v8236_v1, %v9384_v11  ;;  %v10741_v18 = vrot.slane %v4710_v8, %v9384_v11  ;;  %8619 = vmatprep.mubr.msk.bf16.mxu0 %vm9070_vm0, %v11550_v52  ;;  %v5381_v2 = vpop.permute.xlu1 %5380 }
 0x92a   :  { %v4658_v24 = vcombine.low %v10714_v5, %v10717_v63  ;;  %v10744_v41 = vrot.slane %v8230_v48, %v9384_v11  ;;  %v10752_v54 = vrot.slane %v5286_v25, %v9384_v11  ;;  %v4674_v17 = vcombine.low %v10721_v50, %v10724_v20  ;;  %8623 = vmatprep.subr.bf16.mxu0 %v11550_v52 }
 0x92b   :  { %v4726_v1 = vcombine.low %v10727_v10, %v10730_v56  ;;  %v10769_v25 = vrot.slane %v5302_v57, %v9384_v11  ;;  %v10775_v0 = vrot.slane %v8238_v38, %v9384_v11  ;;  %v5419_v46 = vcombine.high %v10696_v13, %v10683_v29 }
 0x92c   :  { %v4742_v44 = vcombine.low %v10741_v18, %v10744_v41  ;;  %v10785_v39 = vrot.slane %v4607_v43, %v9393_v23  ;;  %v10788_v57 = vrot.slane %v4658_v24, %v9393_v23  ;;  %v10791_v36 = vrot.slane %v4674_v17, %v9393_v23 }
 0x92d   :  { %v5426_v14 = vrot.slane %v5418_v3, %v9384_v11  ;;  %v10797_v38 = vrot.slane %v4726_v1, %v9393_v23  ;;  %v5402_v49 = vcombine.low %v10524_v47, %v5379_v40  ;;  %v5403_v13 = vcombine.high %v10524_v47, %v5379_v40  ;;  %v5393_v16 = vpop.permute.xlu1 %5392 }
 0x92e   :  { %v10803_v43 = vrot.slane %v4742_v44, %v9393_v23  ;;  %v5250_v3 = vcombine.low %v10664_v6, %v10673_v32  ;;  %v5266_v61 = vcombine.low %v10676_v60, %v10736_v26  ;;  %v5433_v55 = vrot.slane %v5419_v46, %v9384_v11 }
 0x92f   :  { %v5410_v28 = vrot.slane %v5402_v49, %v9384_v11  ;;  %v5318_v62 = vcombine.low %v10752_v54, %v10758_v12  ;;  %v5334_v34 = vcombine.low %v10769_v25, %v10775_v0  ;;  %v4691_v30 = vcombine.high %v10788_v57, %v10791_v36 }
 0x930   :  { %v5417_v47 = vrot.slane %v5403_v13, %v9384_v11  ;;  %v5258_v45 = vrot.slane %v5250_v3, %v9393_v23  ;;  %v5274_v19 = vrot.slane %v5266_v61, %v9393_v23  ;;  %v5470_v46 = vcombine.low %v10518_v42, %v5381_v2 }
 0x931   :  { %v5434_v8 = vcombine.low %v5410_v28, %v5426_v14  ;;  %v5435_v48 = vcombine.high %v5410_v28, %v5426_v14  ;;  %v5326_v40 = vrot.slane %v5318_v62, %v9393_v23  ;;  %v5342_v24 = vrot.slane %v5334_v34, %v9393_v23 }
 0x932   :  { %v5450_v17 = vcombine.low %v5417_v47, %v5433_v55  ;;  %v5451_v1 = vcombine.high %v5417_v47, %v5433_v55  ;;  %v5283_v44 = vcombine.high %v5258_v45, %v5274_v19  ;;  %v5471_v3 = vcombine.high %v10518_v42, %v5381_v2 }
 0x933   :  { %v5442_v49 = vrot.slane %v5434_v8, %v9393_v23  ;;  %v5449_v29 = vrot.slane %v5435_v48, %v9393_v23  ;;  %v5351_v13 = vcombine.high %v5326_v40, %v5342_v24  ;;  %v4759_v14 = vcombine.high %v10797_v38, %v10803_v43 }
 0x934   :  { %v5458_v61 = vrot.slane %v5450_v17, %v9393_v23  ;;  %v5465_v28 = vrot.slane %v5451_v1, %v9393_v23  ;;  %v4556_v55 = vcombine.low %v10590_v9, %v10596_v27  ;;  %v4624_v8 = vcombine.low %v10651_v7, %v10785_v39 }
 0x935   :  { %v5674_v62 = vcombine.low %v5442_v49, %v5449_v29  ;;  %v8239_v34 = vcombine.high %v5442_v49, %v5449_v29  ;;  %v5359_v47 = vpack.c.bf16 %v5351_v13, %v5283_v44  ;;  %v5478_v42 = vrot.slane %v5470_v46, %v9384_v11 }
 0x936   :  { %v5690_v48 = vcombine.low %v5458_v61, %v5465_v28  ;;  %v5486_v2 = vcombine.low %v10648_v15, %v5393_v16  ;;  %v5487_v52 = vcombine.high %v10648_v15, %v5393_v16  ;;  %v8240_v35 = vcombine.high %v5458_v61, %v5465_v28 }
 0x937   :  { %v6193_v17 = vsel %vm2137_vm1, %v5359_v47, 0  ;;  %v5485_v1 = vrot.slane %v5471_v3, %v9384_v11  ;;  %v4764_v33 = vpack.c.bf16 %v4624_v8, %v4556_v55  ;;  %v10841_v37 = vrot.slane %v5674_v62, %v9384_v11 }
 0x938   :  { %v10844_v29 = vrot.slane %v8239_v34, %v9384_v11  ;;  %8636 = vmatpush3.bf16.xpose.msra.mxu1 %v6193_v17  ;;  %v5494_v44 = vrot.slane %v5486_v2, %v9384_v11  ;;  %v5501_v46 = vrot.slane %v5487_v52, %v9384_v11  ;;  %v10849_v49 = vrot.slane %v5690_v48, %v9384_v11 }
 0x939   :  { %8620 = vmatmul.mubr.msk.bf16.vlgmr.msra.gmra.mrb[44].mxu0 %vm2137_vm1, %v4764_v33  ;;  %v6099_v15 = vsel %vm2137_vm1, %v10469_v31, 0  ;;  %v11582_v16 = vmov 0.0   ;;  %v4557_v13 = vcombine.high %v10590_v9, %v10596_v27  ;;  %v4625_v3 = vcombine.high %v10651_v7, %v10785_v39 }
 0x93a   :  { %8647 = vmatprep.subr.bf16.mxu1 %v11582_v16  ;;  %8624 = vmatpush3.bf16.xpose.msra.mxu0 %v6099_v15  ;;  %v5502_v61 = vcombine.low %v5478_v42, %v5494_v44  ;;  %v5503_v28 = vcombine.high %v5478_v42, %v5494_v44  ;;  %v5518_v52 = vcombine.low %v5485_v1, %v5501_v46 }
 0x93b   :  { %v5519_v55 = vcombine.high %v5485_v1, %v5501_v46  ;;  %8625 = vmatprep.mubr.msk.bf16.mxu0 %vm9070_vm0, %v11582_v16  ;;  %8629 = vmatprep.subr.bf16.mxu0 %v11582_v16  ;;  %v5282_v33 = vcombine.low %v5258_v45, %v5274_v19  ;;  %v5350_v31 = vcombine.low %v5326_v40, %v5342_v24 }
 0x93c   :  { %v4767_v62 = vpack.c.bf16 %v4759_v14, %v4691_v30  ;;  %v5510_v34 = vrot.slane %v5502_v61, %v9393_v23  ;;  %v5517_v9 = vrot.slane %v5503_v28, %v9393_v23  ;;  %v5526_v27 = vrot.slane %v5518_v52, %v9393_v23 }
 0x93d   :  { %v5533_v7 = vrot.slane %v5519_v55, %v9393_v23  ;;  %v5358_v39 = vpack.c.bf16 %v5350_v31, %v5282_v33  ;;  %v5251_v47 = vcombine.high %v10664_v6, %v10673_v32  ;;  %v5267_v8 = vcombine.high %v10676_v60, %v10736_v26 }
 0x93e   :  { %v5319_v45 = vcombine.high %v10752_v54, %v10758_v12  ;;  %v5742_v19 = vcombine.low %v5510_v34, %v5517_v9  ;;  %v8241_v30 = vcombine.high %v5510_v34, %v5517_v9  ;;  %v5705_v14 = vrot.slane %v8240_v35, %v9384_v11 }
 0x93f   :  { %v5758_v40 = vcombine.low %v5526_v27, %v5533_v7  ;;  %v8242_v24 = vcombine.high %v5526_v27, %v5533_v7  ;;  %v4765_v48 = vpack.c.bf16 %v4625_v3, %v4557_v13  ;;  %8638 = vmatmul.mubr.msk.bf16.vlgmr.msra.gmra.mrb[56].mxu1 %vm2137_vm1, %v4767_v62  ;;  %v5265_v42 = vrot.slane %v5251_v47, %v9393_v23 }
 0x940   :  { %v5281_v2 = vrot.slane %v5267_v8, %v9393_v23  ;;  %v5749_v6 = vrot.slane %v5742_v19, %v9384_v11  ;;  %v5757_v32 = vrot.slane %v8241_v30, %v9384_v11  ;;  %v6146_v60 = vsel %vm2137_vm1, %v5358_v39, 0  ;;  %8649 = vmatprep.mubr.msk.bf16.mxu1 %vm9070_vm0, %v11582_v16 }
 0x941   :  { %v5333_v26 = vrot.slane %v5319_v45, %v9393_v23  ;;  %v5765_v35 = vrot.slane %v5758_v40, %v9384_v11  ;;  %v5773_v54 = vrot.slane %v8242_v24, %v9384_v11  ;;  %8626 = vmatmul.mubr.msk.bf16.vlgmr.msra.gmra.mrb[48].mxu0 %vm2137_vm1, %v4765_v48  ;;  %v5335_v12 = vcombine.high %v10769_v25, %v10775_v0 }
 0x942   :  { %v4758_v17 = vcombine.low %v10797_v38, %v10803_v43  ;;  %v4659_v1 = vcombine.high %v10714_v5, %v10717_v63  ;;  %v4675_v44 = vcombine.high %v10721_v50, %v10724_v20  ;;  %v11583_v46 = vcombine.high %v10727_v10, %v10730_v56  ;;  %8630 = vmatpush3.bf16.xpose.msra.mxu0 %v6146_v60 }
 0x943   :  { %8631 = vmatprep.mubr.msk.bf16.mxu0 %vm9070_vm0, %v11582_v16  ;;  %v11584_v25 = vcombine.high %v10741_v18, %v10744_v41  ;;  %v5285_v38 = vcombine.high %v5265_v42, %v5281_v2  ;;  %v5349_v5 = vrot.slane %v5335_v12, %v9393_v23  ;;  %8641 = vmatprep.subr.bf16.mxu0 %v11582_v16 }
 0x944   :  { %v4741_v15 = vrot.slane %v11583_v46, %v9393_v23  ;;  %v4690_v63 = vcombine.low %v10788_v57, %v10791_v36  ;;  %v5284_v50 = vcombine.low %v5265_v42, %v5281_v2  ;;  %v5706_v20 = vcombine.low %v10841_v37, %v10844_v29 }
 0x945   :  { %v4757_v0 = vrot.slane %v11584_v25, %v9393_v23  ;;  %v5722_v10 = vcombine.low %v10849_v49, %v5705_v14  ;;  %v5774_v56 = vcombine.low %v5749_v6, %v5757_v32  ;;  %v5353_v43 = vcombine.high %v5333_v26, %v5349_v5 }
 0x946   :  { %v4766_v13 = vpack.c.bf16 %v4758_v17, %v4690_v63  ;;  %v5352_v3 = vcombine.low %v5333_v26, %v5349_v5  ;;  %v5790_v18 = vcombine.low %v5765_v35, %v5773_v54  ;;  %v5714_v41 = vrot.slane %v5706_v20, %v9393_v23 }
 0x947   :  { %v5730_v61 = vrot.slane %v5722_v10, %v9393_v23  ;;  %v5782_v28 = vrot.slane %v5774_v56, %v9393_v23  ;;  %v5707_v57 = vcombine.high %v10841_v37, %v10844_v29  ;;  %v5361_v36 = vpack.c.bf16 %v5353_v43, %v5285_v38 }
 0x948   :  { %v5360_v52 = vpack.c.bf16 %v5352_v3, %v5284_v50  ;;  %v5798_v55 = vrot.slane %v5790_v18, %v9393_v23  ;;  %v5723_v33 = vcombine.high %v10849_v49, %v5705_v14  ;;  %v4673_v31 = vrot.slane %v4659_v1, %v9393_v23 }
 0x949   :  { %v4689_v62 = vrot.slane %v4675_v44, %v9393_v23  ;;  %v5721_v34 = vrot.slane %v5707_v57, %v9393_v23  ;;  %v5775_v9 = vcombine.high %v5749_v6, %v5757_v32  ;;  %v6287_v27 = vsel %vm2137_vm1, %v5361_v36, 0  ;;  %8632 = vmatmul.mubr.msk.bf16.vlgmr.msra.gmra.mrb[52].mxu0 %vm2137_vm1, %v4766_v13 }
 0x94a   :  { %v6240_v7 = vsel %vm2137_vm1, %v5360_v52, 0  ;;  %v5806_v37 = vcombine.low %v5782_v28, %v5798_v55  ;;  %v5807_v29 = vcombine.high %v5782_v28, %v5798_v55  ;;  %8648 = vmatpush3.bf16.xpose.msra.mxu1 %v6287_v27  ;;  %v5737_v39 = vrot.slane %v5723_v33, %v9393_v23  ;;  %8643 = vmatprep.mubr.msk.bf16.mxu0 %vm9070_vm0, %v11582_v16 }
 0x94b   :  { %8642 = vmatpush3.bf16.xpose.msra.mxu0 %v6240_v7  ;;  %v5789_v49 = vrot.slane %v5775_v9, %v9393_v23  ;;  %v5791_v47 = vcombine.high %v5765_v35, %v5773_v54  ;;  %v4761_v8 = vcombine.high %v4741_v15, %v4757_v0  ;;  %v4760_v45 = vcombine.low %v4741_v15, %v4757_v0 }
 0x94c   :  { %8653 = vmatprep.subr.bf16.mxu0 %v11582_v16  ;;  %v5738_v19 = vcombine.low %v5714_v41, %v5730_v61  ;;  %8659 = vmatprep.subr.bf16.mxu1 %v11582_v16  ;;  %v5739_v30 = vcombine.high %v5714_v41, %v5730_v61  ;;  %v5740_v40 = vcombine.low %v5721_v34, %v5737_v39 }
 0x94d   :  { %v5805_v24 = vrot.slane %v5791_v47, %v9393_v23  ;;  %v5741_v14 = vcombine.high %v5721_v34, %v5737_v39  ;;  %v4693_v48 = vcombine.high %v4673_v31, %v4689_v62  ;;  %v4692_v42 = vcombine.low %v4673_v31, %v4689_v62 }
 0x94e   :  { %v5946_v2 = vpack.c.bf16 %v5806_v37, %v5738_v19  ;;  %v5947_v6 = vpack.c.bf16 %v5807_v29, %v5739_v30 }
 0x94f   :  { %v5808_v32 = vcombine.low %v5789_v49, %v5805_v24  ;;  %v5809_v60 = vcombine.high %v5789_v49, %v5805_v24  ;;  %v4769_v26 = vpack.c.bf16 %v4761_v8, %v4693_v48  ;;  %v4768_v35 = vpack.c.bf16 %v4760_v45, %v4692_v42 }
 0x951   :  { %v10930_v54 = vpack.c.bf16 %v5808_v32, %v5740_v40  ;;  %v10932_v12 = vpack.c.bf16 %v5809_v60, %v5741_v14  ;;  %8650 = vmatmul.mubr.msk.bf16.vlgmr.msra.gmra.mrb[60].mxu1 %vm2137_vm1, %v4769_v26 }
 0x952   :  { %8644 = vmatmul.mubr.msk.bf16.vlgmr.msra.gmra.mrb[56].mxu0 %vm2137_vm1, %v4768_v35  ;;  %8660 = vmatpush3.bf16.msra.mxu1 %v5947_v6 }
 0x953   :  { %8654 = vmatpush3.bf16.msra.mxu0 %v5946_v2  ;;  %8655 = vmatprep.mubr.msk.bf16.mxu0 %vm9070_vm0, %v11582_v16 }
 0x954   :  { %8665 = vmatprep.subr.bf16.mxu0 %v11582_v16  ;;  %8661 = vmatprep.mubr.msk.bf16.mxu1 %vm9070_vm0, %v11582_v16 }
 0x955   :  { %8671 = vmatprep.subr.bf16.mxu1 %v11582_v16 }
 0x9f2   :  { %v5994_v17 = vpop.f32.mrb[36].mxu0 }
 0x9f3   :  { %v10942_v1 = vmul.f32 0.17677669, %v5994_v17  ;;  %v8609_v44 = vpop.f32.mrb[37].mxu0 }
 0x9f4   :  { %v5997_v46 = vpop.f32.mrb[38].mxu0 }
 0x9f5   :  { %v8610_v15 = vpop.f32.mrb[39].mxu0  ;;  %v6346_v25 = vsel %vm2557_vm3, %v10942_v1, -inf  ;;  %v10950_v36 = vmul.f32 0.17677669, %v5997_v46 }
 0x9f6   :  { %6347 = vmax.xlane.f32.xlu0 %v6346_v25 }
 0x9f7   :  { %v6349_v34 = vsel %vm2557_vm3, %v10950_v36, -inf }
 0x9fa   :  { %v6041_v0 = vpop.f32.mrb[40].mxu0 }
 0x9fb   :  { %v8615_v38 = vpop.f32.mrb[41].mxu0  ;;  %v10954_v33 = vmul.f32 0.17677669, %v6041_v0 }
 0x9fc   :  { %v6044_v5 = vpop.f32.mrb[42].mxu0 }
 0x9fd   :  { %v8616_v63 = vpop.f32.mrb[43].mxu0  ;;  %v6352_v9 = vsel %vm2557_vm3, %v10954_v33, -inf  ;;  %v10970_v2 = vmul.f32 0.17677669, %v6044_v5 }
 0x9fe   :  { %v11002_v63 = vadd.f32 %v10456_v59, %v10510_v21  ;;  %v11018_v59 = vpop.permute.xlu1 %5370 }
 0x9ff   :  { %v6355_v35 = vsel %vm2557_vm3, %v10970_v2, -inf }
 0xa0c   :  { %v6088_v50 = vpop.f32.mrb[44].mxu0 }
 0xa0d   :  { %v8621_v20 = vpop.f32.mrb[45].mxu0  ;;  %v10964_v40 = vmul.f32 0.17677669, %v6088_v50 }
 0xa0e   :  { %v6091_v10 = vpop.f32.mrb[46].mxu0 }
 0xa0f   :  { %v8622_v56 = vpop.f32.mrb[47].mxu0  ;;  %v6358_v60 = vsel %vm2557_vm3, %v10964_v40, -inf  ;;  %v10978_v26 = vmul.f32 0.17677669, %v6091_v10 }
 0xa11   :  { %v6361_v15 = vsel %vm2557_vm3, %v10978_v26, -inf }
 0xa12   :  { %v6229_v43 = vpop.f32.mrb[56].mxu1 }
 0xa13   :  { %v10946_v13 = vmul.f32 0.17677669, %v6229_v43  ;;  %v8639_v3 = vpop.f32.mrb[57].mxu1 }
 0xa14   :  { %v6135_v18 = vpop.f32.mrb[48].mxu0  ;;  %v6232_v41 = vpop.f32.mrb[58].mxu1 }
 0xa15   :  { %v8627_v61 = vpop.f32.mrb[49].mxu0  ;;  %v10948_v28 = vmul.f32 0.17677669, %v6232_v41  ;;  %v8640_v57 = vpop.f32.mrb[59].mxu1  ;;  %v6376_v55 = vsel %vm2557_vm3, %v10946_v13, -inf }
 0xa16   :  { %v6138_v52 = vpop.f32.mrb[50].mxu0  ;;  %6377 = vmax.xlane.f32.xlu1 %v6376_v55  ;;  %v10974_v32 = vmul.f32 0.17677669, %v6135_v18 }
 0xa17   :  { %v8628_v31 = vpop.f32.mrb[51].mxu0  ;;  %v6379_v62 = vsel %vm2557_vm3, %v10948_v28, -inf  ;;  %v10986_v46 = vmul.f32 0.17677669, %v6138_v52 }
 0xa18   :  { %6380 = vmax.xlane.f32.xlu0 %v6379_v62  ;;  %v6364_v44 = vsel %vm2557_vm3, %v10974_v32, -inf }
 0xa19   :  { %v6367_v38 = vsel %vm2557_vm3, %v10986_v46, -inf }
 0xa1a   :  { %6350 = vmax.xlane.f32.xlu1 %v6349_v34 }
 0xa1c   :  { %v6182_v27 = vpop.f32.mrb[52].mxu0  ;;  %6353 = vmax.xlane.f32.xlu0 %v6352_v9 }
 0xa1d   :  { %v8633_v7 = vpop.f32.mrb[53].mxu0  ;;  %v10982_v17 = vmul.f32 0.17677669, %v6182_v27 }
 0xa1e   :  { %v6185_v37 = vpop.f32.mrb[54].mxu0 }
 0xa1f   :  { %v8634_v29 = vpop.f32.mrb[55].mxu0  ;;  %v6370_v25 = vsel %vm2557_vm3, %v10982_v17, -inf  ;;  %v10992_v0 = vmul.f32 0.17677669, %v6185_v37 }
 0xa21   :  { %v6373_v5 = vsel %vm2557_vm3, %v10992_v0, -inf }
 0xa24   :  { %v6323_v39 = vpop.f32.mrb[60].mxu1 }
 0xa25   :  { %v6276_v49 = vpop.f32.mrb[56].mxu0  ;;  %v10962_v47 = vmul.f32 0.17677669, %v6323_v39  ;;  %v8651_v8 = vpop.f32.mrb[61].mxu1 }
 0xa26   :  { %v8645_v45 = vpop.f32.mrb[57].mxu0  ;;  %v6326_v19 = vpop.f32.mrb[62].mxu1  ;;  %v11006_v50 = vmul.f32 0.17677669, %v6276_v49 }
 0xa27   :  { %v6279_v30 = vpop.f32.mrb[58].mxu0  ;;  %v10966_v24 = vmul.f32 0.17677669, %v6326_v19  ;;  %v8652_v14 = vpop.f32.mrb[63].mxu1  ;;  %v6388_v48 = vsel %vm2557_vm3, %v10962_v47, -inf }
 0xa28   :  { %6389 = vmax.xlane.f32.xlu1 %v6388_v48  ;;  %v8646_v42 = vpop.f32.mrb[59].mxu0  ;;  %v6382_v20 = vsel %vm2557_vm3, %v11006_v50, -inf  ;;  %v11010_v10 = vmul.f32 0.17677669, %v6279_v30 }
 0xa29   :  { %v6391_v6 = vsel %vm2557_vm3, %v10966_v24, -inf }
 0xa2a   :  { %6392 = vmax.xlane.f32.xlu0 %v6391_v6  ;;  %v6385_v56 = vsel %vm2557_vm3, %v11010_v10, -inf }
 0xa2c   :  { %6359 = vmax.xlane.f32.xlu1 %v6358_v60 }
 0xa2e   :  { %6356 = vmax.xlane.f32.xlu0 %v6355_v35 }
 0xa30   :  { %6365 = vmax.xlane.f32.xlu1 %v6364_v44 }
 0xa32   :  { %6362 = vmax.xlane.f32.xlu0 %v6361_v15 }
 0xa34   :  { %6371 = vmax.xlane.f32.xlu1 %v6370_v25 }
 0xa36   :  { %6368 = vmax.xlane.f32.xlu0 %v6367_v38 }
 0xa3a   :  { %6374 = vmax.xlane.f32.xlu0 %v6373_v5 }
 0xa45   :  { %5382 = vrot.lane.b32.xlu1 %v10540_v53, %s9067_s10 }
 0xa50   :  { %5372 = vrot.lane.b32.xlu0 %v11002_v63, %s9066_s29 }
 0xa69   :  { %6383 = vmax.xlane.f32.xlu1 %v6382_v20 }
 0xa6f   :  { %6386 = vmax.xlane.f32.xlu0 %v6385_v56 }
 0xa7a   :  { %5384 = vrot.lane.b32.xlu1 %v11002_v63, %s9067_s10 }
 0xa83   :  { %v6348_v21 = vpop.xlane.xlu0 %6347 }
 0xa84   :  { %v6394_v43 = vsub.f32 %v10942_v1, %v6348_v21 }
 0xa85   :  { %5394 = vrot.lane.b32.xlu0 %v10540_v53, %s9068_s24 }
 0xa86   :  { %v6410_v57 = vmul.f32 1.442695, %v6394_v43 }
 0xaa3   :  { %v6378_v3 = vpop.xlane.xlu1 %6377 }
 0xaa4   :  { %v6404_v18 = vsub.f32 %v10946_v13, %v6378_v3 }
 0xaa5   :  { %v6381_v41 = vpop.xlane.xlu0 %6380 }
 0xaa6   :  { %v6405_v61 = vsub.f32 %v10948_v28, %v6381_v41  ;;  %v6430_v52 = vmul.f32 1.442695, %v6404_v18 }
 0xaa7   :  { %v6351_v31 = vpop.xlane.xlu1 %6350 }
 0xaa8   :  { %v6432_v55 = vmul.f32 1.442695, %v6405_v61  ;;  %8981 = vpow2.f32 %v6430_v52  ;;  %v6395_v62 = vsub.f32 %v10950_v36, %v6351_v31 }
 0xaa9   :  { %v6354_v34 = vpop.xlane.xlu0 %6353 }
 0xaaa   :  { %8983 = vpow2.f32 %v6432_v55  ;;  %v6396_v9 = vsub.f32 %v10954_v33, %v6354_v34  ;;  %v6412_v27 = vmul.f32 1.442695, %v6395_v62 }
 0xaab   :  { %8985 = vpow2.f32 %v6410_v57 }
 0xaac   :  { %v6414_v1 = vmul.f32 1.442695, %v6396_v9  ;;  %8987 = vpow2.f32 %v6412_v27 }
 0xaae   :  { %8989 = vpow2.f32 %v6414_v1 }
 0xab2   :  { %v11025_v13 = vpop.eup %8981 }
 0xab3   :  { %v6472_v28 = vsel %vm2557_vm3, %v11025_v13, 0.0 }
 0xab4   :  { %v11027_v7 = vpop.eup %8983  ;;  %6473 = vadd.xlane.f32.xlu1 %v6472_v28 }
 0xab5   :  { %v11031_v37 = vpop.eup %8985  ;;  %v11033_v29 = vpop.xlane.xlu1 %6389  ;;  %v6475_v36 = vsel %vm2557_vm3, %v11027_v7, 0.0 }
 0xab6   :  { %6476 = vadd.xlane.f32.xlu0 %v6475_v36  ;;  %v11037_v33 = vpop.eup %8987  ;;  %v6442_v49 = vsel %vm2557_vm3, %v11031_v37, 0.0  ;;  %v6408_v28 = vsub.f32 %v10962_v47, %v11033_v29 }
 0xab7   :  { %v11039_v39 = vpop.xlane.xlu0 %6392  ;;  %v6445_v19 = vsel %vm2557_vm3, %v11037_v33, 0.0 }
 0xab8   :  { %v11043_v8 = vpop.eup %8989  ;;  %6443 = vadd.xlane.f32.xlu1 %v6442_v49 }
 0xab9   :  { %v6360_v45 = vpop.xlane.xlu1 %6359  ;;  %v6448_v42 = vsel %vm2557_vm3, %v11043_v8, 0.0 }
 0xaba   :  { %v6398_v30 = vsub.f32 %v10964_v40, %v6360_v45  ;;  %6446 = vadd.xlane.f32.xlu0 %v6445_v19  ;;  %v6409_v45 = vsub.f32 %v10966_v24, %v11039_v39 }
 0xabb   :  { %v6357_v14 = vpop.xlane.xlu0 %6356 }
 0xabc   :  { %v6397_v48 = vsub.f32 %v10970_v2, %v6357_v14  ;;  %6449 = vadd.xlane.f32.xlu1 %v6448_v42  ;;  %v6418_v60 = vmul.f32 1.442695, %v6398_v30  ;;  %v6438_v30 = vmul.f32 1.442695, %v6408_v28 }
 0xabd   :  { %v6366_v6 = vpop.xlane.xlu1 %6365 }
 0xabe   :  { %v6416_v35 = vmul.f32 1.442695, %v6397_v48  ;;  %v6400_v44 = vsub.f32 %v10974_v32, %v6366_v6  ;;  %v6440_v48 = vmul.f32 1.442695, %v6409_v45 }
 0xabf   :  { %v6363_v15 = vpop.xlane.xlu0 %6362 }
 0xac0   :  { %8991 = vpow2.f32 %v6416_v35  ;;  %v6399_v25 = vsub.f32 %v10978_v26, %v6363_v15  ;;  %v6422_v38 = vmul.f32 1.442695, %v6400_v44 }
 0xac1   :  { %v6372_v5 = vpop.xlane.xlu1 %6371  ;;  %8993 = vpow2.f32 %v6418_v60 }
 0xac2   :  { %v6420_v40 = vmul.f32 1.442695, %v6399_v25  ;;  %v6402_v20 = vsub.f32 %v10982_v17, %v6372_v5 }
 0xac3   :  { %v6369_v2 = vpop.xlane.xlu0 %6368 }
 0xac4   :  { %8995 = vpow2.f32 %v6420_v40  ;;  %v6426_v56 = vmul.f32 1.442695, %v6402_v20  ;;  %v6401_v21 = vsub.f32 %v10986_v46, %v6369_v2 }
 0xac5   :  { %8997 = vpow2.f32 %v6422_v38  ;;  %v5383_v1 = vpop.permute.xlu1 %5382 }
 0xac6   :  { %8999 = vpow2.f32 %v6426_v56  ;;  %v6424_v43 = vmul.f32 1.442695, %v6401_v21 }
 0xac7   :  { %v6375_v3 = vpop.xlane.xlu0 %6374 }
 0xac8   :  { %v6403_v32 = vsub.f32 %v10992_v0, %v6375_v3  ;;  %9001 = vpow2.f32 %v6424_v43 }
 0xaca   :  { %v11056_v18 = vpop.eup %8991  ;;  %v6428_v26 = vmul.f32 1.442695, %v6403_v32 }
 0xacb   :  { %v6451_v41 = vsel %vm2557_vm3, %v11056_v18, 0.0  ;;  %v11060_v61 = vpop.eup %8993  ;;  %v11091_v19 = vpop.permute.xlu0 %5372 }
 0xacc   :  { %6452 = vadd.xlane.f32.xlu0 %v6451_v41  ;;  %9003 = vpow2.f32 %v6428_v26  ;;  %v6454_v57 = vsel %vm2557_vm3, %v11060_v61, 0.0  ;;  %v5538_v41 = vcombine.low %v10540_v53, %v5383_v1 }
 0xace   :  { %v11062_v17 = vpop.eup %8995 }
 0xacf   :  { %v11064_v46 = vpop.eup %8997  ;;  %v6457_v0 = vsel %vm2557_vm3, %v11062_v17, 0.0 }
 0xad0   :  { %v11070_v52 = vpop.eup %8999  ;;  %6455 = vadd.xlane.f32.xlu0 %v6454_v57  ;;  %6458 = vadd.xlane.f32.xlu1 %v6457_v0  ;;  %v6460_v55 = vsel %vm2557_vm3, %v11064_v46, 0.0 }
 0xad1   :  { %v6466_v31 = vsel %vm2557_vm3, %v11070_v52, 0.0 }
 0xad2   :  { %v11076_v62 = vpop.eup %9001 }
 0xad3   :  { %v6463_v34 = vsel %vm2557_vm3, %v11076_v62, 0.0 }
 0xad4   :  { %6461 = vadd.xlane.f32.xlu0 %v6460_v55  ;;  %6467 = vadd.xlane.f32.xlu1 %v6466_v31  ;;  %v5546_v55 = vrot.slane %v5538_v41, %v9384_v11 }
 0xad6   :  { %v11080_v9 = vpop.eup %9003 }
 0xad7   :  { %v6469_v27 = vsel %vm2557_vm3, %v11080_v9, 0.0 }
 0xad8   :  { %6464 = vadd.xlane.f32.xlu0 %v6463_v34 }
 0xadc   :  { %6470 = vadd.xlane.f32.xlu0 %v6469_v27 }
 0xae5   :  { %5396 = vrot.lane.b32.xlu1 %v11002_v63, %s9068_s24 }
 0xaf6   :  { %v6384_v36 = vpop.xlane.xlu1 %6383 }
 0xaf7   :  { %v6406_v49 = vsub.f32 %v11006_v50, %v6384_v36 }
 0xaf9   :  { %v6434_v14 = vmul.f32 1.442695, %v6406_v49 }
 0xafa   :  { %v11110_v15 = vpop.permute.xlu1 %5384 }
 0xafb   :  { %9005 = vpow2.f32 %v6434_v14 }
 0xafc   :  { %v6387_v42 = vpop.xlane.xlu0 %6386  ;;  %9007 = vpow2.f32 %v6438_v30 }
 0xafd   :  { %v6407_v6 = vsub.f32 %v11010_v10, %v6387_v42  ;;  %9009 = vpow2.f32 %v6440_v48  ;;  %v5606_v48 = vcombine.low %v11002_v63, %v11110_v15 }
 0xaff   :  { %v6436_v60 = vmul.f32 1.442695, %v6407_v6 }
 0xb00   :  { %v5395_v25 = vpop.permute.xlu0 %5394 }
 0xb01   :  { %9011 = vpow2.f32 %v6436_v60  ;;  %v5554_v3 = vcombine.low %v11018_v59, %v5395_v25  ;;  %v5555_v57 = vcombine.high %v11018_v59, %v5395_v25 }
 0xb03   :  { %v5569_v59 = vrot.slane %v5555_v57, %v9384_v11 }
 0xb05   :  { %v11094_v47 = vpop.eup %9005 }
 0xb06   :  { %v6478_v50 = vsel %vm2557_vm3, %v11094_v47, 0.0  ;;  %v11098_v29 = vpop.eup %9007 }
 0xb07   :  { %6479 = vadd.xlane.f32.xlu0 %v6478_v50  ;;  %v11100_v24 = vpop.eup %9009  ;;  %v6484_v39 = vsel %vm2557_vm3, %v11098_v29, 0.0  ;;  %v5607_v50 = vcombine.high %v11002_v63, %v11110_v15 }
 0xb08   :  { %v6487_v44 = vsel %vm2557_vm3, %v11100_v24, 0.0 }
 0xb09   :  { %v5621_v15 = vrot.slane %v5607_v50, %v9384_v11 }
 0xb0b   :  { %v11104_v35 = vpop.eup %9011  ;;  %6485 = vadd.xlane.f32.xlu0 %v6484_v39 }
 0xb0c   :  { %v6481_v10 = vsel %vm2557_vm3, %v11104_v35, 0.0 }
 0xb0d   :  { %6482 = vadd.xlane.f32.xlu1 %v6481_v10 }
 0xb0f   :  { %6488 = vadd.xlane.f32.xlu0 %v6487_v44 }
 0xb41   :  { %v6474_v38 = vpop.xlane.xlu1 %6473 }
 0xb43   :  { %v11112_v5 = vpop.xlane.xlu0 %6476 }
 0xb45   :  { %v6444_v40 = vpop.xlane.xlu1 %6443 }
 0xb46   :  { %9013 = vrcp.f32 %v6444_v40 }
 0xb47   :  { %v6447_v20 = vpop.xlane.xlu0 %6446 }
 0xb48   :  { %9015 = vrcp.f32 %v6447_v20 }
 0xb49   :  { %v6450_v32 = vpop.xlane.xlu1 %6449 }
 0xb4a   :  { %9017 = vrcp.f32 %v6450_v32 }
 0xb50   :  { %v9014_v2 = vpop.eup %9013 }
 0xb51   :  { %v6506_v21 = vmul.f32 %v9014_v2, %v11031_v37  ;;  %v5539_v37 = vcombine.high %v10540_v53, %v5383_v1 }
 0xb52   :  { %v9016_v56 = vpop.eup %9015 }
 0xb53   :  { %v6507_v43 = vmul.f32 %v9016_v56, %v11037_v33  ;;  %v5562_v33 = vrot.slane %v5554_v3, %v9384_v11  ;;  %v5553_v31 = vrot.slane %v5539_v37, %v9384_v11 }
 0xb54   :  { %v9018_v14 = vpop.eup %9017 }
 0xb55   :  { %v6522_v26 = vpack.c.bf16 %v6507_v43, %v6506_v21  ;;  %v5570_v34 = vcombine.low %v5546_v55, %v5562_v33  ;;  %v5571_v27 = vcombine.high %v5546_v55, %v5562_v33  ;;  %v5586_v36 = vcombine.low %v5553_v31, %v5569_v59 }
 0xb56   :  { %v5587_v49 = vcombine.high %v5553_v31, %v5569_v59  ;;  %v6508_v44 = vmul.f32 %v9018_v14, %v11043_v8  ;;  %v5614_v21 = vrot.slane %v5606_v48, %v9384_v11 }
 0xb57   :  { %8656 = vmatmul.mubr.msk.bf16.vlgmr.msra.gmra.mrb[60].mxu0 %vm2557_vm3, %v6522_v26  ;;  %v5578_v53 = vrot.slane %v5570_v34, %v9393_v23  ;;  %v5585_v1 = vrot.slane %v5571_v27, %v9393_v23  ;;  %v5594_v42 = vrot.slane %v5586_v36, %v9393_v23 }
 0xb58   :  { %8666 = vmatpush3.bf16.msra.mxu0 %v10930_v54  ;;  %8667 = vmatprep.mubr.msk.bf16.mxu0 %vm9070_vm0, %v11582_v16  ;;  %v5601_v6 = vrot.slane %v5587_v49, %v9393_v23 }
 0xb59   :  { %v6453_v0 = vpop.xlane.xlu0 %6452  ;;  %8677 = vmatprep.subr.bf16.mxu0 %v11582_v16  ;;  %v5810_v39 = vcombine.low %v5578_v53, %v5585_v1  ;;  %v8243_v10 = vcombine.high %v5578_v53, %v5585_v1 }
 0xb5a   :  { %9019 = vrcp.f32 %v6453_v0  ;;  %v5826_v43 = vcombine.low %v5594_v42, %v5601_v6  ;;  %v8244_v3 = vcombine.high %v5594_v42, %v5601_v6 }
 0xb5b   :  { %v5817_v41 = vrot.slane %v5810_v39, %v9384_v11  ;;  %v5825_v57 = vrot.slane %v8243_v10, %v9384_v11 }
 0xb5c   :  { %v5833_v59 = vrot.slane %v5826_v43, %v9384_v11  ;;  %v5841_v31 = vrot.slane %v8244_v3, %v9384_v11 }
 0xb5d   :  { %v6459_v54 = vpop.xlane.xlu1 %6458  ;;  %v6456_v28 = vpop.xlane.xlu0 %6455  ;;  %v5842_v49 = vcombine.low %v5817_v41, %v5825_v57 }
 0xb5e   :  { %9021 = vrcp.f32 %v6459_v54 }
 0xb5f   :  { %9023 = vrcp.f32 %v6456_v28 }
 0xb61   :  { %v6468_v45 = vpop.xlane.xlu1 %6467  ;;  %v6462_v30 = vpop.xlane.xlu0 %6461 }
 0xb62   :  { %9025 = vrcp.f32 %v6462_v30  ;;  %v5858_v30 = vcombine.low %v5833_v59, %v5841_v31 }
 0xb64   :  { %v9020_v60 = vpop.eup %9019 }
 0xb65   :  { %v6509_v25 = vmul.f32 %v9020_v60, %v11056_v18  ;;  %v5397_v40 = vpop.permute.xlu1 %5396  ;;  %v6465_v20 = vpop.xlane.xlu0 %6464 }
 0xb66   :  { %v5622_v2 = vcombine.low %v11091_v19, %v5397_v40  ;;  %v5623_v56 = vcombine.high %v11091_v19, %v5397_v40  ;;  %9027 = vrcp.f32 %v6465_v20  ;;  %v5859_v40 = vcombine.high %v5833_v59, %v5841_v31 }
 0xb67   :  { %v6523_v32 = vpack.c.bf16 %v6509_v25, %v6508_v44  ;;  %9029 = vrcp.f32 %v6474_v38  ;;  %v5850_v44 = vrot.slane %v5842_v49, %v9393_v23 }
 0xb68   :  { %v9022_v63 = vpop.eup %9021  ;;  %v5630_v8 = vrot.slane %v5622_v2, %v9384_v11  ;;  %v5637_v18 = vrot.slane %v5623_v56, %v9384_v11  ;;  %9031 = vrcp.f32 %v11112_v5 }
 0xb69   :  { %v9024_v26 = vpop.eup %9023  ;;  %v6511_v19 = vmul.f32 %v9022_v63, %v11062_v17  ;;  %8662 = vmatmul.mubr.msk.bf16.vlgmr.msra.gmra.mrb[64].mxu1 %vm2557_vm3, %v6523_v32  ;;  %v6471_v37 = vpop.xlane.xlu0 %6470 }
 0xb6a   :  { %v6510_v33 = vmul.f32 %v9024_v26, %v11060_v61  ;;  %v5638_v0 = vcombine.low %v5614_v21, %v5630_v8  ;;  %v5639_v38 = vcombine.high %v5614_v21, %v5630_v8  ;;  %v5654_v55 = vcombine.low %v5621_v15, %v5637_v18  ;;  %8672 = vmatpush3.bf16.msra.mxu1 %v10932_v12 }
 0xb6b   :  { %v5655_v34 = vcombine.high %v5621_v15, %v5637_v18  ;;  %9033 = vrcp.f32 %v6471_v37  ;;  %8673 = vmatprep.mubr.msk.bf16.mxu1 %vm9070_vm0, %v11582_v16  ;;  %8683 = vmatprep.subr.bf16.mxu1 %v11582_v16  ;;  %v5866_v21 = vrot.slane %v5858_v30, %v9393_v23  ;;  %v5873_v18 = vrot.slane %v5859_v40, %v9393_v23 }
 0xb6c   :  { %v5646_v17 = vrot.slane %v5638_v0, %v9393_v23  ;;  %v5653_v61 = vrot.slane %v5639_v38, %v9393_v23  ;;  %v5662_v5 = vrot.slane %v5654_v55, %v9393_v23  ;;  %v6524_v27 = vpack.c.bf16 %v6511_v19, %v6510_v33  ;;  %v9026_v54 = vpop.eup %9025 }
 0xb6d   :  { %9035 = vrcp.f32 %v6468_v45  ;;  %v5669_v12 = vrot.slane %v5655_v34, %v9393_v23  ;;  %v5843_v45 = vcombine.high %v5817_v41, %v5825_v57  ;;  %v6512_v6 = vmul.f32 %v9026_v54, %v11064_v46 }
 0xb6e   :  { %v5878_v28 = vcombine.low %v5646_v17, %v5653_v61  ;;  %v8245_v36 = vcombine.high %v5646_v17, %v5653_v61  ;;  %8668 = vmatmul.mubr.msk.bf16.vlgmr.msra.gmra.mrb[64].mxu0 %vm2557_vm3, %v6524_v27  ;;  %v5874_v41 = vcombine.low %v5850_v44, %v5866_v21  ;;  %v5875_v19 = vcombine.high %v5850_v44, %v5866_v21 }
 0xb6f   :  { %v5894_v53 = vcombine.low %v5662_v5, %v5669_v12  ;;  %v8246_v1 = vcombine.high %v5662_v5, %v5669_v12  ;;  %8679 = vmatprep.mubr.msk.bf16.mxu0 %vm9070_vm0, %v11582_v16  ;;  %v5857_v8 = vrot.slane %v5843_v45, %v9393_v23 }
 0xb70   :  { %v9028_v14 = vpop.eup %9027  ;;  %v5885_v48 = vrot.slane %v5878_v28, %v9384_v11  ;;  %v5893_v42 = vrot.slane %v8245_v36, %v9384_v11 }
 0xb71   :  { %v5901_v60 = vrot.slane %v5894_v53, %v9384_v11  ;;  %v5909_v50 = vrot.slane %v8246_v1, %v9384_v11  ;;  %v6513_v39 = vmul.f32 %v9028_v14, %v11076_v62  ;;  %v9030_v10 = vpop.eup %9029  ;;  %v5876_v61 = vcombine.low %v5857_v8, %v5873_v18 }
 0xb72   :  { %v5910_v25 = vcombine.low %v5885_v48, %v5893_v42  ;;  %v5911_v20 = vcombine.high %v5885_v48, %v5893_v42  ;;  %v9032_v2 = vpop.eup %9031  ;;  %v6516_v34 = vmul.f32 %v9030_v10, %v11025_v13  ;;  %v5877_v5 = vcombine.high %v5857_v8, %v5873_v18 }
 0xb73   :  { %v6525_v56 = vpack.c.bf16 %v6513_v39, %v6512_v6  ;;  %v5926_v43 = vcombine.low %v5901_v60, %v5909_v50  ;;  %v5927_v3 = vcombine.high %v5901_v60, %v5909_v50  ;;  %v6517_v33 = vmul.f32 %v9032_v2, %v11027_v7 }
 0xb74   :  { %v5918_v46 = vrot.slane %v5910_v25, %v9393_v23  ;;  %v5925_v62 = vrot.slane %v5911_v20, %v9393_v23 }
 0xb75   :  { %v9034_v32 = vpop.eup %9033  ;;  %8674 = vmatmul.mubr.msk.bf16.vlgmr.msra.gmra.mrb[68].mxu1 %vm2557_vm3, %v6525_v56  ;;  %v5934_v63 = vrot.slane %v5926_v43, %v9393_v23  ;;  %v5941_v15 = vrot.slane %v5927_v3, %v9393_v23  ;;  %v6527_v12 = vpack.c.bf16 %v6517_v33, %v6516_v34 }
 0xb76   :  { %8685 = vmatprep.mubr.msk.bf16.mxu1 %vm9070_vm0, %v11582_v16  ;;  %v6515_v0 = vmul.f32 %v9034_v32, %v11080_v9 }
 0xb77   :  { %v9036_v26 = vpop.eup %9035  ;;  %v5942_v57 = vcombine.low %v5918_v46, %v5934_v63  ;;  %v5943_v37 = vcombine.high %v5918_v46, %v5934_v63  ;;  %v5944_v59 = vcombine.low %v5925_v62, %v5941_v15  ;;  %v5945_v31 = vcombine.high %v5925_v62, %v5941_v15 }
 0xb78   :  { %v6514_v17 = vmul.f32 %v9036_v26, %v11070_v52 }
 0xb79   :  { %v5950_v38 = vpack.c.bf16 %v5942_v57, %v5874_v41  ;;  %v5951_v55 = vpack.c.bf16 %v5943_v37, %v5875_v19  ;;  %v5952_v7 = vpack.c.bf16 %v5944_v59, %v5876_v61  ;;  %v5953_v9 = vpack.c.bf16 %v5945_v31, %v5877_v5 }
 0xb7a   :  { %v6526_v27 = vpack.c.bf16 %v6515_v0, %v6514_v17 }
 0xb7b   :  { %8678 = vmatpush3.bf16.msra.mxu0 %v5950_v38  ;;  %8684 = vmatpush3.bf16.msra.mxu1 %v5951_v55 }
 0xb7c   :  { %8689 = vmatprep.subr.bf16.mxu0 %v11582_v16  ;;  %8695 = vmatprep.subr.bf16.mxu1 %v11582_v16 }
 0xb7e   :  { %8680 = vmatmul.mubr.msk.bf16.vlgmr.msra.gmra.mrb[68].mxu0 %vm2557_vm3, %v6526_v27  ;;  %8686 = vmatmul.mubr.msk.bf16.vlgmr.msra.gmra.mrb[72].mxu1 %vm2557_vm3, %v6527_v12 }
 0xb7f   :  { %8690 = vmatpush3.bf16.msra.mxu0 %v5952_v7  ;;  %8696 = vmatpush3.bf16.msra.mxu1 %v5953_v9 }
 0xb80   :  { %8691 = vmatprep.mubr.msk.bf16.mxu0 %vm9070_vm0, %v11582_v16  ;;  %8697 = vmatprep.mubr.msk.bf16.mxu1 %vm9070_vm0, %v11582_v16 }
 0xb94   :  { %v6480_v13 = vpop.xlane.xlu0 %6479 }
 0xb95   :  { %9037 = vrcp.f32 %v6480_v13 }
 0xb98   :  { %v6486_v52 = vpop.xlane.xlu0 %6485 }
 0xb99   :  { %9039 = vrcp.f32 %v6486_v52 }
 0xb9a   :  { %v6483_v54 = vpop.xlane.xlu1 %6482 }
 0xb9b   :  { %9041 = vrcp.f32 %v6483_v54 }
 0xb9c   :  { %v6489_v28 = vpop.xlane.xlu0 %6488 }
 0xb9d   :  { %9043 = vrcp.f32 %v6489_v28 }
 0xb9f   :  { %v9038_v36 = vpop.eup %9037 }
 0xba0   :  { %v6518_v1 = vmul.f32 %v9038_v36, %v11094_v47 }
 0xba3   :  { %v9040_v49 = vpop.eup %9039 }
 0xba4   :  { %v6520_v48 = vmul.f32 %v9040_v49, %v11098_v29 }
 0xba5   :  { %v9042_v53 = vpop.eup %9041 }
 0xba6   :  { %v6519_v30 = vmul.f32 %v9042_v53, %v11104_v35 }
 0xba7   :  { %v9044_v14 = vpop.eup %9043 }
 0xba8   :  { %v6521_v16 = vmul.f32 %v9044_v14, %v11100_v24  ;;  %v6528_v42 = vpack.c.bf16 %v6519_v30, %v6518_v1 }
 0xbaa   :  { %8692 = vmatmul.mubr.msk.bf16.vlgmr.msra.gmra.mrb[72].mxu0 %vm2557_vm3, %v6528_v42  ;;  %v6529_v45 = vpack.c.bf16 %v6521_v16, %v6520_v48 }
 0xbac   :  { %8698 = vmatmul.mubr.msk.bf16.vlgmr.msra.gmra.mrb[76].mxu1 %vm2557_vm3, %v6529_v45 }
 0xbad   :  { %7820 = vmatprep.mubr.bf16.mxu1 %v11577_v58 }
 0xc2a   :  { %v6567_v6 = vpop.f32.mrb[60].mxu0 }
 0xc2b   :  { %v8657_v60 = vpop.f32.mrb[61].mxu0 }
 0xc2c   :  { %v6570_v50 = vpop.f32.mrb[62].mxu0 }
 0xc2d   :  { %v8658_v39 = vpop.f32.mrb[63].mxu0 }
 0xc3c   :  { %v6611_v47 = vpop.f32.mrb[64].mxu1 }
 0xc3d   :  { %v8663_v10 = vpop.f32.mrb[65].mxu1 }
 0xc3e   :  { %v6614_v35 = vpop.f32.mrb[66].mxu1 }
 0xc3f   :  { %v8664_v44 = vpop.f32.mrb[67].mxu1 }
 0xc41   :  { %v6655_v25 = vpop.f32.mrb[64].mxu0 }
 0xc42   :  { %v6882_v29 = vcombine.low %v6567_v6, %v6655_v25  ;;  %v6883_v40 = vcombine.high %v6567_v6, %v6655_v25  ;;  %v8669_v24 = vpop.f32.mrb[65].mxu0 }
 0xc43   :  { %v6658_v20 = vpop.f32.mrb[66].mxu0 }
 0xc44   :  { %v6950_v2 = vcombine.low %v6570_v50, %v6658_v20  ;;  %v6951_v56 = vcombine.high %v6570_v50, %v6658_v20  ;;  %v8670_v21 = vpop.f32.mrb[67].mxu0  ;;  %v6890_v63 = vrot.slane %v6882_v29, %v9384_v11  ;;  %v6897_v62 = vrot.slane %v6883_v40, %v9384_v11 }
 0xc46   :  { %v6958_v38 = vrot.slane %v6950_v2, %v9384_v11  ;;  %v6965_v55 = vrot.slane %v6951_v56, %v9384_v11 }
 0xc48   :  { %v6699_v43 = vpop.f32.mrb[68].mxu1 }
 0xc49   :  { %v6898_v3 = vcombine.low %v6611_v47, %v6699_v43  ;;  %v6899_v46 = vcombine.high %v6611_v47, %v6699_v43  ;;  %v8675_v32 = vpop.f32.mrb[69].mxu1 }
 0xc4a   :  { %v6702_v15 = vpop.f32.mrb[70].mxu1 }
 0xc4b   :  { %v6906_v8 = vrot.slane %v6898_v3, %v9384_v11  ;;  %v6913_v18 = vrot.slane %v6899_v46, %v9384_v11  ;;  %v6966_v26 = vcombine.low %v6614_v35, %v6702_v15  ;;  %v6967_v41 = vcombine.high %v6614_v35, %v6702_v15  ;;  %v8676_v57 = vpop.f32.mrb[71].mxu1 }
 0xc4d   :  { %v6914_v19 = vcombine.low %v6890_v63, %v6906_v8  ;;  %v6915_v37 = vcombine.high %v6890_v63, %v6906_v8  ;;  %v6930_v33 = vcombine.low %v6897_v62, %v6913_v18  ;;  %v6931_v0 = vcombine.high %v6897_v62, %v6913_v18 }
 0xc4e   :  { %v6974_v59 = vrot.slane %v6966_v26, %v9384_v11  ;;  %v6981_v31 = vrot.slane %v6967_v41, %v9384_v11 }
 0xc4f   :  { %v6922_v34 = vrot.slane %v6914_v19, %v9393_v23  ;;  %v6929_v17 = vrot.slane %v6915_v37, %v9393_v23  ;;  %v6938_v61 = vrot.slane %v6930_v33, %v9393_v23  ;;  %v6945_v5 = vrot.slane %v6931_v0, %v9393_v23 }
 0xc50   :  { %v6982_v27 = vcombine.low %v6958_v38, %v6974_v59  ;;  %v6983_v12 = vcombine.high %v6958_v38, %v6974_v59  ;;  %v6998_v7 = vcombine.low %v6965_v55, %v6981_v31  ;;  %v6999_v9 = vcombine.high %v6965_v55, %v6981_v31  ;;  %v8861_v59 = vld [vmem:[%s11531_s12] sm:$0xff]   ;;  %v8862_v31 = vld [vmem:[%s11531_s12 + $0x8] sm:$0xff]  }
 0xc51   :  { %v7154_v13 = vcombine.low %v6922_v34, %v6929_v17  ;;  %v8263_v52 = vcombine.high %v6922_v34, %v6929_v17  ;;  %v7170_v54 = vcombine.low %v6938_v61, %v6945_v5  ;;  %v8264_v28 = vcombine.high %v6938_v61, %v6945_v5  ;;  %v11212_v36 = vpop.f32.mrb[68].mxu0  ;;  %v11214_v49 = vpop.f32.mrb[72].mxu1  ;;  %8701 = vmatprep.subr.bf16.mxu0 %v8861_v59 }
 0xc52   :  { %v6990_v53 = vrot.slane %v6982_v27, %v9393_v23  ;;  %v6997_v1 = vrot.slane %v6983_v12, %v9393_v23  ;;  %v7006_v30 = vrot.slane %v6998_v7, %v9393_v23  ;;  %v7013_v14 = vrot.slane %v6999_v9, %v9393_v23  ;;  %v8681_v48 = vpop.f32.mrb[69].mxu0  ;;  %v8687_v16 = vpop.f32.mrb[73].mxu1  ;;  %8702 = vmatpush3.bf16.msra.mxu0 %v8861_v59  ;;  %v8863_v9 = vld [vmem:[%s11531_s12 + $0x10] sm:$0xff]  }
 0xc53   :  { %v7161_v42 = vrot.slane %v7154_v13, %v9384_v11  ;;  %v7169_v45 = vrot.slane %v8263_v52, %v9384_v11  ;;  %v7177_v6 = vrot.slane %v7170_v54, %v9384_v11  ;;  %v7185_v60 = vrot.slane %v8264_v28, %v9384_v11  ;;  %v11224_v50 = vpop.f32.mrb[70].mxu0  ;;  %v11226_v39 = vpop.f32.mrb[74].mxu1  ;;  %8703 = vmatprep.subr.bf16.mxu0 %v8862_v31  ;;  %v8864_v13 = vld [vmem:[%s11531_s12 + $0x18] sm:$0xff]   ;;  %v8865_v52 = vld [vmem:[%s11531_s12 + $0x20] sm:$0xff]   ;;  %v8866_v54 = vld [vmem:[%s11531_s12 + $0x28] sm:$0xff]  }
 0xc54   :  { %v7222_v47 = vcombine.low %v6990_v53, %v6997_v1  ;;  %v8265_v10 = vcombine.high %v6990_v53, %v6997_v1  ;;  %v7238_v35 = vcombine.low %v7006_v30, %v7013_v14  ;;  %v8266_v44 = vcombine.high %v7006_v30, %v7013_v14  ;;  %v8682_v25 = vpop.f32.mrb[71].mxu0  ;;  %v8688_v29 = vpop.f32.mrb[75].mxu1 }
 0xc55   :  { %v7186_v40 = vcombine.low %v7161_v42, %v7169_v45  ;;  %v7202_v24 = vcombine.low %v7177_v6, %v7185_v60  ;;  %v7187_v20 = vcombine.high %v7161_v42, %v7169_v45  ;;  %v7203_v2 = vcombine.high %v7177_v6, %v7185_v60 }
 0xc56   :  { %v7229_v56 = vrot.slane %v7222_v47, %v9384_v11  ;;  %v7237_v21 = vrot.slane %v8265_v10, %v9384_v11  ;;  %v7245_v43 = vrot.slane %v7238_v35, %v9384_v11  ;;  %v7253_v3 = vrot.slane %v8266_v44, %v9384_v11  ;;  %8704 = vmatpush3.bf16.msra.mxu0 %v8862_v31 }
 0xc57   :  { %v11233_v46 = vrot.slane %v7186_v40, %v9393_v23  ;;  %v11236_v32 = vrot.slane %v7202_v24, %v9393_v23  ;;  %v7201_v63 = vrot.slane %v7187_v20, %v9393_v23  ;;  %v7217_v62 = vrot.slane %v7203_v2, %v9393_v23  ;;  %8705 = vmatprep.subr.bf16.mxu0 %v8863_v9 }
 0xc58   :  { %v7254_v15 = vcombine.low %v7229_v56, %v7237_v21  ;;  %v7270_v8 = vcombine.low %v7245_v43, %v7253_v3  ;;  %v7255_v18 = vcombine.high %v7229_v56, %v7237_v21  ;;  %v7271_v26 = vcombine.high %v7245_v43, %v7253_v3 }
 0xc59   :  { %v7219_v41 = vcombine.high %v11233_v46, %v11236_v32  ;;  %v7220_v57 = vcombine.low %v7201_v63, %v7217_v62  ;;  %v7221_v19 = vcombine.high %v7201_v63, %v7217_v62  ;;  %v7218_v37 = vcombine.low %v11233_v46, %v11236_v32 }
 0xc5a   :  { %v11245_v33 = vrot.slane %v7254_v15, %v9393_v23  ;;  %v11248_v0 = vrot.slane %v7270_v8, %v9393_v23  ;;  %v7269_v38 = vrot.slane %v7255_v18, %v9393_v23  ;;  %v7285_v55 = vrot.slane %v7271_v26, %v9393_v23  ;;  %8706 = vmatpush3.bf16.msra.mxu0 %v8863_v9 }
 0xc5b   :  { %8707 = vmatprep.subr.bf16.mxu0 %v8864_v13 }
 0xc5c   :  { %v7287_v34 = vcombine.high %v11245_v33, %v11248_v0  ;;  %v7288_v17 = vcombine.low %v7269_v38, %v7285_v55  ;;  %v7289_v61 = vcombine.high %v7269_v38, %v7285_v55  ;;  %v7286_v5 = vcombine.low %v11245_v33, %v11248_v0 }
 0xc5e   :  { %v8759_v27 = vpack.i.bf16 %v7287_v34, %v7219_v41  ;;  %v8764_v12 = vpack.i.bf16 %v7288_v17, %v7220_v57  ;;  %v11262_v7 = vpack.i.bf16 %v7289_v61, %v7221_v19  ;;  %8708 = vmatpush3.bf16.msra.mxu0 %v8864_v13 }
 0xc5f   :  { %8709 = vmatprep.subr.bf16.mxu0 %v8865_v52 }
 0xc60   :  { %8760 = vrot.lane.b32.xlu1 %v8759_v27, %s9068_s24 }
 0xc62   :  { %8710 = vmatpush3.bf16.msra.mxu0 %v8865_v52 }
 0xc63   :  { %8711 = vmatprep.subr.bf16.mxu0 %v8866_v54 }
 0xc64   :  { %8765 = vrot.lane.b32.xlu1 %v8764_v12, %s9067_s10 }
 0xc66   :  { %8712 = vmatpush3.bf16.msra.mxu0 %v8866_v54 }
 0xc7d   :  { %v6831_v28 = vpop.f32.mrb[72].mxu0 }
 0xc7e   :  { %v7018_v53 = vcombine.low %v11212_v36, %v6831_v28  ;;  %v7019_v1 = vcombine.high %v11212_v36, %v6831_v28  ;;  %v8693_v30 = vpop.f32.mrb[73].mxu0 }
 0xc7f   :  { %v6834_v14 = vpop.f32.mrb[74].mxu0  ;;  %v6875_v48 = vpop.f32.mrb[76].mxu1 }
 0xc80   :  { %v7086_v16 = vcombine.low %v11224_v50, %v6834_v14  ;;  %v7087_v42 = vcombine.high %v11224_v50, %v6834_v14  ;;  %v8694_v45 = vpop.f32.mrb[75].mxu0  ;;  %v8699_v6 = vpop.f32.mrb[77].mxu1  ;;  %v7034_v60 = vcombine.low %v11214_v49, %v6875_v48  ;;  %v7035_v47 = vcombine.high %v11214_v49, %v6875_v48 }
 0xc81   :  { %v6878_v10 = vpop.f32.mrb[78].mxu1  ;;  %v7026_v36 = vrot.slane %v7018_v53, %v9384_v11  ;;  %v7033_v29 = vrot.slane %v7019_v1, %v9384_v11  ;;  %v8867_v53 = vld [vmem:[%s11531_s12 + $0x30] sm:$0xff]  }
 0xc82   :  { %v7102_v35 = vcombine.low %v11226_v39, %v6878_v10  ;;  %v7103_v44 = vcombine.high %v11226_v39, %v6878_v10  ;;  %v8700_v25 = vpop.f32.mrb[79].mxu1  ;;  %v7042_v40 = vrot.slane %v7034_v60, %v9384_v11  ;;  %v7049_v50 = vrot.slane %v7035_v47, %v9384_v11  ;;  %8713 = vmatprep.subr.bf16.mxu0 %v8867_v53 }
 0xc83   :  { %v7094_v24 = vrot.slane %v7086_v16, %v9384_v11  ;;  %v7101_v20 = vrot.slane %v7087_v42, %v9384_v11  ;;  %8714 = vmatpush3.bf16.msra.mxu0 %v8867_v53 }
 0xc84   :  { %v7110_v49 = vrot.slane %v7102_v35, %v9384_v11  ;;  %v7117_v2 = vrot.slane %v7103_v44, %v9384_v11  ;;  %v7050_v56 = vcombine.low %v7026_v36, %v7042_v40  ;;  %v7051_v21 = vcombine.high %v7026_v36, %v7042_v40 }
 0xc85   :  { %v7066_v39 = vcombine.low %v7033_v29, %v7049_v50  ;;  %v7067_v43 = vcombine.high %v7033_v29, %v7049_v50 }
 0xc86   :  { %v7118_v3 = vcombine.low %v7094_v24, %v7110_v49  ;;  %v7119_v63 = vcombine.high %v7094_v24, %v7110_v49  ;;  %v7134_v62 = vcombine.low %v7101_v20, %v7117_v2  ;;  %v7135_v15 = vcombine.high %v7101_v20, %v7117_v2  ;;  %v8868_v20 = vld [vmem:[%s11531_s12 + $0x38] sm:$0xff]  }
 0xc87   :  { %v7058_v8 = vrot.slane %v7050_v56, %v9393_v23  ;;  %v7065_v18 = vrot.slane %v7051_v21, %v9393_v23  ;;  %v7074_v26 = vrot.slane %v7066_v39, %v9393_v23  ;;  %v7081_v41 = vrot.slane %v7067_v43, %v9393_v23  ;;  %8715 = vmatprep.subr.bf16.mxu0 %v8868_v20 }
 0xc88   :  { %v7126_v57 = vrot.slane %v7118_v3, %v9393_v23  ;;  %v7133_v19 = vrot.slane %v7119_v63, %v9393_v23  ;;  %v7142_v38 = vrot.slane %v7134_v62, %v9393_v23  ;;  %v7149_v55 = vrot.slane %v7135_v15, %v9393_v23  ;;  %8716 = vmatpush3.bf16.msra.mxu0 %v8868_v20 }
 0xc89   :  { %v7290_v59 = vcombine.low %v7058_v8, %v7065_v18  ;;  %v8267_v31 = vcombine.high %v7058_v8, %v7065_v18  ;;  %v7306_v34 = vcombine.low %v7074_v26, %v7081_v41  ;;  %v8268_v17 = vcombine.high %v7074_v26, %v7081_v41 }
 0xc8a   :  { %v7358_v61 = vcombine.low %v7126_v57, %v7133_v19  ;;  %v8269_v27 = vcombine.high %v7126_v57, %v7133_v19  ;;  %v7374_v12 = vcombine.low %v7142_v38, %v7149_v55  ;;  %v8270_v9 = vcombine.high %v7142_v38, %v7149_v55 }
 0xc8b   :  { %v7297_v13 = vrot.slane %v7290_v59, %v9384_v11  ;;  %v7305_v52 = vrot.slane %v8267_v31, %v9384_v11  ;;  %v7313_v54 = vrot.slane %v7306_v34, %v9384_v11  ;;  %v7321_v28 = vrot.slane %v8268_v17, %v9384_v11 }
 0xc8c   :  { %v7365_v1 = vrot.slane %v7358_v61, %v9384_v11  ;;  %v7373_v30 = vrot.slane %v8269_v27, %v9384_v11  ;;  %v7381_v14 = vrot.slane %v7374_v12, %v9384_v11  ;;  %v7389_v48 = vrot.slane %v8270_v9, %v9384_v11 }
 0xc8d   :  { %v7323_v16 = vcombine.high %v7297_v13, %v7305_v52  ;;  %v7339_v42 = vcombine.high %v7313_v54, %v7321_v28  ;;  %v7322_v45 = vcombine.low %v7297_v13, %v7305_v52  ;;  %v7338_v6 = vcombine.low %v7313_v54, %v7321_v28 }
 0xc8e   :  { %v7391_v60 = vcombine.high %v7365_v1, %v7373_v30  ;;  %v7407_v47 = vcombine.high %v7381_v14, %v7389_v48  ;;  %v7390_v10 = vcombine.low %v7365_v1, %v7373_v30  ;;  %v7406_v35 = vcombine.low %v7381_v14, %v7389_v48 }
 0xc8f   :  { %v7337_v44 = vrot.slane %v7323_v16, %v9393_v23  ;;  %v7353_v25 = vrot.slane %v7339_v42, %v9393_v23  ;;  %v7330_v36 = vrot.slane %v7322_v45, %v9393_v23  ;;  %v7346_v29 = vrot.slane %v7338_v6, %v9393_v23  ;;  %v8271_v16 = vld [vmem:[%s11532_s13] ss:$0 sm:$0xff] }
 0xc90   :  { %v7405_v11 = vrot.slane %v7391_v60, %v9393_v23  ;;  %v7421_v40 = vrot.slane %v7407_v47, %v9393_v23  ;;  %v7398_v50 = vrot.slane %v7390_v10, %v9393_v23  ;;  %v7414_v24 = vrot.slane %v7406_v35, %v9393_v23 }
 0xc91   :  { %v7356_v49 = vcombine.low %v7337_v44, %v7353_v25  ;;  %v7355_v2 = vcombine.high %v7330_v36, %v7346_v29  ;;  %v7357_v56 = vcombine.high %v7337_v44, %v7353_v25  ;;  %v7354_v21 = vcombine.low %v7330_v36, %v7346_v29 }
 0xc92   :  { %v7424_v39 = vcombine.low %v7405_v11, %v7421_v40  ;;  %v7423_v43 = vcombine.high %v7398_v50, %v7414_v24  ;;  %v7425_v3 = vcombine.high %v7405_v11, %v7421_v40  ;;  %v7422_v63 = vcombine.low %v7398_v50, %v7414_v24  ;;  %v11585_v11 = vld [vmem:[#allocation4_spill] sm:$0xff]  ;;  %v8869_v50 = vld [vmem:[%s11533_s16] ss:$8 sps:$4 sm:$0xff]  }
 0xc94   :  { %v8779_v62 = vpack.i.bf16 %v7424_v39, %v7356_v49  ;;  %v8769_v15 = vpack.i.bf16 %v7423_v43, %v7355_v2  ;;  %v8784_v8 = vpack.i.bf16 %v7425_v3, %v7357_v56 }
 0xc96   :  { %8780 = vrot.lane.b32.xlu1 %v8779_v62, %s9067_s10  ;;  %8770 = vrot.lane.b32.xlu0 %v8769_v15, %s9068_s24 }
 0xc9a   :  { %8785 = vrot.lane.b32.xlu1 %v8784_v8, %s9066_s29  ;;  %8775 = vrot.lane.b32.xlu0 %v11262_v7, %s9066_s29 }
 0xcd2   :  { %v8761_v23 = vpop.permute.xlu1 %8760 }
 0xcd3   :  { %v8763_v26 = vunpack.i.h.bf16 %v8761_v23  ;;  %v8762_v41 = vunpack.i.l.bf16 %v8761_v23 }
 0xcd5   :  { %v7474_v7 = vsel %vm2137_vm1, %v7218_v37, %v8762_v41  ;;  %v7475_v12 = vsel %vm2137_vm1, %v7286_v5, %v8763_v26  ;;  %v8877_v41 = vld [vmem:[%s11533_s16 + $0x24] ss:$8 sps:$4 sm:$0xff]  }
 0xcd6   :  { %v8766_v18 = vpop.permute.xlu1 %8765 }
 0xcd7   :  { %v8768_v59 = vunpack.i.h.bf16 %v8766_v18  ;;  %v8767_v31 = vunpack.i.l.bf16 %v8766_v18 }
 0xcd9   :  { %v7478_v1 = vsel %vm3690_vm5, %v7474_v7, %v8767_v31  ;;  %v7479_v30 = vsel %vm3690_vm5, %v7475_v12, %v8768_v59  ;;  %v8881_v59 = vld [vmem:[%s11533_s16 + $0x40] ss:$8 sps:$4 sm:$0xff]   ;;  %v8886_v31 = vld [vmem:[%s11533_s16 + $0x54] ss:$8 sps:$4 sm:$0xff]   ;;  %v8890_v7 = vld [vmem:[%s11533_s16 + $0x70] ss:$8 sps:$4 sm:$0xff]  }
 0xcda   :  { %v8893_v12 = vld [vmem:[%s11534_s18 + $0x40] sm:$0xff]  }
 0xcdb   :  { %8421 = vmatprep.subr.bf16.mxu0 %v8893_v12 }
 0xd08   :  { %v8781_v57 = vpop.permute.xlu1 %8780  ;;  %v8771_v19 = vpop.permute.xlu0 %8770 }
 0xd09   :  { %v8773_v38 = vunpack.i.h.bf16 %v8771_v19  ;;  %v8772_v55 = vunpack.i.l.bf16 %v8771_v19  ;;  %v8783_v34 = vunpack.i.h.bf16 %v8781_v57  ;;  %v8782_v17 = vunpack.i.l.bf16 %v8781_v57  ;;  %v8875_v57 = vld [vmem:[%s11533_s16 + $0x20] ss:$8 sps:$4 sm:$0xff]   ;;  %v8878_v19 = vld [vmem:[%s11533_s16 + $0x30] ss:$8 sps:$4 sm:$0xff]  }
 0xd0b   :  { %v7476_v61 = vsel %vm2137_vm1, %v7354_v21, %v8772_v55  ;;  %v7477_v27 = vsel %vm2137_vm1, %v7422_v63, %v8773_v38  ;;  %v8880_v38 = vld [vmem:[%s11533_s16 + $0x34] ss:$8 sps:$4 sm:$0xff]   ;;  %v8883_v55 = vld [vmem:[%s11533_s16 + $0x44] ss:$8 sps:$4 sm:$0xff]  }
 0xd0c   :  { %v8786_v9 = vpop.permute.xlu1 %8785  ;;  %v8776_v13 = vpop.permute.xlu0 %8775  ;;  %v7480_v14 = vsel %vm3690_vm5, %v7476_v61, %v8782_v17  ;;  %v7481_v46 = vsel %vm3690_vm5, %v7477_v27, %v8783_v34  ;;  %v8884_v34 = vld [vmem:[%s11533_s16 + $0x50] ss:$8 sps:$4 sm:$0xff]   ;;  %v8889_v17 = vld [vmem:[%s11533_s16 + $0x64] ss:$8 sps:$4 sm:$0xff]   ;;  %v8887_v61 = vld [vmem:[%s11533_s16 + $0x60] ss:$8 sps:$4 sm:$0xff]  }
 0xd0d   :  { %v8788_v52 = vunpack.i.h.bf16 %v8786_v9  ;;  %v8787_v54 = vunpack.i.l.bf16 %v8786_v9  ;;  %v8778_v28 = vunpack.i.h.bf16 %v8776_v13  ;;  %v8777_v53 = vunpack.i.l.bf16 %v8776_v13  ;;  %v8892_v27 = vld [vmem:[%s11533_s16 + $0x74] ss:$8 sps:$4 sm:$0xff]   ;;  %v8894_v9 = vld [vmem:[%s11534_s18] sm:$0xff]   ;;  %v8895_v13 = vld [vmem:[%s11534_s18 + $0x48] sm:$0xff]  }
 0xd0f   :  { %v7484_v32 = vsel %vm3695_vm6, %v7480_v14, %v8787_v54  ;;  %v7485_v37 = vsel %vm3695_vm6, %v7481_v46, %v8788_v52  ;;  %v7482_v33 = vsel %vm3695_vm6, %v7478_v1, %v8777_v53  ;;  %v7483_v0 = vsel %vm3695_vm6, %v7479_v30, %v8778_v28  ;;  %v8896_v52 = vld [vmem:[%s11534_s18 + $0x8] sm:$0xff]   ;;  %v8897_v54 = vld [vmem:[%s11534_s18 + $0x50] sm:$0xff]   ;;  %v8899_v53 = vld [vmem:[%s11534_s18 + $0x58] sm:$0xff]  }
 0xd10   :  { %v7503_v5 = vpack.c.bf16 %v7485_v37, %v7484_v32  ;;  %v7502_v48 = vpack.c.bf16 %v7483_v0, %v7482_v33  ;;  %v8898_v28 = vld [vmem:[%s11534_s18 + $0x10] sm:$0xff]   ;;  %v8900_v1 = vld [vmem:[%s11534_s18 + $0x18] sm:$0xff]   ;;  %v8901_v30 = vld [vmem:[%s11534_s18 + $0x60] sm:$0xff]  }
 0xd11   :  { %v8902_v14 = vld [vmem:[%s11534_s18 + $0x20] sm:$0xff]   ;;  %v8903_v46 = vld [vmem:[%s11534_s18 + $0x68] sm:$0xff]  }
 0xd12   :  { %8717 = vmatprep.mubr.bf16.mxu0 %v7502_v48 }
 0xd13   :  { %8718 = vmatmul.mubr.bf16.vlgmr.msra.gmra.mrb[76].mxu0 %v7503_v5 }
 0xd14   :  { %8422 = vmatpush3.bf16.msra.mxu0 %v8894_v9 }
 0xd15   :  { %8423 = vmatprep.subr.bf16.mxu0 %v8895_v13 }
 0xd18   :  { %8424 = vmatpush3.bf16.msra.mxu0 %v8896_v52 }
 0xd19   :  { %8425 = vmatprep.subr.bf16.mxu0 %v8897_v54 }
 0xd1c   :  { %8426 = vmatpush3.bf16.msra.mxu0 %v8898_v28 }
 0xd1d   :  { %8427 = vmatprep.subr.bf16.mxu0 %v8899_v53 }
 0xd20   :  { %8428 = vmatpush3.bf16.msra.mxu0 %v8900_v1 }
 0xd21   :  { %8429 = vmatprep.subr.bf16.mxu0 %v8901_v30 }
 0xd24   :  { %8430 = vmatpush3.bf16.msra.mxu0 %v8902_v14 }
 0xd25   :  { %8431 = vmatprep.subr.bf16.mxu0 %v8903_v46 }
 0xde6   :  { %v8719_v42 = vpop.f32.mrb[76].mxu0 }
 0xde7   :  { %v7593_v45 = vpop.f32.mrb[77].mxu0  ;;  %v7602_v10 = vadd.f32 %v8719_v42, %v8271_v16 }
 0xde8   :  { %v7594_v6 = vadd.f32 %v8271_v16, %v7593_v45  ;;  %v8720_v60 = vpop.f32.mrb[78].mxu0 }
 0xde9   :  { %v7596_v47 = vpop.f32.mrb[79].mxu0  ;;  %v7610_v36 = vadd.f32 %v7602_v10, %v10415_v51  ;;  %v7605_v29 = vadd.f32 %v8720_v60, %v8271_v16  ;;  %v8874_v51 = vld [vmem:[%s11533_s16 + $0x14] ss:$8 sps:$4 sm:$0xff]  }
 0xdea   :  { %v7608_v35 = vadd.f32 %v7594_v6, %v10408_v4  ;;  %v7597_v44 = vadd.f32 %v8271_v16, %v7596_v47  ;;  %v8871_v4 = vld [vmem:[%s11533_s16 + $0x4] ss:$8 sps:$4 sm:$0xff]  }
 0xdeb   :  { %v7611_v40 = vadd.f32 %v7605_v29, %v11585_v11  ;;  %7788 = vmatprep.subr.bf16.mxu1 %v8871_v4 }
 0xdec   :  { %v7609_v25 = vadd.f32 %v7597_v44, %v10410_v22  ;;  %7614 = vadd.xlane.f32.xlu0 %v7608_v35  ;;  %v8872_v22 = vld [vmem:[%s11533_s16 + $0x10] ss:$8 sps:$4 sm:$0xff]   ;;  %7789 = vmatpush1.bf16.msra.mxu1 %v8869_v50 }
 0xded   :  { %7790 = vmatprep.subr.bf16.mxu1 %v8874_v51 }
 0xdee   :  { %7616 = vadd.xlane.f32.xlu1 %v7609_v25 }
 0xdf0   :  { %7618 = vadd.xlane.f32.xlu0 %v7610_v36  ;;  %7791 = vmatpush1.bf16.msra.mxu1 %v8872_v22 }
 0xdf1   :  { %7792 = vmatprep.subr.bf16.mxu1 %v8877_v41 }
 0xdf4   :  { %7620 = vadd.xlane.f32.xlu0 %v7611_v40  ;;  %7793 = vmatpush1.bf16.msra.mxu1 %v8875_v57 }
 0xdf5   :  { %7794 = vmatprep.subr.bf16.mxu1 %v8880_v38 }
 0xdf8   :  { %7795 = vmatpush1.bf16.msra.mxu1 %v8878_v19 }
 0xdf9   :  { %7796 = vmatprep.subr.bf16.mxu1 %v8883_v55 }
 0xdfc   :  { %7797 = vmatpush1.bf16.msra.mxu1 %v8881_v59 }
 0xdfd   :  { %7798 = vmatprep.subr.bf16.mxu1 %v8886_v31 }
 0xe00   :  { %7799 = vmatpush1.bf16.msra.mxu1 %v8884_v34 }
 0xe01   :  { %7800 = vmatprep.subr.bf16.mxu1 %v8889_v17 }
 0xe04   :  { %7801 = vmatpush1.bf16.msra.mxu1 %v8887_v61 }
 0xe05   :  { %7802 = vmatprep.subr.bf16.mxu1 %v8892_v27 }
 0xe08   :  { %7803 = vmatpush1.bf16.msra.mxu1 %v8890_v7 }
 0xe79   :  { %v7615_v24 = vpop.xlane.xlu0 %7614 }
 0xe7a   :  { %v7622_v20 = vmul.f32 0.0078125, %v7615_v24 }
 0xe7b   :  { %v7617_v49 = vpop.xlane.xlu1 %7616 }
 0xe7c   :  { %v11366_v2 = vsub.f32 %v7608_v35, %v7622_v20  ;;  %v7623_v56 = vmul.f32 0.0078125, %v7617_v49  ;;  %v8280_v35 = vld [vmem:[%s11535_s14] ss:$0 sm:$0xff] }
 0xe7d   :  { %v7619_v21 = vpop.xlane.xlu0 %7618 }
 0xe7e   :  { %v11368_v39 = vsub.f32 %v7609_v25, %v7623_v56  ;;  %v7624_v43 = vmul.f32 0.0078125, %v7619_v21  ;;  %v7630_v3 = vmul.f32 %v11366_v2, %v11366_v2 }
 0xe80   :  { %v11372_v63 = vsub.f32 %v7610_v36, %v7624_v43  ;;  %7634 = vadd.xlane.f32.xlu1 %v7630_v3  ;;  %v7631_v62 = vmul.f32 %v11368_v39, %v11368_v39  ;;  %v8904_v3 = vld [vmem:[%s11534_s18 + $0x28] sm:$0xff]  }
 0xe81   :  { %v7621_v15 = vpop.xlane.xlu0 %7620  ;;  %8432 = vmatpush3.bf16.msra.mxu0 %v8904_v3 }
 0xe82   :  { %v7625_v8 = vmul.f32 0.0078125, %v7621_v15  ;;  %7636 = vadd.xlane.f32.xlu0 %v7631_v62  ;;  %v7632_v23 = vmul.f32 %v11372_v63, %v11372_v63  ;;  %v8907_v62 = vld [vmem:[%s11534_s18 + $0x78] sm:$0xff]  }
 0xe83   :  { %v8908_v15 = vld [vmem:[%s11534_s18 + $0x38] sm:$0xff]  }
 0xe84   :  { %v11378_v18 = vsub.f32 %v7611_v40, %v7625_v8  ;;  %7638 = vadd.xlane.f32.xlu1 %v7632_v23  ;;  %v8281_v40 = vld [vmem:[%s11536_s15] ss:$0 sm:$0xff] }
 0xe85   :  { %v7696_v8 = vld [vmem:[%s11537_s17] sm:$0x3] }
 0xe86   :  { %v7633_v26 = vmul.f32 %v11378_v18, %v11378_v18  ;;  %v11586_v23 = vld [vmem:[#allocation2_spill] sm:$0xff] }
 0xe88   :  { %7640 = vadd.xlane.f32.xlu0 %v7633_v26  ;;  %v11587_v26 = vld [vmem:[#allocation3_spill] sm:$0xff] }
 0xe89   :  { %v7705_v41 = vrot.slane %v7696_v8, %v11587_v26 }
 0xf0d   :  { %v7635_v32 = vpop.xlane.xlu1 %7634 }
 0xf0e   :  { %v7642_v37 = vmul.f32 0.0078125, %v7635_v32 }
 0xf0f   :  { %v7637_v33 = vpop.xlane.xlu0 %7636 }
 0xf10   :  { %v7646_v0 = vadd.f32 1e-05, %v7642_v37  ;;  %v7643_v5 = vmul.f32 0.0078125, %v7637_v33 }
 0xf11   :  { %v7639_v48 = vpop.xlane.xlu1 %7638 }
 0xf12   :  { %9045 = vrsqrt.f32 %v7646_v0  ;;  %v7647_v16 = vadd.f32 1e-05, %v7643_v5  ;;  %v7644_v42 = vmul.f32 0.0078125, %v7639_v48 }
 0xf14   :  { %9047 = vrsqrt.f32 %v7647_v16  ;;  %v7648_v45 = vadd.f32 1e-05, %v7644_v42  ;;  %v8298_v42 = vld [vmem:[%s11538_s19] ss:$0 sm:$0xff] }
 0xf15   :  { %v7641_v6 = vpop.xlane.xlu0 %7640 }
 0xf16   :  { %9049 = vrsqrt.f32 %v7648_v45  ;;  %v7645_v60 = vmul.f32 0.0078125, %v7641_v6 }
 0xf18   :  { %v7649_v47 = vadd.f32 1e-05, %v7645_v60 }
 0xf1a   :  { %9051 = vrsqrt.f32 %v7649_v47 }
 0xf1c   :  { %v9046_v10 = vpop.eup %9045 }
 0xf1d   :  { %v7654_v44 = vmul.f32 %v9046_v10, %v11366_v2 }
 0xf1e   :  { %v9048_v25 = vpop.eup %9047 }
 0xf1f   :  { %v7655_v36 = vmul.f32 %v9048_v25, %v11368_v39  ;;  %v7664_v29 = vmul.f32 %v8280_v35, %v7654_v44 }
 0xf20   :  { %v9050_v11 = vpop.eup %9049 }
 0xf21   :  { %v7665_v50 = vmul.f32 %v8280_v35, %v7655_v36  ;;  %v11459_v4 = vadd.f32 %v8281_v40, %v7664_v29  ;;  %v7656_v51 = vmul.f32 %v9050_v11, %v11372_v63  ;;  %v8905_v63 = vld [vmem:[%s11534_s18 + $0x70] sm:$0xff]  }
 0xf22   :  { %8433 = vmatprep.subr.bf16.mxu0 %v8905_v63 }
 0xf23   :  { %v11461_v22 = vadd.f32 %v8281_v40, %v7665_v50  ;;  %v7666_v2 = vmul.f32 %v8280_v35, %v7656_v51 }
 0xf24   :  { %v9052_v24 = vpop.eup %9051 }
 0xf25   :  { %v7694_v20 = vpack.c.bf16 %v11461_v22, %v11459_v4  ;;  %v7657_v49 = vmul.f32 %v9052_v24, %v11378_v18  ;;  %v11470_v39 = vadd.f32 %v8281_v40, %v7666_v2  ;;  %v7701_v18 = vrot.slane %v7696_v8, %v11586_v23 }
 0xf27   :  { %7821 = vmatmul.mubr.bf16.vlgmr.msra.gmra.mrb[80].mxu1 %v7694_v20  ;;  %v7667_v56 = vmul.f32 %v8280_v35, %v7657_v49 }
 0xf28   :  { %7830 = vmatprep.mubr.bf16.mxu1 %v11577_v58  ;;  %v8906_v58 = vld [vmem:[%s11534_s18 + $0x30] sm:$0xff]  }
 0xf29   :  { %v11468_v21 = vadd.f32 %v8281_v40, %v7667_v56  ;;  %8434 = vmatpush3.bf16.msra.mxu0 %v8906_v58 }
 0xf2a   :  { %8435 = vmatprep.subr.bf16.mxu0 %v8907_v62 }
 0xf2b   :  { %v7695_v43 = vpack.c.bf16 %v11468_v21, %v11470_v39 }
 0xf2d   :  { %8436 = vmatpush3.bf16.msra.mxu0 %v8908_v15 }
 0xf2f   :  { %7831 = vmatmul.mubr.bf16.gmra.mrb[84].mxu1 %v7695_v43 }
 0xffa   :  { %v7822_v57 = vpop.f32.mrb[80].mxu1 }
 0xffb   :  { %v7823_v19 = vadd.f32 %v7822_v57, %v7701_v18  ;;  %v7824_v38 = vpop.f32.mrb[81].mxu1 }
 0xffc   :  { %v7825_v55 = vadd.f32 %v7824_v38, %v7705_v41  ;;  %v7826_v59 = vpop.f32.mrb[82].mxu1 }
 0xffd   :  { %v7827_v31 = vadd.f32 %v7826_v59, %v7701_v18  ;;  %v7828_v34 = vpop.f32.mrb[83].mxu1  ;;  %v7841_v61 = vmax.f32 %v7823_v19, 0.0 }
 0xffe   :  { %v7829_v17 = vadd.f32 %v7828_v34, %v7705_v41  ;;  %v7842_v7 = vmax.f32 %v7825_v55, 0.0 }
 0xfff   :  { %v7843_v27 = vmax.f32 %v7827_v31, 0.0 }
0x1000   :  { %v7844_v12 = vmax.f32 %v7829_v17, 0.0 }
0x1001   :  { %v7881_v9 = vpack.c.bf16 %v7843_v27, %v7841_v61 }
0x1002   :  { %v7882_v13 = vpack.c.bf16 %v7844_v12, %v7842_v7  ;;  %v7832_v52 = vpop.f32.mrb[84].mxu1 }
0x1003   :  { %v7833_v54 = vadd.f32 %v7832_v52, %v7701_v18  ;;  %v7834_v28 = vpop.f32.mrb[85].mxu1  ;;  %v8315_v52 = vld [vmem:[%s11539_s20] ss:$0 sm:$0xff] }
0x1004   :  { %v7835_v53 = vadd.f32 %v7834_v28, %v7705_v41  ;;  %v7836_v1 = vpop.f32.mrb[86].mxu1  ;;  %8020 = vmatprep.mubr.bf16.mxu0 %v7882_v13 }
0x1005   :  { %v7837_v30 = vadd.f32 %v7836_v1, %v7701_v18  ;;  %v7838_v14 = vpop.f32.mrb[87].mxu1  ;;  %8021 = vmatmul.mubr.bf16.vlgmr.msra.gmra.mrb[80].mxu0 %v7881_v9  ;;  %v7845_v32 = vmax.f32 %v7833_v54, 0.0 }
0x1006   :  { %v7839_v46 = vadd.f32 %v7838_v14, %v7705_v41  ;;  %v7846_v33 = vmax.f32 %v7835_v53, 0.0  ;;  %v8316_v53 = vld [vmem:[%s11540_s21] ss:$0 sm:$0xff] }
0x1007   :  { %v7847_v37 = vmax.f32 %v7837_v30, 0.0 }
0x1008   :  { %v7848_v0 = vmax.f32 %v7839_v46, 0.0 }
0x1009   :  { %v7883_v5 = vpack.c.bf16 %v7847_v37, %v7845_v32 }
0x100a   :  { %v7884_v48 = vpack.c.bf16 %v7848_v0, %v7846_v33 }
0x100c   :  { %8028 = vmatprep.mubr.bf16.mxu0 %v7884_v48 }
0x100d   :  { %8029 = vmatmul.mubr.bf16.gmra.mrb[84].mxu0 %v7883_v5 }
0x10d8   :  { %v8437_v16 = vpop.f32.mrb[80].mxu0 }
0x10d9   :  { %v8438_v45 = vpop.f32.mrb[81].mxu0 }
0x10da   :  { %v8439_v6 = vadd.f32 %v8438_v45, %v8437_v16  ;;  %v8440_v60 = vpop.f32.mrb[82].mxu0 }
0x10db   :  { %v8441_v47 = vpop.f32.mrb[83].mxu0 }
0x10dc   :  { %v8023_v10 = vadd.f32 %v8439_v6, %v8298_v42  ;;  %v8442_v35 = vadd.f32 %v8441_v47, %v8440_v60 }
0x10de   :  { %v8026_v44 = vadd.f32 %v8442_v35, %v8298_v42  ;;  %v8037_v25 = vadd.f32 %v8023_v10, %v11459_v4 }
0x10e0   :  { %v8443_v36 = vpop.f32.mrb[84].mxu0  ;;  %8043 = vadd.xlane.f32.xlu1 %v8037_v25  ;;  %v8038_v29 = vadd.f32 %v8026_v44, %v11461_v22 }
0x10e1   :  { %v8444_v11 = vpop.f32.mrb[85].mxu0 }
0x10e2   :  { %v8445_v40 = vadd.f32 %v8444_v11, %v8443_v36  ;;  %v8446_v50 = vpop.f32.mrb[86].mxu0  ;;  %8045 = vadd.xlane.f32.xlu0 %v8038_v29 }
0x10e3   :  { %v8447_v51 = vpop.f32.mrb[87].mxu0 }
0x10e4   :  { %v8031_v24 = vadd.f32 %v8445_v40, %v8298_v42  ;;  %v8448_v20 = vadd.f32 %v8447_v51, %v8446_v50 }
0x10e6   :  { %v8034_v49 = vadd.f32 %v8448_v20, %v8298_v42  ;;  %v8039_v2 = vadd.f32 %v8031_v24, %v11470_v39 }
0x10e8   :  { %8047 = vadd.xlane.f32.xlu1 %v8039_v2  ;;  %v8040_v56 = vadd.f32 %v8034_v49, %v11468_v21 }
0x10ea   :  { %8049 = vadd.xlane.f32.xlu0 %v8040_v56 }
0x116d   :  { %v8044_v43 = vpop.xlane.xlu1 %8043 }
0x116e   :  { %v8051_v4 = vmul.f32 0.0078125, %v8044_v43 }
0x116f   :  { %v8046_v3 = vpop.xlane.xlu0 %8045 }
0x1170   :  { %v8055_v63 = vsub.f32 %v8037_v25, %v8051_v4  ;;  %v8052_v58 = vmul.f32 0.0078125, %v8046_v3 }
0x1172   :  { %v8056_v22 = vsub.f32 %v8038_v29, %v8052_v58  ;;  %v8059_v62 = vmul.f32 %v8055_v63, %v8055_v63 }
0x1174   :  { %8063 = vadd.xlane.f32.xlu1 %v8059_v62  ;;  %v8060_v15 = vmul.f32 %v8056_v22, %v8056_v22 }
0x1175   :  { %v8048_v8 = vpop.xlane.xlu1 %8047 }
0x1176   :  { %v8053_v23 = vmul.f32 0.0078125, %v8048_v8  ;;  %8065 = vadd.xlane.f32.xlu0 %v8060_v15 }
0x1177   :  { %v8050_v18 = vpop.xlane.xlu0 %8049 }
0x1178   :  { %v8057_v26 = vsub.f32 %v8039_v2, %v8053_v23  ;;  %v8054_v41 = vmul.f32 0.0078125, %v8050_v18 }
0x117a   :  { %v8058_v39 = vsub.f32 %v8040_v56, %v8054_v41  ;;  %v8061_v57 = vmul.f32 %v8057_v26, %v8057_v26 }
0x117c   :  { %8067 = vadd.xlane.f32.xlu1 %v8061_v57  ;;  %v8062_v21 = vmul.f32 %v8058_v39, %v8058_v39 }
0x117e   :  { %8069 = vadd.xlane.f32.xlu0 %v8062_v21 }
0x1201   :  { %v8064_v19 = vpop.xlane.xlu1 %8063 }
0x1202   :  { %v8071_v38 = vmul.f32 0.0078125, %v8064_v19 }
0x1203   :  { %v8066_v55 = vpop.xlane.xlu0 %8065 }
0x1204   :  { %v8075_v59 = vadd.f32 1e-05, %v8071_v38  ;;  %v8072_v31 = vmul.f32 0.0078125, %v8066_v55 }
0x1206   :  { %9053 = vrsqrt.f32 %v8075_v59  ;;  %v8076_v34 = vadd.f32 1e-05, %v8072_v31 }
0x1208   :  { %9055 = vrsqrt.f32 %v8076_v34 }
0x1209   :  { %v8068_v17 = vpop.xlane.xlu1 %8067 }
0x120a   :  { %v8073_v61 = vmul.f32 0.0078125, %v8068_v17 }
0x120b   :  { %v8070_v27 = vpop.xlane.xlu0 %8069 }
0x120c   :  { %v8077_v7 = vadd.f32 1e-05, %v8073_v61  ;;  %v8074_v12 = vmul.f32 0.0078125, %v8070_v27 }
0x120e   :  { %9057 = vrsqrt.f32 %v8077_v7  ;;  %v8078_v9 = vadd.f32 1e-05, %v8074_v12 }
0x1210   :  { %v9054_v13 = vpop.eup %9053  ;;  %9059 = vrsqrt.f32 %v8078_v9 }
0x1211   :  { %v8083_v54 = vmul.f32 %v9054_v13, %v8055_v63 }
0x1212   :  { %v9056_v28 = vpop.eup %9055 }
0x1213   :  { %v8093_v1 = vmul.f32 %v8315_v52, %v8083_v54  ;;  %v8084_v30 = vmul.f32 %v9056_v28, %v8056_v22 }
0x1215   :  { %v8103_v14 = vadd.f32 %v8316_v53, %v8093_v1  ;;  %v8094_v46 = vmul.f32 %v8315_v52, %v8084_v30 }
0x1217   :  { %8107 = vst [vmem:[%s11541_s22] sm:$0xff] %v8103_v14  ;;  %v8104_v32 = vadd.f32 %v8316_v53, %v8094_v46 }
0x1218   :  { %v9058_v37 = vpop.eup %9057 }
0x1219   :  { %8108 = vst [vmem:[%s11541_s22 + $0x8] sm:$0xff] %v8104_v32  ;;  %v8085_v33 = vmul.f32 %v9058_v37, %v8057_v26 }
0x121a   :  { %v9060_v0 = vpop.eup %9059 }
0x121b   :  { %v8095_v5 = vmul.f32 %v8315_v52, %v8085_v33  ;;  %v8086_v48 = vmul.f32 %v9060_v0, %v8058_v39 }
0x121d   :  { %v8105_v16 = vadd.f32 %v8316_v53, %v8095_v5  ;;  %v8096_v42 = vmul.f32 %v8315_v52, %v8086_v48 }
0x121f   :  { %8109 = vst [vmem:[%s11541_s22 + $0x10] sm:$0xff] %v8105_v16  ;;  %v8106_v45 = vadd.f32 %v8316_v53, %v8096_v42 }
0x1221   :  { %8110 = vst [vmem:[%s11541_s22 + $0x18] sm:$0xff] %v8106_v45 }

</bundles_post_ra>
